<compile_context>
chip_gen: v6e
topology: v6e:2x2x1
jax: 0.10.0
libtpu: 0.0.40
codegen_flags: <defaults>
</compile_context>

<pallas_src>
import numpy as np
import jax
import jax.numpy as jnp
from jax import lax
from jax.experimental import pallas as pl
from jax.experimental.pallas import tpu as pltpu

IN_DIM = 8           # == OUT_DIM (required by the reference module's shapes)
OUT_DIM = 8
N_CLASSES = 3
MAX_NEIGHS = 10      # set inside BGAN.get_graphs
N_NODES = 16         # must be divisible by IN_DIM (GlobalAttention reshape)
BATCH = 8            # graphs per call
NCORES = 2           # leading "parallel" grid axis (v7x: one step per TensorCore)
CPAD = 128           # classifier lanes padded to a full vreg width (unmasked store)


def bgan_kernel(h_ref, G_ref, S_ref, R_ref, K_ref, A_ref, M_ref,
                pool_ref, bc_ref, wbig_ref, wcol_ref, lwrow_ref, lwcol_ref,
                wclsT_ref, bcls_ref, scal_ref, out_ref):
    f32 = jnp.float32
    D = wbig_ref.shape[0]
    maxn = K_ref.shape[1]

    h = h_ref[...]                                                # [Bh*N, D]
    brow = scal_ref[0]
    bcol = scal_ref[1]
    bgc = scal_ref[2]
    eps = 1e-5

    # ---- fused per-node projections (one matmul):
    #      [ z | z@a_src | z@wrow0 | z@wrow1 | z@a_dst | h@wgc ]
    P = jnp.dot(h, wbig_ref[...], preferred_element_type=f32)    # [Bh*N, D+5]
    ed = P[:, D + 3:D + 4]                                        # z @ a_dst  [.,1]
    gcp = P[:, D + 4:D + 5]                                       # h @ wgc    [.,1]

    # ---- fixed-fanout mailbox gather (BGAN.get_graphs), one block-diag matmul.
    # Slot-major rows b*maxn*N + m*N + i hold the projection of src(b, i, m).
    gathered = jnp.dot(G_ref[...], P, preferred_element_type=f32)  # [Bh*maxn*N, D+5]
    z_all = gathered[:, :D]                                        # z_src per slot

    mask = K_ref[...]                                              # slot one-hot
    S = S_ref[...]                                                 # collect-over-slots

    # slot-major per-slot scalars -> node-major [Bh*N, maxn] (no lane concats)
    ES = jnp.dot(S, gathered[:, D:D + 1] * mask, preferred_element_type=f32)
    T0 = jnp.dot(S, gathered[:, D + 1:D + 2] * mask, preferred_element_type=f32)
    T1 = jnp.dot(S, gathered[:, D + 2:D + 3] * mask, preferred_element_type=f32)

    # ---- edge attention + per-node softmax over the mailbox (lane axis)
    e = ES + ed
    e = jnp.where(e >= 0, e, 0.01 * e)            # F.leaky_relu (default slope 0.01)
    e = e - jnp.max(e, axis=1, keepdims=True)
    pexp = jnp.exp(e)
    alpha = pexp * pl.reciprocal(jnp.sum(pexp, axis=1, keepdims=True), approx=True)

    # ---- CNN over the alpha-weighted mailbox
    # Conv2d(1,1,(2,in_dim)): y_row[n,r] = a[n,r]*T0[n,r] + a[n,r+1]*T1[n,r+1] + brow
    aT0 = alpha * T0
    aT1 = alpha * T1
    y_row = aT0[:, :maxn - 1] + aT1[:, 1:] + brow                  # [Bh*N, maxn-1]

    # Conv2d(1,1,(maxn,1)): wcol-weighted reduce over slots.
    walpha = alpha * wcol_ref[...]                                 # [Bh*N, maxn]
    walpha_sm = jnp.sum(
        jnp.dot(R_ref[...], walpha, preferred_element_type=f32) * mask,
        axis=1, keepdims=True)                                     # [Bh*maxn*N, 1]
    y_col = jnp.dot(S, walpha_sm * z_all, preferred_element_type=f32) + bcol  # [Bh*N, D]

    # ---- BatchNorm2d(1): training-mode per-graph batch stats (gamma=1, beta=0), ReLU.
    pool = pool_ref[...]          # [Bh, Bh*N], entries 1/N on the graph's own block
    bc = bc_ref[...]              # [Bh*N, Bh], per-graph broadcast-back

    def bn_relu(x):
        w = x.shape[1]
        mu = jnp.sum(jnp.dot(pool, x, preferred_element_type=f32),
                     axis=1, keepdims=True) * (1.0 / w)            # [Bh, 1]
        ex2 = jnp.sum(jnp.dot(pool, x * x, preferred_element_type=f32),
                      axis=1, keepdims=True) * (1.0 / w)
        scale = lax.rsqrt(jnp.maximum(ex2 - mu * mu, 0.0) + eps)   # [Bh, 1]
        sc_f = jnp.dot(bc, scale, preferred_element_type=f32)      # [Bh*N, 1]
        sh_f = jnp.dot(bc, mu * scale, preferred_element_type=f32)
        return jnp.maximum(x * sc_f - sh_f, 0.0)

    # ---- LocalAttention: ReLU([bn(row)|bn(col)] @ localw + h), localw pre-split
    feats = jnp.maximum(
        jnp.dot(bn_relu(y_row), lwrow_ref[...], preferred_element_type=f32)
        + jnp.dot(bn_relu(y_col), lwcol_ref[...], preferred_element_type=f32)
        + h, 0.0)                                                  # [Bh*N, D]

    # ---- GlobalAttention: GraphConv(norm='both') + softmax over groups of D nodes
    gc = jnp.dot(A_ref[...], gcp, preferred_element_type=f32) + bgc  # [Bh*N, 1]
    gc = gc - jnp.max(gc)        # global shift; per-group softmax is shift-invariant
    egc = jnp.exp(gc)
    gsum = jnp.dot(M_ref[...], egc, preferred_element_type=f32)    # per-group sums
    weight = egc * pl.reciprocal(gsum, approx=True)                # [Bh*N, 1]

    # ---- classifier: dgl.mean_nodes + Linear, one lane-dense store per core
    updata = weight * feats                                        # [Bh*N, D]
    hg = jnp.dot(pool, updata, preferred_element_type=f32)         # [Bh, D]
    out_ref[0] = (jnp.dot(hg, wclsT_ref[...], preferred_element_type=f32)
                  + bcls_ref[...])                                 # [Bh, CPAD]


def bgan_forward(h_stacked, structs, params):
    G_h, S_h, R_h, K_h, A_h, M_h, pool_h, bc_h = structs
    BN, D = h_stacked.shape
    BNh = BN // NCORES
    Bh = pool_h.shape[0]

    inv = lambda c: (0, 0)           # grid-invariant operands
    in_specs = [
        pl.BlockSpec((BNh, D), lambda c: (c, 0)),                  # h (per-core slab)
        pl.BlockSpec(G_h.shape, inv),                              # mailbox gather
        pl.BlockSpec(S_h.shape, inv),                              # collect over slots
        pl.BlockSpec(R_h.shape, inv),                              # repeat node rows
        pl.BlockSpec(K_h.shape, inv),                              # slot one-hot mask
        pl.BlockSpec(A_h.shape, inv),                              # GraphConv adjacency
        pl.BlockSpec(M_h.shape, inv),                              # group-sum matrix
        pl.BlockSpec(pool_h.shape, inv),                           # per-graph mean pool
        pl.BlockSpec(bc_h.shape, inv),                             # per-graph broadcast
        pl.BlockSpec(params["wbig"].shape, inv),                   # fused projections
        pl.BlockSpec(params["wcol"].shape, inv),                   # col-conv weights
        pl.BlockSpec(params["lwrow"].shape, inv),                  # localw (row part)
        pl.BlockSpec(params["lwcol"].shape, inv),                  # localw (col part)
        pl.BlockSpec(params["wclsT"].shape, inv),                  # classifier W (padded)
        pl.BlockSpec(params["bcls"].shape, inv),                   # classifier b (padded)
        pl.BlockSpec(memory_space=pltpu.MemorySpace.SMEM),         # scalar biases
    ]
    out_spec = pl.BlockSpec((1, Bh, CPAD), lambda c: (c, 0, 0))

    out = pl.pallas_call(
        bgan_kernel,
        out_shape=jax.ShapeDtypeStruct((NCORES, Bh, CPAD), jnp.float32),
        grid=(NCORES,),
        in_specs=in_specs,
        out_specs=out_spec,
        compiler_params=pltpu.CompilerParams(
            dimension_semantics=("parallel",)),
    )(h_stacked, G_h, S_h, R_h, K_h, A_h, M_h, pool_h, bc_h,
      params["wbig"], params["wcol"], params["lwrow"], params["lwcol"],
      params["wclsT"], params["bcls"], params["scal"])
    return out.reshape(NCORES * Bh, CPAD)[:, :N_CLASSES]


def build_graph_structs(n, d, maxn, b_half):
    # synthetic directed graph: node i has in-edges from (i-1), (i+1), (i+5) mod n
    src_of = [[(i - 1) % n, (i + 1) % n, (i + 5) % n] for i in range(n)]

    # normalized adjacency for dgl GraphConv(norm='both'): D_in^-1/2 A D_out^-1/2
    A = np.zeros((n, n), np.float32)
    for i, srcs in enumerate(src_of):
        for j in srcs:
            A[i, j] += 1.0
    deg_in = np.clip(A.sum(axis=1), 1.0, None)
    deg_out = np.clip(A.sum(axis=0), 1.0, None)
    A_norm = (deg_in ** -0.5)[:, None] * A * (deg_out ** -0.5)[None, :]

    # BGAN.get_graphs fixed-fanout mailbox, slot-major: G[m*n+i, src(i,m)] = 1
    G = np.zeros((maxn * n, n), np.float32)
    for i, srcs in enumerate(src_of):
        tiled = (srcs * maxn)[:maxn]
        for m, j in enumerate(tiled):
            G[m * n + i, j] = 1.0

    S = np.tile(np.eye(n, dtype=np.float32), (1, maxn))      # collect: [n, maxn*n]
    R = np.tile(np.eye(n, dtype=np.float32), (maxn, 1))      # repeat:  [maxn*n, n]
    K1 = np.zeros((maxn * n, maxn), np.float32)               # slot one-hot
    for m in range(maxn):
        K1[m * n:(m + 1) * n, m] = 1.0

    # group-sum matrix for the GlobalAttention softmax over groups of d nodes
    M = np.zeros((n, n), np.float32)
    for i in range(n):
        for j in range(n):
            if i // d == j // d:
                M[i, j] = 1.0

    # block-diagonal batched versions for b_half graphs (shared synthetic topology)
    eye_b = np.eye(b_half, dtype=np.float32)
    G_h = np.kron(eye_b, G)                                    # [bh*maxn*n, bh*n]
    S_h = np.kron(eye_b, S)                                    # [bh*n, bh*maxn*n]
    R_h = np.kron(eye_b, R)                                    # [bh*maxn*n, bh*n]
    K_h = np.tile(K1, (b_half, 1))                             # [bh*maxn*n, maxn]
    A_h = np.kron(eye_b, A_norm)                               # [bh*n, bh*n]
    M_h = np.kron(eye_b, M)                                    # [bh*n, bh*n]
    pool_h = np.kron(eye_b, np.full((1, n), 1.0 / n, np.float32))   # [bh, bh*n]
    bc_h = np.kron(eye_b, np.ones((n, 1), np.float32))              # [bh*n, bh]

    return tuple(jnp.asarray(x) for x in
                 (G_h, S_h, R_h, K_h, A_h, M_h, pool_h, bc_h))


def init_params(key, in_dim, out_dim, n_classes, maxn):
    ks = jax.random.split(key, 8)

    def xavier(k, shape, fan_in, fan_out, gain=np.sqrt(2.0)):
        std = gain * np.sqrt(2.0 / (fan_in + fan_out))
        return (std * jax.random.normal(k, shape)).astype(jnp.float32)

    wfc = xavier(ks[0], (out_dim, in_dim), in_dim, out_dim)        # GATLayer.fc
    wattn = xavier(ks[1], (1, 2 * out_dim), 2 * out_dim, 1)        # GATLayer.attn_fc
    wrow = xavier(ks[2], (2, in_dim), 2 * in_dim, 1)               # Conv2d(1,1,(2,in_dim))
    wcol = xavier(ks[3], (maxn,), maxn, 1)                         # Conv2d(1,1,(maxn,1))
    localw = xavier(ks[4], (maxn + in_dim - 1, out_dim),
                    maxn + in_dim - 1, out_dim)                    # BGAN.localw
    wgc = xavier(ks[5], (in_dim, 1), in_dim, 1)                    # GraphConv weight
    wcls = xavier(ks[6], (n_classes, out_dim), out_dim, n_classes) # classify weight
    bcls = (0.01 * jax.random.normal(ks[7], (1, n_classes))).astype(jnp.float32)
    brow, bcol, bgc = 0.01, -0.01, 0.02                            # small fixed biases

    # Fold all small projections acting on h / z into one [D, D+5] weight:
    #   z = h @ wfc.T ; e_src = z @ a0 = h @ (wfc.T @ a0) ; etc.
    wfcT = wfc.T
    a0 = wattn[0, :out_dim].reshape(out_dim, 1)
    a1 = wattn[0, out_dim:].reshape(out_dim, 1)
    r0 = wrow[0].reshape(in_dim, 1)
    r1 = wrow[1].reshape(in_dim, 1)
    wbig = jnp.concatenate(
        [wfcT, wfcT @ a0, wfcT @ r0, wfcT @ r1, wfcT @ a1, wgc], axis=1)  # [D, D+5]

    # classifier padded to a full lane width for a lane-dense final store
    wclsT_pad = jnp.zeros((out_dim, CPAD), jnp.float32).at[:, :n_classes].set(wcls.T)
    bcls_pad = jnp.zeros((1, CPAD), jnp.float32).at[:, :n_classes].set(bcls)

    return dict(
        wbig=jnp.asarray(wbig, jnp.float32),
        wcol=jnp.asarray(wcol, jnp.float32).reshape(1, maxn),      # lane vector (VMEM)
        lwrow=jnp.asarray(localw[:maxn - 1, :]),                   # localw row half
        lwcol=jnp.asarray(localw[maxn - 1:, :]),                   # localw col half
        wclsT=wclsT_pad,
        bcls=bcls_pad,
        scal=jnp.array([brow, bcol, bgc], jnp.float32),            # SMEM scalars
    )


if __name__ == "__main__":
    assert BATCH % NCORES == 0 and N_NODES % IN_DIM == 0 and IN_DIM == OUT_DIM

    key = jax.random.PRNGKey(0)
    kh, kp = jax.random.split(key)
    # whole batch stacked node-major: graph b occupies rows [b*N, (b+1)*N)
    h = jax.random.normal(kh, (BATCH * N_NODES, IN_DIM), dtype=jnp.float32)

    structs = build_graph_structs(N_NODES, IN_DIM, MAX_NEIGHS, BATCH // NCORES)
    params = init_params(kp, IN_DIM, OUT_DIM, N_CLASSES, MAX_NEIGHS)

    out = bgan_forward(h, structs, params)
    out = jax.block_until_ready(out)

    assert out.shape == (BATCH, N_CLASSES), out.shape
    assert bool(jnp.all(jnp.isfinite(out)))
    print("KERNEL_OK")
</pallas_src>

<mosaic_0001>
module attributes {stable_mosaic.version = 11 : i64} {
  func.func @bgan_kernel(%arg0: i32, %arg1: memref<64x8xf32, #tpu.memory_space<vmem>>, %arg2: memref<640x64xf32, #tpu.memory_space<vmem>>, %arg3: memref<64x640xf32, #tpu.memory_space<vmem>>, %arg4: memref<640x64xf32, #tpu.memory_space<vmem>>, %arg5: memref<640x10xf32, #tpu.memory_space<vmem>>, %arg6: memref<64x64xf32, #tpu.memory_space<vmem>>, %arg7: memref<64x64xf32, #tpu.memory_space<vmem>>, %arg8: memref<4x64xf32, #tpu.memory_space<vmem>>, %arg9: memref<64x4xf32, #tpu.memory_space<vmem>>, %arg10: memref<8x13xf32, #tpu.memory_space<vmem>>, %arg11: memref<1x10xf32, #tpu.memory_space<vmem>>, %arg12: memref<9x8xf32, #tpu.memory_space<vmem>>, %arg13: memref<8x8xf32, #tpu.memory_space<vmem>>, %arg14: memref<8x128xf32, #tpu.memory_space<vmem>>, %arg15: memref<1x128xf32, #tpu.memory_space<vmem>>, %arg16: memref<3xf32, #tpu.memory_space<smem>>, %arg17: memref<1x4x128xf32, #tpu.memory_space<vmem>>) attributes {dimension_semantics = [#tpu.dimension_semantics<parallel>], iteration_bounds = array<i64: 2>, scalar_prefetch = 0 : i64, scratch_operands = 0 : i64, tpu.core_type = #tpu.core_type<tc>, window_params = [{transform_indices = @transform_0, window_bounds = array<i64: 64, 8>}, {pipeline_mode = #tpu.pipeline_mode<synchronous>, transform_indices = @transform_1, window_bounds = array<i64: 640, 64>}, {pipeline_mode = #tpu.pipeline_mode<synchronous>, transform_indices = @transform_2, window_bounds = array<i64: 64, 640>}, {pipeline_mode = #tpu.pipeline_mode<synchronous>, transform_indices = @transform_3, window_bounds = array<i64: 640, 64>}, {pipeline_mode = #tpu.pipeline_mode<synchronous>, transform_indices = @transform_4, window_bounds = array<i64: 640, 10>}, {pipeline_mode = #tpu.pipeline_mode<synchronous>, transform_indices = @transform_5, window_bounds = array<i64: 64, 64>}, {pipeline_mode = #tpu.pipeline_mode<synchronous>, transform_indices = @transform_6, window_bounds = array<i64: 64, 64>}, {pipeline_mode = #tpu.pipeline_mode<synchronous>, transform_indices = @transform_7, window_bounds = array<i64: 4, 64>}, {pipeline_mode = #tpu.pipeline_mode<synchronous>, transform_indices = @transform_8, window_bounds = array<i64: 64, 4>}, {pipeline_mode = #tpu.pipeline_mode<synchronous>, transform_indices = @transform_9, window_bounds = array<i64: 8, 13>}, {pipeline_mode = #tpu.pipeline_mode<synchronous>, transform_indices = @transform_10, window_bounds = array<i64: 1, 10>}, {pipeline_mode = #tpu.pipeline_mode<synchronous>, transform_indices = @transform_11, window_bounds = array<i64: 9, 8>}, {pipeline_mode = #tpu.pipeline_mode<synchronous>, transform_indices = @transform_12, window_bounds = array<i64: 8, 8>}, {pipeline_mode = #tpu.pipeline_mode<synchronous>, transform_indices = @transform_13, window_bounds = array<i64: 8, 128>}, {pipeline_mode = #tpu.pipeline_mode<synchronous>, transform_indices = @transform_14, window_bounds = array<i64: 1, 128>}, {transform_indices = @transform_15, window_bounds = array<i64: 3>}, {transform_indices = @transform_16, window_bounds = array<i64: 1, 4, 128>}]} {
    %c0 = arith.constant 0 : index
    %c0_0 = arith.constant 0 : index
    %0 = vector.load %arg1[%c0, %c0_0] : memref<64x8xf32, #tpu.memory_space<vmem>>, vector<64x8xf32>
    %c0_1 = arith.constant 0 : index
    %1 = memref.load %arg16[%c0_1] : memref<3xf32, #tpu.memory_space<smem>>
    %c1 = arith.constant 1 : index
    %2 = memref.load %arg16[%c1] : memref<3xf32, #tpu.memory_space<smem>>
    %c2 = arith.constant 2 : index
    %3 = memref.load %arg16[%c2] : memref<3xf32, #tpu.memory_space<smem>>
    %c0_2 = arith.constant 0 : index
    %c0_3 = arith.constant 0 : index
    %4 = vector.load %arg10[%c0_2, %c0_3] : memref<8x13xf32, #tpu.memory_space<vmem>>, vector<8x13xf32>
    %cst = arith.constant dense<0.000000e+00> : vector<64x13xf32>
    %5 = tpu.matmul %0, %4, %cst {dimension_numbers = #tpu.dot_dimension_numbers<[1], [0], [0], [1], [0, 0, 1, 1], [], []>} : vector<64x8xf32>, vector<8x13xf32>, vector<64x13xf32> -> vector<64x13xf32>
    %6 = vector.extract_strided_slice %5 {offsets = [0, 11], sizes = [64, 1], strides = [1, 1]} : vector<64x13xf32> to vector<64x1xf32>
    %7 = vector.extract_strided_slice %5 {offsets = [0, 12], sizes = [64, 1], strides = [1, 1]} : vector<64x13xf32> to vector<64x1xf32>
    %c0_4 = arith.constant 0 : index
    %c0_5 = arith.constant 0 : index
    %8 = vector.load %arg2[%c0_4, %c0_5] : memref<640x64xf32, #tpu.memory_space<vmem>>, vector<640x64xf32>
    %cst_6 = arith.constant dense<0.000000e+00> : vector<640x13xf32>
    %9 = tpu.matmul %8, %5, %cst_6 {dimension_numbers = #tpu.dot_dimension_numbers<[1], [0], [0], [1], [0, 0, 1, 1], [], []>} : vector<640x64xf32>, vector<64x13xf32>, vector<640x13xf32> -> vector<640x13xf32>
    %10 = vector.extract_strided_slice %9 {offsets = [0, 0], sizes = [640, 8], strides = [1, 1]} : vector<640x13xf32> to vector<640x8xf32>
    %c0_7 = arith.constant 0 : index
    %c0_8 = arith.constant 0 : index
    %11 = vector.load %arg5[%c0_7, %c0_8] : memref<640x10xf32, #tpu.memory_space<vmem>>, vector<640x10xf32>
    %c0_9 = arith.constant 0 : index
    %c0_10 = arith.constant 0 : index
    %12 = vector.load %arg3[%c0_9, %c0_10] : memref<64x640xf32, #tpu.memory_space<vmem>>, vector<64x640xf32>
    %13 = vector.extract_strided_slice %9 {offsets = [0, 8], sizes = [640, 1], strides = [1, 1]} : vector<640x13xf32> to vector<640x1xf32>
    %14 = vector.broadcast %13 : vector<640x1xf32> to vector<640x10xf32>
    %15 = arith.mulf %14, %11 : vector<640x10xf32>
    %cst_11 = arith.constant dense<0.000000e+00> : vector<64x10xf32>
    %16 = tpu.matmul %12, %15, %cst_11 {dimension_numbers = #tpu.dot_dimension_numbers<[1], [0], [0], [1], [0, 0, 1, 1], [], []>} : vector<64x640xf32>, vector<640x10xf32>, vector<64x10xf32> -> vector<64x10xf32>
    %17 = vector.extract_strided_slice %9 {offsets = [0, 9], sizes = [640, 1], strides = [1, 1]} : vector<640x13xf32> to vector<640x1xf32>
    %18 = vector.broadcast %17 : vector<640x1xf32> to vector<640x10xf32>
    %19 = arith.mulf %18, %11 : vector<640x10xf32>
    %cst_12 = arith.constant dense<0.000000e+00> : vector<64x10xf32>
    %20 = tpu.matmul %12, %19, %cst_12 {dimension_numbers = #tpu.dot_dimension_numbers<[1], [0], [0], [1], [0, 0, 1, 1], [], []>} : vector<64x640xf32>, vector<640x10xf32>, vector<64x10xf32> -> vector<64x10xf32>
    %21 = vector.extract_strided_slice %9 {offsets = [0, 10], sizes = [640, 1], strides = [1, 1]} : vector<640x13xf32> to vector<640x1xf32>
    %22 = vector.broadcast %21 : vector<640x1xf32> to vector<640x10xf32>
    %23 = arith.mulf %22, %11 : vector<640x10xf32>
    %cst_13 = arith.constant dense<0.000000e+00> : vector<64x10xf32>
    %24 = tpu.matmul %12, %23, %cst_13 {dimension_numbers = #tpu.dot_dimension_numbers<[1], [0], [0], [1], [0, 0, 1, 1], [], []>} : vector<64x640xf32>, vector<640x10xf32>, vector<64x10xf32> -> vector<64x10xf32>
    %25 = vector.broadcast %6 : vector<64x1xf32> to vector<64x10xf32>
    %26 = arith.addf %16, %25 : vector<64x10xf32>
    %cst_14 = arith.constant 0.000000e+00 : f32
    %27 = vector.broadcast %cst_14 : f32 to vector<64x10xf32>
    %28 = arith.cmpf oge, %26, %27 : vector<64x10xf32>
    %cst_15 = arith.constant 0.00999999977 : f32
    %29 = vector.broadcast %cst_15 : f32 to vector<64x10xf32>
    %30 = arith.mulf %29, %26 : vector<64x10xf32>
    %31 = arith.select %28, %26, %30 : vector<64x10xi1>, vector<64x10xf32>
    %cst_16 = arith.constant dense<0xFF800000> : vector<64xf32>
    %32 = vector.multi_reduction <maximumf>, %31, %cst_16 [1] : vector<64x10xf32> to vector<64xf32>
    %33 = vector.shape_cast %32 : vector<64xf32> to vector<64x1xf32>
    %34 = vector.broadcast %33 : vector<64x1xf32> to vector<64x10xf32>
    %35 = arith.subf %31, %34 : vector<64x10xf32>
    %36 = math.exp %35 : vector<64x10xf32>
    %cst_17 = arith.constant dense<0.000000e+00> : vector<64xf32>
    %37 = vector.multi_reduction <add>, %36, %cst_17 [1] : vector<64x10xf32> to vector<64xf32>
    %38 = vector.shape_cast %37 : vector<64xf32> to vector<64x1xf32>
    %39 = tpu.reciprocal %38 {approx = true} : vector<64x1xf32> -> vector<64x1xf32>
    %40 = vector.broadcast %39 : vector<64x1xf32> to vector<64x10xf32>
    %41 = arith.mulf %36, %40 : vector<64x10xf32>
    %42 = arith.mulf %41, %20 : vector<64x10xf32>
    %43 = arith.mulf %41, %24 : vector<64x10xf32>
    %44 = vector.extract_strided_slice %42 {offsets = [0, 0], sizes = [64, 9], strides = [1, 1]} : vector<64x10xf32> to vector<64x9xf32>
    %45 = vector.extract_strided_slice %43 {offsets = [0, 1], sizes = [64, 9], strides = [1, 1]} : vector<64x10xf32> to vector<64x9xf32>
    %46 = arith.addf %44, %45 : vector<64x9xf32>
    %47 = vector.broadcast %1 : f32 to vector<64x9xf32>
    %48 = arith.addf %46, %47 : vector<64x9xf32>
    %c0_18 = arith.constant 0 : index
    %c0_19 = arith.constant 0 : index
    %49 = vector.load %arg11[%c0_18, %c0_19] : memref<1x10xf32, #tpu.memory_space<vmem>>, vector<1x10xf32>
    %50 = vector.broadcast %49 : vector<1x10xf32> to vector<64x10xf32>
    %51 = arith.mulf %41, %50 : vector<64x10xf32>
    %c0_20 = arith.constant 0 : index
    %c0_21 = arith.constant 0 : index
    %52 = vector.load %arg4[%c0_20, %c0_21] : memref<640x64xf32, #tpu.memory_space<vmem>>, vector<640x64xf32>
    %cst_22 = arith.constant dense<0.000000e+00> : vector<640x10xf32>
    %53 = tpu.matmul %52, %51, %cst_22 {dimension_numbers = #tpu.dot_dimension_numbers<[1], [0], [0], [1], [0, 0, 1, 1], [], []>} : vector<640x64xf32>, vector<64x10xf32>, vector<640x10xf32> -> vector<640x10xf32>
    %54 = arith.mulf %53, %11 : vector<640x10xf32>
    %cst_23 = arith.constant dense<0.000000e+00> : vector<640xf32>
    %55 = vector.multi_reduction <add>, %54, %cst_23 [1] : vector<640x10xf32> to vector<640xf32>
    %56 = vector.shape_cast %55 : vector<640xf32> to vector<640x1xf32>
    %57 = vector.broadcast %56 : vector<640x1xf32> to vector<640x8xf32>
    %58 = arith.mulf %57, %10 : vector<640x8xf32>
    %cst_24 = arith.constant dense<0.000000e+00> : vector<64x8xf32>
    %59 = tpu.matmul %12, %58, %cst_24 {dimension_numbers = #tpu.dot_dimension_numbers<[1], [0], [0], [1], [0, 0, 1, 1], [], []>} : vector<64x640xf32>, vector<640x8xf32>, vector<64x8xf32> -> vector<64x8xf32>
    %60 = vector.broadcast %2 : f32 to vector<64x8xf32>
    %61 = arith.addf %59, %60 : vector<64x8xf32>
    %c0_25 = arith.constant 0 : index
    %c0_26 = arith.constant 0 : index
    %62 = vector.load %arg8[%c0_25, %c0_26] : memref<4x64xf32, #tpu.memory_space<vmem>>, vector<4x64xf32>
    %c0_27 = arith.constant 0 : index
    %c0_28 = arith.constant 0 : index
    %63 = vector.load %arg9[%c0_27, %c0_28] : memref<64x4xf32, #tpu.memory_space<vmem>>, vector<64x4xf32>
    %cst_29 = arith.constant dense<0.000000e+00> : vector<4x9xf32>
    %64 = tpu.matmul %62, %48, %cst_29 {dimension_numbers = #tpu.dot_dimension_numbers<[1], [0], [0], [1], [0, 0, 1, 1], [], []>} : vector<4x64xf32>, vector<64x9xf32>, vector<4x9xf32> -> vector<4x9xf32>
    %cst_30 = arith.constant dense<0.000000e+00> : vector<4xf32>
    %65 = vector.multi_reduction <add>, %64, %cst_30 [1] : vector<4x9xf32> to vector<4xf32>
    %66 = vector.shape_cast %65 : vector<4xf32> to vector<4x1xf32>
    %cst_31 = arith.constant 0.111111112 : f32
    %67 = vector.broadcast %cst_31 : f32 to vector<4x1xf32>
    %68 = arith.mulf %66, %67 : vector<4x1xf32>
    %69 = arith.mulf %48, %48 : vector<64x9xf32>
    %cst_32 = arith.constant dense<0.000000e+00> : vector<4x9xf32>
    %70 = tpu.matmul %62, %69, %cst_32 {dimension_numbers = #tpu.dot_dimension_numbers<[1], [0], [0], [1], [0, 0, 1, 1], [], []>} : vector<4x64xf32>, vector<64x9xf32>, vector<4x9xf32> -> vector<4x9xf32>
    %cst_33 = arith.constant dense<0.000000e+00> : vector<4xf32>
    %71 = vector.multi_reduction <add>, %70, %cst_33 [1] : vector<4x9xf32> to vector<4xf32>
    %72 = vector.shape_cast %71 : vector<4xf32> to vector<4x1xf32>
    %cst_34 = arith.constant 0.111111112 : f32
    %73 = vector.broadcast %cst_34 : f32 to vector<4x1xf32>
    %74 = arith.mulf %72, %73 : vector<4x1xf32>
    %75 = arith.mulf %68, %68 : vector<4x1xf32>
    %76 = arith.subf %74, %75 : vector<4x1xf32>
    %cst_35 = arith.constant 0.000000e+00 : f32
    %77 = vector.broadcast %cst_35 : f32 to vector<4x1xf32>
    %78 = arith.maximumf %76, %77 : vector<4x1xf32>
    %cst_36 = arith.constant 9.99999974E-6 : f32
    %79 = vector.broadcast %cst_36 : f32 to vector<4x1xf32>
    %80 = arith.addf %78, %79 : vector<4x1xf32>
    %81 = math.rsqrt %80 : vector<4x1xf32>
    %cst_37 = arith.constant dense<0.000000e+00> : vector<64x1xf32>
    %82 = tpu.matmul %63, %81, %cst_37 {dimension_numbers = #tpu.dot_dimension_numbers<[1], [0], [0], [1], [0, 0, 1, 1], [], []>} : vector<64x4xf32>, vector<4x1xf32>, vector<64x1xf32> -> vector<64x1xf32>
    %83 = arith.mulf %68, %81 : vector<4x1xf32>
    %cst_38 = arith.constant dense<0.000000e+00> : vector<64x1xf32>
    %84 = tpu.matmul %63, %83, %cst_38 {dimension_numbers = #tpu.dot_dimension_numbers<[1], [0], [0], [1], [0, 0, 1, 1], [], []>} : vector<64x4xf32>, vector<4x1xf32>, vector<64x1xf32> -> vector<64x1xf32>
    %85 = vector.broadcast %82 : vector<64x1xf32> to vector<64x9xf32>
    %86 = arith.mulf %48, %85 : vector<64x9xf32>
    %87 = vector.broadcast %84 : vector<64x1xf32> to vector<64x9xf32>
    %88 = arith.subf %86, %87 : vector<64x9xf32>
    %cst_39 = arith.constant 0.000000e+00 : f32
    %89 = vector.broadcast %cst_39 : f32 to vector<64x9xf32>
    %90 = arith.maximumf %88, %89 : vector<64x9xf32>
    %c0_40 = arith.constant 0 : index
    %c0_41 = arith.constant 0 : index
    %91 = vector.load %arg12[%c0_40, %c0_41] : memref<9x8xf32, #tpu.memory_space<vmem>>, vector<9x8xf32>
    %cst_42 = arith.constant dense<0.000000e+00> : vector<64x8xf32>
    %92 = tpu.matmul %90, %91, %cst_42 {dimension_numbers = #tpu.dot_dimension_numbers<[1], [0], [0], [1], [0, 0, 1, 1], [], []>} : vector<64x9xf32>, vector<9x8xf32>, vector<64x8xf32> -> vector<64x8xf32>
    %cst_43 = arith.constant dense<0.000000e+00> : vector<4x8xf32>
    %93 = tpu.matmul %62, %61, %cst_43 {dimension_numbers = #tpu.dot_dimension_numbers<[1], [0], [0], [1], [0, 0, 1, 1], [], []>} : vector<4x64xf32>, vector<64x8xf32>, vector<4x8xf32> -> vector<4x8xf32>
    %cst_44 = arith.constant dense<0.000000e+00> : vector<4xf32>
    %94 = vector.multi_reduction <add>, %93, %cst_44 [1] : vector<4x8xf32> to vector<4xf32>
    %95 = vector.shape_cast %94 : vector<4xf32> to vector<4x1xf32>
    %cst_45 = arith.constant 1.250000e-01 : f32
    %96 = vector.broadcast %cst_45 : f32 to vector<4x1xf32>
    %97 = arith.mulf %95, %96 : vector<4x1xf32>
    %98 = arith.mulf %61, %61 : vector<64x8xf32>
    %cst_46 = arith.constant dense<0.000000e+00> : vector<4x8xf32>
    %99 = tpu.matmul %62, %98, %cst_46 {dimension_numbers = #tpu.dot_dimension_numbers<[1], [0], [0], [1], [0, 0, 1, 1], [], []>} : vector<4x64xf32>, vector<64x8xf32>, vector<4x8xf32> -> vector<4x8xf32>
    %cst_47 = arith.constant dense<0.000000e+00> : vector<4xf32>
    %100 = vector.multi_reduction <add>, %99, %cst_47 [1] : vector<4x8xf32> to vector<4xf32>
    %101 = vector.shape_cast %100 : vector<4xf32> to vector<4x1xf32>
    %cst_48 = arith.constant 1.250000e-01 : f32
    %102 = vector.broadcast %cst_48 : f32 to vector<4x1xf32>
    %103 = arith.mulf %101, %102 : vector<4x1xf32>
    %104 = arith.mulf %97, %97 : vector<4x1xf32>
    %105 = arith.subf %103, %104 : vector<4x1xf32>
    %cst_49 = arith.constant 0.000000e+00 : f32
    %106 = vector.broadcast %cst_49 : f32 to vector<4x1xf32>
    %107 = arith.maximumf %105, %106 : vector<4x1xf32>
    %cst_50 = arith.constant 9.99999974E-6 : f32
    %108 = vector.broadcast %cst_50 : f32 to vector<4x1xf32>
    %109 = arith.addf %107, %108 : vector<4x1xf32>
    %110 = math.rsqrt %109 : vector<4x1xf32>
    %cst_51 = arith.constant dense<0.000000e+00> : vector<64x1xf32>
    %111 = tpu.matmul %63, %110, %cst_51 {dimension_numbers = #tpu.dot_dimension_numbers<[1], [0], [0], [1], [0, 0, 1, 1], [], []>} : vector<64x4xf32>, vector<4x1xf32>, vector<64x1xf32> -> vector<64x1xf32>
    %112 = arith.mulf %97, %110 : vector<4x1xf32>
    %cst_52 = arith.constant dense<0.000000e+00> : vector<64x1xf32>
    %113 = tpu.matmul %63, %112, %cst_52 {dimension_numbers = #tpu.dot_dimension_numbers<[1], [0], [0], [1], [0, 0, 1, 1], [], []>} : vector<64x4xf32>, vector<4x1xf32>, vector<64x1xf32> -> vector<64x1xf32>
    %114 = vector.broadcast %111 : vector<64x1xf32> to vector<64x8xf32>
    %115 = arith.mulf %61, %114 : vector<64x8xf32>
    %116 = vector.broadcast %113 : vector<64x1xf32> to vector<64x8xf32>
    %117 = arith.subf %115, %116 : vector<64x8xf32>
    %cst_53 = arith.constant 0.000000e+00 : f32
    %118 = vector.broadcast %cst_53 : f32 to vector<64x8xf32>
    %119 = arith.maximumf %117, %118 : vector<64x8xf32>
    %c0_54 = arith.constant 0 : index
    %c0_55 = arith.constant 0 : index
    %120 = vector.load %arg13[%c0_54, %c0_55] : memref<8x8xf32, #tpu.memory_space<vmem>>, vector<8x8xf32>
    %cst_56 = arith.constant dense<0.000000e+00> : vector<64x8xf32>
    %121 = tpu.matmul %119, %120, %cst_56 {dimension_numbers = #tpu.dot_dimension_numbers<[1], [0], [0], [1], [0, 0, 1, 1], [], []>} : vector<64x8xf32>, vector<8x8xf32>, vector<64x8xf32> -> vector<64x8xf32>
    %122 = arith.addf %92, %121 : vector<64x8xf32>
    %123 = arith.addf %122, %0 : vector<64x8xf32>
    %cst_57 = arith.constant 0.000000e+00 : f32
    %124 = vector.broadcast %cst_57 : f32 to vector<64x8xf32>
    %125 = arith.maximumf %123, %124 : vector<64x8xf32>
    %c0_58 = arith.constant 0 : index
    %c0_59 = arith.constant 0 : index
    %126 = vector.load %arg6[%c0_58, %c0_59] : memref<64x64xf32, #tpu.memory_space<vmem>>, vector<64x64xf32>
    %cst_60 = arith.constant dense<0.000000e+00> : vector<64x1xf32>
    %127 = tpu.matmul %126, %7, %cst_60 {dimension_numbers = #tpu.dot_dimension_numbers<[1], [0], [0], [1], [0, 0, 1, 1], [], []>} : vector<64x64xf32>, vector<64x1xf32>, vector<64x1xf32> -> vector<64x1xf32>
    %128 = vector.broadcast %3 : f32 to vector<64x1xf32>
    %129 = arith.addf %127, %128 : vector<64x1xf32>
    %130 = vector.shape_cast %129 : vector<64x1xf32> to vector<1x64x1xf32>
    %cst_61 = arith.constant dense<0xFF800000> : vector<1xf32>
    %131 = vector.multi_reduction <maximumf>, %130, %cst_61 [1, 2] : vector<1x64x1xf32> to vector<1xf32>
    %132 = vector.shape_cast %131 : vector<1xf32> to vector<1x1x1xf32>
    %133 = vector.extract %132[0, 0, 0] : f32 from vector<1x1x1xf32>
    %134 = vector.broadcast %133 : f32 to vector<64x1xf32>
    %135 = arith.subf %129, %134 : vector<64x1xf32>
    %136 = math.exp %135 : vector<64x1xf32>
    %c0_62 = arith.constant 0 : index
    %c0_63 = arith.constant 0 : index
    %137 = vector.load %arg7[%c0_62, %c0_63] : memref<64x64xf32, #tpu.memory_space<vmem>>, vector<64x64xf32>
    %cst_64 = arith.constant dense<0.000000e+00> : vector<64x1xf32>
    %138 = tpu.matmul %137, %136, %cst_64 {dimension_numbers = #tpu.dot_dimension_numbers<[1], [0], [0], [1], [0, 0, 1, 1], [], []>} : vector<64x64xf32>, vector<64x1xf32>, vector<64x1xf32> -> vector<64x1xf32>
    %139 = tpu.reciprocal %138 {approx = true} : vector<64x1xf32> -> vector<64x1xf32>
    %140 = arith.mulf %136, %139 : vector<64x1xf32>
    %141 = vector.broadcast %140 : vector<64x1xf32> to vector<64x8xf32>
    %142 = arith.mulf %141, %125 : vector<64x8xf32>
    %cst_65 = arith.constant dense<0.000000e+00> : vector<4x8xf32>
    %143 = tpu.matmul %62, %142, %cst_65 {dimension_numbers = #tpu.dot_dimension_numbers<[1], [0], [0], [1], [0, 0, 1, 1], [], []>} : vector<4x64xf32>, vector<64x8xf32>, vector<4x8xf32> -> vector<4x8xf32>
    %c0_66 = arith.constant 0 : index
    %c0_67 = arith.constant 0 : index
    %144 = vector.load %arg14[%c0_66, %c0_67] : memref<8x128xf32, #tpu.memory_space<vmem>>, vector<8x128xf32>
    %cst_68 = arith.constant dense<0.000000e+00> : vector<4x128xf32>
    %145 = tpu.matmul %143, %144, %cst_68 {dimension_numbers = #tpu.dot_dimension_numbers<[1], [0], [0], [1], [0, 0, 1, 1], [], []>} : vector<4x8xf32>, vector<8x128xf32>, vector<4x128xf32> -> vector<4x128xf32>
    %c0_69 = arith.constant 0 : index
    %c0_70 = arith.constant 0 : index
    %146 = vector.load %arg15[%c0_69, %c0_70] : memref<1x128xf32, #tpu.memory_space<vmem>>, vector<1x128xf32>
    %147 = vector.broadcast %146 : vector<1x128xf32> to vector<4x128xf32>
    %148 = arith.addf %145, %147 : vector<4x128xf32>
    %c0_71 = arith.constant 0 : index
    %c0_72 = arith.constant 0 : index
    %c0_73 = arith.constant 0 : index
    %149 = vector.load %arg17[%c0_71, %c0_72, %c0_73] : memref<1x4x128xf32, #tpu.memory_space<vmem>>, vector<1x4x128xf32>
    %150 = vector.shape_cast %149 : vector<1x4x128xf32> to vector<4x128xf32>
    %151 = vector.shape_cast %148 : vector<4x128xf32> to vector<1x4x128xf32>
    tpu.vector_store %arg17[%c0_71, %c0_72, %c0_73], %151 {strides = array<i32>} : memref<1x4x128xf32, #tpu.memory_space<vmem>>, vector<1x4x128xf32>,
    return
  }
  func.func @transform_0(%arg0: i32) -> (i32, i32) {
    %c0_i32 = arith.constant 0 : i32
    %c0_i32_0 = arith.constant 0 : i32
    return %arg0, %c0_i32 : i32, i32
  }
  func.func @transform_1(%arg0: i32) -> (i32, i32) {
    %c0_i32 = arith.constant 0 : i32
    %c0_i32_0 = arith.constant 0 : i32
    %c0_i32_1 = arith.constant 0 : i32
    return %c0_i32, %c0_i32_0 : i32, i32
  }
  func.func @transform_2(%arg0: i32) -> (i32, i32) {
    %c0_i32 = arith.constant 0 : i32
    %c0_i32_0 = arith.constant 0 : i32
    %c0_i32_1 = arith.constant 0 : i32
    return %c0_i32, %c0_i32_0 : i32, i32
  }
  func.func @transform_3(%arg0: i32) -> (i32, i32) {
    %c0_i32 = arith.constant 0 : i32
    %c0_i32_0 = arith.constant 0 : i32
    %c0_i32_1 = arith.constant 0 : i32
    return %c0_i32, %c0_i32_0 : i32, i32
  }
  func.func @transform_4(%arg0: i32) -> (i32, i32) {
    %c0_i32 = arith.constant 0 : i32
    %c0_i32_0 = arith.constant 0 : i32
    %c0_i32_1 = arith.constant 0 : i32
    return %c0_i32, %c0_i32_0 : i32, i32
  }
  func.func @transform_5(%arg0: i32) -> (i32, i32) {
    %c0_i32 = arith.constant 0 : i32
    %c0_i32_0 = arith.constant 0 : i32
    %c0_i32_1 = arith.constant 0 : i32
    return %c0_i32, %c0_i32_0 : i32, i32
  }
  func.func @transform_6(%arg0: i32) -> (i32, i32) {
    %c0_i32 = arith.constant 0 : i32
    %c0_i32_0 = arith.constant 0 : i32
    %c0_i32_1 = arith.constant 0 : i32
    return %c0_i32, %c0_i32_0 : i32, i32
  }
  func.func @transform_7(%arg0: i32) -> (i32, i32) {
    %c0_i32 = arith.constant 0 : i32
    %c0_i32_0 = arith.constant 0 : i32
    %c0_i32_1 = arith.constant 0 : i32
    return %c0_i32, %c0_i32_0 : i32, i32
  }
  func.func @transform_8(%arg0: i32) -> (i32, i32) {
    %c0_i32 = arith.constant 0 : i32
    %c0_i32_0 = arith.constant 0 : i32
    %c0_i32_1 = arith.constant 0 : i32
    return %c0_i32, %c0_i32_0 : i32, i32
  }
  func.func @transform_9(%arg0: i32) -> (i32, i32) {
    %c0_i32 = arith.constant 0 : i32
    %c0_i32_0 = arith.constant 0 : i32
    %c0_i32_1 = arith.constant 0 : i32
    return %c0_i32, %c0_i32_0 : i32, i32
  }
  func.func @transform_10(%arg0: i32) -> (i32, i32) {
    %c0_i32 = arith.constant 0 : i32
    %c0_i32_0 = arith.constant 0 : i32
    %c0_i32_1 = arith.constant 0 : i32
    return %c0_i32, %c0_i32_0 : i32, i32
  }
  func.func @transform_11(%arg0: i32) -> (i32, i32) {
    %c0_i32 = arith.constant 0 : i32
    %c0_i32_0 = arith.constant 0 : i32
    %c0_i32_1 = arith.constant 0 : i32
    return %c0_i32, %c0_i32_0 : i32, i32
  }
  func.func @transform_12(%arg0: i32) -> (i32, i32) {
    %c0_i32 = arith.constant 0 : i32
    %c0_i32_0 = arith.constant 0 : i32
    %c0_i32_1 = arith.constant 0 : i32
    return %c0_i32, %c0_i32_0 : i32, i32
  }
  func.func @transform_13(%arg0: i32) -> (i32, i32) {
    %c0_i32 = arith.constant 0 : i32
    %c0_i32_0 = arith.constant 0 : i32
    %c0_i32_1 = arith.constant 0 : i32
    return %c0_i32, %c0_i32_0 : i32, i32
  }
  func.func @transform_14(%arg0: i32) -> (i32, i32) {
    %c0_i32 = arith.constant 0 : i32
    %c0_i32_0 = arith.constant 0 : i32
    %c0_i32_1 = arith.constant 0 : i32
    return %c0_i32, %c0_i32_0 : i32, i32
  }
  func.func @transform_15(%arg0: i32) -> i32 {
    %c0_i32 = arith.constant 0 : i32
    %c0_i32_0 = arith.constant 0 : i32
    return %c0_i32 : i32
  }
  func.func @transform_16(%arg0: i32) -> (i32, i32, i32) {
    %c0_i32 = arith.constant 0 : i32
    %c0_i32_0 = arith.constant 0 : i32
    %c0_i32_1 = arith.constant 0 : i32
    return %arg0, %c0_i32, %c0_i32_0 : i32, i32, i32
  }
}

</mosaic_0001>

<bundles_post_ra>
// kernel: tpu_custom_call.1
= control target key start
LH: loop header
LB: loop body
LE: loop exit
PB: predicated region body
PF: predicated region fallthrough
CT: control target
= control target key end

     0   :  { %s14509_s0 = inlined_call_operand.vmem [shape: f32[128,8], index: 0, kind: input, shape index: {}]   ;;  %s14510_s1 = inlined_call_operand.vmem [shape: f32[640,64], index: 1, kind: input, shape index: {}]   ;;  %s14511_s2 = inlined_call_operand.vmem [shape: f32[64,640], index: 2, kind: input, shape index: {}]   ;;  %s14512_s3 = inlined_call_operand.vmem [shape: f32[640,64], index: 3, kind: input, shape index: {}]   ;;  %s14513_s4 = inlined_call_operand.vmem [shape: f32[640,10], index: 4, kind: input, shape index: {}]   ;;  %s14514_s5 = inlined_call_operand.vmem [shape: f32[64,64], index: 5, kind: input, shape index: {}]   ;;  %s14515_s6 = inlined_call_operand.vmem [shape: f32[64,64], index: 6, kind: input, shape index: {}]   ;;  %s14516_s7 = inlined_call_operand.vmem [shape: f32[4,64], index: 7, kind: input, shape index: {}]   ;;  %s14517_s8 = inlined_call_operand.vmem [shape: f32[64,4], index: 8, kind: input, shape index: {}]   ;;  %s14518_s9 = inlined_call_operand.vmem [shape: f32[8,13], index: 9, kind: input, shape index: {}]   ;;  %s14519_s10 = inlined_call_operand.vmem [shape: f32[1,10], index: 10, kind: input, shape index: {}]   ;;  %s14520_s11 = inlined_call_operand.vmem [shape: f32[9,8], index: 11, kind: input, shape index: {}]   ;;  %s14521_s12 = inlined_call_operand.vmem [shape: f32[8,8], index: 12, kind: input, shape index: {}]   ;;  %s14522_s13 = inlined_call_operand.vmem [shape: f32[8,128], index: 13, kind: input, shape index: {}]   ;;  %s14523_s14 = inlined_call_operand.vmem [shape: f32[1,128], index: 14, kind: input, shape index: {}]   ;;  %s14524_s15 = inlined_call_operand.vmem [shape: f32[3], index: 15, kind: input, shape index: {}]   ;;  %s14525_s16 = inlined_call_operand.hbm [shape: f32[2,4,128], index: 16, kind: output, shape index: {}]  }
   0x1   :  { %14735 = sst [smem:[#allocation231_spill]] %s14509_s0 }
   0x2   :  { %14736 = sst [smem:[#allocation232_spill]] %s14510_s1 }
   0x3   :  { %14737 = sst [smem:[#allocation233_spill]] %s14511_s2 }
   0x4   :  { %14738 = sst [smem:[#allocation234_spill]] %s14518_s9 }
   0x5   :  { %14739 = sst [smem:[#allocation235_spill]] %s14524_s15 }
   0x6   :  { %21 = vsyncpa [#allocation4], 0 }
   0x7   :  { %22 = vsyncpa [#allocation3], 0 }
   0x8   :  { %24 = vsyncpa [#allocation3 + $0x1], 0  ;;  %s9942_s21 = smov 0   ;;  %s9944_s22 = smov 0  }
   0x9   :  { %s9946_s23 = smov 0   ;;  %s9948_s24 = smov 0  }
   0xa LB: > { %14740 = sst [smem:[#allocation8_spill]] %s9840_s23  ;;  %s9963_s25 = sadd.s32 4294967295, %s9844_s24   ;;  %s9844_s24 = sphi %s9948_s24, %s15360_s24   ;;  %s9840_s23 = sphi %s9946_s23, %s15357_s23   ;;  %s9836_s22 = sphi %s9944_s22, %s15359_s22   ;;  %s9832_s21 = sphi %s9942_s21, %s15358_s21  }
   0xb   : > { %s7479_s26 = sadd.s32 4294967294, %s9844_s24   ;;  %s9967_s27 = sadd.s32 1, %s9844_s24  }
   0xc   : > { %s378_s28 = sadd.s32 1, %s9840_s23  ;;  %s375_s29 = ssub.s32 %s9844_s24, %s9967_s27 }
   0xd   : > { %p388_p0 = scmp.ne.s32.totalorder %s9840_s23, %s9836_s22  ;;  %p376_p1 = scmp.eq.s32.totalorder %s375_s29, 0 }
   0xe   : > { %p389_p2 = scmp.eq.s32.totalorder %s9963_s25, 1  ;;  %p394_p3 = scmp.ne.s32.totalorder %s9836_s22, %s9832_s21 }
   0xf   : > { %p395_p4 = scmp.eq.s32.totalorder %s7479_s26, 1  ;;  %p7480_p7 = scmp.ge.s32.totalorder %s9844_s24, 1 }
  0x10   : > { %s9978_s30 = scalar_select %p376_p1, %s9840_s23, %s378_s28  }
  0x11   : > { %p9980_p5 = por %p389_p2, %p388_p0  ;;  %p9984_p6 = por %p395_p4, %p394_p3 }
  0x12   : > { %14741 = sst [smem:[#allocation9_spill]] %s9978_s30  ;;  %p402_p8 = scmp.lt.s32.totalorder %s9844_s24, 3 }
  0x13   : > { %p9322_p9 = scmp.eq.s32.totalorder %s9963_s25, 0  ;;  %s14745_s15 = sld [smem:[#allocation235_spill]] }
  0x14   : > { %p9991_p10 = pnand %p7480_p7, %p402_p8 }
  0x16   : > { %p9314_p11 = pneg %p9991_p10 }
  0x18   : > { %p9315_p12 = pnand %p9322_p9, %p9314_p11 }
  0x19   : > { %s457_s26 = sshll.u32 %s14745_s15, 4  ;;  %s458_s26 = int_to_ptr.vmem [resolvable:$true] %s457_s26 }
  0x1a   : > { %s9765_s28 = scalar_lea.vmem %s458_s26, 16  ;;  %p9767_p0 = pneg %p9315_p12 }
  0x1b   : > { %p9766_p13 = scmp.ne.s32.totalorder %s458_s26, %s9765_s28  ;;  %p9773_p3 = scmp.lt.s32.totalorder %s458_s26, %s458_s26 }
  0x1c   : > { %p9774_p4 = scmp.lt.s32.totalorder %s9765_s28, %s9765_s28 }
  0x1d   : > { %p9768_p1 = pnand %p9767_p0, %p9766_p13 }
  0x1e   : > { %p9775_p7 = por %p9774_p4, %p9773_p3 }
  0x1f   : > { %p9769_p2 = pneg %p9768_p1 }
  0x21   : > { %p9776_p8 = pnand %p9775_p7, %p9769_p2 }
  0x23   : > { %9779 = shalt.err (!%p9776_p8)
}
  0x24   : > { %s9846_s29 = smov [#allocation2]   ;;  %479 = sbr.rel (%p9991_p10) target bundleno = 4600 (0x11f8), region = 84 }
  0x25   : > { %9317 = dma.vmem_to_smem (!%p9315_p12), %s458_s26, 16, %s9846_s29, [#allocation4]  }
  0x29   : > { %9823 = dma.done.wait (%p9322_p9), [#allocation4], 16  }
  0x2a   : > { %9825 = vsyncadd (%p9322_p9), [#allocation4], 4294967280 }
  0x2b   : > { %485 = sfence }
  0x2c   : > { %s14746_s9 = sld [smem:[#allocation234_spill]]  ;;  %s7486_s28 = sshll.u32 %s9963_s25, 3  ;;  %vm548_vm0 = vcmask 64512   ;;  %vm758_vm1 = vcmask 523264   ;;  %v14535_v10 = vmov 10   ;;  %v14530_v11 = vmov 9  }
  0x2d   : > { %p531_p11 = scmp.lt.s32.totalorder %s7486_s28, 15  ;;  %s14747_s15 = sld [smem:[#allocation231_spill]]  ;;  %9368 = vset.pattern.permute.xlu0 %v14535_v10  ;;  %9367 = vset.pattern.permute.xlu1 %v14530_v11  ;;  %vm3873_vm2 = vcmask 80896   ;;  %vm9853_vm11 = vmmov 0   ;;  %vm5625_vm12 = vcmask 68608   ;;  %vm5717_vm13 = vcmask 31744  }
  0x2e   : > { %s14748_s1 = sld [smem:[#allocation232_spill]]  ;;  %vm5742_vm14 = vcmask 1043456   ;;  %vm6136_vm15 = vcmask 60416   ;;  %s7736_s23 = sshll.u32 %s9963_s25, 6 }
  0x2f   : > { %s15362_s28 = smov (!%p531_p11, %s7486_s28), 15  ;;  %s14861_s2 = sld [smem:[#allocation233_spill]] }
  0x30   : > { %s7487_s26 = sshll.u32 %s15362_s28, 3  ;;  %s544_s20 = sld [smem:[#allocation2]] }
  0x31   : > { %s7488_s29 = sld [smem:[#allocation2 + $0x1]]  ;;  %s9854_s28 = smov 116  }
  0x32   : > { %v547_v0 = vld [vmem:[%s14746_s9] sm:$0xff]  ;;  %s14474_s18 = scalar_lea.hbm %s14525_s16, %s7736_s23 }
  0x33   : > { %8602 = vmatprep.subr.mxu0 %v547_v0  ;;  %s10015_s30 = scalar_lea.vmem %s14747_s15, %s7487_s26  ;;  %s9851_s26 = smov 127  }
  0x34   : > { %8603 = vmatpush3.msra.mxu0 %v547_v0  ;;  %v536_v1 = vld [vmem:[%s10015_s30] sm:$0xff]  ;;  %v537_v2 = vld [vmem:[%s10015_s30 + $0x8] sm:$0xff]  ;;  %v538_v3 = vld [vmem:[%s10015_s30 + $0x10] sm:$0xff]  ;;  %s527_s15 = sand.u32 1, %s9836_s22  }
  0x35   : > { %8604 = vmatprep.mubr.msk.f32.mxu0 %vm548_vm0, %v536_v1  ;;  %v539_v4 = vld [vmem:[%s10015_s30 + $0x18] sm:$0xff]  ;;  %v540_v5 = vld [vmem:[%s10015_s30 + $0x20] sm:$0xff]  ;;  %v541_v6 = vld [vmem:[%s10015_s30 + $0x28] sm:$0xff]  ;;  %s7485_s9 = sshll.u32 %s527_s15, 2 }
  0x36   : > { %8605 = vmatmul.mubr.msk.f32.vlgmr.msra.gmra.mxu0 %vm548_vm0, %v537_v2  ;;  %v542_v7 = vld [vmem:[%s10015_s30 + $0x30] sm:$0xff]  ;;  %v543_v8 = vld [vmem:[%s10015_s30 + $0x38] sm:$0xff]  ;;  %v678_v9 = vld [vmem:[%s14748_s1] sm:$0xff] }
  0x37   : > { %8607 = vmatprep.mubr.msk.f32.mxu0 %vm548_vm0, %v538_v3  ;;  %8632 = vmatprep.mubr.msk.f32.mxu1 %vm758_vm1, %v678_v9  ;;  %v679_v20 = vld [vmem:[%s14748_s1 + $0x8] sm:$0xff]  ;;  %v680_v21 = vld [vmem:[%s14748_s1 + $0x10] sm:$0xff]  ;;  %v681_v22 = vld [vmem:[%s14748_s1 + $0x18] sm:$0xff] }
  0x38   : > { %v682_v23 = vld [vmem:[%s14748_s1 + $0x20] sm:$0xff]  ;;  %v683_v24 = vld [vmem:[%s14748_s1 + $0x28] sm:$0xff]  ;;  %v684_v25 = vld [vmem:[%s14748_s1 + $0x30] sm:$0xff] }
  0x39   : > { %v685_v26 = vld [vmem:[%s14748_s1 + $0x38] sm:$0xff]  ;;  %v686_v27 = vld [vmem:[%s14748_s1 + $0x40] sm:$0xff]  ;;  %v687_v28 = vld [vmem:[%s14748_s1 + $0x48] sm:$0xff] }
  0x3a   : > { %8608 = vmatmul.mubr.msk.f32.gmra.mxu0 %vm548_vm0, %v539_v4  ;;  %v688_v29 = vld [vmem:[%s14748_s1 + $0x50] sm:$0xff]  ;;  %v689_v30 = vld [vmem:[%s14748_s1 + $0x58] sm:$0xff]  ;;  %v690_v31 = vld [vmem:[%s14748_s1 + $0x60] sm:$0xff] }
  0x3b   : > { %8610 = vmatprep.mubr.msk.f32.mxu0 %vm548_vm0, %v540_v5  ;;  %v691_v32 = vld [vmem:[%s14748_s1 + $0x68] sm:$0xff]  ;;  %v692_v33 = vld [vmem:[%s14748_s1 + $0x70] sm:$0xff]  ;;  %v693_v34 = vld [vmem:[%s14748_s1 + $0x78] sm:$0xff] }
  0x3c   : > { %v694_v35 = vld [vmem:[%s14748_s1 + $0x80] sm:$0xff]  ;;  %v695_v36 = vld [vmem:[%s14748_s1 + $0x88] sm:$0xff]  ;;  %v696_v37 = vld [vmem:[%s14748_s1 + $0x90] sm:$0xff] }
  0x3d   : > { %v697_v38 = vld [vmem:[%s14748_s1 + $0x98] sm:$0xff]  ;;  %v698_v39 = vld [vmem:[%s14748_s1 + $0xa0] sm:$0xff]  ;;  %v699_v40 = vld [vmem:[%s14748_s1 + $0xa8] sm:$0xff] }
  0x3e   : > { %8611 = vmatmul.mubr.msk.f32.gmra.mxu0 %vm548_vm0, %v541_v6  ;;  %v700_v41 = vld [vmem:[%s14748_s1 + $0xb0] sm:$0xff]  ;;  %v701_v42 = vld [vmem:[%s14748_s1 + $0xb8] sm:$0xff]  ;;  %v702_v43 = vld [vmem:[%s14748_s1 + $0xc0] sm:$0xff] }
  0x3f   : > { %8613 = vmatprep.mubr.msk.f32.mxu0 %vm548_vm0, %v542_v7  ;;  %v703_v44 = vld [vmem:[%s14748_s1 + $0xc8] sm:$0xff]  ;;  %v704_v45 = vld [vmem:[%s14748_s1 + $0xd0] sm:$0xff]  ;;  %v705_v46 = vld [vmem:[%s14748_s1 + $0xd8] sm:$0xff] }
  0x40   : > { %v706_v47 = vld [vmem:[%s14748_s1 + $0xe0] sm:$0xff]  ;;  %v707_v48 = vld [vmem:[%s14748_s1 + $0xe8] sm:$0xff]  ;;  %v708_v49 = vld [vmem:[%s14748_s1 + $0xf0] sm:$0xff] }
  0x41   : > { %v709_v50 = vld [vmem:[%s14748_s1 + $0xf8] sm:$0xff]  ;;  %v710_v51 = vld [vmem:[%s14748_s1 + $0x100] sm:$0xff]  ;;  %v711_v52 = vld [vmem:[%s14748_s1 + $0x108] sm:$0xff] }
  0x42   : > { %8614 = vmatmul.mubr.msk.f32.gmra.mxu0 %vm548_vm0, %v543_v8  ;;  %v712_v53 = vld [vmem:[%s14748_s1 + $0x110] sm:$0xff]  ;;  %v713_v54 = vld [vmem:[%s14748_s1 + $0x118] sm:$0xff]  ;;  %v714_v55 = vld [vmem:[%s14748_s1 + $0x120] sm:$0xff] }
  0x43   : > { %v715_v56 = vld [vmem:[%s14748_s1 + $0x128] sm:$0xff]  ;;  %v716_v57 = vld [vmem:[%s14748_s1 + $0x130] sm:$0xff]  ;;  %v717_v58 = vld [vmem:[%s14748_s1 + $0x138] sm:$0xff] }
  0x44   : > { %v718_v59 = vld [vmem:[%s14748_s1 + $0x140] sm:$0xff]  ;;  %v719_v60 = vld [vmem:[%s14748_s1 + $0x148] sm:$0xff]  ;;  %v720_v61 = vld [vmem:[%s14748_s1 + $0x150] sm:$0xff] }
  0x45   : > { %v721_v62 = vld [vmem:[%s14748_s1 + $0x158] sm:$0xff]  ;;  %v722_v63 = vld [vmem:[%s14748_s1 + $0x160] sm:$0xff]  ;;  %v723_v0 = vld [vmem:[%s14748_s1 + $0x168] sm:$0xff] }
  0x46   : > { %v724_v1 = vld [vmem:[%s14748_s1 + $0x170] sm:$0xff]  ;;  %v725_v2 = vld [vmem:[%s14748_s1 + $0x178] sm:$0xff]  ;;  %v726_v3 = vld [vmem:[%s14748_s1 + $0x180] sm:$0xff] }
  0x47   : > { %v727_v4 = vld [vmem:[%s14748_s1 + $0x188] sm:$0xff]  ;;  %v728_v5 = vld [vmem:[%s14748_s1 + $0x190] sm:$0xff]  ;;  %v729_v6 = vld [vmem:[%s14748_s1 + $0x198] sm:$0xff] }
  0x48   : > { %v730_v7 = vld [vmem:[%s14748_s1 + $0x1a0] sm:$0xff]  ;;  %v731_v8 = vld [vmem:[%s14748_s1 + $0x1a8] sm:$0xff]  ;;  %v732_v9 = vld [vmem:[%s14748_s1 + $0x1b0] sm:$0xff] }
  0xf6   : > { %v10039_v12 = vpop.f32.mrf.mxu0 }
  0xf7   : > { %14749 = vst [vmem:[#allocation10_spill] sm:$0xff] %v10039_v12 }
  0xf8   : > { %v10041_v13 = vpop.f32.mrf.mxu0 }
  0xf9   : > { %14750 = vst [vmem:[#allocation11_spill] sm:$0xff] %v10041_v13 }
  0xfa   : > { %v10043_v14 = vpop.f32.mrf.mxu0 }
  0xfb   : > { %14751 = vst [vmem:[#allocation12_spill] sm:$0xff] %v10043_v14 }
  0xfc   : > { %v10045_v15 = vpop.f32.mrf.mxu0 }
  0xfd   : > { %14752 = vst [vmem:[#allocation13_spill] sm:$0xff] %v10045_v15 }
  0xfe   : > { %v10047_v16 = vpop.f32.mrf.mxu0 }
  0xff   : > { %14753 = vst [vmem:[#allocation14_spill] sm:$0xff] %v10047_v16 }
 0x100   : > { %v10049_v17 = vpop.f32.mrf.mxu0 }
 0x101   : > { %14754 = vst [vmem:[#allocation15_spill] sm:$0xff] %v10049_v17 }
 0x102   : > { %v10051_v18 = vpop.f32.mrf.mxu0 }
 0x103   : > { %14755 = vst [vmem:[#allocation16_spill] sm:$0xff] %v10051_v18  ;;  %8616 = vmatprep.subr.mxu1 %v10051_v18 }
 0x104   : > { %v10054_v19 = vpop.f32.mrf.mxu0  ;;  %8617 = vmatpush3.msra.mxu1 %v10051_v18 }
 0x105   : > { %14756 = vst [vmem:[#allocation17_spill] sm:$0xff] %v10054_v19  ;;  %8618 = vmatprep.subr.mxu1 %v10054_v19 }
 0x106   : > { %8619 = vmatpush3.msra.mxu1 %v10054_v19 }
 0x107   : > { %8620 = vmatprep.subr.mxu1 %v10047_v16 }
 0x108   : > { %8621 = vmatpush3.msra.mxu1 %v10047_v16 }
 0x109   : > { %8622 = vmatprep.subr.mxu1 %v10049_v17 }
 0x10a   : > { %8623 = vmatpush3.msra.mxu1 %v10049_v17 }
 0x10b   : > { %8624 = vmatprep.subr.mxu1 %v10043_v14 }
 0x10c   : > { %8625 = vmatpush3.msra.mxu1 %v10043_v14 }
 0x10d   : > { %8626 = vmatprep.subr.mxu1 %v10045_v15 }
 0x10e   : > { %8627 = vmatpush3.msra.mxu1 %v10045_v15 }
 0x10f   : > { %8628 = vmatprep.subr.mxu1 %v10039_v12 }
 0x110   : > { %8629 = vmatpush3.msra.mxu1 %v10039_v12 }
 0x111   : > { %8630 = vmatprep.subr.mxu1 %v10041_v13 }
 0x112   : > { %8631 = vmatpush3.msra.mxu1 %v10041_v13 }
 0x113   : > { %8633 = vmatmul.mubr.msk.f32.vlgmr.msra.gmra.mxu1 %vm758_vm1, %v679_v20  ;;  %v733_v20 = vld [vmem:[%s14748_s1 + $0x1b8] sm:$0xff] }
 0x114   : > { %8635 = vmatprep.mubr.msk.f32.mxu1 %vm758_vm1, %v680_v21  ;;  %v734_v21 = vld [vmem:[%s14748_s1 + $0x1c0] sm:$0xff] }
 0x117   : > { %8636 = vmatmul.mubr.msk.f32.gmra.mxu1 %vm758_vm1, %v681_v22  ;;  %v735_v22 = vld [vmem:[%s14748_s1 + $0x1c8] sm:$0xff] }
 0x118   : > { %8638 = vmatprep.mubr.msk.f32.mxu1 %vm758_vm1, %v682_v23  ;;  %v736_v23 = vld [vmem:[%s14748_s1 + $0x1d0] sm:$0xff] }
 0x11b   : > { %8639 = vmatmul.mubr.msk.f32.gmra.mxu1 %vm758_vm1, %v683_v24  ;;  %v737_v24 = vld [vmem:[%s14748_s1 + $0x1d8] sm:$0xff] }
 0x11c   : > { %8641 = vmatprep.mubr.msk.f32.mxu1 %vm758_vm1, %v684_v25  ;;  %v738_v25 = vld [vmem:[%s14748_s1 + $0x1e0] sm:$0xff] }
 0x11f   : > { %8642 = vmatmul.mubr.msk.f32.gmra.mxu1 %vm758_vm1, %v685_v26  ;;  %v739_v26 = vld [vmem:[%s14748_s1 + $0x1e8] sm:$0xff] }
 0x120   : > { %8644 = vmatprep.mubr.msk.f32.mxu1 %vm758_vm1, %v686_v27  ;;  %v740_v27 = vld [vmem:[%s14748_s1 + $0x1f0] sm:$0xff] }
 0x123   : > { %8645 = vmatmul.mubr.msk.f32.gmra.mxu1 %vm758_vm1, %v687_v28  ;;  %v741_v28 = vld [vmem:[%s14748_s1 + $0x1f8] sm:$0xff] }
 0x124   : > { %8647 = vmatprep.mubr.msk.f32.mxu1 %vm758_vm1, %v688_v29  ;;  %v742_v29 = vld [vmem:[%s14748_s1 + $0x200] sm:$0xff] }
 0x127   : > { %8648 = vmatmul.mubr.msk.f32.gmra.mxu1 %vm758_vm1, %v689_v30  ;;  %v743_v30 = vld [vmem:[%s14748_s1 + $0x208] sm:$0xff] }
 0x128   : > { %8650 = vmatprep.mubr.msk.f32.mxu1 %vm758_vm1, %v690_v31  ;;  %v744_v31 = vld [vmem:[%s14748_s1 + $0x210] sm:$0xff] }
 0x12b   : > { %8651 = vmatmul.mubr.msk.f32.gmra.mxu1 %vm758_vm1, %v691_v32  ;;  %v745_v32 = vld [vmem:[%s14748_s1 + $0x218] sm:$0xff] }
 0x12c   : > { %8653 = vmatprep.mubr.msk.f32.mxu1 %vm758_vm1, %v692_v33  ;;  %v746_v33 = vld [vmem:[%s14748_s1 + $0x220] sm:$0xff] }
 0x12f   : > { %8654 = vmatmul.mubr.msk.f32.gmra.mxu1 %vm758_vm1, %v693_v34  ;;  %v747_v34 = vld [vmem:[%s14748_s1 + $0x228] sm:$0xff] }
 0x130   : > { %8656 = vmatprep.mubr.msk.f32.mxu1 %vm758_vm1, %v694_v35  ;;  %v748_v35 = vld [vmem:[%s14748_s1 + $0x230] sm:$0xff] }
 0x133   : > { %8657 = vmatmul.mubr.msk.f32.gmra.mxu1 %vm758_vm1, %v695_v36  ;;  %v749_v36 = vld [vmem:[%s14748_s1 + $0x238] sm:$0xff] }
 0x134   : > { %8659 = vmatprep.mubr.msk.f32.mxu1 %vm758_vm1, %v696_v37 }
 0x137   : > { %8660 = vmatmul.mubr.msk.f32.gmra.mxu1 %vm758_vm1, %v697_v38  ;;  %v750_v38 = vld [vmem:[%s14748_s1 + $0x240] sm:$0xff] }
 0x138   : > { %8662 = vmatprep.mubr.msk.f32.mxu1 %vm758_vm1, %v698_v39  ;;  %v751_v39 = vld [vmem:[%s14748_s1 + $0x248] sm:$0xff] }
 0x13b   : > { %8663 = vmatmul.mubr.msk.f32.gmra.mxu1 %vm758_vm1, %v699_v40 }
 0x13c   : > { %8665 = vmatprep.mubr.msk.f32.mxu1 %vm758_vm1, %v700_v41 }
 0x13f   : > { %8666 = vmatmul.mubr.msk.f32.gmra.mxu1 %vm758_vm1, %v701_v42  ;;  %v752_v42 = vld [vmem:[%s14748_s1 + $0x250] sm:$0xff] }
 0x140   : > { %8668 = vmatprep.mubr.msk.f32.mxu1 %vm758_vm1, %v702_v43  ;;  %v753_v43 = vld [vmem:[%s14748_s1 + $0x258] sm:$0xff] }
 0x143   : > { %8669 = vmatmul.mubr.msk.f32.gmra.mxu1 %vm758_vm1, %v703_v44 }
 0x144   : > { %8671 = vmatprep.mubr.msk.f32.mxu1 %vm758_vm1, %v704_v45 }
 0x147   : > { %8672 = vmatmul.mubr.msk.f32.gmra.mxu1 %vm758_vm1, %v705_v46 }
 0x148   : > { %8674 = vmatprep.mubr.msk.f32.mxu1 %vm758_vm1, %v706_v47  ;;  %v754_v47 = vld [vmem:[%s14748_s1 + $0x260] sm:$0xff] }
 0x14b   : > { %8675 = vmatmul.mubr.msk.f32.gmra.mxu1 %vm758_vm1, %v707_v48  ;;  %v755_v48 = vld [vmem:[%s14748_s1 + $0x268] sm:$0xff] }
 0x14c   : > { %8677 = vmatprep.mubr.msk.f32.mxu1 %vm758_vm1, %v708_v49 }
 0x14f   : > { %8678 = vmatmul.mubr.msk.f32.gmra.mxu1 %vm758_vm1, %v709_v50 }
 0x150   : > { %8680 = vmatprep.mubr.msk.f32.mxu1 %vm758_vm1, %v710_v51  ;;  %v756_v51 = vld [vmem:[%s14748_s1 + $0x270] sm:$0xff] }
 0x153   : > { %8681 = vmatmul.mubr.msk.f32.gmra.mxu1 %vm758_vm1, %v711_v52  ;;  %v757_v52 = vld [vmem:[%s14748_s1 + $0x278] sm:$0xff] }
 0x154   : > { %8683 = vmatprep.mubr.msk.f32.mxu1 %vm758_vm1, %v712_v53 }
 0x157   : > { %8684 = vmatmul.mubr.msk.f32.gmra.mxu1 %vm758_vm1, %v713_v54 }
 0x158   : > { %8686 = vmatprep.mubr.msk.f32.mxu1 %vm758_vm1, %v714_v55 }
 0x15b   : > { %8687 = vmatmul.mubr.msk.f32.gmra.mxu1 %vm758_vm1, %v715_v56 }
 0x15c   : > { %8689 = vmatprep.mubr.msk.f32.mxu1 %vm758_vm1, %v716_v57 }
 0x15f   : > { %8690 = vmatmul.mubr.msk.f32.gmra.mxu1 %vm758_vm1, %v717_v58 }
 0x160   : > { %8692 = vmatprep.mubr.msk.f32.mxu1 %vm758_vm1, %v718_v59  ;;  %v14526_v59 = vmov 8  }
 0x163   : > { %8693 = vmatmul.mubr.msk.f32.gmra.mxu1 %vm758_vm1, %v719_v60 }
 0x164   : > { %8695 = vmatprep.mubr.msk.f32.mxu1 %vm758_vm1, %v720_v61 }
 0x167   : > { %8696 = vmatmul.mubr.msk.f32.gmra.mxu1 %vm758_vm1, %v721_v62 }
 0x168   : > { %8698 = vmatprep.mubr.msk.f32.mxu1 %vm758_vm1, %v722_v63 }
 0x16b   : > { %8699 = vmatmul.mubr.msk.f32.gmra.mxu1 %vm758_vm1, %v723_v0 }
 0x16c   : > { %8701 = vmatprep.mubr.msk.f32.mxu1 %vm758_vm1, %v724_v1 }
 0x16f   : > { %8702 = vmatmul.mubr.msk.f32.gmra.mxu1 %vm758_vm1, %v725_v2 }
 0x170   : > { %8704 = vmatprep.mubr.msk.f32.mxu1 %vm758_vm1, %v726_v3 }
 0x173   : > { %8705 = vmatmul.mubr.msk.f32.gmra.mxu1 %vm758_vm1, %v727_v4 }
 0x174   : > { %8707 = vmatprep.mubr.msk.f32.mxu1 %vm758_vm1, %v728_v5 }
 0x177   : > { %8708 = vmatmul.mubr.msk.f32.gmra.mxu1 %vm758_vm1, %v729_v6 }
 0x178   : > { %8710 = vmatprep.mubr.msk.f32.mxu1 %vm758_vm1, %v730_v7 }
 0x17b   : > { %8711 = vmatmul.mubr.msk.f32.gmra.mxu1 %vm758_vm1, %v731_v8 }
 0x17c   : > { %8713 = vmatprep.mubr.msk.f32.mxu1 %vm758_vm1, %v732_v9 }
 0x17f   : > { %8714 = vmatmul.mubr.msk.f32.gmra.mxu1 %vm758_vm1, %v733_v20 }
 0x180   : > { %8716 = vmatprep.mubr.msk.f32.mxu1 %vm758_vm1, %v734_v21 }
 0x183   : > { %8717 = vmatmul.mubr.msk.f32.gmra.mxu1 %vm758_vm1, %v735_v22 }
 0x184   : > { %8719 = vmatprep.mubr.msk.f32.mxu1 %vm758_vm1, %v736_v23 }
 0x187   : > { %8720 = vmatmul.mubr.msk.f32.gmra.mxu1 %vm758_vm1, %v737_v24 }
 0x188   : > { %8722 = vmatprep.mubr.msk.f32.mxu1 %vm758_vm1, %v738_v25 }
 0x18b   : > { %8723 = vmatmul.mubr.msk.f32.gmra.mxu1 %vm758_vm1, %v739_v26 }
 0x18c   : > { %8725 = vmatprep.mubr.msk.f32.mxu1 %vm758_vm1, %v740_v27 }
 0x18f   : > { %8726 = vmatmul.mubr.msk.f32.gmra.mxu1 %vm758_vm1, %v741_v28 }
 0x190   : > { %8728 = vmatprep.mubr.msk.f32.mxu1 %vm758_vm1, %v742_v29 }
 0x193   : > { %8729 = vmatmul.mubr.msk.f32.gmra.mxu1 %vm758_vm1, %v743_v30 }
 0x194   : > { %8731 = vmatprep.mubr.msk.f32.mxu1 %vm758_vm1, %v744_v31 }
 0x197   : > { %8732 = vmatmul.mubr.msk.f32.gmra.mxu1 %vm758_vm1, %v745_v32 }
 0x198   : > { %8734 = vmatprep.mubr.msk.f32.mxu1 %vm758_vm1, %v746_v33 }
 0x19b   : > { %8735 = vmatmul.mubr.msk.f32.gmra.mxu1 %vm758_vm1, %v747_v34 }
 0x19c   : > { %8737 = vmatprep.mubr.msk.f32.mxu1 %vm758_vm1, %v748_v35 }
 0x19f   : > { %8738 = vmatmul.mubr.msk.f32.gmra.mxu1 %vm758_vm1, %v749_v36 }
 0x1a0   : > { %8740 = vmatprep.mubr.msk.f32.mxu1 %vm758_vm1, %v750_v38 }
 0x1a3   : > { %8741 = vmatmul.mubr.msk.f32.gmra.mxu1 %vm758_vm1, %v751_v39 }
 0x1a4   : > { %8743 = vmatprep.mubr.msk.f32.mxu1 %vm758_vm1, %v752_v42 }
 0x1a7   : > { %8744 = vmatmul.mubr.msk.f32.gmra.mxu1 %vm758_vm1, %v753_v43 }
 0x1a8   : > { %8746 = vmatprep.mubr.msk.f32.mxu1 %vm758_vm1, %v754_v47 }
 0x1ab   : > { %8747 = vmatmul.mubr.msk.f32.gmra.mxu1 %vm758_vm1, %v755_v48 }
 0x1ac   : > { %8749 = vmatprep.mubr.msk.f32.mxu1 %vm758_vm1, %v756_v51 }
 0x1af   : > { %8750 = vmatmul.mubr.msk.f32.gmra.mxu1 %vm758_vm1, %v757_v52 }
 0x1d3   : > { %v10355_v37 = vpop.f32.mrf.mxu1 }
 0x1d4   : > { %14757 = vst [vmem:[#allocation18_spill] sm:$0xff] %v10355_v37  ;;  %2784 = vperm.xlu0 %9368, %v10355_v37   ;;  %2069 = vperm.xlu1 %9367, %v10355_v37  }
 0x1d5   : > { %v10367_v40 = vpop.f32.mrf.mxu1 }
 0x1d6   : > { %14758 = vst [vmem:[#allocation19_spill] sm:$0xff] %v10367_v40 }
 0x1d7   : > { %v10371_v41 = vpop.f32.mrf.mxu1 }
 0x1d8   : > { %2780 = vperm.xlu0 %9368, %v10367_v40   ;;  %2065 = vperm.xlu1 %9367, %v10367_v40   ;;  %14759 = vst [vmem:[#allocation20_spill] sm:$0xff] %v10371_v41 }
 0x1d9   : > { %v10382_v44 = vpop.f32.mrf.mxu1 }
 0x1da   : > { %14760 = vst [vmem:[#allocation21_spill] sm:$0xff] %v10382_v44 }
 0x1db   : > { %v10387_v45 = vpop.f32.mrf.mxu1 }
 0x1dc   : > { %2792 = vperm.xlu0 %9368, %v10371_v41   ;;  %2077 = vperm.xlu1 %9367, %v10371_v41   ;;  %14761 = vst [vmem:[#allocation22_spill] sm:$0xff] %v10387_v45  ;;  %v1479_v41 = vld [vmem:[%s14513_s4 + $0x78] sm:$0xff] }
 0x1dd   : > { %v10391_v46 = vpop.f32.mrf.mxu1 }
 0x1de   : > { %14762 = vst [vmem:[#allocation23_spill] sm:$0xff] %v10391_v46 }
 0x1df   : > { %v10403_v49 = vpop.f32.mrf.mxu1 }
 0x1e0   : > { %2788 = vperm.xlu0 %9368, %v10382_v44   ;;  %2073 = vperm.xlu1 %9367, %v10382_v44   ;;  %14763 = vst [vmem:[#allocation24_spill] sm:$0xff] %v10403_v49 }
 0x1e1   : > { %v10407_v50 = vpop.f32.mrf.mxu1 }
 0x1e2   : > { %14764 = vst [vmem:[#allocation25_spill] sm:$0xff] %v10407_v50 }
 0x1e3   : > { %v10419_v53 = vpop.f32.mrf.mxu1 }
 0x1e4   : > { %2800 = vperm.xlu0 %9368, %v10387_v45   ;;  %2085 = vperm.xlu1 %9367, %v10387_v45   ;;  %14765 = vst [vmem:[#allocation26_spill] sm:$0xff] %v10419_v53  ;;  %v1545_v45 = vld [vmem:[%s14861_s2 + $0x8] sm:$0xff] }
 0x1e5   : > { %v10423_v54 = vpop.f32.mrf.mxu1  ;;  %2528 = vmatprep.mubr.f32.mxu0 %v1545_v45 }
 0x1e6   : > { %14766 = vst [vmem:[#allocation27_spill] sm:$0xff] %v10423_v54 }
 0x1e7   : > { %v10427_v55 = vpop.f32.mrf.mxu1 }
 0x1e8   : > { %2796 = vperm.xlu0 %9368, %v10391_v46   ;;  %2081 = vperm.xlu1 %9367, %v10391_v46   ;;  %14767 = vst [vmem:[#allocation28_spill] sm:$0xff] %v10427_v55 }
 0x1e9   : > { %v10431_v56 = vpop.f32.mrf.mxu1 }
 0x1ea   : > { %14768 = vst [vmem:[#allocation29_spill] sm:$0xff] %v10431_v56 }
 0x1eb   : > { %v10435_v57 = vpop.f32.mrf.mxu1 }
 0x1ec   : > { %2808 = vperm.xlu0 %9368, %v10403_v49   ;;  %2093 = vperm.xlu1 %9367, %v10403_v49   ;;  %14769 = vst [vmem:[#allocation30_spill] sm:$0xff] %v10435_v57 }
 0x1ed   : > { %v10439_v58 = vpop.f32.mrf.mxu1 }
 0x1ee   : > { %14770 = vst [vmem:[#allocation31_spill] sm:$0xff] %v10439_v58 }
 0x1ef   : > { %v10444_v60 = vpop.f32.mrf.mxu1 }
 0x1f0   : > { %2804 = vperm.xlu0 %9368, %v10407_v50   ;;  %2089 = vperm.xlu1 %9367, %v10407_v50   ;;  %14771 = vst [vmem:[#allocation32_spill] sm:$0xff] %v10444_v60 }
 0x1f1   : > { %v10450_v61 = vpop.f32.mrf.mxu1 }
 0x1f2   : > { %14772 = vst [vmem:[#allocation33_spill] sm:$0xff] %v10450_v61 }
 0x1f3   : > { %v10460_v62 = vpop.f32.mrf.mxu1 }
 0x1f4   : > { %2816 = vperm.xlu0 %9368, %v10419_v53   ;;  %2101 = vperm.xlu1 %9367, %v10419_v53   ;;  %14773 = vst [vmem:[#allocation34_spill] sm:$0xff] %v10460_v62 }
 0x1f5   : > { %v10466_v63 = vpop.f32.mrf.mxu1 }
 0x1f6   : > { %14774 = vst [vmem:[#allocation35_spill] sm:$0xff] %v10466_v63 }
 0x1f7   : > { %v10470_v0 = vpop.f32.mrf.mxu1 }
 0x1f8   : > { %2812 = vperm.xlu0 %9368, %v10423_v54   ;;  %2097 = vperm.xlu1 %9367, %v10423_v54   ;;  %14775 = vst [vmem:[#allocation36_spill] sm:$0xff] %v10470_v0 }
 0x1f9   : > { %v10474_v1 = vpop.f32.mrf.mxu1 }
 0x1fa   : > { %14776 = vst [vmem:[#allocation37_spill] sm:$0xff] %v10474_v1 }
 0x1fb   : > { %v10478_v2 = vpop.f32.mrf.mxu1 }
 0x1fc   : > { %2824 = vperm.xlu0 %9368, %v10427_v55   ;;  %2109 = vperm.xlu1 %9367, %v10427_v55   ;;  %14777 = vst [vmem:[#allocation38_spill] sm:$0xff] %v10478_v2 }
 0x1fd   : > { %v10482_v3 = vpop.f32.mrf.mxu1 }
 0x1fe   : > { %14778 = vst [vmem:[#allocation39_spill] sm:$0xff] %v10482_v3 }
 0x1ff   : > { %v10486_v4 = vpop.f32.mrf.mxu1 }
 0x200   : > { %2820 = vperm.xlu0 %9368, %v10431_v56   ;;  %2105 = vperm.xlu1 %9367, %v10431_v56   ;;  %14779 = vst [vmem:[#allocation40_spill] sm:$0xff] %v10486_v4 }
 0x201   : > { %v10490_v5 = vpop.f32.mrf.mxu1 }
 0x202   : > { %14780 = vst [vmem:[#allocation41_spill] sm:$0xff] %v10490_v5 }
 0x203   : > { %v10494_v6 = vpop.f32.mrf.mxu1 }
 0x204   : > { %2832 = vperm.xlu0 %9368, %v10435_v57   ;;  %2117 = vperm.xlu1 %9367, %v10435_v57   ;;  %14781 = vst [vmem:[#allocation42_spill] sm:$0xff] %v10494_v6 }
 0x205   : > { %v10498_v7 = vpop.f32.mrf.mxu1 }
 0x206   : > { %14782 = vst [vmem:[#allocation43_spill] sm:$0xff] %v10498_v7 }
 0x207   : > { %v10502_v8 = vpop.f32.mrf.mxu1 }
 0x208   : > { %9369 = vset.pattern.permute.xlu1 %v14526_v59  ;;  %2828 = vperm.xlu0 %9368, %v10439_v58   ;;  %14783 = vst [vmem:[#allocation44_spill] sm:$0xff] %v10502_v8 }
 0x209   : > { %1651 = vperm.xlu1 %9369, %v10435_v57   ;;  %v10505_v9 = vpop.f32.mrf.mxu1 }
 0x20a   : > { %14784 = vst [vmem:[#allocation45_spill] sm:$0xff] %v10505_v9 }
 0x20b   : > { %v10508_v20 = vpop.f32.mrf.mxu1 }
 0x20c   : > { %9371 = vset.pattern.permute.xlu0 %v14530_v11  ;;  %14785 = vst [vmem:[#allocation46_spill] sm:$0xff] %v10508_v20 }
 0x20d   : > { %9370 = vset.pattern.permute.xlu1 %v14530_v11  ;;  %2125 = vperm.xlu0 %9371, %v10444_v60   ;;  %v10511_v21 = vpop.f32.mrf.mxu1 }
 0x20e   : > { %2113 = vperm.xlu1 %9370, %v10439_v58   ;;  %14786 = vst [vmem:[#allocation47_spill] sm:$0xff] %v10511_v21 }
 0x20f   : > { %v10514_v22 = vpop.f32.mrf.mxu1 }
 0x210   : > { %14787 = vst [vmem:[#allocation48_spill] sm:$0xff] %v10514_v22 }
 0x211   : > { %9375 = vset.pattern.permute.xlu0 %v14535_v10  ;;  %v10517_v23 = vpop.f32.mrf.mxu1 }
 0x212   : > { %9372 = vset.pattern.permute.xlu1 %v14535_v10  ;;  %2836 = vperm.xlu0 %9375, %v10450_v61   ;;  %14788 = vst [vmem:[#allocation49_spill] sm:$0xff] %v10517_v23 }
 0x213   : > { %2840 = vperm.xlu1 %9372, %v10444_v60   ;;  %v10520_v24 = vpop.f32.mrf.mxu1 }
 0x214   : > { %14789 = vst [vmem:[#allocation50_spill] sm:$0xff] %v10520_v24 }
 0x215   : > { %v10528_v27 = vpop.f32.mrf.mxu1 }
 0x216   : > { %9376 = vset.pattern.permute.xlu0 %v14526_v59  ;;  %14791 = vst [vmem:[#allocation52_spill] sm:$0xff] %v10528_v27 }
 0x217   : > { %9373 = vset.pattern.permute.xlu1 %v14526_v59  ;;  %1656 = vperm.xlu0 %9376, %v10450_v61   ;;  %v10536_v30 = vpop.f32.mrf.mxu1 }
 0x218   : > { %1661 = vperm.xlu1 %9373, %v10444_v60   ;;  %14793 = vst [vmem:[#allocation54_spill] sm:$0xff] %v10536_v30  ;;  %v14807_v60 = vmov 9  }
 0x219   : > { %v10545_v33 = vpop.f32.mrf.mxu1 }
 0x21a   : > { %14795 = vst [vmem:[#allocation56_spill] sm:$0xff] %v10545_v33 }
 0x21b   : > { %9377 = vset.pattern.permute.xlu0 %v14530_v11  ;;  %v10554_v36 = vpop.f32.mrf.mxu1 }
 0x21c   : > { %9374 = vset.pattern.permute.xlu1 %v14530_v11  ;;  %2133 = vperm.xlu0 %9377, %v10460_v62   ;;  %14797 = vst [vmem:[#allocation58_spill] sm:$0xff] %v10554_v36 }
 0x21d   : > { %2121 = vperm.xlu1 %9374, %v10450_v61   ;;  %v10563_v42 = vpop.f32.mrf.mxu1 }
 0x21e   : > { %14799 = vst [vmem:[#allocation60_spill] sm:$0xff] %v10563_v42 }
 0x21f   : > { %v10571_v48 = vpop.f32.mrf.mxu1 }
 0x220   : > { %2129 = vperm.xlu0 %9377, %v10466_v63   ;;  %14801 = vst [vmem:[#allocation62_spill] sm:$0xff] %v10571_v48 }
 0x221   : > { %9378 = vset.pattern.permute.xlu1 %v14535_v10 }
 0x222   : > { %2848 = vperm.xlu1 %9378, %v10460_v62  }
 0x224   : > { %2141 = vperm.xlu0 %9377, %v10470_v0  }
 0x226   : > { %2844 = vperm.xlu1 %9378, %v10466_v63  }
 0x228   : > { %2137 = vperm.xlu0 %9377, %v10474_v1  }
 0x22a   : > { %2856 = vperm.xlu1 %9378, %v10470_v0  }
 0x22c   : > { %2149 = vperm.xlu0 %9377, %v10478_v2  }
 0x22e   : > { %2852 = vperm.xlu1 %9378, %v10474_v1  }
 0x230   : > { %2145 = vperm.xlu0 %9377, %v10482_v3  }
 0x232   : > { %2864 = vperm.xlu1 %9378, %v10478_v2  }
 0x234   : > { %2157 = vperm.xlu0 %9377, %v10486_v4  }
 0x236   : > { %2860 = vperm.xlu1 %9378, %v10482_v3  }
 0x238   : > { %2153 = vperm.xlu0 %9377, %v10490_v5  }
 0x23a   : > { %2872 = vperm.xlu1 %9378, %v10486_v4  }
 0x23c   : > { %2165 = vperm.xlu0 %9377, %v10494_v6  }
 0x23e   : > { %2868 = vperm.xlu1 %9378, %v10490_v5  }
 0x240   : > { %2161 = vperm.xlu0 %9377, %v10498_v7  }
 0x242   : > { %2880 = vperm.xlu1 %9378, %v10494_v6  }
 0x244   : > { %2173 = vperm.xlu0 %9377, %v10502_v8  }
 0x246   : > { %2876 = vperm.xlu1 %9378, %v10498_v7  }
 0x248   : > { %2169 = vperm.xlu0 %9377, %v10505_v9  }
 0x24a   : > { %2888 = vperm.xlu1 %9378, %v10502_v8  }
 0x24c   : > { %2181 = vperm.xlu0 %9377, %v10508_v20  }
 0x24e   : > { %2884 = vperm.xlu1 %9378, %v10505_v9  }
 0x24f   : > { %v10523_v25 = vpop.permute.xlu0 %2784  ;;  %v10525_v26 = vpop.permute.xlu1 %2069 }
 0x250   : > { %14790 = vst [vmem:[#allocation51_spill] sm:$0xff] %v10523_v25  ;;  %2177 = vperm.xlu0 %9377, %v10511_v21  }
 0x252   : > { %2896 = vperm.xlu1 %9378, %v10508_v20  }
 0x253   : > { %v10531_v28 = vpop.permute.xlu0 %2780  ;;  %v10533_v29 = vpop.permute.xlu1 %2065 }
 0x254   : > { %14792 = vst [vmem:[#allocation53_spill] sm:$0xff] %v10531_v28  ;;  %2189 = vperm.xlu0 %9377, %v10514_v22  }
 0x256   : > { %9379 = vset.pattern.permute.xlu1 %v14526_v59 }
 0x257   : > { %v10539_v31 = vpop.permute.xlu0 %2792  ;;  %v10541_v32 = vpop.permute.xlu1 %2077  ;;  %1731 = vperm.xlu1 %9379, %v10508_v20  }
 0x258   : > { %14794 = vst [vmem:[#allocation55_spill] sm:$0xff] %v10539_v31  ;;  %9382 = vset.pattern.permute.xlu0 %v14535_v10  ;;  %v14812_v31 = vmov 10  }
 0x259   : > { %2904 = vperm.xlu0 %9382, %v10514_v22  }
 0x25b   : > { %v10548_v34 = vpop.permute.xlu0 %2788  ;;  %v10550_v35 = vpop.permute.xlu1 %2073  ;;  %9380 = vset.pattern.permute.xlu1 %v14535_v10 }
 0x25c   : > { %14796 = vst [vmem:[#allocation57_spill] sm:$0xff] %v10548_v34  ;;  %2892 = vperm.xlu1 %9380, %v10511_v21  }
 0x25d   : > { %9383 = vset.pattern.permute.xlu0 %v14526_v59 }
 0x25e   : > { %1741 = vperm.xlu0 %9383, %v10514_v22  }
 0x25f   : > { %v10558_v38 = vpop.permute.xlu0 %2800  ;;  %v10560_v39 = vpop.permute.xlu1 %2085 }
 0x260   : > { %14798 = vst [vmem:[#allocation59_spill] sm:$0xff] %v10558_v38  ;;  %9381 = vset.pattern.permute.xlu1 %v14526_v59  ;;  %v10581_v59 = vpop.f32.mrf.mxu1 }
 0x261   : > { %1726 = vperm.xlu1 %9381, %v10511_v21   ;;  %14803 = vst [vmem:[#allocation64_spill] sm:$0xff] %v10581_v59 }
 0x262   : > { %1736 = vperm.xlu0 %9383, %v10517_v23  }
 0x263   : > { %v10567_v43 = vpop.permute.xlu0 %2796  ;;  %v10569_v47 = vpop.permute.xlu1 %2081 }
 0x264   : > { %14800 = vst [vmem:[#allocation61_spill] sm:$0xff] %v10567_v43 }
 0x265   : > { %9384 = vset.pattern.permute.xlu1 %v14530_v11  ;;  %v10590_v11 = vpop.f32.mrf.mxu1 }
 0x266   : > { %9387 = vset.pattern.permute.xlu0 %v14535_v10  ;;  %2185 = vperm.xlu1 %9384, %v10517_v23   ;;  %14805 = vst [vmem:[#allocation66_spill] sm:$0xff] %v10590_v11 }
 0x267   : > { %v10576_v51 = vpop.permute.xlu0 %2808  ;;  %v10578_v52 = vpop.permute.xlu1 %2093  ;;  %2912 = vperm.xlu0 %9387, %v10520_v24  }
 0x268   : > { %14802 = vst [vmem:[#allocation63_spill] sm:$0xff] %v10576_v51 }
 0x26a   : > { %9385 = vset.pattern.permute.xlu1 %v14535_v10  ;;  %v10599_v10 = vpop.f32.mrf.mxu1 }
 0x26b   : > { %v10584_v21 = vpop.permute.xlu0 %2804  ;;  %v10586_v57 = vpop.permute.xlu1 %2089  ;;  %2900 = vperm.xlu1 %9385, %v10517_v23   ;;  %2920 = vperm.xlu0 %9387, %v10536_v30   ;;  %14808 = vst [vmem:[#allocation68_spill] sm:$0xff] %v10599_v10 }
 0x26c   : > { %14804 = vst [vmem:[#allocation65_spill] sm:$0xff] %v10584_v21  ;;  %v10607_v23 = vpop.f32.mrf.mxu1 }
 0x26d   : > { %14810 = vst [vmem:[#allocation70_spill] sm:$0xff] %v10607_v23 }
 0x26e   : > { %v10615_v12 = vpop.f32.mrf.mxu1 }
 0x26f   : > { %v10592_v20 = vpop.permute.xlu0 %2816  ;;  %v10594_v61 = vpop.permute.xlu1 %2101  ;;  %9386 = vset.pattern.permute.xlu1 %v14807_v60  ;;  %2928 = vperm.xlu0 %9387, %v10554_v36   ;;  %14813 = vst [vmem:[#allocation72_spill] sm:$0xff] %v10615_v12 }
 0x270   : > { %14806 = vst [vmem:[#allocation67_spill] sm:$0xff] %v10592_v20  ;;  %2197 = vperm.xlu1 %9386, %v10520_v24   ;;  %v10623_v14 = vpop.f32.mrf.mxu1 }
 0x271   : > { %14815 = vst [vmem:[#allocation74_spill] sm:$0xff] %v10623_v14 }
 0x272   : > { %v10632_v16 = vpop.f32.mrf.mxu1 }
 0x273   : > { %v10601_v22 = vpop.permute.xlu0 %2812  ;;  %v10603_v28 = vpop.permute.xlu1 %2097  ;;  %2936 = vperm.xlu0 %9387, %v10571_v48   ;;  %14817 = vst [vmem:[#allocation76_spill] sm:$0xff] %v10632_v16 }
 0x274   : > { %14809 = vst [vmem:[#allocation69_spill] sm:$0xff] %v10601_v22  ;;  %2193 = vperm.xlu1 %9386, %v10528_v27   ;;  %v10636_v22 = vpop.f32.mrf.mxu1 }
 0x275   : > { %14818 = vst [vmem:[#allocation77_spill] sm:$0xff] %v10636_v22 }
 0x277   : > { %v10609_v25 = vpop.permute.xlu0 %2824  ;;  %v10611_v34 = vpop.permute.xlu1 %2109  ;;  %2944 = vperm.xlu0 %9387, %v10590_v11  }
 0x278   : > { %14811 = vst [vmem:[#allocation71_spill] sm:$0xff] %v10609_v25  ;;  %9388 = vset.pattern.permute.xlu1 %v14812_v31  ;;  %v10647_v25 = vpop.f32.mrf.mxu1 }
 0x279   : > { %2908 = vperm.xlu1 %9388, %v10528_v27   ;;  %14821 = vst [vmem:[#allocation80_spill] sm:$0xff] %v10647_v25 }
 0x27b   : > { %v10618_v43 = vpop.permute.xlu0 %2820  ;;  %v10620_v38 = vpop.permute.xlu1 %2105  ;;  %2952 = vperm.xlu0 %9387, %v10607_v23  }
 0x27c   : > { %14814 = vst [vmem:[#allocation73_spill] sm:$0xff] %v10618_v43 }
 0x27d   : > { %9389 = vset.pattern.permute.xlu1 %v14807_v60 }
 0x27e   : > { %2205 = vperm.xlu1 %9389, %v10536_v30  }
 0x27f   : > { %v10627_v21 = vpop.permute.xlu0 %2832  ;;  %v10629_v51 = vpop.permute.xlu1 %2117  ;;  %2960 = vperm.xlu0 %9387, %v10623_v14  }
 0x280   : > { %14816 = vst [vmem:[#allocation75_spill] sm:$0xff] %v10627_v21 }
 0x282   : > { %2201 = vperm.xlu1 %9389, %v10545_v33  }
 0x283   : > { %2956 = vperm.xlu0 %9387, %v10632_v16   ;;  %v10638_v20 = vpop.permute.xlu0 %2828 }
 0x284   : > { %14819 = vst [vmem:[#allocation78_spill] sm:$0xff] %v10638_v20  ;;  %v10640_v19 = vpop.permute.xlu1 %1651 }
 0x285   : > { %14820 = vst [vmem:[#allocation79_spill] sm:$0xff] %v10640_v19  ;;  %v10656_v19 = vpop.f32.mrf.mxu1 }
 0x286   : > { %9390 = vset.pattern.permute.xlu1 %v14812_v31  ;;  %14823 = vst [vmem:[#allocation82_spill] sm:$0xff] %v10656_v19 }
 0x287   : > { %2916 = vperm.xlu1 %9390, %v10545_v33   ;;  %2968 = vperm.xlu0 %9387, %v10636_v22  }
 0x288   : > { %v10645_v43 = vpop.permute.xlu0 %2125 }
 0x289   : > { %v10649_v21 = vpop.permute.xlu1 %2113  ;;  %v2399_v46 = vmul.f32 %v10645_v43, %v1479_v41 }
 0x28b   : > { %9391 = vset.pattern.permute.xlu1 %v14807_v60  ;;  %2964 = vperm.xlu0 %9387, %v10647_v25  }
 0x28c   : > { %2213 = vperm.xlu1 %9391, %v10554_v36  }
 0x28d   : > { %v10654_v20 = vpop.permute.xlu0 %2836 }
 0x28e   : > { %14822 = vst [vmem:[#allocation81_spill] sm:$0xff] %v10654_v20  ;;  %v10658_v13 = vpop.permute.xlu1 %2840 }
 0x28f   : > { %14824 = vst [vmem:[#allocation83_spill] sm:$0xff] %v10658_v13  ;;  %9400 = vset.pattern.permute.xlu0 %v14807_v60  ;;  %v10673_v13 = vpop.f32.mrf.mxu1 }
 0x290   : > { %2209 = vperm.xlu1 %9391, %v10563_v42   ;;  %2261 = vperm.xlu0 %9400, %v10656_v19   ;;  %14827 = vst [vmem:[#allocation86_spill] sm:$0xff] %v10673_v13 }
 0x292   : > { %v10663_v15 = vpop.permute.xlu0 %1656 }
 0x293   : > { %14825 = vst [vmem:[#allocation84_spill] sm:$0xff] %v10663_v15  ;;  %v10665_v17 = vpop.permute.xlu1 %1661 }
 0x294   : > { %14826 = vst [vmem:[#allocation85_spill] sm:$0xff] %v10665_v17  ;;  %9392 = vset.pattern.permute.xlu1 %v14812_v31  ;;  %9401 = vset.pattern.permute.xlu0 %v14812_v31  ;;  %v10683_v17 = vpop.f32.mrf.mxu1 }
 0x295   : > { %2924 = vperm.xlu1 %9392, %v10563_v42   ;;  %2976 = vperm.xlu0 %9401, %v10656_v19   ;;  %14828 = vst [vmem:[#allocation87_spill] sm:$0xff] %v10683_v17 }
 0x297   : > { %v10671_v20 = vpop.permute.xlu0 %2133 }
 0x298   : > { %v10675_v18 = vpop.permute.xlu1 %2121 }
 0x299   : > { %9393 = vset.pattern.permute.xlu1 %v14807_v60  ;;  %9402 = vset.pattern.permute.xlu0 %v14807_v60 }
 0x29a   : > { %2221 = vperm.xlu1 %9393, %v10571_v48   ;;  %2257 = vperm.xlu0 %9402, %v10673_v13  }
 0x29b   : > { %v10681_v15 = vpop.permute.xlu0 %2129 }
 0x29d   : > { %v10685_v24 = vpop.permute.xlu1 %2848 }
 0x29e   : > { %14829 = vst [vmem:[#allocation88_spill] sm:$0xff] %v10685_v24  ;;  %2217 = vperm.xlu1 %9393, %v10581_v59   ;;  %2269 = vperm.xlu0 %9402, %v10683_v17   ;;  %v10701_v24 = vpop.f32.mrf.mxu1 }
 0x29f   : > { %v10689_v19 = vpop.permute.xlu0 %2141  ;;  %14832 = vst [vmem:[#allocation91_spill] sm:$0xff] %v10701_v24 }
 0x2a0   : > { %v10711_v48 = vpop.f32.mrf.mxu1 }
 0x2a1   : > { %v10691_v30 = vpop.permute.xlu1 %2844  ;;  %14834 = vst [vmem:[#allocation93_spill] sm:$0xff] %v10711_v48 }
 0x2a2   : > { %14830 = vst [vmem:[#allocation89_spill] sm:$0xff] %v10691_v30  ;;  %9394 = vset.pattern.permute.xlu1 %v14812_v31  ;;  %9404 = vset.pattern.permute.xlu0 %v14812_v31  ;;  %v10729_v40 = vpop.f32.mrf.mxu1 }
 0x2a3   : > { %v10695_v27 = vpop.permute.xlu0 %2137  ;;  %2932 = vperm.xlu1 %9394, %v10581_v59   ;;  %2984 = vperm.xlu0 %9404, %v10683_v17   ;;  %14837 = vst [vmem:[#allocation96_spill] sm:$0xff] %v10729_v40 }
 0x2a5   : > { %v10699_v36 = vpop.permute.xlu1 %2856 }
 0x2a6   : > { %14831 = vst [vmem:[#allocation90_spill] sm:$0xff] %v10699_v36 }
 0x2a7   : > { %v10703_v33 = vpop.permute.xlu0 %2149  ;;  %9395 = vset.pattern.permute.xlu1 %v14807_v60  ;;  %9405 = vset.pattern.permute.xlu0 %v14807_v60 }
 0x2a8   : > { %2229 = vperm.xlu1 %9395, %v10590_v11   ;;  %2265 = vperm.xlu0 %9405, %v10701_v24  }
 0x2a9   : > { %v10709_v30 = vpop.permute.xlu1 %2852 }
 0x2aa   : > { %14833 = vst [vmem:[#allocation92_spill] sm:$0xff] %v10709_v30 }
 0x2ab   : > { %v10713_v59 = vpop.permute.xlu0 %2145 }
 0x2ac   : > { %2225 = vperm.xlu1 %9395, %v10599_v10   ;;  %2277 = vperm.xlu0 %9405, %v10711_v48  }
 0x2ad   : > { %v10717_v36 = vpop.permute.xlu1 %2864 }
 0x2ae   : > { %14835 = vst [vmem:[#allocation94_spill] sm:$0xff] %v10717_v36 }
 0x2af   : > { %v10719_v17 = vpop.permute.xlu0 %2157 }
 0x2b0   : > { %9396 = vset.pattern.permute.xlu1 %v14812_v31  ;;  %9406 = vset.pattern.permute.xlu0 %v14812_v31 }
 0x2b1   : > { %v10723_v42 = vpop.permute.xlu1 %2860  ;;  %2940 = vperm.xlu1 %9396, %v10599_v10   ;;  %2992 = vperm.xlu0 %9406, %v10711_v48  }
 0x2b2   : > { %14836 = vst [vmem:[#allocation95_spill] sm:$0xff] %v10723_v42  ;;  %v10739_v42 = vpop.f32.mrf.mxu1 }
 0x2b3   : > { %v10727_v30 = vpop.permute.xlu0 %2153  ;;  %14839 = vst [vmem:[#allocation98_spill] sm:$0xff] %v10739_v42 }
 0x2b5   : > { %v10731_v63 = vpop.permute.xlu1 %2872  ;;  %9397 = vset.pattern.permute.xlu1 %v14807_v60  ;;  %9407 = vset.pattern.permute.xlu0 %v14807_v60 }
 0x2b6   : > { %14838 = vst [vmem:[#allocation97_spill] sm:$0xff] %v10731_v63  ;;  %2237 = vperm.xlu1 %9397, %v10607_v23   ;;  %2273 = vperm.xlu0 %9407, %v10729_v40  }
 0x2b7   : > { %v10737_v36 = vpop.permute.xlu0 %2165 }
 0x2b9   : > { %v10741_v10 = vpop.permute.xlu1 %2868 }
 0x2ba   : > { %14840 = vst [vmem:[#allocation99_spill] sm:$0xff] %v10741_v10  ;;  %2233 = vperm.xlu1 %9397, %v10615_v12   ;;  %2285 = vperm.xlu0 %9407, %v10739_v42   ;;  %v10757_v10 = vpop.f32.mrf.mxu1 }
 0x2bb   : > { %v10745_v48 = vpop.permute.xlu0 %2161  ;;  %14843 = vst [vmem:[#allocation102_spill] sm:$0xff] %v10757_v10 }
 0x2bc   : > { %v10767_v44 = vpop.f32.mrf.mxu1 }
 0x2bd   : > { %v10747_v63 = vpop.permute.xlu1 %2880  ;;  %14845 = vst [vmem:[#allocation104_spill] sm:$0xff] %v10767_v44 }
 0x2be   : > { %14841 = vst [vmem:[#allocation100_spill] sm:$0xff] %v10747_v63  ;;  %9398 = vset.pattern.permute.xlu1 %v14812_v31  ;;  %9408 = vset.pattern.permute.xlu0 %v14812_v31  ;;  %v10784_v23 = vpop.f32.mrf.mxu1 }
 0x2bf   : > { %v10751_v37 = vpop.permute.xlu0 %2173  ;;  %2948 = vperm.xlu1 %9398, %v10615_v12   ;;  %3000 = vperm.xlu0 %9408, %v10739_v42   ;;  %14848 = vst [vmem:[#allocation107_spill] sm:$0xff] %v10784_v23 }
 0x2c1   : > { %v10755_v62 = vpop.permute.xlu1 %2876 }
 0x2c2   : > { %14842 = vst [vmem:[#allocation101_spill] sm:$0xff] %v10755_v62 }
 0x2c3   : > { %v10759_v11 = vpop.permute.xlu0 %2169  ;;  %9399 = vset.pattern.permute.xlu1 %v14807_v60  ;;  %9409 = vset.pattern.permute.xlu0 %v14807_v60 }
 0x2c4   : > { %2245 = vperm.xlu1 %9399, %v10623_v14   ;;  %2281 = vperm.xlu0 %9409, %v10757_v10  }
 0x2c5   : > { %v10765_v63 = vpop.permute.xlu1 %2888 }
 0x2c6   : > { %14844 = vst [vmem:[#allocation103_spill] sm:$0xff] %v10765_v63  ;;  %v1495_v63 = vld [vmem:[%s14513_s4 + $0xf8] sm:$0xff] }
 0x2c7   : > { %v2182_v1 = vpop.permute.xlu0 %2181 }
 0x2c8   : > { %2241 = vperm.xlu1 %9399, %v10632_v16   ;;  %2293 = vperm.xlu0 %9409, %v10767_v44   ;;  %v1492_v16 = vld [vmem:[%s14513_s4 + $0xe0] sm:$0xff] }
 0x2c9   : > { %v10771_v62 = vpop.permute.xlu1 %2884 }
 0x2ca   : > { %14846 = vst [vmem:[#allocation105_spill] sm:$0xff] %v10771_v62 }
 0x2cb   : > { %v2178_v42 = vpop.permute.xlu0 %2177 }
 0x2cc   : > { %2253 = vperm.xlu1 %9399, %v10636_v22   ;;  %9410 = vset.pattern.permute.xlu0 %v14812_v31 }
 0x2cd   : > { %v10775_v12 = vpop.permute.xlu1 %2896  ;;  %3008 = vperm.xlu0 %9410, %v10767_v44   ;;  %v10792_v44 = vpop.f32.mrf.mxu1 }
 0x2ce   : > { %14847 = vst [vmem:[#allocation106_spill] sm:$0xff] %v10775_v12  ;;  %14850 = vst [vmem:[#allocation109_spill] sm:$0xff] %v10792_v44 }
 0x2cf   : > { %v2190_v0 = vpop.permute.xlu0 %2189  ;;  %v10801_v41 = vpop.f32.mrf.mxu1 }
 0x2d0   : > { %v2415_v62 = vmul.f32 %v2190_v0, %v1495_v63  ;;  %2249 = vperm.xlu1 %9399, %v10647_v25   ;;  %14853 = vst [vmem:[#allocation112_spill] sm:$0xff] %v10801_v41 }
 0x2d1   : > { %9411 = vset.pattern.permute.xlu0 %v14807_v60 }
 0x2d2   : > { %v10789_v12 = vpop.permute.xlu1 %1731  ;;  %7836 = vmatprep.subr.mxu0 %v2415_v62  ;;  %2289 = vperm.xlu0 %9411, %v10784_v23  }
 0x2d3   : > { %14849 = vst [vmem:[#allocation108_spill] sm:$0xff] %v10789_v12  ;;  %7837 = vmatpush3.msra.mxu0 %v2399_v46  ;;  %v10807_v46 = vpop.f32.mrf.mxu1 }
 0x2d4   : > { %9403 = vset.pattern.permute.xlu1 %v14812_v31  ;;  %v10795_v3 = vpop.permute.xlu0 %2904  ;;  %14855 = vst [vmem:[#allocation114_spill] sm:$0xff] %v10807_v46 }
 0x2d5   : > { %14851 = vst [vmem:[#allocation110_spill] sm:$0xff] %v10795_v3  ;;  %2972 = vperm.xlu1 %9403, %v10673_v13   ;;  %v10815_v12 = vpop.f32.mrf.mxu1 }
 0x2d6   : > { %2301 = vperm.xlu0 %9411, %v10792_v44   ;;  %14858 = vst [vmem:[#allocation117_spill] sm:$0xff] %v10815_v12 }
 0x2d7   : > { %v10799_v63 = vpop.permute.xlu1 %2892 }
 0x2d8   : > { %14852 = vst [vmem:[#allocation111_spill] sm:$0xff] %v10799_v63  ;;  %v1493_v63 = vld [vmem:[%s14513_s4 + $0xe8] sm:$0xff] }
 0x2d9   : > { %2980 = vperm.xlu1 %9403, %v10701_v24   ;;  %v10804_v62 = vpop.permute.xlu0 %1741  ;;  %v2413_v2 = vmul.f32 %v2182_v1, %v1493_v63  ;;  %v2412_v1 = vmul.f32 %v2178_v42, %v1492_v16  ;;  %v1474_v16 = vld [vmem:[%s14513_s4 + $0x50] sm:$0xff] }
 0x2da   : > { %14854 = vst [vmem:[#allocation113_spill] sm:$0xff] %v10804_v62  ;;  %2297 = vperm.xlu0 %9411, %v10801_v41   ;;  %v1494_v62 = vld [vmem:[%s14513_s4 + $0xf0] sm:$0xff] }
 0x2dc   : > { %v10809_v0 = vpop.permute.xlu1 %1726 }
 0x2dd   : > { %14856 = vst [vmem:[#allocation115_spill] sm:$0xff] %v10809_v0  ;;  %2988 = vperm.xlu1 %9403, %v10729_v40   ;;  %v10812_v43 = vpop.permute.xlu0 %1736  ;;  %v1477_v0 = vld [vmem:[%s14513_s4 + $0x68] sm:$0xff] }
 0x2de   : > { %14857 = vst [vmem:[#allocation116_spill] sm:$0xff] %v10812_v43  ;;  %2309 = vperm.xlu0 %9411, %v10807_v46   ;;  %v1478_v43 = vld [vmem:[%s14513_s4 + $0x70] sm:$0xff] }
 0x2df   : > { %v2398_v40 = vmul.f32 %v10675_v18, %v1478_v43  ;;  %v1475_v18 = vld [vmem:[%s14513_s4 + $0x58] sm:$0xff]  ;;  %v1476_v43 = vld [vmem:[%s14513_s4 + $0x60] sm:$0xff] }
 0x2e0   : > { %v2395_v42 = vmul.f32 %v10611_v34, %v1475_v18  ;;  %v2394_v34 = vmul.f32 %v10620_v38, %v1474_v16  ;;  %v1487_v38 = vld [vmem:[%s14513_s4 + $0xb8] sm:$0xff] }
 0x2e1   : > { %v2186_v3 = vpop.permute.xlu1 %2185  ;;  %2996 = vperm.xlu1 %9403, %v10757_v10   ;;  %v10837_v10 = vpop.f32.mrf.mxu1 }
 0x2e2   : > { %v2414_v13 = vmul.f32 %v2186_v3, %v1494_v62  ;;  %2305 = vperm.xlu0 %9411, %v10815_v12   ;;  %v10831_v24 = vpop.permute.xlu0 %2912  ;;  %14860 = vst [vmem:[#allocation119_spill] sm:$0xff] %v10837_v10  ;;  %v2397_v3 = vmul.f32 %v10629_v51, %v1477_v0  ;;  %v1491_v62 = vld [vmem:[%s14513_s4 + $0xd8] sm:$0xff]  ;;  %v1490_v51 = vld [vmem:[%s14513_s4 + $0xd0] sm:$0xff]  ;;  %v1473_v0 = vld [vmem:[%s14513_s4 + $0x48] sm:$0xff] }
 0x2e3   : > { %14859 = vst [vmem:[#allocation118_spill] sm:$0xff] %v10831_v24  ;;  %v10862_v63 = vpop.f32.mrf.mxu1 }
 0x2e4   : > { %7838 = vmatprep.subr.mxu0 %v2414_v13  ;;  %14864 = vst [vmem:[#allocation122_spill] sm:$0xff] %v10862_v63 }
 0x2e5   : > { %7839 = vmatpush3.msra.mxu0 %v2398_v40  ;;  %3004 = vperm.xlu1 %9403, %v10784_v23   ;;  %v2396_v40 = vmul.f32 %v10649_v21, %v1476_v43  ;;  %v1489_v21 = vld [vmem:[%s14513_s4 + $0xc8] sm:$0xff]  ;;  %v10886_v43 = vpop.f32.mrf.mxu1 }
 0x2e6   : > { %7840 = vmatprep.subr.mxu0 %v2413_v2  ;;  %v10853_v13 = vpop.permute.xlu1 %2900  ;;  %2317 = vperm.xlu0 %9411, %v10837_v10   ;;  %v10856_v45 = vpop.permute.xlu0 %2920  ;;  %v2411_v2 = vmul.f32 %v10751_v37, %v1491_v62  ;;  %v1488_v62 = vld [vmem:[%s14513_s4 + $0xc0] sm:$0xff]  ;;  %14866 = vst [vmem:[#allocation124_spill] sm:$0xff] %v10886_v43 }
 0x2e7   : > { %14862 = vst [vmem:[#allocation120_spill] sm:$0xff] %v10853_v13  ;;  %14863 = vst [vmem:[#allocation121_spill] sm:$0xff] %v10856_v45  ;;  %7841 = vmatpush3.msra.mxu0 %v2397_v3  ;;  %v2410_v3 = vmul.f32 %v10759_v11, %v1490_v51  ;;  %v1472_v11 = vld [vmem:[%s14513_s4 + $0x40] sm:$0xff]  ;;  %v1471_v51 = vld [vmem:[%s14513_s4 + $0x38] sm:$0xff]  ;;  %v2408_v16 = vmul.f32 %v10745_v48, %v1488_v62  ;;  %v2407_v48 = vmul.f32 %v10719_v17, %v1487_v38 }
 0x2e8   : > { %7842 = vmatprep.subr.mxu0 %v2412_v1  ;;  %v2409_v1 = vmul.f32 %v10737_v36, %v1489_v21  ;;  %v1470_v21 = vld [vmem:[%s14513_s4 + $0x30] sm:$0xff] }
 0x2e9   : > { %7843 = vmatpush3.msra.mxu0 %v2396_v40  ;;  %3016 = vperm.xlu1 %9403, %v10792_v44   ;;  %v2393_v40 = vmul.f32 %v10594_v61, %v1473_v0  ;;  %v2392_v61 = vmul.f32 %v10603_v28, %v1472_v11  ;;  %v2391_v0 = vmul.f32 %v10578_v52, %v1471_v51  ;;  %v1485_v28 = vld [vmem:[%s14513_s4 + $0xa8] sm:$0xff]  ;;  %v1484_v11 = vld [vmem:[%s14513_s4 + $0xa0] sm:$0xff] }
 0x2ea   : > { %7844 = vmatprep.subr.mxu0 %v2411_v2  ;;  %2313 = vperm.xlu0 %9411, %v10862_v63   ;;  %v10878_v37 = vpop.permute.xlu0 %2928  ;;  %v1486_v2 = vld [vmem:[%s14513_s4 + $0xb0] sm:$0xff]  ;;  %v2390_v52 = vmul.f32 %v10586_v57, %v1470_v21  ;;  %v1483_v57 = vld [vmem:[%s14513_s4 + $0x98] sm:$0xff] }
 0x2eb   : > { %14865 = vst [vmem:[#allocation123_spill] sm:$0xff] %v10878_v37  ;;  %7845 = vmatpush3.msra.mxu0 %v2395_v42  ;;  %v10884_v18 = vpop.permute.xlu1 %2197  ;;  %v2406_v62 = vmul.f32 %v10727_v30, %v1486_v2  ;;  %v2405_v30 = vmul.f32 %v10703_v33, %v1485_v28  ;;  %v2404_v33 = vmul.f32 %v10713_v59, %v1484_v11  ;;  %v1482_v2 = vld [vmem:[%s14513_s4 + $0x90] sm:$0xff]  ;;  %v1465_v28 = vld [vmem:[%s14513_s4 + $0x8] sm:$0xff]  ;;  %v1464_v11 = vld [vmem:[%s14513_s4] sm:$0xff] }
 0x2ec   : > { %7846 = vmatprep.subr.mxu0 %v2410_v3  ;;  %v10919_v3 = vpop.f32.mrf.mxu1  ;;  %v1466_v21 = vld [vmem:[%s14513_s4 + $0x10] sm:$0xff] }
 0x2ed   : > { %7847 = vmatpush3.msra.mxu0 %v2394_v34  ;;  %3012 = vperm.xlu1 %9403, %v10801_v41   ;;  %14868 = vst [vmem:[#allocation126_spill] sm:$0xff] %v10919_v3  ;;  %v1469_v34 = vld [vmem:[%s14513_s4 + $0x28] sm:$0xff] }
 0x2ee   : > { %7848 = vmatprep.subr.mxu0 %v2409_v1  ;;  %2325 = vperm.xlu0 %9411, %v10886_v43   ;;  %v10902_v36 = vpop.permute.xlu0 %2936  ;;  %v1468_v1 = vld [vmem:[%s14513_s4 + $0x20] sm:$0xff]  ;;  %v2389_v38 = vmul.f32 %v10560_v39, %v1469_v34  ;;  %v10944_v51 = vpop.f32.mrf.mxu1 }
 0x2ef   : > { %14867 = vst [vmem:[#allocation125_spill] sm:$0xff] %v10902_v36  ;;  %7849 = vmatpush3.msra.mxu0 %v2393_v40  ;;  %v10908_v42 = vpop.permute.xlu1 %2193  ;;  %14871 = vst [vmem:[#allocation129_spill] sm:$0xff] %v10944_v51  ;;  %v2388_v39 = vmul.f32 %v10569_v47, %v1468_v1  ;;  %v1481_v47 = vld [vmem:[%s14513_s4 + $0x88] sm:$0xff] }
 0x2f0   : > { %7850 = vmatprep.subr.mxu0 %v2408_v16  ;;  %v1467_v16 = vld [vmem:[%s14513_s4 + $0x18] sm:$0xff]  ;;  %v2401_v1 = vmul.f32 %v10671_v20, %v1481_v47  ;;  %v1554_v47 = vld [vmem:[%s14861_s2 + $0x50] sm:$0xff] }
 0x2f1   : > { %7851 = vmatpush3.msra.mxu0 %v2392_v61  ;;  %3024 = vperm.xlu1 %9403, %v10807_v46   ;;  %v2387_v59 = vmul.f32 %v10541_v32, %v1467_v16  ;;  %v2386_v32 = vmul.f32 %v10550_v35, %v1466_v21 }
 0x2f2   : > { %7852 = vmatprep.subr.mxu0 %v2407_v48  ;;  %9412 = vset.pattern.permute.xlu0 %v14812_v31  ;;  %v10926_v17 = vpop.permute.xlu0 %2944  ;;  %v2403_v48 = vmul.f32 %v10689_v19, %v1483_v57  ;;  %v2402_v19 = vmul.f32 %v10695_v27, %v1482_v2  ;;  %v2385_v27 = vmul.f32 %v10525_v26, %v1465_v28  ;;  %v1544_v26 = vld [vmem:[%s14861_s2] sm:$0xff] }
 0x2f3   : > { %14869 = vst [vmem:[#allocation127_spill] sm:$0xff] %v10926_v17  ;;  %7853 = vmatpush3.msra.mxu0 %v2391_v0  ;;  %3040 = vperm.xlu0 %9412, %v10886_v43   ;;  %v2384_v57 = vmul.f32 %v10533_v29, %v1464_v11  ;;  %v1550_v29 = vld [vmem:[%s14861_s2 + $0x30] sm:$0xff] }
 0x2f4   : > { %7854 = vmatprep.subr.mxu0 %v2406_v62  ;;  %v10937_v40 = vpop.permute.xlu1 %2908  ;;  %v1480_v62 = vld [vmem:[%s14513_s4 + $0x80] sm:$0xff] }
 0x2f5   : > { %14870 = vst [vmem:[#allocation128_spill] sm:$0xff] %v10937_v40  ;;  %7855 = vmatpush3.msra.mxu0 %v2390_v52  ;;  %3020 = vperm.xlu1 %9403, %v10815_v12   ;;  %v10979_v52 = vpop.f32.mrf.mxu1 }
 0x2f6   : > { %7856 = vmatprep.subr.mxu0 %v2405_v30  ;;  %v10950_v61 = vpop.permute.xlu0 %2952  ;;  %14874 = vst [vmem:[#allocation132_spill] sm:$0xff] %v10979_v52  ;;  %v2400_v30 = vmul.f32 %v10681_v15, %v1480_v62  ;;  %v1559_v62 = vld [vmem:[%s14861_s2 + $0x78] sm:$0xff] }
 0x2f7   : > { %14872 = vst [vmem:[#allocation130_spill] sm:$0xff] %v10950_v61  ;;  %7857 = vmatpush3.msra.mxu0 %v2389_v38  ;;  %9414 = vset.pattern.permute.xlu0 %v14807_v60  ;;  %v10995_v20 = vpop.f32.mrf.mxu1 }
 0x2f8   : > { %7858 = vmatprep.subr.mxu0 %v2404_v33  ;;  %2333 = vperm.xlu0 %9414, %v10944_v51   ;;  %14876 = vst [vmem:[#allocation134_spill] sm:$0xff] %v10995_v20 }
 0x2f9   : > { %7859 = vmatpush3.msra.mxu0 %v2388_v39  ;;  %v10966_v0 = vpop.permute.xlu1 %2205  ;;  %3032 = vperm.xlu1 %9403, %v10837_v10   ;;  %v11012_v33 = vpop.f32.mrf.mxu1  ;;  %v1549_v39 = vld [vmem:[%s14861_s2 + $0x28] sm:$0xff] }
 0x2fa   : > { %7860 = vmatprep.subr.mxu0 %v2403_v48  ;;  %v10973_v34 = vpop.permute.xlu0 %2960  ;;  %14879 = vst [vmem:[#allocation137_spill] sm:$0xff] %v11012_v33  ;;  %v1555_v48 = vld [vmem:[%s14861_s2 + $0x58] sm:$0xff] }
 0x2fb   : > { %14873 = vst [vmem:[#allocation131_spill] sm:$0xff] %v10973_v34  ;;  %7861 = vmatpush3.msra.mxu0 %v2387_v59  ;;  %v11027_v59 = vpop.f32.mrf.mxu1 }
 0x2fc   : > { %7862 = vmatprep.subr.mxu0 %v2402_v19  ;;  %9417 = vset.pattern.permute.xlu0 %v14812_v31  ;;  %14881 = vst [vmem:[#allocation139_spill] sm:$0xff] %v11027_v59 }
 0x2fd   : > { %7863 = vmatpush3.msra.mxu0 %v2386_v32  ;;  %v10987_v35 = vpop.permute.xlu1 %2201  ;;  %3028 = vperm.xlu1 %9403, %v10862_v63   ;;  %v1560_v32 = vld [vmem:[%s14861_s2 + $0x80] sm:$0xff]  ;;  %v11046_v11 = vpop.f32.mrf.mxu1 }
 0x2fe   : > { %3044 = vperm.xlu0 %9417, %v10979_v52   ;;  %7864 = vmatprep.subr.mxu0 %v2401_v1  ;;  %v10992_v38 = vpop.permute.xlu0 %2956  ;;  %14882 = vst [vmem:[#allocation140_spill] sm:$0xff] %v11046_v11 }
 0x2ff   : > { %14875 = vst [vmem:[#allocation133_spill] sm:$0xff] %v10992_v38  ;;  %7865 = vmatpush3.msra.mxu0 %v2385_v27 }
 0x300   : > { %7866 = vmatprep.subr.mxu0 %v2400_v30  ;;  %v1565_v30 = vld [vmem:[%s14861_s2 + $0xa8] sm:$0xff] }
 0x301   : > { %7867 = vmatpush3.msra.mxu0 %v2384_v57  ;;  %9413 = vset.pattern.permute.xlu1 %v14807_v60  ;;  %v1564_v57 = vld [vmem:[%s14861_s2 + $0xa0] sm:$0xff] }
 0x302   : > { %9418 = vset.pattern.permute.xlu0 %v14807_v60  ;;  %v11002_v15 = vpop.permute.xlu1 %2916  ;;  %2321 = vperm.xlu1 %9413, %v10919_v3   ;;  %v11005_v16 = vpop.permute.xlu0 %2968 }
 0x303   : > { %14877 = vst [vmem:[#allocation135_spill] sm:$0xff] %v11002_v15  ;;  %14878 = vst [vmem:[#allocation136_spill] sm:$0xff] %v11005_v16  ;;  %2341 = vperm.xlu0 %9418, %v10995_v20   ;;  %2529 = vmatmul.mubr.f32.vlgmr.msra.gmra.mxu0 %v1544_v26  ;;  %v11062_v26 = vpop.f32.mrf.mxu1 }
 0x304   : > { %2533 = vmatprep.mubr.f32.mxu0 %v1550_v29  ;;  %14885 = vst [vmem:[#allocation143_spill] sm:$0xff] %v11062_v26 }
 0x306   : > { %9415 = vset.pattern.permute.xlu1 %v14812_v31  ;;  %v11021_v21 = vpop.permute.xlu0 %2964 }
 0x307   : > { %9419 = vset.pattern.permute.xlu0 %v14812_v31  ;;  %v11018_v2 = vpop.permute.xlu1 %2213  ;;  %3048 = vperm.xlu1 %9415, %v10944_v51   ;;  %14880 = vst [vmem:[#allocation138_spill] sm:$0xff] %v11021_v21  ;;  %v14898_v21 = vmov 8  }
 0x308   : > { %3056 = vperm.xlu0 %9419, %v10995_v20   ;;  %2534 = vmatmul.mubr.f32.gmra.mxu0 %v1549_v39 }
 0x309   : > { %2538 = vmatprep.mubr.f32.mxu0 %v1555_v48  ;;  %v1570_v48 = vld [vmem:[%s14861_s2 + $0xd0] sm:$0xff] }
 0x30b   : > { %v11032_v28 = vpop.permute.xlu1 %2209  ;;  %9416 = vset.pattern.permute.xlu1 %v14807_v60  ;;  %v11035_v19 = vpop.permute.xlu0 %2261 }
 0x30c   : > { %9421 = vset.pattern.permute.xlu0 %v14807_v60  ;;  %2329 = vperm.xlu1 %9416, %v10979_v52  }
 0x30d   : > { %2349 = vperm.xlu0 %9421, %v11027_v59   ;;  %2539 = vmatmul.mubr.f32.gmra.mxu0 %v1554_v47  ;;  %v1569_v47 = vld [vmem:[%s14861_s2 + $0xc8] sm:$0xff] }
 0x30e   : > { %2543 = vmatprep.mubr.f32.mxu0 %v1560_v32  ;;  %v11077_v32 = vpop.f32.mrf.mxu1 }
 0x30f   : > { %14886 = vst [vmem:[#allocation144_spill] sm:$0xff] %v11077_v32 }
 0x310   : > { %v11048_v1 = vpop.permute.xlu1 %2924  ;;  %2337 = vperm.xlu1 %9416, %v11012_v33   ;;  %v11051_v27 = vpop.permute.xlu0 %2976 }
 0x311   : > { %14883 = vst [vmem:[#allocation141_spill] sm:$0xff] %v11048_v1  ;;  %14884 = vst [vmem:[#allocation142_spill] sm:$0xff] %v11051_v27  ;;  %9422 = vset.pattern.permute.xlu0 %v14812_v31  ;;  %2544 = vmatmul.mubr.f32.gmra.mxu0 %v1559_v62  ;;  %v11093_v40 = vpop.f32.mrf.mxu1  ;;  %v1579_v27 = vld [vmem:[%s14861_s2 + $0x118] sm:$0xff] }
 0x312   : > { %3064 = vperm.xlu0 %9422, %v11027_v59   ;;  %2548 = vmatprep.mubr.f32.mxu0 %v1565_v30  ;;  %14887 = vst [vmem:[#allocation145_spill] sm:$0xff] %v11093_v40 }
 0x313   : > { %v11118_v45 = vpop.f32.mrf.mxu1 }
 0x314   : > { %9420 = vset.pattern.permute.xlu1 %v14812_v31  ;;  %14890 = vst [vmem:[#allocation148_spill] sm:$0xff] %v11118_v45 }
 0x315   : > { %v11064_v29 = vpop.permute.xlu1 %2221  ;;  %3052 = vperm.xlu1 %9420, %v11012_v33   ;;  %v11067_v39 = vpop.permute.xlu0 %2257  ;;  %2549 = vmatmul.mubr.f32.gmra.mxu0 %v1564_v57  ;;  %v1575_v57 = vld [vmem:[%s14861_s2 + $0xf8] sm:$0xff] }
 0x316   : > { %9425 = vset.pattern.permute.xlu0 %v14807_v60  ;;  %2553 = vmatprep.mubr.f32.mxu0 %v1570_v48  ;;  %v1574_v48 = vld [vmem:[%s14861_s2 + $0xf0] sm:$0xff] }
 0x317   : > { %2357 = vperm.xlu0 %9425, %v11062_v26  }
 0x319   : > { %v11079_v62 = vpop.permute.xlu1 %2217  ;;  %9423 = vset.pattern.permute.xlu1 %v14807_v60  ;;  %v11082_v30 = vpop.permute.xlu0 %2269  ;;  %2554 = vmatmul.mubr.f32.gmra.mxu0 %v1569_v47  ;;  %v1580_v47 = vld [vmem:[%s14861_s2 + $0x120] sm:$0xff] }
 0x31a   : > { %2345 = vperm.xlu1 %9423, %v11046_v11   ;;  %2558 = vmatprep.mubr.f32.mxu0 %v1575_v57 }
 0x31b   : > { %9426 = vset.pattern.permute.xlu0 %v14812_v31 }
 0x31c   : > { %3072 = vperm.xlu0 %9426, %v11062_v26  }
 0x31d   : > { %2559 = vmatmul.mubr.f32.gmra.mxu0 %v1574_v48  ;;  %v1547_v48 = vld [vmem:[%s14861_s2 + $0x18] sm:$0xff] }
 0x31e   : > { %v11098_v24 = vpop.permute.xlu1 %2932  ;;  %9424 = vset.pattern.permute.xlu1 %v14812_v31  ;;  %v11101_v57 = vpop.permute.xlu0 %2984  ;;  %2563 = vmatprep.mubr.f32.mxu0 %v1580_v47 }
 0x31f   : > { %14888 = vst [vmem:[#allocation146_spill] sm:$0xff] %v11098_v24  ;;  %14889 = vst [vmem:[#allocation147_spill] sm:$0xff] %v11101_v57  ;;  %3060 = vperm.xlu1 %9424, %v11046_v11  }
 0x320   : > { %9429 = vset.pattern.permute.xlu0 %v14807_v60 }
 0x321   : > { %2365 = vperm.xlu0 %9429, %v11093_v40   ;;  %2564 = vmatmul.mubr.f32.gmra.mxu0 %v1579_v27 }
 0x322   : > { %2633 = vmatprep.mubr.f32.mxu0 %v1547_v48  ;;  %v11127_v48 = vpop.f32.mrf.mxu1 }
 0x323   : > { %v11112_v15 = vpop.permute.xlu1 %2229  ;;  %9427 = vset.pattern.permute.xlu1 %v14807_v60  ;;  %v11115_v47 = vpop.permute.xlu0 %2265  ;;  %14891 = vst [vmem:[#allocation149_spill] sm:$0xff] %v11127_v48 }
 0x324   : > { %2353 = vperm.xlu1 %9427, %v11077_v32   ;;  %v11138_v24 = vpop.f32.mrf.mxu1 }
 0x325   : > { %9430 = vset.pattern.permute.xlu0 %v14812_v31  ;;  %14894 = vst [vmem:[#allocation152_spill] sm:$0xff] %v11138_v24 }
 0x326   : > { %3080 = vperm.xlu0 %9430, %v11093_v40   ;;  %v11147_v61 = vpop.f32.mrf.mxu1 }
 0x327   : > { %v11122_v27 = vpop.permute.xlu1 %2225  ;;  %v11124_v57 = vpop.permute.xlu0 %2277  ;;  %14895 = vst [vmem:[#allocation153_spill] sm:$0xff] %v11147_v61 }
 0x328   : > { %9428 = vset.pattern.permute.xlu1 %v14812_v31  ;;  %v11170_v13 = vpop.f32.mrf.mxu1 }
 0x329   : > { %3068 = vperm.xlu1 %9428, %v11077_v32   ;;  %14899 = vst [vmem:[#allocation156_spill] sm:$0xff] %v11170_v13 }
 0x32a   : > { %9433 = vset.pattern.permute.xlu0 %v14807_v60 }
 0x32b   : > { %2373 = vperm.xlu0 %9433, %v11127_v48  }
 0x32c   : > { %v11132_v1 = vpop.permute.xlu1 %2940  ;;  %v11134_v37 = vpop.permute.xlu0 %2992 }
 0x32d   : > { %14892 = vst [vmem:[#allocation150_spill] sm:$0xff] %v11132_v1  ;;  %14893 = vst [vmem:[#allocation151_spill] sm:$0xff] %v11134_v37  ;;  %9431 = vset.pattern.permute.xlu1 %v14807_v60 }
 0x32e   : > { %2361 = vperm.xlu1 %9431, %v11118_v45  }
 0x32f   : > { %9434 = vset.pattern.permute.xlu0 %v14812_v31 }
 0x330   : > { %3088 = vperm.xlu0 %9434, %v11127_v48  }
 0x331   : > { %v11142_v36 = vpop.permute.xlu1 %2237  ;;  %v11144_v17 = vpop.permute.xlu0 %2273 }
 0x332   : > { %9432 = vset.pattern.permute.xlu1 %v14812_v31 }
 0x333   : > { %3076 = vperm.xlu1 %9432, %v11118_v45  }
 0x334   : > { %9437 = vset.pattern.permute.xlu0 %v14807_v60 }
 0x335   : > { %2381 = vperm.xlu0 %9437, %v11147_v61   ;;  %v11152_v37 = vpop.permute.xlu1 %2233  ;;  %v11154_v1 = vpop.permute.xlu0 %2285 }
 0x337   : > { %9435 = vset.pattern.permute.xlu1 %v14807_v60 }
 0x338   : > { %2369 = vperm.xlu1 %9435, %v11138_v24  }
 0x339   : > { %9438 = vset.pattern.permute.xlu0 %v14812_v31 }
 0x33a   : > { %3096 = vperm.xlu0 %9438, %v11147_v61   ;;  %v11160_v38 = vpop.permute.xlu1 %2948  ;;  %v11162_v34 = vpop.permute.xlu0 %3000 }
 0x33b   : > { %14896 = vst [vmem:[#allocation154_spill] sm:$0xff] %v11160_v38  ;;  %14897 = vst [vmem:[#allocation155_spill] sm:$0xff] %v11162_v34 }
 0x33c   : > { %9436 = vset.pattern.permute.xlu1 %v14812_v31 }
 0x33d   : > { %3084 = vperm.xlu1 %9436, %v11138_v24  }
 0x33e   : > { %9441 = vset.pattern.permute.xlu0 %v14898_v21 }
 0x33f   : > { %1721 = vperm.xlu0 %9441, %v10502_v8   ;;  %v2246_v16 = vpop.permute.xlu1 %2245  ;;  %v11168_v52 = vpop.permute.xlu0 %2281 }
 0x341   : > { %9439 = vset.pattern.permute.xlu1 %v14807_v60 }
 0x342   : > { %2377 = vperm.xlu1 %9439, %v11170_v13  }
 0x343   : > { %1716 = vperm.xlu0 %9441, %v10505_v9   ;;  %v11175_v34 = vpop.permute.xlu1 %2241  ;;  %v11177_v38 = vpop.permute.xlu0 %2293 }
 0x346   : > { %9440 = vset.pattern.permute.xlu1 %v14898_v21 }
 0x347   : > { %1636 = vperm.xlu0 %9441, %v10431_v56   ;;  %v2254_v8 = vpop.permute.xlu1 %2253  ;;  %1646 = vperm.xlu1 %9440, %v10439_v58  }
 0x348   : > { %v11182_v33 = vpop.permute.xlu0 %3008 }
 0x349   : > { %14900 = vst [vmem:[#allocation157_spill] sm:$0xff] %v11182_v33 }
 0x34b   : > { %1711 = vperm.xlu0 %9441, %v10494_v6   ;;  %v2250_v60 = vpop.permute.xlu1 %2249  ;;  %9442 = vset.pattern.permute.xlu1 %v14812_v31 }
 0x34c   : > { %3036 = vperm.xlu1 %9442, %v10919_v3  }
 0x34d   : > { %v11187_v9 = vpop.permute.xlu0 %2289 }
 0x34f   : > { %1631 = vperm.xlu0 %9441, %v10419_v53  }
 0x350   : > { %v11190_v11 = vpop.permute.xlu1 %2972  ;;  %9443 = vset.pattern.permute.xlu1 %v14898_v21 }
 0x351   : > { %14901 = vst [vmem:[#allocation158_spill] sm:$0xff] %v11190_v11  ;;  %v2302_v56 = vpop.permute.xlu0 %2301  ;;  %1641 = vperm.xlu1 %9443, %v10427_v55   ;;  %v11232_v55 = vld [vmem:[%s14513_s4 + $0x1f0] sm:$0xff] }
 0x353   : > { %1706 = vperm.xlu0 %9441, %v10498_v7   ;;  %v11209_v7 = vld [vmem:[%s14861_s2 + $0x20] sm:$0xff] }
 0x354   : > { %v11195_v58 = vpop.permute.xlu1 %2980  ;;  %8828 = vmatprep.mubr.f32.mxu1 %v11209_v7 }
 0x355   : > { %14902 = vst [vmem:[#allocation159_spill] sm:$0xff] %v11195_v58  ;;  %v2298_v6 = vpop.permute.xlu0 %2297  ;;  %1901 = vperm.xlu1 %9443, %v10837_v10   ;;  %v11215_v10 = vld [vmem:[%s14513_s4 + $0x1f8] sm:$0xff] }
 0x357   : > { %1626 = vperm.xlu0 %9441, %v10423_v54  }
 0x358   : > { %v11199_v33 = vpop.permute.xlu1 %2988 }
 0x359   : > { %14903 = vst [vmem:[#allocation160_spill] sm:$0xff] %v11199_v33  ;;  %v2310_v3 = vpop.permute.xlu0 %2309  ;;  %1821 = vperm.xlu1 %9443, %v10636_v22  }
 0x35b   : > { %1701 = vperm.xlu0 %9441, %v10486_v4  }
 0x35c   : > { %v11203_v53 = vpop.permute.xlu1 %2996 }
 0x35d   : > { %14904 = vst [vmem:[#allocation161_spill] sm:$0xff] %v11203_v53  ;;  %v2306_v11 = vpop.permute.xlu0 %2305  ;;  %1896 = vperm.xlu1 %9443, %v10862_v63   ;;  %v11224_v63 = vld [vmem:[%s14513_s4 + $0x178] sm:$0xff] }
 0x35f   : > { %1621 = vperm.xlu0 %9441, %v10403_v49   ;;  %v2431_v49 = vmul.f32 %v2254_v8, %v11224_v63 }
 0x360   : > { %v11218_v22 = vpop.permute.xlu1 %3004 }
 0x361   : > { %14905 = vst [vmem:[#allocation162_spill] sm:$0xff] %v11218_v22  ;;  %v2318_v4 = vpop.permute.xlu0 %2317  ;;  %1816 = vperm.xlu1 %9443, %v10647_v25   ;;  %v11239_v25 = vld [vmem:[%s14513_s4 + $0x1e8] sm:$0xff] }
 0x362   : > { %v2447_v54 = vmul.f32 %v2318_v4, %v11215_v10  ;;  %v11245_v4 = vld [vmem:[%s14513_s4 + $0x170] sm:$0xff] }
 0x363   : > { %1696 = vperm.xlu0 %9441, %v10490_v5   ;;  %v2430_v5 = vmul.f32 %v2250_v60, %v11245_v4  ;;  %v11267_v60 = vld [vmem:[%s14513_s4 + $0x1d8] sm:$0xff] }
 0x364   : > { %v11234_v58 = vpop.permute.xlu1 %3016  ;;  %7892 = vmatprep.subr.mxu0 %v2447_v54  ;;  %v11252_v54 = vld [vmem:[%s14513_s4 + $0x1e0] sm:$0xff] }
 0x365   : > { %14906 = vst [vmem:[#allocation163_spill] sm:$0xff] %v11234_v58  ;;  %7893 = vmatpush3.msra.mxu0 %v2431_v49  ;;  %v2314_v33 = vpop.permute.xlu0 %2313  ;;  %1891 = vperm.xlu1 %9443, %v10807_v46   ;;  %v11258_v49 = vld [vmem:[%s14513_s4 + $0x168] sm:$0xff]  ;;  %v2445_v46 = vmul.f32 %v2310_v3, %v11239_v25  ;;  %v2444_v3 = vmul.f32 %v2306_v11, %v11252_v54 }
 0x366   : > { %v2446_v8 = vmul.f32 %v2314_v33, %v11232_v55  ;;  %v2429_v33 = vmul.f32 %v2246_v16, %v11258_v49 }
 0x367   : > { %1616 = vperm.xlu0 %9441, %v10407_v50   ;;  %v11273_v50 = vld [vmem:[%s14513_s4 + $0x160] sm:$0xff] }
 0x368   : > { %v11261_v53 = vpop.permute.xlu1 %3012  ;;  %7894 = vmatprep.subr.mxu0 %v2446_v8  ;;  %v2428_v16 = vmul.f32 %v11175_v34, %v11273_v50  ;;  %v11283_v8 = vld [vmem:[%s14513_s4 + $0x1d0] sm:$0xff]  ;;  %v2443_v34 = vmul.f32 %v2302_v56, %v11267_v60 }
 0x369   : > { %14907 = vst [vmem:[#allocation164_spill] sm:$0xff] %v11261_v53  ;;  %7895 = vmatpush3.msra.mxu0 %v2430_v5  ;;  %1811 = vperm.xlu1 %9443, %v10623_v14   ;;  %v11276_v22 = vpop.permute.xlu0 %2325  ;;  %v14908_v5 = vld [vmem:[#allocation38_spill] sm:$0xff]  ;;  %v11289_v14 = vld [vmem:[%s14513_s4 + $0x158] sm:$0xff] }
 0x36a   : > { %7896 = vmatprep.subr.mxu0 %v2445_v46  ;;  %v11294_v46 = vld [vmem:[%s14513_s4 + $0x150] sm:$0xff]  ;;  %v2427_v53 = vmul.f32 %v11142_v36, %v11289_v14  ;;  %v11315_v36 = vld [vmem:[%s14513_s4 + $0x1c0] sm:$0xff] }
 0x36b   : > { %1691 = vperm.xlu0 %9441, %v14908_v5   ;;  %7897 = vmatpush3.msra.mxu0 %v2429_v33  ;;  %v11304_v33 = vld [vmem:[%s14513_s4 + $0x1c8] sm:$0xff]  ;;  %v2442_v5 = vmul.f32 %v2298_v6, %v11283_v8  ;;  %v2426_v56 = vmul.f32 %v11152_v37, %v11294_v46  ;;  %v11326_v6 = vld [vmem:[%s14513_s4 + $0x140] sm:$0xff] }
 0x36c   : > { %v11297_v11 = vpop.permute.xlu1 %3024  ;;  %7898 = vmatprep.subr.mxu0 %v2444_v3  ;;  %v14910_v3 = vld [vmem:[#allocation22_spill] sm:$0xff]  ;;  %v2441_v37 = vmul.f32 %v11177_v38, %v11304_v33  ;;  %v2424_v38 = vmul.f32 %v11122_v27, %v11326_v6 }
 0x36d   : > { %7899 = vmatpush3.msra.mxu0 %v2428_v16  ;;  %1886 = vperm.xlu1 %9443, %v10815_v12   ;;  %v11321_v16 = vld [vmem:[%s14513_s4 + $0x148] sm:$0xff] }
 0x36e   : > { %7900 = vmatprep.subr.mxu0 %v2443_v34  ;;  %v11308_v58 = vpop.permute.xlu0 %3040  ;;  %14911 = vst [vmem:[#allocation166_spill] sm:$0xff] %v11321_v16  ;;  %v2425_v12 = vmul.f32 %v11112_v15, %v11321_v16  ;;  %v14914_v15 = vld [vmem:[#allocation39_spill] sm:$0xff] }
 0x36f   : > { %14909 = vst [vmem:[#allocation165_spill] sm:$0xff] %v11308_v58  ;;  %1611 = vperm.xlu0 %9441, %v14910_v3   ;;  %7901 = vmatpush3.msra.mxu0 %v2427_v53  ;;  %v11337_v53 = vld [vmem:[%s14513_s4 + $0x1b8] sm:$0xff]  ;;  %v2440_v58 = vmul.f32 %v11187_v9, %v11315_v36  ;;  %v11360_v9 = vld [vmem:[%s14513_s4 + $0x130] sm:$0xff] }
 0x370   : > { %v11330_v34 = vpop.permute.xlu1 %3020  ;;  %7902 = vmatprep.subr.mxu0 %v2442_v5  ;;  %v14912_v3 = vld [vmem:[#allocation76_spill] sm:$0xff]  ;;  %v11347_v5 = vld [vmem:[%s14513_s4 + $0x1b0] sm:$0xff]  ;;  %14915 = vst [vmem:[#allocation168_spill] sm:$0xff] %v11360_v9  ;;  %v2439_v27 = vmul.f32 %v11154_v1, %v11337_v53  ;;  %v2422_v1 = vmul.f32 %v11079_v62, %v11360_v9 }
 0x371   : > { %7903 = vmatpush3.msra.mxu0 %v2426_v56  ;;  %1806 = vperm.xlu1 %9443, %v14912_v3   ;;  %14913 = vst [vmem:[#allocation167_spill] sm:$0xff] %v11347_v5  ;;  %v11355_v56 = vld [vmem:[%s14513_s4 + $0x138] sm:$0xff]  ;;  %v11371_v3 = vld [vmem:[%s14513_s4 + $0x1a8] sm:$0xff] }
 0x372   : > { %7904 = vmatprep.subr.mxu0 %v2441_v37  ;;  %v2437_v62 = vmul.f32 %v11124_v57, %v11371_v3 }
 0x373   : > { %1686 = vperm.xlu0 %9441, %v14914_v15   ;;  %7905 = vmatpush3.msra.mxu0 %v2425_v12  ;;  %v11350_v16 = vpop.permute.xlu0 %2333  ;;  %v2423_v12 = vmul.f32 %v11064_v29, %v11355_v56  ;;  %v2438_v15 = vmul.f32 %v11168_v52, %v11347_v5  ;;  %v14916_v29 = vld [vmem:[#allocation23_spill] sm:$0xff]  ;;  %v11392_v52 = vld [vmem:[%s14513_s4 + $0x120] sm:$0xff] }
 0x374   : > { %v11364_v37 = vpop.permute.xlu1 %3032  ;;  %7906 = vmatprep.subr.mxu0 %v2440_v58  ;;  %v11381_v58 = vld [vmem:[%s14513_s4 + $0x1a0] sm:$0xff]  ;;  %v2420_v57 = vmul.f32 %v11032_v28, %v11392_v52 }
 0x375   : > { %7907 = vmatpush3.msra.mxu0 %v2424_v38  ;;  %1881 = vperm.xlu1 %9443, %v10792_v44   ;;  %v11387_v38 = vld [vmem:[%s14513_s4 + $0x128] sm:$0xff]  ;;  %v2436_v5 = vmul.f32 %v11144_v17, %v11381_v58  ;;  %v11426_v17 = vld [vmem:[%s14513_s4 + $0x110] sm:$0xff] }
 0x376   : > { %7908 = vmatprep.subr.mxu0 %v2439_v27  ;;  %v2421_v44 = vmul.f32 %v11018_v2, %v11387_v38  ;;  %v11415_v2 = vld [vmem:[%s14513_s4 + $0x190] sm:$0xff]  ;;  %14922 = vst [vmem:[#allocation172_spill] sm:$0xff] %v11426_v17 }
 0x377   : > { %1606 = vperm.xlu0 %9441, %v14916_v29   ;;  %7909 = vmatpush3.msra.mxu0 %v2423_v12  ;;  %v11403_v12 = vld [vmem:[%s14513_s4 + $0x198] sm:$0xff]  ;;  %v14917_v29 = vld [vmem:[#allocation70_spill] sm:$0xff]  ;;  %14919 = vst [vmem:[#allocation170_spill] sm:$0xff] %v11415_v2 }
 0x378   : > { %v11396_v27 = vpop.permute.xlu1 %3028  ;;  %7910 = vmatprep.subr.mxu0 %v2438_v15  ;;  %v14920_v15 = vld [vmem:[#allocation36_spill] sm:$0xff]  ;;  %v2435_v28 = vmul.f32 %v11082_v30, %v11403_v12  ;;  %v2434_v30 = vmul.f32 %v11115_v47, %v11415_v2  ;;  %v14930_v2 = vld [vmem:[#allocation37_spill] sm:$0xff] }
 0x379   : > { %7911 = vmatpush3.msra.mxu0 %v2422_v1  ;;  %1801 = vperm.xlu1 %9443, %v14917_v29   ;;  %v11406_v9 = vpop.permute.xlu0 %3044  ;;  %v11421_v1 = vld [vmem:[%s14513_s4 + $0x118] sm:$0xff] }
 0x37a   : > { %14918 = vst [vmem:[#allocation169_spill] sm:$0xff] %v11406_v9  ;;  %7912 = vmatprep.subr.mxu0 %v2437_v62  ;;  %14921 = vst [vmem:[#allocation171_spill] sm:$0xff] %v11421_v1  ;;  %v2419_v62 = vmul.f32 %v10966_v0, %v11421_v1  ;;  %v11460_v9 = vld [vmem:[%s14513_s4 + $0x100] sm:$0xff] }
 0x37b   : > { %1681 = vperm.xlu0 %9441, %v14920_v15   ;;  %7913 = vmatpush3.msra.mxu0 %v2421_v44  ;;  %v11435_v44 = vld [vmem:[%s14513_s4 + $0x188] sm:$0xff]  ;;  %14927 = vst [vmem:[#allocation176_spill] sm:$0xff] %v11460_v9 }
 0x37c   : > { %7914 = vmatprep.subr.mxu0 %v2436_v5  ;;  %14923 = vst [vmem:[#allocation173_spill] sm:$0xff] %v11435_v44  ;;  %v11443_v15 = vld [vmem:[%s14513_s4 + $0x108] sm:$0xff]  ;;  %v2418_v5 = vmul.f32 %v10987_v35, %v11426_v17  ;;  %v2433_v47 = vmul.f32 %v11035_v19, %v11435_v44  ;;  %v11477_v19 = vld [vmem:[%s14861_s2 + $0x10] sm:$0xff] }
 0x37d   : > { %7915 = vmatpush3.msra.mxu0 %v2420_v57  ;;  %v11437_v29 = vpop.permute.xlu1 %2321  ;;  %1876 = vperm.xlu1 %9443, %v10801_v41   ;;  %14924 = vst [vmem:[#allocation174_spill] sm:$0xff] %v11443_v15  ;;  %v11454_v57 = vld [vmem:[%s14513_s4 + $0x180] sm:$0xff]  ;;  %v14926_v41 = vld [vmem:[#allocation20_spill] sm:$0xff]  ;;  %v2417_v35 = vmul.f32 %v10884_v18, %v11443_v15  ;;  %14931 = vst [vmem:[#allocation178_spill] sm:$0xff] %v11477_v19 }
 0x37e   : > { %7916 = vmatprep.subr.mxu0 %v2435_v28  ;;  %v11447_v0 = vpop.permute.xlu0 %2341  ;;  %14925 = vst [vmem:[#allocation175_spill] sm:$0xff] %v11454_v57  ;;  %v14928_v28 = vld [vmem:[#allocation72_spill] sm:$0xff]  ;;  %v2432_v17 = vmul.f32 %v11067_v39, %v11454_v57  ;;  %v11484_v39 = vld [vmem:[%s14861_s2 + $0x40] sm:$0xff] }
 0x37f   : > { %1601 = vperm.xlu0 %9441, %v14926_v41   ;;  %7917 = vmatpush3.msra.mxu0 %v2419_v62  ;;  %v2416_v41 = vmul.f32 %v10908_v42, %v11460_v9  ;;  %14933 = vst [vmem:[#allocation180_spill] sm:$0xff] %v11484_v39  ;;  %v14935_v42 = vld [vmem:[#allocation21_spill] sm:$0xff]  ;;  %v14966_v9 = vld [vmem:[#allocation56_spill] sm:$0xff] }
 0x380   : > { %7918 = vmatprep.subr.mxu0 %v2434_v30  ;;  %v14934_v30 = vld [vmem:[#allocation104_spill] sm:$0xff] }
 0x381   : > { %7919 = vmatpush3.msra.mxu0 %v2418_v5  ;;  %1796 = vperm.xlu1 %9443, %v14928_v28   ;;  %v14967_v57 = vld [vmem:[#allocation64_spill] sm:$0xff] }
 0x382   : > { %7920 = vmatprep.subr.mxu0 %v2433_v47  ;;  %v11469_v62 = vpop.permute.xlu1 %3048 }
 0x383   : > { %14929 = vst [vmem:[#allocation177_spill] sm:$0xff] %v11469_v62  ;;  %1676 = vperm.xlu0 %9441, %v14930_v2   ;;  %7921 = vmatpush3.msra.mxu0 %v2417_v35  ;;  %v11479_v18 = vpop.permute.xlu0 %3056  ;;  %v14938_v35 = vld [vmem:[#allocation66_spill] sm:$0xff]  ;;  %v11518_v2 = vld [vmem:[%s14861_s2 + $0x90] sm:$0xff]  ;;  %v11566_v62 = vld [vmem:[%s14861_s2 + $0xd8] sm:$0xff] }
 0x384   : > { %7922 = vmatprep.subr.mxu0 %v2432_v17  ;;  %14932 = vst [vmem:[#allocation179_spill] sm:$0xff] %v11479_v18  ;;  %v11495_v17 = vld [vmem:[%s14861_s2 + $0x38] sm:$0xff]  ;;  %14941 = vst [vmem:[#allocation184_spill] sm:$0xff] %v11518_v2  ;;  %v11600_v18 = vld [vmem:[%s14861_s2 + $0x128] sm:$0xff] }
 0x385   : > { %7923 = vmatpush3.msra.mxu0 %v2416_v41  ;;  %1871 = vperm.xlu1 %9443, %v14934_v30   ;;  %14936 = vst [vmem:[#allocation181_spill] sm:$0xff] %v11495_v17  ;;  %v11502_v41 = vld [vmem:[%s14861_s2 + $0x68] sm:$0xff]  ;;  %14953 = vst [vmem:[#allocation192_spill] sm:$0xff] %v11566_v62 }
 0x386   : > { %2634 = vmatmul.mubr.f32.vlgmr.msra.gmra.mxu0 %v11477_v19  ;;  %14937 = vst [vmem:[#allocation182_spill] sm:$0xff] %v11502_v41  ;;  %v14939_v30 = vld [vmem:[#allocation34_spill] sm:$0xff]  ;;  %14962 = vst [vmem:[#allocation197_spill] sm:$0xff] %v11600_v18 }
 0x387   : > { %1596 = vperm.xlu0 %9441, %v14935_v42   ;;  %v11489_v5 = vpop.permute.xlu1 %2329  ;;  %2638 = vmatprep.mubr.f32.mxu0 %v11484_v39  ;;  %v11513_v42 = vld [vmem:[%s14861_s2 + $0x60] sm:$0xff] }
 0x388   : > { %v11497_v47 = vpop.permute.xlu0 %2349  ;;  %14940 = vst [vmem:[#allocation183_spill] sm:$0xff] %v11513_v42 }
 0x389   : > { %1791 = vperm.xlu1 %9443, %v14938_v35  }
 0x38a   : > { %2639 = vmatmul.mubr.f32.gmra.mxu0 %v11495_v17 }
 0x38b   : > { %1671 = vperm.xlu0 %9441, %v14939_v30   ;;  %v11507_v28 = vpop.permute.xlu1 %2337  ;;  %2643 = vmatprep.mubr.f32.mxu0 %v11502_v41  ;;  %v14943_v30 = vld [vmem:[#allocation18_spill] sm:$0xff] }
 0x38c   : > { %v11530_v41 = vld [vmem:[%s14861_s2 + $0x88] sm:$0xff] }
 0x38d   : > { %9444 = vset.pattern.permute.xlu1 %v14812_v31  ;;  %v11522_v35 = vpop.permute.xlu0 %3064  ;;  %14944 = vst [vmem:[#allocation186_spill] sm:$0xff] %v11530_v41  ;;  %v11537_v31 = vld [vmem:[%s14861_s2 + $0xb8] sm:$0xff] }
 0x38e   : > { %3092 = vperm.xlu1 %9444, %v11170_v13   ;;  %14942 = vst [vmem:[#allocation185_spill] sm:$0xff] %v11522_v35  ;;  %2644 = vmatmul.mubr.f32.gmra.mxu0 %v11513_v42  ;;  %14946 = vst [vmem:[#allocation188_spill] sm:$0xff] %v11537_v31 }
 0x38f   : > { %1591 = vperm.xlu0 %9441, %v14943_v30   ;;  %2648 = vmatprep.mubr.f32.mxu0 %v11518_v2  ;;  %v14947_v30 = vld [vmem:[#allocation35_spill] sm:$0xff] }
 0x390   : > { %v11532_v17 = vpop.permute.xlu1 %3052  ;;  %v11548_v2 = vld [vmem:[%s14861_s2 + $0xb0] sm:$0xff] }
 0x391   : > { %14945 = vst [vmem:[#allocation187_spill] sm:$0xff] %v11532_v17  ;;  %14948 = vst [vmem:[#allocation189_spill] sm:$0xff] %v11548_v2 }
 0x392   : > { %9445 = vset.pattern.permute.xlu1 %v14898_v21  ;;  %v11540_v39 = vpop.permute.xlu0 %2357  ;;  %2649 = vmatmul.mubr.f32.gmra.mxu0 %v11530_v41  ;;  %v11556_v21 = vld [vmem:[%s14861_s2 + $0xe0] sm:$0xff]  ;;  %v14950_v41 = vld [vmem:[#allocation19_spill] sm:$0xff] }
 0x393   : > { %1666 = vperm.xlu0 %9441, %v14947_v30   ;;  %1866 = vperm.xlu1 %9445, %v10784_v23   ;;  %14949 = vst [vmem:[#allocation190_spill] sm:$0xff] %v11556_v21  ;;  %v14951_v30 = vld [vmem:[#allocation68_spill] sm:$0xff] }
 0x394   : > { %2653 = vmatprep.mubr.f32.mxu0 %v11537_v31  ;;  %v11572_v31 = vld [vmem:[%s14861_s2 + $0x108] sm:$0xff] }
 0x395   : > { %v11551_v42 = vpop.permute.xlu1 %2345  ;;  %14954 = vst [vmem:[#allocation193_spill] sm:$0xff] %v11572_v31 }
 0x396   : > { %2654 = vmatmul.mubr.f32.gmra.mxu0 %v11548_v2  ;;  %v11582_v2 = vld [vmem:[%s14861_s2 + $0x100] sm:$0xff] }
 0x397   : > { %1586 = vperm.xlu0 %9441, %v14950_v41   ;;  %1786 = vperm.xlu1 %9445, %v14951_v30   ;;  %v11561_v23 = vpop.permute.xlu0 %3072  ;;  %v14956_v41 = vld [vmem:[#allocation96_spill] sm:$0xff]  ;;  %v14957_v30 = vld [vmem:[#allocation98_spill] sm:$0xff]  ;;  %14958 = vst [vmem:[#allocation195_spill] sm:$0xff] %v11582_v2 }
 0x398   : > { %14952 = vst [vmem:[#allocation191_spill] sm:$0xff] %v11561_v23  ;;  %2658 = vmatprep.mubr.f32.mxu0 %v11556_v21  ;;  %v11590_v21 = vld [vmem:[%s14861_s2 + $0x130] sm:$0xff] }
 0x399   : > { %14959 = vst [vmem:[#allocation196_spill] sm:$0xff] %v11590_v21  ;;  %v14972_v23 = vld [vmem:[#allocation87_spill] sm:$0xff] }
 0x39a   : > { %v11574_v19 = vpop.permute.xlu1 %3060  ;;  %2659 = vmatmul.mubr.f32.gmra.mxu0 %v11566_v62  ;;  %v14960_v62 = vld [vmem:[#allocation60_spill] sm:$0xff] }
 0x39b   : > { %14955 = vst [vmem:[#allocation194_spill] sm:$0xff] %v11574_v19  ;;  %1846 = vperm.xlu0 %9441, %v14956_v41   ;;  %1861 = vperm.xlu1 %9445, %v14957_v30   ;;  %v14961_v30 = vld [vmem:[#allocation62_spill] sm:$0xff]  ;;  %v14963_v19 = vld [vmem:[#allocation91_spill] sm:$0xff] }
 0x39c   : > { %v11584_v17 = vpop.permute.xlu0 %2365  ;;  %2663 = vmatprep.mubr.f32.mxu0 %v11572_v31 }
 0x39e   : > { %2664 = vmatmul.mubr.f32.gmra.mxu0 %v11582_v2  ;;  %v14964_v2 = vld [vmem:[#allocation102_spill] sm:$0xff] }
 0x39f   : > { %1766 = vperm.xlu0 %9441, %v14960_v62   ;;  %v11594_v41 = vpop.permute.xlu1 %2353  ;;  %1781 = vperm.xlu1 %9445, %v14961_v30  }
 0x3a0   : > { %2668 = vmatprep.mubr.f32.mxu0 %v11590_v21  ;;  %v14968_v21 = vld [vmem:[#allocation93_spill] sm:$0xff] }
 0x3a1   : > { %v11603_v31 = vpop.permute.xlu0 %3080 }
 0x3a2   : > { %2669 = vmatmul.mubr.f32.gmra.mxu0 %v11600_v18 }
 0x3a3   : > { %1836 = vperm.xlu0 %9441, %v14963_v19   ;;  %1856 = vperm.xlu1 %9445, %v14964_v2   ;;  %v1543_v19 = vld [vmem:[%s14513_s4 + $0x278] sm:$0xff] }
 0x3a4   : > { %v11608_v62 = vpop.permute.xlu1 %3068  ;;  %8784 = vmatprep.mubr.f32.mxu0 %v11209_v7  ;;  %v14969_v7 = vld [vmem:[#allocation58_spill] sm:$0xff] }
 0x3a5   : > { %14965 = vst [vmem:[#allocation198_spill] sm:$0xff] %v11608_v62  ;;  %v14971_v62 = vld [vmem:[#allocation52_spill] sm:$0xff] }
 0x3a6   : > { %v2374_v30 = vpop.permute.xlu0 %2373 }
 0x3a7   : > { %1756 = vperm.xlu0 %9441, %v14966_v9   ;;  %1776 = vperm.xlu1 %9445, %v14967_v57   ;;  %v14970_v57 = vld [vmem:[#allocation86_spill] sm:$0xff] }
 0x3a9   : > { %v2362_v35 = vpop.permute.xlu1 %2361 }
 0x3ab   : > { %1966 = vperm.xlu0 %9441, %v11138_v24   ;;  %1851 = vperm.xlu1 %9445, %v14968_v21   ;;  %v11615_v15 = vpop.permute.xlu0 %3088 }
 0x3ae   : > { %v11617_v18 = vpop.permute.xlu1 %3076 }
 0x3af   : > { %1976 = vperm.xlu0 %9441, %v11170_v13   ;;  %1771 = vperm.xlu1 %9445, %v14969_v7  }
 0x3b0   : > { %v2382_v9 = vpop.permute.xlu0 %2381 }
 0x3b1   : > { %v2463_v2 = vmul.f32 %v2382_v9, %v1543_v19  ;;  %v14974_v9 = vld [vmem:[#allocation54_spill] sm:$0xff] }
 0x3b3   : > { %1826 = vperm.xlu0 %9441, %v14970_v57   ;;  %v2370_v44 = vpop.permute.xlu1 %2369  ;;  %1981 = vperm.xlu1 %9445, %v11147_v61   ;;  %v11637_v61 = vld [vmem:[%s14513_s4 + $0x270] sm:$0xff]  ;;  %v11658_v57 = vld [vmem:[%s14513_s4 + $0x258] sm:$0xff] }
 0x3b4   : > { %8752 = vmatprep.subr.mxu0 %v2463_v2 }
 0x3b5   : > { %v3097_v24 = vpop.permute.xlu0 %3096  ;;  %8753 = vmatpush3.msra.mxu0 %v2463_v2 }
 0x3b6   : > { %v3178_v21 = vmul.f32 %v3097_v24, %v1543_v19  ;;  %v11642_v24 = vld [vmem:[%s14513_s4 + $0x268] sm:$0xff] }
 0x3b7   : > { %1746 = vperm.xlu0 %9441, %v14971_v62   ;;  %1841 = vperm.xlu1 %9445, %v14972_v23   ;;  %v11653_v62 = vld [vmem:[%s14513_s4 + $0x260] sm:$0xff]  ;;  %v11677_v23 = vld [vmem:[%s14513_s4 + $0x248] sm:$0xff] }
 0x3b8   : > { %v11628_v1 = vpop.permute.xlu1 %3084  ;;  %8796 = vmatprep.subr.mxu1 %v3178_v21  ;;  %v2457_v7 = vmul.f32 %v11540_v39, %v11677_v23 }
 0x3b9   : > { %8797 = vmatpush3.msra.mxu1 %v3178_v21 }
 0x3ba   : > { %v11630_v13 = vpop.permute.xlu0 %1721 }
 0x3bb   : > { %14973 = vst [vmem:[#allocation199_spill] sm:$0xff] %v11630_v13  ;;  %1951 = vperm.xlu0 %9441, %v11062_v26   ;;  %1761 = vperm.xlu1 %9445, %v14974_v9   ;;  %v2461_v26 = vmul.f32 %v2374_v30, %v11642_v24  ;;  %v14977_v30 = vld [vmem:[#allocation82_spill] sm:$0xff] }
 0x3bd   : > { %v2378_v2 = vpop.permute.xlu1 %2377 }
 0x3be   : > { %v11644_v19 = vpop.permute.xlu0 %1716  ;;  %v2462_v21 = vmul.f32 %v2378_v2, %v11637_v61 }
 0x3bf   : > { %14975 = vst [vmem:[#allocation200_spill] sm:$0xff] %v11644_v19  ;;  %1941 = vperm.xlu0 %9441, %v11027_v59   ;;  %1971 = vperm.xlu1 %9445, %v11127_v48   ;;  %v2460_v59 = vmul.f32 %v2370_v44, %v11653_v62  ;;  %v2459_v48 = vmul.f32 %v11584_v17, %v11658_v57  ;;  %v14980_v17 = vld [vmem:[#allocation50_spill] sm:$0xff] }
 0x3c0   : > { %8754 = vmatprep.subr.mxu0 %v2462_v21 }
 0x3c1   : > { %8755 = vmatpush3.msra.mxu0 %v2462_v21  ;;  %v11670_v21 = vld [vmem:[%s14513_s4 + $0x250] sm:$0xff] }
 0x3c2   : > { %v11660_v9 = vpop.permute.xlu0 %1636  ;;  %8756 = vmatprep.subr.mxu0 %v2461_v26  ;;  %v11662_v2 = vpop.permute.xlu1 %1646 }
 0x3c3   : > { %14976 = vst [vmem:[#allocation201_spill] sm:$0xff] %v11660_v9  ;;  %1931 = vperm.xlu0 %9441, %v10995_v20   ;;  %1831 = vperm.xlu1 %9445, %v14977_v30   ;;  %v2458_v20 = vmul.f32 %v2362_v35, %v11670_v21  ;;  %v15007_v9 = vld [vmem:[#allocation132_spill] sm:$0xff] }
 0x3c4   : > { %8757 = vmatpush3.msra.mxu0 %v2461_v26  ;;  %v11688_v26 = vld [vmem:[%s14513_s4 + $0x240] sm:$0xff] }
 0x3c5   : > { %8758 = vmatprep.subr.mxu0 %v2460_v59 }
 0x3c6   : > { %v11679_v44 = vpop.permute.xlu0 %1711  ;;  %8759 = vmatpush3.msra.mxu0 %v2460_v59  ;;  %v11696_v59 = vld [vmem:[%s14513_s4 + $0x238] sm:$0xff] }
 0x3c7   : > { %14978 = vst [vmem:[#allocation202_spill] sm:$0xff] %v11679_v44  ;;  %1921 = vperm.xlu0 %9441, %v10944_v51   ;;  %8760 = vmatprep.subr.mxu0 %v2459_v48  ;;  %v11683_v30 = vpop.permute.xlu1 %3036  ;;  %v2456_v51 = vmul.f32 %v11594_v41, %v11688_v26  ;;  %v2455_v39 = vmul.f32 %v11497_v47, %v11696_v59  ;;  %v11718_v41 = vld [vmem:[%s14513_s4 + $0x228] sm:$0xff] }
 0x3c8   : > { %14979 = vst [vmem:[#allocation203_spill] sm:$0xff] %v11683_v30  ;;  %1751 = vperm.xlu1 %9445, %v14980_v17   ;;  %8761 = vmatpush3.msra.mxu0 %v2459_v48  ;;  %v11711_v17 = vld [vmem:[%s14513_s4 + $0x230] sm:$0xff] }
 0x3c9   : > { %8762 = vmatprep.subr.mxu0 %v2458_v20  ;;  %v2454_v47 = vmul.f32 %v11551_v42, %v11711_v17  ;;  %v11739_v42 = vld [vmem:[%s14513_s4 + $0x218] sm:$0xff] }
 0x3ca   : > { %v11698_v35 = vpop.permute.xlu0 %1631  ;;  %8763 = vmatpush3.msra.mxu0 %v2458_v20 }
 0x3cb   : > { %14981 = vst [vmem:[#allocation204_spill] sm:$0xff] %v11698_v35  ;;  %1911 = vperm.xlu0 %9441, %v10886_v43   ;;  %8764 = vmatprep.subr.mxu0 %v2457_v7  ;;  %v14984_v43 = vld [vmem:[#allocation16_spill] sm:$0xff] }
 0x3cc   : > { %1961 = vperm.xlu1 %9445, %v11093_v40   ;;  %8765 = vmatpush3.msra.mxu0 %v2457_v7  ;;  %v11704_v48 = vpop.permute.xlu1 %1641  ;;  %v14689_v7 = vmov 11  }
 0x3cd   : > { %14982 = vst [vmem:[#allocation205_spill] sm:$0xff] %v11704_v48  ;;  %8766 = vmatprep.subr.mxu0 %v2456_v51  ;;  %v11851_v48 = vld [vmem:[%s14861_s2 + $0xc0] sm:$0xff] }
 0x3ce   : > { %v11713_v20 = vpop.permute.xlu0 %1706  ;;  %8767 = vmatpush3.msra.mxu0 %v2456_v51  ;;  %v11730_v51 = vld [vmem:[%s14513_s4 + $0x220] sm:$0xff] }
 0x3cf   : > { %14983 = vst [vmem:[#allocation206_spill] sm:$0xff] %v11713_v20  ;;  %9446 = vset.pattern.permute.xlu0 %v14689_v7  ;;  %8768 = vmatprep.subr.mxu0 %v2455_v39  ;;  %v2453_v20 = vmul.f32 %v11447_v0, %v11718_v41  ;;  %v2451_v0 = vmul.f32 %v11350_v16, %v11739_v42 }
 0x3d0   : > { %3531 = vperm.xlu0 %9446, %v14984_v43   ;;  %1956 = vperm.xlu1 %9445, %v11118_v45   ;;  %v11725_v40 = vpop.permute.xlu1 %1901  ;;  %v2452_v43 = vmul.f32 %v11507_v28, %v11730_v51  ;;  %v14987_v45 = vld [vmem:[#allocation15_spill] sm:$0xff] }
 0x3d1   : > { %14985 = vst [vmem:[#allocation207_spill] sm:$0xff] %v11725_v40  ;;  %8769 = vmatpush3.msra.mxu0 %v2455_v39  ;;  %v11759_v28 = vld [vmem:[%s14513_s4 + $0x210] sm:$0xff] }
 0x3d2   : > { %8770 = vmatprep.subr.mxu0 %v2454_v47  ;;  %v11734_v7 = vpop.permute.xlu0 %1626 }
 0x3d3   : > { %14986 = vst [vmem:[#allocation208_spill] sm:$0xff] %v11734_v7  ;;  %8771 = vmatpush3.msra.mxu0 %v2454_v47  ;;  %v11754_v47 = vld [vmem:[%s14513_s4 + $0x208] sm:$0xff] }
 0x3d4   : > { %8772 = vmatprep.subr.mxu0 %v2453_v20  ;;  %3516 = vperm.xlu0 %9446, %v14987_v45   ;;  %v11744_v35 = vpop.permute.xlu1 %1821  ;;  %14990 = vst [vmem:[#allocation211_spill] sm:$0xff] %v11754_v47  ;;  %v14991_v45 = vld [vmem:[#allocation13_spill] sm:$0xff]  ;;  %v2449_v7 = vmul.f32 %v11276_v22, %v11754_v47  ;;  %v11790_v22 = vld [vmem:[%s14513_s4 + $0xf8] sm:$0xff]  ;;  %v11896_v47 = vld [vmem:[%s14513_s4 + $0xd0] sm:$0xff] }
 0x3d5   : > { %14988 = vst [vmem:[#allocation209_spill] sm:$0xff] %v11744_v35  ;;  %1946 = vperm.xlu1 %9445, %v11077_v32   ;;  %8773 = vmatpush3.msra.mxu0 %v2453_v20  ;;  %v2450_v20 = vmul.f32 %v11489_v5, %v11759_v28  ;;  %v11769_v32 = vld [vmem:[%s14513_s4 + $0x200] sm:$0xff] }
 0x3d6   : > { %8774 = vmatprep.subr.mxu0 %v2452_v43  ;;  %v11749_v39 = vpop.permute.xlu0 %1701  ;;  %14993 = vst [vmem:[#allocation213_spill] sm:$0xff] %v11769_v32  ;;  %v2448_v5 = vmul.f32 %v11437_v29, %v11769_v32  ;;  %v14998_v35 = vld [vmem:[#allocation137_spill] sm:$0xff]  ;;  %v15016_v32 = vld [vmem:[#allocation126_spill] sm:$0xff] }
 0x3d7   : > { %14989 = vst [vmem:[#allocation210_spill] sm:$0xff] %v11749_v39  ;;  %8775 = vmatpush3.msra.mxu0 %v2452_v43  ;;  %v14994_v39 = vld [vmem:[#allocation140_spill] sm:$0xff] }
 0x3d8   : > { %8776 = vmatprep.subr.mxu0 %v2451_v0  ;;  %3506 = vperm.xlu0 %9446, %v14991_v45   ;;  %v11764_v16 = vpop.permute.xlu1 %1896  ;;  %v14996_v45 = vld [vmem:[#allocation11_spill] sm:$0xff] }
 0x3d9   : > { %14992 = vst [vmem:[#allocation212_spill] sm:$0xff] %v11764_v16  ;;  %1936 = vperm.xlu1 %9445, %v14994_v39   ;;  %8777 = vmatpush3.msra.mxu0 %v2451_v0  ;;  %v11785_v0 = vld [vmem:[%s14861_s2 + $0x48] sm:$0xff] }
 0x3da   : > { %8778 = vmatprep.subr.mxu0 %v2450_v20  ;;  %v11774_v43 = vpop.permute.xlu0 %1621  ;;  %14999 = vst [vmem:[#allocation216_spill] sm:$0xff] %v11785_v0 }
 0x3db   : > { %14995 = vst [vmem:[#allocation214_spill] sm:$0xff] %v11774_v43  ;;  %8779 = vmatpush3.msra.mxu0 %v2450_v20  ;;  %v15000_v20 = vld [vmem:[#allocation110_spill] sm:$0xff]  ;;  %v11806_v43 = vld [vmem:[%s14861_s2 + $0x70] sm:$0xff] }
 0x3dc   : > { %8780 = vmatprep.subr.mxu0 %v2449_v7  ;;  %3496 = vperm.xlu0 %9446, %v14996_v45   ;;  %v11779_v16 = vpop.permute.xlu1 %1816  ;;  %v3130_v29 = vmul.f32 %v11790_v22, %v15000_v20  ;;  %v11811_v20 = vld [vmem:[%s14513_s4 + $0xf0] sm:$0xff] }
 0x3dd   : > { %14997 = vst [vmem:[#allocation215_spill] sm:$0xff] %v11779_v16  ;;  %1926 = vperm.xlu1 %9445, %v14998_v35   ;;  %8781 = vmatpush3.msra.mxu0 %v2449_v7  ;;  %v11799_v7 = vld [vmem:[%s14513_s4 + $0x78] sm:$0xff]  ;;  %v15002_v35 = vld [vmem:[#allocation83_spill] sm:$0xff] }
 0x3de   : > { %8782 = vmatprep.subr.mxu0 %v2448_v5  ;;  %v11794_v45 = vpop.permute.xlu0 %1696  ;;  %v3114_v39 = vmul.f32 %v11799_v7, %v15002_v35  ;;  %15003 = vst [vmem:[#allocation83_spill] sm:$0xff] %v11806_v43  ;;  %v11821_v35 = vld [vmem:[%s14513_s4 + $0x70] sm:$0xff] }
 0x3df   : > { %15001 = vst [vmem:[#allocation110_spill] sm:$0xff] %v11794_v45  ;;  %8783 = vmatpush3.msra.mxu0 %v2448_v5  ;;  %v15004_v45 = vld [vmem:[#allocation120_spill] sm:$0xff]  ;;  %v15006_v5 = vld [vmem:[#allocation81_spill] sm:$0xff] }
 0x3e0   : > { %v3129_v16 = vmul.f32 %v11811_v20, %v15004_v45  ;;  %7972 = vmatprep.subr.mxu0 %v3130_v29  ;;  %8785 = vmatmul.mubr.f32.vlgmr.msra.gmra.mxu0 %v11785_v0  ;;  %v11816_v40 = vpop.permute.xlu1 %1891  ;;  %v3113_v44 = vmul.f32 %v11821_v35, %v15006_v5  ;;  %v11829_v45 = vld [vmem:[%s14861_s2 + $0x98] sm:$0xff]  ;;  %v11834_v29 = vld [vmem:[%s14513_s4 + $0xe8] sm:$0xff]  ;;  %v15011_v5 = vld [vmem:[#allocation75_spill] sm:$0xff] }
 0x3e1   : > { %15005 = vst [vmem:[#allocation120_spill] sm:$0xff] %v11816_v40  ;;  %1916 = vperm.xlu1 %9445, %v15007_v9   ;;  %7973 = vmatpush3.msra.mxu0 %v3114_v39  ;;  %15008 = vst [vmem:[#allocation81_spill] sm:$0xff] %v11829_v45  ;;  %v15009_v40 = vld [vmem:[#allocation106_spill] sm:$0xff] }
 0x3e2   : > { %v3128_v0 = vmul.f32 %v11834_v29, %v15009_v40  ;;  %7974 = vmatprep.subr.mxu0 %v3129_v16  ;;  %v11838_v19 = vpop.permute.xlu0 %1616  ;;  %8787 = vmatprep.mubr.f32.mxu0 %v11806_v43  ;;  %v11844_v39 = vld [vmem:[%s14513_s4 + $0x68] sm:$0xff]  ;;  %15012 = vst [vmem:[#allocation75_spill] sm:$0xff] %v11851_v48  ;;  %v11856_v40 = vld [vmem:[%s14513_s4 + $0xe0] sm:$0xff]  ;;  %v15013_v16 = vld [vmem:[#allocation111_spill] sm:$0xff] }
 0x3e3   : > { %15010 = vst [vmem:[#allocation106_spill] sm:$0xff] %v11838_v19  ;;  %v3112_v9 = vmul.f32 %v11844_v39, %v15011_v5  ;;  %7975 = vmatpush3.msra.mxu0 %v3113_v44  ;;  %v3127_v43 = vmul.f32 %v11856_v40, %v15013_v16  ;;  %v11866_v44 = vld [vmem:[%s14513_s4 + $0x60] sm:$0xff]  ;;  %v15015_v5 = vld [vmem:[#allocation78_spill] sm:$0xff] }
 0x3e4   : > { %7976 = vmatprep.subr.mxu0 %v3128_v0  ;;  %v11860_v19 = vpop.permute.xlu1 %1811  ;;  %8788 = vmatmul.mubr.f32.gmra.mxu0 %v11829_v45  ;;  %v3111_v30 = vmul.f32 %v11866_v44, %v15015_v5  ;;  %v11874_v16 = vld [vmem:[%s14861_s2 + $0xe8] sm:$0xff]  ;;  %v11879_v0 = vld [vmem:[%s14513_s4 + $0xd8] sm:$0xff]  ;;  %v15019_v45 = vld [vmem:[#allocation103_spill] sm:$0xff] }
 0x3e5   : > { %15014 = vst [vmem:[#allocation111_spill] sm:$0xff] %v11860_v19  ;;  %1906 = vperm.xlu1 %9445, %v15016_v32   ;;  %7977 = vmatpush3.msra.mxu0 %v3112_v9  ;;  %15017 = vst [vmem:[#allocation78_spill] sm:$0xff] %v11874_v16  ;;  %v3126_v19 = vmul.f32 %v11879_v0, %v15019_v45  ;;  %v11889_v9 = vld [vmem:[%s14513_s4 + $0x58] sm:$0xff]  ;;  %v15022_v5 = vld [vmem:[#allocation71_spill] sm:$0xff] }
 0x3e6   : > { %15018 = vst [vmem:[#allocation217_spill] sm:$0xff] %v11879_v0  ;;  %7978 = vmatprep.subr.mxu0 %v3127_v43  ;;  %v11883_v13 = vpop.permute.xlu0 %1691  ;;  %8790 = vmatprep.mubr.f32.mxu0 %v11851_v48  ;;  %15021 = vst [vmem:[#allocation218_spill] sm:$0xff] %v11889_v9  ;;  %v3110_v32 = vmul.f32 %v11889_v9, %v15022_v5  ;;  %v15024_v45 = vld [vmem:[#allocation105_spill] sm:$0xff]  ;;  %v11906_v48 = vld [vmem:[%s14861_s2 + $0x110] sm:$0xff]  ;;  %v15029_v0 = vmov 11  }
 0x3e7   : > { %15020 = vst [vmem:[#allocation103_spill] sm:$0xff] %v11883_v13  ;;  %7979 = vmatpush3.msra.mxu0 %v3111_v30  ;;  %15023 = vst [vmem:[#allocation71_spill] sm:$0xff] %v11896_v47  ;;  %v3125_v43 = vmul.f32 %v11896_v47, %v15024_v45  ;;  %v11911_v30 = vld [vmem:[%s14513_s4 + $0x50] sm:$0xff]  ;;  %v15028_v5 = vld [vmem:[#allocation73_spill] sm:$0xff] }
 0x3e8   : > { %7980 = vmatprep.subr.mxu0 %v3126_v19  ;;  %v11900_v13 = vpop.permute.xlu1 %1886  ;;  %8791 = vmatmul.mubr.f32.gmra.mxu0 %v11874_v16  ;;  %15026 = vst [vmem:[#allocation219_spill] sm:$0xff] %v11906_v48  ;;  %15027 = vst [vmem:[#allocation220_spill] sm:$0xff] %v11911_v30  ;;  %v3109_v9 = vmul.f32 %v11911_v30, %v15028_v5  ;;  %v11919_v19 = vld [vmem:[%s14861_s2 + $0x138] sm:$0xff]  ;;  %v11924_v45 = vld [vmem:[%s14513_s4 + $0xc8] sm:$0xff] }
 0x3e9   : > { %15025 = vst [vmem:[#allocation105_spill] sm:$0xff] %v11900_v13  ;;  %9447 = vset.pattern.permute.xlu1 %v15029_v0  ;;  %7981 = vmatpush3.msra.mxu0 %v3110_v32  ;;  %15030 = vst [vmem:[#allocation73_spill] sm:$0xff] %v11919_v19  ;;  %v15032_v16 = vld [vmem:[#allocation100_spill] sm:$0xff]  ;;  %v15033_v47 = vld [vmem:[#allocation17_spill] sm:$0xff] }
 0x3ea   : > { %15031 = vst [vmem:[#allocation221_spill] sm:$0xff] %v11924_v45  ;;  %v3124_v13 = vmul.f32 %v11924_v45, %v15032_v16  ;;  %3526 = vperm.xlu1 %9447, %v15033_v47   ;;  %7982 = vmatprep.subr.mxu0 %v3125_v43  ;;  %v11929_v5 = vpop.permute.xlu0 %1611  ;;  %v11934_v32 = vld [vmem:[%s14513_s4 + $0x48] sm:$0xff]  ;;  %v15036_v0 = vld [vmem:[#allocation67_spill] sm:$0xff]  ;;  %v11942_v16 = vld [vmem:[%s14513_s4 + $0xc0] sm:$0xff] }
 0x3eb   : > { %15034 = vst [vmem:[#allocation100_spill] sm:$0xff] %v11929_v5  ;;  %15035 = vst [vmem:[#allocation222_spill] sm:$0xff] %v11934_v32  ;;  %v3108_v30 = vmul.f32 %v11934_v32, %v15036_v0  ;;  %7983 = vmatpush3.msra.mxu0 %v3109_v9  ;;  %8793 = vmatprep.mubr.f32.mxu0 %v11906_v48  ;;  %v15038_v47 = vld [vmem:[#allocation101_spill] sm:$0xff]  ;;  %v11959_v32 = vld [vmem:[%s14861_s2 + $0x8] sm:$0xff] }
 0x3ec   : > { %15037 = vst [vmem:[#allocation67_spill] sm:$0xff] %v11942_v16  ;;  %v3123_v43 = vmul.f32 %v11942_v16, %v15038_v47  ;;  %7984 = vmatprep.subr.mxu0 %v3124_v13  ;;  %v11946_v5 = vpop.permute.xlu1 %1806  ;;  %8794 = vmatmul.mubr.f32.gmra.mxu0 %v11919_v19  ;;  %v11952_v0 = vld [vmem:[%s14513_s4 + $0x40] sm:$0xff]  ;;  %v11965_v13 = vld [vmem:[%s14513_s4 + $0xb8] sm:$0xff]  ;;  %v11982_v16 = vld [vmem:[%s14513_s4 + $0xb0] sm:$0xff] }
 0x3ed   : > { %15039 = vst [vmem:[#allocation101_spill] sm:$0xff] %v11946_v5  ;;  %15040 = vst [vmem:[#allocation223_spill] sm:$0xff] %v11952_v0  ;;  %v15041_v9 = vld [vmem:[#allocation69_spill] sm:$0xff]  ;;  %7985 = vmatpush3.msra.mxu0 %v3108_v30  ;;  %3243 = vmatprep.mubr.f32.mxu0 %v11959_v32  ;;  %v15045_v5 = vld [vmem:[#allocation14_spill] sm:$0xff] }
 0x3ee   : > { %v3107_v48 = vmul.f32 %v11952_v0, %v15041_v9  ;;  %15042 = vst [vmem:[#allocation69_spill] sm:$0xff] %v11959_v32  ;;  %15043 = vst [vmem:[#allocation224_spill] sm:$0xff] %v11965_v13  ;;  %v15044_v47 = vld [vmem:[#allocation97_spill] sm:$0xff]  ;;  %3521 = vperm.xlu1 %9447, %v15045_v5   ;;  %7986 = vmatprep.subr.mxu0 %v3123_v43  ;;  %v11970_v9 = vpop.permute.xlu0 %1686  ;;  %v11975_v30 = vld [vmem:[%s14513_s4 + $0x38] sm:$0xff] }
 0x3ef   : > { %v3122_v19 = vmul.f32 %v11965_v13, %v15044_v47  ;;  %15046 = vst [vmem:[#allocation97_spill] sm:$0xff] %v11970_v9  ;;  %15047 = vst [vmem:[#allocation225_spill] sm:$0xff] %v11975_v30  ;;  %v15048_v0 = vld [vmem:[#allocation63_spill] sm:$0xff]  ;;  %v15053_v13 = vld [vmem:[#allocation65_spill] sm:$0xff] }
 0x3f0   : > { %v3106_v32 = vmul.f32 %v11975_v30, %v15048_v0  ;;  %7987 = vmatpush3.msra.mxu0 %v3107_v48  ;;  %15049 = vst [vmem:[#allocation63_spill] sm:$0xff] %v11982_v16  ;;  %v15050_v47 = vld [vmem:[#allocation99_spill] sm:$0xff]  ;;  %v11986_v43 = vpop.permute.xlu1 %1881  ;;  %v11998_v48 = vld [vmem:[%s14513_s4 + $0xa8] sm:$0xff] }
 0x3f1   : > { %v3121_v5 = vmul.f32 %v11982_v16, %v15050_v47  ;;  %7988 = vmatprep.subr.mxu0 %v3122_v19  ;;  %15051 = vst [vmem:[#allocation99_spill] sm:$0xff] %v11986_v43  ;;  %v11991_v9 = vld [vmem:[%s14513_s4 + $0x30] sm:$0xff]  ;;  %15054 = vst [vmem:[#allocation65_spill] sm:$0xff] %v11998_v48  ;;  %v15055_v30 = vld [vmem:[#allocation94_spill] sm:$0xff] }
 0x3f2   : > { %15052 = vst [vmem:[#allocation226_spill] sm:$0xff] %v11991_v9  ;;  %v3105_v0 = vmul.f32 %v11991_v9, %v15053_v13  ;;  %7989 = vmatpush3.msra.mxu0 %v3106_v32  ;;  %v3120_v47 = vmul.f32 %v11998_v48, %v15055_v30  ;;  %v15056_v19 = vld [vmem:[#allocation12_spill] sm:$0xff]  ;;  %v12003_v43 = vpop.permute.xlu0 %1606  ;;  %v12008_v16 = vld [vmem:[%s14513_s4 + $0x28] sm:$0xff]  ;;  %v15059_v13 = vld [vmem:[#allocation59_spill] sm:$0xff] }
 0x3f3   : > { %3511 = vperm.xlu1 %9447, %v15056_v19   ;;  %7990 = vmatprep.subr.mxu0 %v3121_v5  ;;  %15057 = vst [vmem:[#allocation94_spill] sm:$0xff] %v12003_v43  ;;  %15058 = vst [vmem:[#allocation227_spill] sm:$0xff] %v12008_v16  ;;  %v3104_v32 = vmul.f32 %v12008_v16, %v15059_v13  ;;  %v12015_v9 = vld [vmem:[%s14513_s4 + $0xa0] sm:$0xff]  ;;  %v15061_v30 = vld [vmem:[#allocation95_spill] sm:$0xff] }
 0x3f4   : > { %7991 = vmatpush3.msra.mxu0 %v3105_v0  ;;  %15060 = vst [vmem:[#allocation59_spill] sm:$0xff] %v12015_v9  ;;  %v3119_v19 = vmul.f32 %v12015_v9, %v15061_v30  ;;  %v12019_v5 = vpop.permute.xlu1 %1801  ;;  %v12024_v43 = vld [vmem:[%s14513_s4 + $0x20] sm:$0xff]  ;;  %v12031_v0 = vld [vmem:[%s14513_s4 + $0x98] sm:$0xff]  ;;  %v15066_v16 = vld [vmem:[#allocation90_spill] sm:$0xff] }
 0x3f5   : > { %7992 = vmatprep.subr.mxu0 %v3120_v47  ;;  %15062 = vst [vmem:[#allocation95_spill] sm:$0xff] %v12019_v5  ;;  %15063 = vst [vmem:[#allocation228_spill] sm:$0xff] %v12024_v43  ;;  %v15064_v48 = vld [vmem:[#allocation61_spill] sm:$0xff]  ;;  %v3118_v30 = vmul.f32 %v12031_v0, %v15066_v16  ;;  %v15067_v47 = vld [vmem:[#allocation10_spill] sm:$0xff] }
 0x3f6   : > { %v3103_v13 = vmul.f32 %v12024_v43, %v15064_v48  ;;  %7993 = vmatpush3.msra.mxu0 %v3104_v32  ;;  %15065 = vst [vmem:[#allocation61_spill] sm:$0xff] %v12031_v0  ;;  %v12036_v9 = vpop.permute.xlu0 %1681  ;;  %v12041_v5 = vld [vmem:[%s14513_s4 + $0x18] sm:$0xff]  ;;  %v15070_v48 = vld [vmem:[#allocation55_spill] sm:$0xff] }
 0x3f7   : > { %3501 = vperm.xlu1 %9447, %v15067_v47   ;;  %7994 = vmatprep.subr.mxu0 %v3119_v19  ;;  %15068 = vst [vmem:[#allocation90_spill] sm:$0xff] %v12036_v9  ;;  %15069 = vst [vmem:[#allocation229_spill] sm:$0xff] %v12041_v5  ;;  %v3102_v32 = vmul.f32 %v12041_v5, %v15070_v48  ;;  %v12048_v43 = vld [vmem:[%s14513_s4 + $0x90] sm:$0xff]  ;;  %v15072_v16 = vld [vmem:[#allocation92_spill] sm:$0xff] }
 0x3f8   : > { %7995 = vmatpush3.msra.mxu0 %v3103_v13  ;;  %15071 = vst [vmem:[#allocation55_spill] sm:$0xff] %v12048_v43  ;;  %v3117_v47 = vmul.f32 %v12048_v43, %v15072_v16  ;;  %v12052_v19 = vpop.permute.xlu1 %1876  ;;  %v12057_v0 = vld [vmem:[%s14513_s4 + $0x10] sm:$0xff]  ;;  %v15075_v9 = vld [vmem:[#allocation57_spill] sm:$0xff]  ;;  %v12064_v13 = vld [vmem:[%s14513_s4 + $0x88] sm:$0xff] }
 0x3f9   : > { %7996 = vmatprep.subr.mxu0 %v3118_v30  ;;  %15073 = vst [vmem:[#allocation92_spill] sm:$0xff] %v12052_v19  ;;  %15074 = vst [vmem:[#allocation230_spill] sm:$0xff] %v12057_v0  ;;  %v3101_v48 = vmul.f32 %v12057_v0, %v15075_v9  ;;  %v15077_v5 = vld [vmem:[#allocation88_spill] sm:$0xff]  ;;  %v12071_v30 = vld [vmem:[%s14513_s4 + $0x8] sm:$0xff] }
 0x3fa   : > { %7997 = vmatpush3.msra.mxu0 %v3102_v32  ;;  %15076 = vst [vmem:[#allocation57_spill] sm:$0xff] %v12064_v13  ;;  %v3116_v16 = vmul.f32 %v12064_v13, %v15077_v5  ;;  %15078 = vst [vmem:[#allocation88_spill] sm:$0xff] %v12071_v30  ;;  %v15079_v43 = vld [vmem:[#allocation51_spill] sm:$0xff]  ;;  %v12075_v45 = vpop.permute.xlu0 %1601  ;;  %v12080_v9 = vld [vmem:[%s14513_s4 + $0x80] sm:$0xff] }
 0x3fb   : > { %7998 = vmatprep.subr.mxu0 %v3117_v47  ;;  %v3100_v19 = vmul.f32 %v12071_v30, %v15079_v43  ;;  %15080 = vst [vmem:[#allocation51_spill] sm:$0xff] %v12075_v45  ;;  %v15081_v32 = vld [vmem:[#allocation89_spill] sm:$0xff]  ;;  %v15083_v0 = vld [vmem:[#allocation136_spill] sm:$0xff] }
 0x3fc   : > { %7999 = vmatpush3.msra.mxu0 %v3101_v48  ;;  %v3115_v5 = vmul.f32 %v12080_v9, %v15081_v32  ;;  %v12084_v47 = vpop.permute.xlu1 %1796  ;;  %v12089_v13 = vld [vmem:[%s14513_s4] sm:$0xff]  ;;  %v3162_v48 = vmul.f32 %v11364_v37, %v11215_v10  ;;  %v3146_v45 = vmul.f32 %v15083_v0, %v11224_v63  ;;  %v15084_v10 = vld [vmem:[#allocation138_spill] sm:$0xff]  ;;  %v3160_v63 = vmul.f32 %v11297_v11, %v11239_v25 }
 0x3fd   : > { %8000 = vmatprep.subr.mxu0 %v3116_v16  ;;  %v15082_v43 = vld [vmem:[#allocation53_spill] sm:$0xff]  ;;  %v3161_v16 = vmul.f32 %v11396_v27, %v11232_v55  ;;  %v3145_v37 = vmul.f32 %v15084_v10, %v11245_v4  ;;  %v12114_v55 = vld [vmem:[%s14861_s2 + $0x30] sm:$0xff]  ;;  %v3159_v4 = vmul.f32 %v11330_v34, %v11252_v54 }
 0x3fe   : > { %v3099_v30 = vmul.f32 %v12089_v13, %v15082_v43  ;;  %8001 = vmatpush3.msra.mxu0 %v3100_v19  ;;  %v12102_v32 = vld [vmem:[%s14861_s2] sm:$0xff]  ;;  %v15085_v27 = vld [vmem:[#allocation131_spill] sm:$0xff]  ;;  %v12141_v43 = vpop.f32.mrf.mxu0 }
 0x3ff   : > { %8002 = vmatprep.subr.mxu0 %v3115_v5  ;;  %v12109_v5 = vpop.permute.xlu0 %1676  ;;  %v3144_v0 = vmul.f32 %v15085_v27, %v11258_v49  ;;  %v15086_v25 = vld [vmem:[#allocation133_spill] sm:$0xff]  ;;  %v12136_v49 = vld [vmem:[%s14861_s2 + $0x58] sm:$0xff]  ;;  %v15087_v54 = vld [vmem:[#allocation163_spill] sm:$0xff] }
 0x400   : > { %8003 = vmatpush3.msra.mxu0 %v3099_v30  ;;  %v12105_v19 = vpop.permute.xlu1 %1871  ;;  %v3143_v11 = vmul.f32 %v15086_v25, %v11273_v50  ;;  %v3158_v34 = vmul.f32 %v15087_v54, %v11267_v60  ;;  %v15089_v50 = vld [vmem:[#allocation164_spill] sm:$0xff]  ;;  %v15090_v60 = vld [vmem:[#allocation154_spill] sm:$0xff] }
 0x401   : > { %3244 = vmatmul.mubr.f32.vlgmr.msra.gmra.mxu0 %v12102_v32  ;;  %8028 = vmatprep.subr.mxu0 %v3162_v48  ;;  %v15088_v48 = vld [vmem:[#allocation130_spill] sm:$0xff]  ;;  %v3141_v27 = vmul.f32 %v15090_v60, %v11294_v46 }
 0x402   : > { %8029 = vmatpush3.msra.mxu0 %v3146_v45  ;;  %3248 = vmatprep.mubr.f32.mxu0 %v12114_v55  ;;  %v12126_v45 = vld [vmem:[%s14861_s2 + $0x28] sm:$0xff] }
 0x403   : > { %8030 = vmatprep.subr.mxu0 %v3161_v16  ;;  %v3142_v16 = vmul.f32 %v15088_v48, %v11289_v14  ;;  %v12145_v10 = vpop.permute.xlu0 %1596  ;;  %v12160_v14 = vld [vmem:[%s14861_s2 + $0x80] sm:$0xff]  ;;  %v15092_v54 = vld [vmem:[#allocation166_spill] sm:$0xff] }
 0x404   : > { %8031 = vmatpush3.msra.mxu0 %v3145_v37  ;;  %v12129_v30 = vpop.permute.xlu1 %1791  ;;  %v3157_v37 = vmul.f32 %v15089_v50, %v11283_v8  ;;  %v15094_v48 = vld [vmem:[#allocation162_spill] sm:$0xff]  ;;  %v12175_v50 = vld [vmem:[%s14861_s2 + $0x78] sm:$0xff] }
 0x405   : > { %3249 = vmatmul.mubr.f32.gmra.mxu0 %v12126_v45  ;;  %8032 = vmatprep.subr.mxu0 %v3160_v63  ;;  %v12152_v63 = vld [vmem:[%s14861_s2 + $0x50] sm:$0xff]  ;;  %15095 = vst [vmem:[#allocation89_spill] sm:$0xff] %v12175_v50 }
 0x406   : > { %8033 = vmatpush3.msra.mxu0 %v3144_v0  ;;  %3253 = vmatprep.mubr.f32.mxu0 %v12136_v49  ;;  %v15091_v0 = vld [vmem:[#allocation157_spill] sm:$0xff] }
 0x407   : > { %8034 = vmatprep.subr.mxu0 %v3159_v4  ;;  %v3156_v4 = vmul.f32 %v15091_v0, %v11304_v33  ;;  %v15096_v33 = vld [vmem:[#allocation150_spill] sm:$0xff]  ;;  %v12180_v60 = vpop.permute.xlu0 %1671 }
 0x408   : > { %8035 = vmatpush3.msra.mxu0 %v3143_v11  ;;  %v12166_v11 = vpop.f32.mrf.mxu0 }
 0x409   : > { %3254 = vmatmul.mubr.f32.gmra.mxu0 %v12152_v63  ;;  %8036 = vmatprep.subr.mxu0 %v3158_v34  ;;  %v3093_v8 = vpop.permute.xlu1 %3092  ;;  %v15093_v34 = vld [vmem:[#allocation127_spill] sm:$0xff] }
 0x40a   : > { %8037 = vmatpush3.msra.mxu0 %v3142_v16  ;;  %3258 = vmatprep.mubr.f32.mxu0 %v12160_v14  ;;  %v3177_v25 = vmul.f32 %v3093_v8, %v11637_v61  ;;  %v3140_v46 = vmul.f32 %v15093_v34, %v15092_v54  ;;  %v3155_v16 = vmul.f32 %v15094_v48, %v11315_v36  ;;  %v12187_v36 = vld [vmem:[%s14861_s2 + $0xa8] sm:$0xff] }
 0x40b   : > { %8038 = vmatprep.subr.mxu0 %v3157_v37  ;;  %v3139_v37 = vmul.f32 %v15096_v33, %v11326_v6  ;;  %15098 = vst [vmem:[#allocation53_spill] sm:$0xff] %v12187_v36  ;;  %v15099_v6 = vld [vmem:[#allocation125_spill] sm:$0xff]  ;;  %v3176_v34 = vmul.f32 %v11615_v15, %v11642_v24  ;;  %v3175_v33 = vmul.f32 %v11628_v1, %v11653_v62  ;;  %v15104_v15 = vld [vmem:[#allocation146_spill] sm:$0xff]  ;;  %v12221_v1 = vld [vmem:[%s14861_s2 + $0xd0] sm:$0xff] }
 0x40c   : > { %8039 = vmatpush3.msra.mxu0 %v3141_v27  ;;  %8798 = vmatprep.subr.mxu1 %v3177_v25  ;;  %v15097_v27 = vld [vmem:[#allocation155_spill] sm:$0xff]  ;;  %v3138_v54 = vmul.f32 %v15099_v6, %v11355_v56  ;;  %v15103_v56 = vld [vmem:[#allocation168_spill] sm:$0xff]  ;;  %15106 = vst [vmem:[#allocation138_spill] sm:$0xff] %v12221_v1 }
 0x40d   : > { %3259 = vmatmul.mubr.f32.gmra.mxu0 %v12175_v50  ;;  %8040 = vmatprep.subr.mxu0 %v3156_v4  ;;  %v3154_v8 = vmul.f32 %v15097_v27, %v11337_v53  ;;  %v12192_v4 = vpop.f32.mrf.mxu0  ;;  %v15100_v53 = vld [vmem:[#allocation167_spill] sm:$0xff]  ;;  %v3137_v24 = vmul.f32 %v15104_v15, %v15103_v56  ;;  %v12249_v15 = vld [vmem:[%s14861_s2 + $0xf8] sm:$0xff] }
 0x40e   : > { %8041 = vmatpush3.msra.mxu0 %v3140_v46  ;;  %3263 = vmatprep.mubr.f32.mxu0 %v12187_v36  ;;  %v12190_v0 = vpop.permute.xlu1 %1866  ;;  %v15101_v46 = vld [vmem:[#allocation161_spill] sm:$0xff]  ;;  %v15105_v27 = vld [vmem:[#allocation151_spill] sm:$0xff]  ;;  %15112 = vst [vmem:[#allocation133_spill] sm:$0xff] %v12249_v15 }
 0x40f   : > { %8042 = vmatprep.subr.mxu0 %v3155_v16  ;;  %8799 = vmatpush3.msra.mxu1 %v3177_v25  ;;  %v3153_v48 = vmul.f32 %v15101_v46, %v15100_v53  ;;  %v12203_v16 = vld [vmem:[%s14861_s2 + $0xa0] sm:$0xff]  ;;  %v3152_v6 = vmul.f32 %v15105_v27, %v11371_v3  ;;  %v12216_v53 = vpop.permute.xlu0 %1591  ;;  %v15107_v62 = vld [vmem:[#allocation123_spill] sm:$0xff]  ;;  %v15108_v3 = vld [vmem:[#allocation160_spill] sm:$0xff] }
 0x410   : > { %8043 = vmatpush3.msra.mxu0 %v3139_v37  ;;  %15102 = vst [vmem:[#allocation136_spill] sm:$0xff] %v12203_v16  ;;  %8800 = vmatprep.subr.mxu1 %v3176_v34  ;;  %v12212_v37 = vpop.f32.mrf.mxu0  ;;  %v12233_v46 = vld [vmem:[%s14861_s2 + $0xc8] sm:$0xff]  ;;  %v15115_v27 = vld [vmem:[#allocation191_spill] sm:$0xff] }
 0x411   : > { %3264 = vmatmul.mubr.f32.gmra.mxu0 %v12203_v16  ;;  %8044 = vmatprep.subr.mxu0 %v3154_v8  ;;  %v3136_v8 = vmul.f32 %v15107_v62, %v11387_v38  ;;  %15109 = vst [vmem:[#allocation131_spill] sm:$0xff] %v12233_v46  ;;  %v15116_v62 = vld [vmem:[#allocation170_spill] sm:$0xff]  ;;  %v15202_v50 = vld [vmem:[#allocation59_spill] sm:$0xff] }
 0x412   : > { %8045 = vmatpush3.msra.mxu0 %v3138_v54  ;;  %8801 = vmatpush3.msra.mxu1 %v3176_v34  ;;  %v12210_v25 = vpop.permute.xlu1 %1786  ;;  %v3174_v54 = vmul.f32 %v11603_v31, %v11658_v57  ;;  %v3151_v34 = vmul.f32 %v15108_v3, %v11381_v58  ;;  %v12240_v57 = vpop.f32.mrf.mxu0  ;;  %v15110_v31 = vld [vmem:[#allocation141_spill] sm:$0xff]  ;;  %v15186_v16 = vld [vmem:[#allocation110_spill] sm:$0xff] }
 0x413   : > { %8046 = vmatprep.subr.mxu0 %v3153_v48  ;;  %8802 = vmatprep.subr.mxu1 %v3175_v33  ;;  %v3173_v48 = vmul.f32 %v11617_v18, %v11670_v21  ;;  %v3135_v58 = vmul.f32 %v15110_v31, %v11392_v52  ;;  %v15113_v18 = vld [vmem:[#allocation171_spill] sm:$0xff]  ;;  %v15114_v21 = vld [vmem:[#allocation121_spill] sm:$0xff]  ;;  %v12256_v52 = vpop.permute.xlu0 %1666 }
 0x414   : > { %3268 = vmatprep.mubr.f32.mxu0 %v12221_v1  ;;  %8047 = vmatpush3.msra.mxu0 %v3137_v24  ;;  %v3134_v24 = vmul.f32 %v15114_v21, %v15113_v18  ;;  %v15122_v18 = vld [vmem:[#allocation173_spill] sm:$0xff]  ;;  %v15123_v21 = vld [vmem:[#allocation142_spill] sm:$0xff] }
 0x415   : > { %8803 = vmatpush3.msra.mxu1 %v3175_v33  ;;  %3269 = vmatmul.mubr.f32.gmra.mxu0 %v12233_v46  ;;  %v15111_v33 = vld [vmem:[#allocation147_spill] sm:$0xff] }
 0x416   : > { %8048 = vmatprep.subr.mxu0 %v3152_v6  ;;  %8804 = vmatprep.subr.mxu1 %v3174_v54  ;;  %v12238_v38 = vpop.permute.xlu1 %1861  ;;  %v3150_v56 = vmul.f32 %v15111_v33, %v11403_v12  ;;  %v3172_v6 = vmul.f32 %v15115_v27, %v11677_v23  ;;  %v15117_v12 = vld [vmem:[#allocation159_spill] sm:$0xff]  ;;  %v15119_v23 = vld [vmem:[#allocation198_spill] sm:$0xff]  ;;  %v3148_v27 = vmul.f32 %v15123_v21, %v15122_v18 }
 0x417   : > { %8049 = vmatpush3.msra.mxu0 %v3136_v8  ;;  %8805 = vmatpush3.msra.mxu1 %v3174_v54  ;;  %v3149_v8 = vmul.f32 %v15117_v12, %v15116_v62  ;;  %v12263_v54 = vld [vmem:[%s14861_s2 + $0xf0] sm:$0xff]  ;;  %v3171_v31 = vmul.f32 %v15119_v23, %v11688_v26  ;;  %v15125_v62 = vld [vmem:[#allocation174_spill] sm:$0xff]  ;;  %v12292_v21 = vpop.permute.xlu0 %1586 }
 0x418   : > { %8050 = vmatprep.subr.mxu0 %v3151_v34  ;;  %8806 = vmatprep.subr.mxu1 %v3173_v48  ;;  %15118 = vst [vmem:[#allocation163_spill] sm:$0xff] %v12263_v54  ;;  %v12268_v34 = vpop.f32.mrf.mxu0  ;;  %v15126_v26 = vld [vmem:[#allocation118_spill] sm:$0xff]  ;;  %v15175_v46 = vld [vmem:[#allocation223_spill] sm:$0xff] }
 0x419   : > { %3273 = vmatprep.mubr.f32.mxu0 %v12249_v15  ;;  %8051 = vmatpush3.msra.mxu0 %v3135_v58  ;;  %v15121_v58 = vld [vmem:[#allocation135_spill] sm:$0xff]  ;;  %v3132_v12 = vmul.f32 %v15126_v26, %v15125_v62  ;;  %v15133_v62 = vld [vmem:[#allocation194_spill] sm:$0xff] }
 0x41a   : > { %8807 = vmatpush3.msra.mxu1 %v3173_v48  ;;  %3274 = vmatmul.mubr.f32.gmra.mxu0 %v12263_v54  ;;  %v12266_v3 = vpop.permute.xlu1 %1781  ;;  %v15120_v48 = vld [vmem:[#allocation172_spill] sm:$0xff]  ;;  %v3169_v26 = vmul.f32 %v15133_v62, %v11711_v17 }
 0x41b   : > { %8052 = vmatprep.subr.mxu0 %v3150_v56  ;;  %8808 = vmatprep.subr.mxu1 %v3172_v6  ;;  %v3133_v33 = vmul.f32 %v15121_v58, %v15120_v48  ;;  %v12279_v56 = vld [vmem:[%s14861_s2 + $0x120] sm:$0xff]  ;;  %v15128_v48 = vld [vmem:[#allocation175_spill] sm:$0xff]  ;;  %v15129_v58 = vld [vmem:[#allocation158_spill] sm:$0xff] }
 0x41c   : > { %8053 = vmatpush3.msra.mxu0 %v3134_v24  ;;  %8809 = vmatpush3.msra.mxu1 %v3172_v6  ;;  %15124 = vst [vmem:[#allocation130_spill] sm:$0xff] %v12279_v56  ;;  %v15127_v24 = vld [vmem:[#allocation185_spill] sm:$0xff]  ;;  %v3147_v18 = vmul.f32 %v15129_v58, %v15128_v48  ;;  %v12315_v17 = vld [vmem:[%s14861_s2 + $0x18] sm:$0xff] }
 0x41d   : > { %8054 = vmatprep.subr.mxu0 %v3149_v8  ;;  %8810 = vmatprep.subr.mxu1 %v3171_v31  ;;  %v3170_v23 = vmul.f32 %v15127_v24, %v11696_v59  ;;  %v12288_v8 = vpop.f32.mrf.mxu0  ;;  %v15131_v59 = vld [vmem:[#allocation176_spill] sm:$0xff]  ;;  %v15134_v24 = vld [vmem:[#allocation179_spill] sm:$0xff] }
 0x41e   : > { %3278 = vmatprep.mubr.f32.mxu0 %v12279_v56  ;;  %8055 = vmatpush3.msra.mxu0 %v3133_v33  ;;  %v12286_v6 = vpop.permute.xlu1 %1856  ;;  %v12297_v56 = vld [vmem:[%s14861_s2 + $0x118] sm:$0xff]  ;;  %v3168_v48 = vmul.f32 %v15134_v24, %v11718_v41 }
 0x41f   : > { %8811 = vmatpush3.msra.mxu1 %v3171_v31  ;;  %15130 = vst [vmem:[#allocation164_spill] sm:$0xff] %v12297_v56  ;;  %3279 = vmatmul.mubr.f32.gmra.mxu0 %v12297_v56  ;;  %v15132_v33 = vld [vmem:[#allocation128_spill] sm:$0xff]  ;;  %v12308_v54 = vpop.f32.mrf.mxu0 }
 0x420   : > { %8056 = vmatprep.subr.mxu0 %v3148_v27  ;;  %v3131_v31 = vmul.f32 %v15132_v33, %v15131_v59  ;;  %8812 = vmatprep.subr.mxu1 %v3170_v23  ;;  %v15135_v27 = vld [vmem:[#allocation113_spill] sm:$0xff]  ;;  %v15138_v59 = vld [vmem:[#allocation178_spill] sm:$0xff]  ;;  %v15139_v33 = vld [vmem:[#allocation116_spill] sm:$0xff] }
 0x421   : > { %8057 = vmatpush3.msra.mxu0 %v3132_v12  ;;  %8813 = vmatpush3.msra.mxu1 %v3170_v23  ;;  %v2015_v56 = vmul.f32 %v11790_v22, %v15135_v27  ;;  %v15136_v12 = vld [vmem:[#allocation85_spill] sm:$0xff]  ;;  %v15137_v23 = vld [vmem:[#allocation187_spill] sm:$0xff]  ;;  %v2014_v22 = vmul.f32 %v11811_v20, %v15139_v33  ;;  %v15140_v62 = vld [vmem:[#allocation84_spill] sm:$0xff] }
 0x422   : > { %8058 = vmatprep.subr.mxu0 %v3147_v18  ;;  %8814 = vmatprep.subr.mxu1 %v3169_v26  ;;  %v12306_v58 = vpop.permute.xlu1 %1776  ;;  %v1999_v41 = vmul.f32 %v11799_v7, %v15136_v12  ;;  %v3167_v18 = vmul.f32 %v15137_v23, %v11730_v51  ;;  %v1998_v24 = vmul.f32 %v11821_v35, %v15140_v62  ;;  %v12331_v7 = vpop.f32.mrf.mxu0  ;;  %v15141_v51 = vld [vmem:[#allocation177_spill] sm:$0xff]  ;;  %v15142_v12 = vld [vmem:[#allocation180_spill] sm:$0xff]  ;;  %v15147_v33 = vld [vmem:[#allocation115_spill] sm:$0xff] }
 0x423   : > { %8059 = vmatpush3.msra.mxu0 %v3131_v31  ;;  %3348 = vmatprep.mubr.f32.mxu0 %v12315_v17  ;;  %v12325_v31 = vpop.permute.xlu0 %1846  ;;  %v3166_v27 = vmul.f32 %v15141_v51, %v11739_v42  ;;  %v15143_v20 = vld [vmem:[#allocation108_spill] sm:$0xff]  ;;  %v2012_v42 = vmul.f32 %v11856_v40, %v15147_v33  ;;  %v15150_v51 = vld [vmem:[#allocation182_spill] sm:$0xff]  ;;  %v15151_v40 = vld [vmem:[#allocation199_spill] sm:$0xff] }
 0x424   : > { %8815 = vmatpush3.msra.mxu1 %v3169_v26  ;;  %3349 = vmatmul.mubr.f32.vlgmr.msra.gmra.mxu0 %v15138_v59  ;;  %v2013_v23 = vmul.f32 %v11834_v29, %v15143_v20  ;;  %v15146_v59 = vld [vmem:[#allocation181_spill] sm:$0xff]  ;;  %v12347_v62 = vpop.f32.mrf.mxu0  ;;  %v1996_v29 = vmul.f32 %v11866_v44, %v11662_v2  ;;  %v15156_v2 = vld [vmem:[#allocation218_spill] sm:$0xff] }
 0x425   : > { %8816 = vmatprep.subr.mxu1 %v3168_v48  ;;  %8108 = vmatprep.subr.mxu0 %v2015_v56  ;;  %v15144_v56 = vld [vmem:[#allocation79_spill] sm:$0xff]  ;;  %v15153_v20 = vld [vmem:[#allocation213_spill] sm:$0xff] }
 0x426   : > { %8817 = vmatpush3.msra.mxu1 %v3168_v48  ;;  %8109 = vmatpush3.msra.mxu0 %v1999_v41  ;;  %v12329_v26 = vpop.permute.xlu1 %1851  ;;  %v1997_v35 = vmul.f32 %v11844_v39, %v15144_v56  ;;  %v15145_v48 = vld [vmem:[#allocation169_spill] sm:$0xff]  ;;  %v12365_v33 = vpop.f32.mrf.mxu0 }
 0x427   : > { %8818 = vmatprep.subr.mxu1 %v3167_v18  ;;  %8110 = vmatprep.subr.mxu0 %v2014_v22  ;;  %v3165_v41 = vmul.f32 %v15145_v48, %v11759_v28  ;;  %v15148_v28 = vld [vmem:[#allocation211_spill] sm:$0xff]  ;;  %v15149_v39 = vld [vmem:[#allocation165_spill] sm:$0xff] }
 0x428   : > { %3353 = vmatprep.mubr.f32.mxu0 %v15142_v12  ;;  %8819 = vmatpush3.msra.mxu1 %v3167_v18  ;;  %v12351_v18 = vpop.permute.xlu0 %1766  ;;  %v15152_v12 = vld [vmem:[#allocation217_spill] sm:$0xff] }
 0x429   : > { %8111 = vmatpush3.msra.mxu0 %v1998_v24  ;;  %8820 = vmatprep.subr.mxu1 %v3166_v27  ;;  %v3164_v24 = vmul.f32 %v15149_v39, %v15148_v28  ;;  %v15155_v48 = vld [vmem:[#allocation205_spill] sm:$0xff]  ;;  %v15159_v28 = vld [vmem:[#allocation71_spill] sm:$0xff] }
 0x42a   : > { %3354 = vmatmul.mubr.f32.gmra.mxu0 %v15146_v59  ;;  %8112 = vmatprep.subr.mxu0 %v2013_v23  ;;  %v12345_v22 = vpop.permute.xlu1 %1771  ;;  %v15154_v23 = vld [vmem:[#allocation203_spill] sm:$0xff]  ;;  %v1995_v44 = vmul.f32 %v15156_v2, %v15155_v48  ;;  %v15164_v48 = vld [vmem:[#allocation184_spill] sm:$0xff] }
 0x42b   : > { %8821 = vmatpush3.msra.mxu1 %v3166_v27  ;;  %8113 = vmatpush3.msra.mxu0 %v1997_v35  ;;  %v2011_v27 = vmul.f32 %v15152_v12, %v15151_v40  ;;  %v3163_v56 = vmul.f32 %v15154_v23, %v15153_v20  ;;  %v15157_v59 = vld [vmem:[#allocation183_spill] sm:$0xff]  ;;  %v15162_v40 = vld [vmem:[#allocation202_spill] sm:$0xff]  ;;  %v15163_v12 = vld [vmem:[#allocation221_spill] sm:$0xff] }
 0x42c   : > { %8822 = vmatprep.subr.mxu1 %v3165_v41  ;;  %8114 = vmatprep.subr.mxu0 %v2012_v42  ;;  %v15158_v42 = vld [vmem:[#allocation200_spill] sm:$0xff]  ;;  %v2009_v20 = vmul.f32 %v15163_v12, %v15162_v40  ;;  %v12373_v23 = vpop.permute.xlu0 %1836  ;;  %v15169_v12 = vld [vmem:[#allocation186_spill] sm:$0xff] }
 0x42d   : > { %3358 = vmatprep.mubr.f32.mxu0 %v15150_v51  ;;  %8823 = vmatpush3.msra.mxu1 %v3165_v41  ;;  %v2010_v39 = vmul.f32 %v15159_v28, %v15158_v42  ;;  %v15160_v41 = vld [vmem:[#allocation201_spill] sm:$0xff]  ;;  %v9567_v2 = vld [vmem:[%s14513_s4 + $0x1f8] sm:$0xff]  ;;  %v15167_v28 = vld [vmem:[#allocation222_spill] sm:$0xff] }
 0x42e   : > { %8115 = vmatpush3.msra.mxu0 %v1996_v29  ;;  %8824 = vmatprep.subr.mxu1 %v3164_v24  ;;  %v12363_v35 = vpop.permute.xlu1 %1981  ;;  %v15161_v29 = vld [vmem:[#allocation220_spill] sm:$0xff] }
 0x42f   : > { %3359 = vmatmul.mubr.f32.gmra.mxu0 %v15157_v59  ;;  %8116 = vmatprep.subr.mxu0 %v2011_v27  ;;  %v1994_v51 = vmul.f32 %v15161_v29, %v15160_v41  ;;  %v15165_v59 = vld [vmem:[#allocation207_spill] sm:$0xff]  ;;  %v15166_v42 = vld [vmem:[#allocation204_spill] sm:$0xff]  ;;  %v15168_v29 = vld [vmem:[#allocation209_spill] sm:$0xff] }
 0x430   : > { %8825 = vmatpush3.msra.mxu1 %v3164_v24  ;;  %8117 = vmatpush3.msra.mxu0 %v1995_v44  ;;  %v2047_v27 = vmul.f32 %v9567_v2, %v15165_v59  ;;  %v12382_v44 = vpop.f32.mrf.mxu0  ;;  %v1993_v41 = vmul.f32 %v15167_v28, %v15166_v42  ;;  %v15171_v2 = vld [vmem:[#allocation67_spill] sm:$0xff]  ;;  %v15172_v59 = vld [vmem:[#allocation212_spill] sm:$0xff] }
 0x431   : > { %8826 = vmatprep.subr.mxu1 %v3163_v56  ;;  %8118 = vmatprep.subr.mxu0 %v2010_v39  ;;  %v9568_v39 = vld [vmem:[%s14513_s4 + $0x178] sm:$0xff] }
 0x432   : > { %3363 = vmatprep.mubr.f32.mxu0 %v15164_v48  ;;  %8827 = vmatpush3.msra.mxu1 %v3163_v56  ;;  %v12380_v24 = vpop.permute.xlu1 %1841  ;;  %v2031_v40 = vmul.f32 %v9568_v39, %v15168_v29  ;;  %v15170_v48 = vld [vmem:[#allocation206_spill] sm:$0xff]  ;;  %v15173_v42 = vld [vmem:[#allocation216_spill] sm:$0xff]  ;;  %v15176_v39 = vld [vmem:[#allocation215_spill] sm:$0xff] }
 0x433   : > { %8119 = vmatpush3.msra.mxu0 %v1994_v51  ;;  %v2008_v56 = vmul.f32 %v15171_v2, %v15170_v48  ;;  %v9569_v51 = vld [vmem:[%s14513_s4 + $0x1f0] sm:$0xff]  ;;  %8164 = vmatprep.subr.mxu1 %v2047_v27  ;;  %v15174_v28 = vld [vmem:[#allocation208_spill] sm:$0xff]  ;;  %v12406_v48 = vpop.f32.mrf.mxu0  ;;  %v15178_v27 = vld [vmem:[#allocation210_spill] sm:$0xff] }
 0x434   : > { %3364 = vmatmul.mubr.f32.gmra.mxu0 %v15169_v12  ;;  %8120 = vmatprep.subr.mxu0 %v2009_v20  ;;  %v2046_v15 = vmul.f32 %v9569_v51, %v15172_v59  ;;  %v1992_v1 = vmul.f32 %v15175_v46, %v15174_v28  ;;  %v9570_v20 = vld [vmem:[%s14513_s4 + $0x170] sm:$0xff]  ;;  %15177 = vst [vmem:[#allocation154_spill] sm:$0xff] %v12406_v48  ;;  %v15179_v2 = vld [vmem:[#allocation224_spill] sm:$0xff]  ;;  %v9571_v46 = vld [vmem:[%s14513_s4 + $0x1e8] sm:$0xff]  ;;  %v12414_v59 = vpop.permute.xlu0 %1756 }
 0x435   : > { %8829 = vmatmul.mubr.f32.vlgmr.msra.gmra.mxu1 %v15173_v42  ;;  %8121 = vmatpush3.msra.mxu0 %v1993_v41  ;;  %v2030_v29 = vmul.f32 %v9570_v20, %v15176_v39  ;;  %v2007_v51 = vmul.f32 %v15179_v2, %v15178_v27  ;;  %v15180_v41 = vld [vmem:[#allocation120_spill] sm:$0xff]  ;;  %v9572_v20 = vld [vmem:[%s14513_s4 + $0x168] sm:$0xff]  ;;  %v15184_v39 = vld [vmem:[#allocation111_spill] sm:$0xff] }
 0x436   : > { %8165 = vmatpush3.msra.mxu1 %v2031_v40  ;;  %8122 = vmatprep.subr.mxu0 %v2008_v56  ;;  %v12404_v12 = vpop.permute.xlu1 %1761  ;;  %v2045_v40 = vmul.f32 %v9571_v46, %v15180_v41  ;;  %v15181_v42 = vld [vmem:[#allocation188_spill] sm:$0xff]  ;;  %v15182_v56 = vld [vmem:[#allocation214_spill] sm:$0xff]  ;;  %v2029_v27 = vmul.f32 %v9572_v20, %v15184_v39  ;;  %v15185_v2 = vld [vmem:[#allocation189_spill] sm:$0xff] }
 0x437   : > { %8166 = vmatprep.subr.mxu1 %v2046_v15  ;;  %3368 = vmatprep.mubr.f32.mxu0 %v15181_v42  ;;  %v15183_v15 = vld [vmem:[#allocation225_spill] sm:$0xff]  ;;  %v15187_v48 = vld [vmem:[#allocation63_spill] sm:$0xff] }
 0x438   : > { %8123 = vmatpush3.msra.mxu0 %v1992_v1  ;;  %v1991_v28 = vmul.f32 %v15183_v15, %v15182_v56  ;;  %8167 = vmatpush3.msra.mxu1 %v2030_v29  ;;  %v2006_v46 = vmul.f32 %v15187_v48, %v15186_v16  ;;  %v9573_v41 = vld [vmem:[%s14513_s4 + $0x1e0] sm:$0xff]  ;;  %v15189_v56 = vld [vmem:[#allocation106_spill] sm:$0xff]  ;;  %v12434_v29 = vpop.f32.mrf.mxu0 }
 0x439   : > { %3369 = vmatmul.mubr.f32.gmra.mxu0 %v15185_v2  ;;  %v15188_v1 = vld [vmem:[#allocation105_spill] sm:$0xff]  ;;  %8124 = vmatprep.subr.mxu0 %v2007_v51  ;;  %v15190_v15 = vld [vmem:[#allocation226_spill] sm:$0xff]  ;;  %15191 = vst [vmem:[#allocation157_spill] sm:$0xff] %v12434_v29  ;;  %v15193_v2 = vld [vmem:[#allocation103_spill] sm:$0xff] }
 0x43a   : > { %v2044_v42 = vmul.f32 %v9573_v41, %v15188_v1  ;;  %8168 = vmatprep.subr.mxu1 %v2045_v40  ;;  %v1990_v36 = vmul.f32 %v15190_v15, %v15189_v56  ;;  %8125 = vmatpush3.msra.mxu0 %v1991_v28  ;;  %v12432_v20 = vpop.permute.xlu1 %1971  ;;  %v9574_v16 = vld [vmem:[%s14513_s4 + $0x160] sm:$0xff]  ;;  %v9575_v28 = vld [vmem:[%s14513_s4 + $0x1d8] sm:$0xff]  ;;  %v15196_v1 = vld [vmem:[#allocation190_spill] sm:$0xff] }
 0x43b   : > { %8169 = vmatpush3.msra.mxu1 %v2029_v27  ;;  %v15192_v48 = vld [vmem:[#allocation101_spill] sm:$0xff]  ;;  %8126 = vmatprep.subr.mxu0 %v2006_v46  ;;  %v15195_v27 = vld [vmem:[#allocation99_spill] sm:$0xff]  ;;  %v15197_v56 = vld [vmem:[#allocation100_spill] sm:$0xff] }
 0x43c   : > { %v2028_v39 = vmul.f32 %v9574_v16, %v15192_v48  ;;  %8170 = vmatprep.subr.mxu1 %v2044_v42  ;;  %v15194_v51 = vld [vmem:[#allocation65_spill] sm:$0xff]  ;;  %v2043_v41 = vmul.f32 %v9575_v28, %v15195_v27  ;;  %3373 = vmatprep.mubr.f32.mxu0 %v15196_v1  ;;  %v15198_v15 = vld [vmem:[#allocation227_spill] sm:$0xff]  ;;  %v9576_v46 = vld [vmem:[%s14513_s4 + $0x158] sm:$0xff]  ;;  %v12453_v48 = vpop.permute.xlu0 %1966 }
 0x43d   : > { %v2005_v40 = vmul.f32 %v15194_v51, %v15193_v2  ;;  %8127 = vmatpush3.msra.mxu0 %v1990_v36  ;;  %v1989_v29 = vmul.f32 %v15198_v15, %v15197_v56  ;;  %v15199_v42 = vld [vmem:[#allocation95_spill] sm:$0xff]  ;;  %v15200_v2 = vld [vmem:[#allocation192_spill] sm:$0xff]  ;;  %v15201_v51 = vld [vmem:[#allocation97_spill] sm:$0xff]  ;;  %v12464_v15 = vpop.f32.mrf.mxu0 }
 0x43e   : > { %v2027_v16 = vmul.f32 %v9576_v46, %v15199_v42  ;;  %8171 = vmatpush3.msra.mxu1 %v2028_v39  ;;  %3374 = vmatmul.mubr.f32.gmra.mxu0 %v15200_v2  ;;  %v2004_v28 = vmul.f32 %v15202_v50, %v15201_v51  ;;  %v9577_v36 = vld [vmem:[%s14513_s4 + $0x1d0] sm:$0xff]  ;;  %v15203_v27 = vld [vmem:[#allocation92_spill] sm:$0xff]  ;;  %v12462_v56 = vpop.permute.xlu1 %1831  ;;  %v15204_v46 = vld [vmem:[#allocation94_spill] sm:$0xff] }
 0x43f   : > { %v2042_v1 = vmul.f32 %v9577_v36, %v15203_v27  ;;  %8128 = vmatprep.subr.mxu0 %v2005_v40  ;;  %8172 = vmatprep.subr.mxu1 %v2043_v41  ;;  %v15205_v42 = vld [vmem:[#allocation228_spill] sm:$0xff]  ;;  %v9578_v50 = vld [vmem:[%s14513_s4 + $0x150] sm:$0xff]  ;;  %v15206_v51 = vld [vmem:[#allocation90_spill] sm:$0xff] }
 0x440   : > { %v1988_v39 = vmul.f32 %v15205_v42, %v15204_v46  ;;  %8129 = vmatpush3.msra.mxu0 %v1989_v29  ;;  %8173 = vmatpush3.msra.mxu1 %v2027_v16  ;;  %v2026_v2 = vmul.f32 %v9578_v50, %v12084_v47  ;;  %v15207_v40 = vld [vmem:[#allocation61_spill] sm:$0xff]  ;;  %v9579_v36 = vld [vmem:[%s14513_s4 + $0x1c8] sm:$0xff]  ;;  %v15209_v29 = vld [vmem:[#allocation51_spill] sm:$0xff]  ;;  %v12486_v50 = vpop.f32.mrf.mxu0 }
 0x441   : > { %8130 = vmatprep.subr.mxu0 %v2004_v28  ;;  %8174 = vmatprep.subr.mxu1 %v2042_v1  ;;  %v2003_v41 = vmul.f32 %v15207_v40, %v15206_v51  ;;  %v2041_v27 = vmul.f32 %v9579_v36, %v12105_v19  ;;  %v15208_v46 = vld [vmem:[#allocation193_spill] sm:$0xff]  ;;  %v9580_v47 = vld [vmem:[%s14513_s4 + $0x148] sm:$0xff]  ;;  %v15211_v1 = vld [vmem:[#allocation195_spill] sm:$0xff]  ;;  %v1977_v36 = vpop.permute.xlu0 %1976 }
 0x442   : > { %3378 = vmatprep.mubr.f32.mxu0 %v15208_v46  ;;  %8131 = vmatpush3.msra.mxu0 %v1988_v39  ;;  %v15210_v16 = vld [vmem:[#allocation229_spill] sm:$0xff]  ;;  %v2025_v28 = vmul.f32 %v9580_v47, %v12129_v30  ;;  %v15212_v51 = vld [vmem:[#allocation55_spill] sm:$0xff]  ;;  %v15213_v46 = vld [vmem:[#allocation230_spill] sm:$0xff] }
 0x443   : > { %v1987_v42 = vmul.f32 %v15210_v16, %v15209_v29  ;;  %8175 = vmatpush3.msra.mxu1 %v2026_v2  ;;  %3379 = vmatmul.mubr.f32.gmra.mxu0 %v15211_v1  ;;  %v2002_v19 = vmul.f32 %v15212_v51, %v12109_v5  ;;  %v9581_v39 = vld [vmem:[%s14513_s4 + $0x1c0] sm:$0xff]  ;;  %v1986_v30 = vmul.f32 %v15213_v46, %v12145_v10  ;;  %v12496_v2 = vpop.permute.xlu1 %1751  ;;  %v15216_v47 = vld [vmem:[#allocation88_spill] sm:$0xff]  ;;  %v15218_v46 = vld [vmem:[#allocation83_spill] sm:$0xff] }
 0x444   : > { %v2040_v40 = vmul.f32 %v9581_v39, %v12190_v0  ;;  %8132 = vmatprep.subr.mxu0 %v2003_v41  ;;  %8176 = vmatprep.subr.mxu1 %v2041_v27  ;;  %v9582_v5 = vld [vmem:[%s14513_s4 + $0x140] sm:$0xff]  ;;  %v9583_v41 = vld [vmem:[%s14513_s4 + $0x1b8] sm:$0xff]  ;;  %v7870_v51 = vadd.f32 %v12166_v11, %v12141_v43 }
 0x445   : > { %8133 = vmatpush3.msra.mxu0 %v1987_v42  ;;  %8177 = vmatpush3.msra.mxu1 %v2025_v28  ;;  %v2024_v29 = vmul.f32 %v9582_v5, %v12210_v25  ;;  %v15214_v0 = vld [vmem:[#allocation57_spill] sm:$0xff]  ;;  %v2039_v10 = vmul.f32 %v9583_v41, %v12238_v38  ;;  %v15215_v27 = vld [vmem:[#allocation196_spill] sm:$0xff]  ;;  %v1985_v28 = vmul.f32 %v15216_v47, %v12216_v53 }
 0x446   : > { %8134 = vmatprep.subr.mxu0 %v2002_v19  ;;  %8178 = vmatprep.subr.mxu1 %v2040_v40  ;;  %v2001_v16 = vmul.f32 %v15214_v0, %v12180_v60  ;;  %v7924_v42 = vpop.f32.mrf.mxu0  ;;  %v9584_v25 = vld [vmem:[%s14513_s4 + $0x138] sm:$0xff]  ;;  %v15217_v60 = vld [vmem:[#allocation197_spill] sm:$0xff]  ;;  %v2000_v38 = vmul.f32 %v12080_v9, %v12256_v52  ;;  %v9585_v19 = vld [vmem:[%s14513_s4 + $0x1b0] sm:$0xff]  ;;  %v12526_v40 = vpop.permute.xlu0 %1826 }
 0x447   : > { %3383 = vmatprep.mubr.f32.mxu0 %v15215_v27  ;;  %8135 = vmatpush3.msra.mxu0 %v1986_v30  ;;  %v2023_v1 = vmul.f32 %v9584_v25, %v12266_v3  ;;  %v2038_v53 = vmul.f32 %v9585_v19, %v12286_v6  ;;  %v1984_v3 = vmul.f32 %v12089_v13, %v12292_v21  ;;  %v9586_v9 = vld [vmem:[%s14513_s4 + $0x130] sm:$0xff]  ;;  %v12532_v52 = vpop.permute.xlu1 %1961  ;;  %v9587_v30 = vld [vmem:[%s14513_s4 + $0x1a8] sm:$0xff]  ;;  %v15220_v0 = vld [vmem:[#allocation69_spill] sm:$0xff] }
 0x448   : > { %8179 = vmatpush3.msra.mxu1 %v2024_v29  ;;  %3384 = vmatmul.mubr.f32.gmra.mxu0 %v15217_v60  ;;  %v7925_v39 = vpop.f32.mrf.mxu0  ;;  %v2022_v11 = vmul.f32 %v9586_v9, %v12306_v58  ;;  %v7873_v13 = vadd.f32 %v12212_v37, %v12192_v4  ;;  %v2037_v5 = vmul.f32 %v9587_v30, %v12329_v26  ;;  %v9588_v58 = vld [vmem:[%s14513_s4 + $0x278] sm:$0xff]  ;;  %v9589_v4 = vld [vmem:[%s14513_s4 + $0x128] sm:$0xff]  ;;  %v15221_v41 = vld [vmem:[#allocation81_spill] sm:$0xff] }
 0x449   : > { %8136 = vmatprep.subr.mxu0 %v2001_v16  ;;  %8180 = vmatprep.subr.mxu1 %v2039_v10  ;;  %v7926_v43 = vadd.f32 %v7925_v39, %v7924_v42  ;;  %v2063_v29 = vmul.f32 %v9588_v58, %v12363_v35  ;;  %v2021_v37 = vmul.f32 %v9589_v4, %v12345_v22  ;;  %v9590_v10 = vld [vmem:[%s14513_s4 + $0x1a0] sm:$0xff]  ;;  %v15222_v25 = vld [vmem:[#allocation75_spill] sm:$0xff]  ;;  %v15223_v19 = vld [vmem:[#allocation78_spill] sm:$0xff] }
 0x44a   : > { %8137 = vmatpush3.msra.mxu0 %v1985_v28  ;;  %8181 = vmatpush3.msra.mxu1 %v2023_v1  ;;  %v7927_v6 = vpop.f32.mrf.mxu0  ;;  %v2036_v35 = vmul.f32 %v9590_v10, %v12325_v31  ;;  %v2062_v27 = vmul.f32 %v1977_v36, %v11637_v61  ;;  %v12559_v47 = vpop.permute.xlu0 %1746  ;;  %v7876_v22 = vadd.f32 %v12268_v34, %v12240_v57  ;;  %v9591_v28 = vld [vmem:[%s14513_s4 + $0x120] sm:$0xff]  ;;  %v9592_v57 = vld [vmem:[%s14513_s4 + $0x198] sm:$0xff] }
 0x44b   : > { %8138 = vmatprep.subr.mxu0 %v2000_v38  ;;  %8182 = vmatprep.subr.mxu1 %v2038_v53  ;;  %v12537_v21 = vadd.f32 %v7926_v43, %v7870_v51  ;;  %v2020_v31 = vmul.f32 %v9591_v28, %v12351_v18  ;;  %v12569_v61 = vpop.permute.xlu1 %1956  ;;  %v2035_v34 = vmul.f32 %v9592_v57, %v12380_v24  ;;  %v9593_v18 = vld [vmem:[%s14513_s4 + $0x268] sm:$0xff]  ;;  %v15226_v58 = vld [vmem:[#allocation73_spill] sm:$0xff]  ;;  %v15231_v57 = vld [vmem:[#allocation136_spill] sm:$0xff] }
 0x44c   : > { %8831 = vmatprep.mubr.f32.mxu1 %v15218_v46  ;;  %8139 = vmatpush3.msra.mxu0 %v1984_v3  ;;  %v7928_v16 = vpop.f32.mrf.mxu0  ;;  %v2061_v60 = vmul.f32 %v9593_v18, %v12432_v20  ;;  %v7879_v24 = vadd.f32 %v12308_v54, %v12288_v8  ;;  %v9595_v20 = vld [vmem:[%s14513_s4 + $0x190] sm:$0xff]  ;;  %v9596_v3 = vld [vmem:[%s14513_s4 + $0x260] sm:$0xff] }
 0x44d   : > { %15219 = vst [vmem:[#allocation166_spill] sm:$0xff] %v12537_v21  ;;  %3598 = vmatprep.mubr.f32.mxu0 %v15220_v0  ;;  %8183 = vmatpush3.msra.mxu1 %v2022_v11  ;;  %v7929_v26 = vadd.f32 %v7928_v16, %v7927_v6  ;;  %v2034_v39 = vmul.f32 %v9595_v20, %v12373_v23  ;;  %v9597_v8 = vld [vmem:[%s14513_s4 + $0x110] sm:$0xff]  ;;  %v9602_v4 = vld [vmem:[%s14513_s4 + $0x100] sm:$0xff] }
 0x44e   : > { %8832 = vmatmul.mubr.f32.gmra.mxu1 %v15221_v41  ;;  %3599 = vmatmul.mubr.f32.vlgmr.msra.gmra.mxu0 %v12102_v32  ;;  %v7930_v42 = vpop.f32.mrf.mxu0  ;;  %v1952_v43 = vpop.permute.xlu0 %1951  ;;  %v2018_v9 = vmul.f32 %v9597_v8, %v12414_v59  ;;  %v15225_v6 = vld [vmem:[#allocation219_spill] sm:$0xff]  ;;  %v9599_v59 = vld [vmem:[%s14513_s4 + $0x258] sm:$0xff]  ;;  %v9612_v8 = vld [vmem:[%s14861_s2 + $0x60] sm:$0xff] }
 0x44f   : > { %8184 = vmatprep.subr.mxu1 %v2037_v5  ;;  %8840 = vmatprep.subr.mxu0 %v2063_v29  ;;  %v12563_v32 = vadd.f32 %v7929_v26, %v7873_v13  ;;  %v9598_v13 = vld [vmem:[%s14513_s4 + $0x188] sm:$0xff]  ;;  %v2059_v5 = vmul.f32 %v9599_v59, %v12532_v52  ;;  %v15235_v59 = vld [vmem:[#allocation163_spill] sm:$0xff] }
 0x450   : > { %8185 = vmatpush3.msra.mxu1 %v2021_v37  ;;  %8841 = vmatpush3.msra.mxu0 %v2063_v29  ;;  %v7931_v36 = vpop.f32.mrf.mxu0  ;;  %v1947_v23 = vpop.permute.xlu1 %1946  ;;  %v2033_v30 = vmul.f32 %v9598_v13, %v12462_v56  ;;  %v9601_v29 = vld [vmem:[%s14513_s4 + $0x180] sm:$0xff]  ;;  %v9614_v13 = vld [vmem:[%s14513_s4 + $0x228] sm:$0xff] }
 0x451   : > { %8186 = vmatprep.subr.mxu1 %v2036_v35  ;;  %8842 = vmatprep.subr.mxu0 %v2062_v27  ;;  %v7932_v1 = vadd.f32 %v7931_v36, %v7930_v42  ;;  %v2032_v16 = vmul.f32 %v9601_v29, %v12526_v40  ;;  %v15227_v35 = vld [vmem:[#allocation89_spill] sm:$0xff]  ;;  %v9606_v36 = vld [vmem:[%s14513_s4 + $0x248] sm:$0xff] }
 0x452   : > { %8834 = vmatprep.mubr.f32.mxu1 %v15222_v25  ;;  %3603 = vmatprep.mubr.f32.mxu0 %v12114_v55  ;;  %v7933_v51 = vpop.f32.mrf.mxu0  ;;  %v9594_v55 = vld [vmem:[%s14513_s4 + $0x118] sm:$0xff]  ;;  %v1942_v37 = vpop.permute.xlu0 %1941  ;;  %v9605_v42 = vld [vmem:[%s14861_s2 + $0x40] sm:$0xff]  ;;  %v2057_v25 = vmul.f32 %v9606_v36, %v1952_v43  ;;  %v15233_v43 = vld [vmem:[#allocation131_spill] sm:$0xff] }
 0x453   : > { %8187 = vmatpush3.msra.mxu1 %v2020_v31  ;;  %8843 = vmatpush3.msra.mxu0 %v2062_v27  ;;  %v2019_v38 = vmul.f32 %v9594_v55, %v12404_v12  ;;  %v12589_v53 = vadd.f32 %v7932_v1, %v7876_v22  ;;  %v2060_v12 = vmul.f32 %v9596_v3, %v12453_v48  ;;  %v15230_v22 = vld [vmem:[#allocation157_spill] sm:$0xff] }
 0x454   : > { %8835 = vmatmul.mubr.f32.gmra.mxu1 %v15223_v19  ;;  %3604 = vmatmul.mubr.f32.gmra.mxu0 %v12126_v45  ;;  %v7934_v45 = vpop.f32.mrf.mxu0  ;;  %v7882_v48 = vadd.f32 %v12347_v62, %v12331_v7  ;;  %v9600_v7 = vld [vmem:[%s14513_s4 + $0x108] sm:$0xff]  ;;  %v1937_v26 = vpop.permute.xlu1 %1936  ;;  %v9633_v36 = vld [vmem:[%s14861_s2 + $0xc0] sm:$0xff] }
 0x455   : > { %15224 = vst [vmem:[#allocation127_spill] sm:$0xff] %v12589_v53  ;;  %8188 = vmatprep.subr.mxu1 %v2035_v34  ;;  %8844 = vmatprep.subr.mxu0 %v2061_v60  ;;  %v7935_v54 = vadd.f32 %v7934_v45, %v7933_v51  ;;  %v2017_v62 = vmul.f32 %v9600_v7, %v12496_v2  ;;  %v9607_v34 = vld [vmem:[%s14513_s4 + $0x240] sm:$0xff]  ;;  %v9608_v51 = vld [vmem:[%s14861_s2 + $0x38] sm:$0xff]  ;;  %v15232_v19 = vld [vmem:[#allocation138_spill] sm:$0xff] }
 0x456   : > { %8189 = vmatpush3.msra.mxu1 %v2019_v38  ;;  %8845 = vmatpush3.msra.mxu0 %v2061_v60  ;;  %v7936_v11 = vpop.f32.mrf.mxu0  ;;  %v2016_v2 = vmul.f32 %v9602_v4, %v12559_v47  ;;  %v15229_v47 = vld [vmem:[#allocation154_spill] sm:$0xff]  ;;  %v1932_v1 = vpop.permute.xlu0 %1931  ;;  %v2056_v18 = vmul.f32 %v9607_v34, %v1947_v23 }
 0x457   : > { %8190 = vmatprep.subr.mxu1 %v2034_v39  ;;  %8846 = vmatprep.subr.mxu0 %v2060_v12  ;;  %v12607_v46 = vadd.f32 %v7935_v54, %v7879_v24  ;;  %v7888_v28 = vadd.f32 %v15230_v22, %v15229_v47  ;;  %v7891_v24 = vadd.f32 %v12486_v50, %v12464_v15  ;;  %v9609_v39 = vld [vmem:[%s14861_s2 + $0x68] sm:$0xff]  ;;  %v9611_v15 = vld [vmem:[%s14513_s4 + $0x230] sm:$0xff] }
 0x458   : > { %8837 = vmatprep.mubr.f32.mxu1 %v15225_v6  ;;  %3608 = vmatprep.mubr.f32.mxu0 %v12136_v49  ;;  %v7937_v49 = vpop.f32.mrf.mxu0  ;;  %v1927_v55 = vpop.permute.xlu1 %1926  ;;  %v2054_v50 = vmul.f32 %v9611_v15, %v1937_v26  ;;  %v9613_v6 = vld [vmem:[%s14861_s2 + $0x90] sm:$0xff]  ;;  %v9616_v7 = vld [vmem:[%s14861_s2 + $0x88] sm:$0xff] }
 0x459   : > { %8191 = vmatpush3.msra.mxu1 %v2018_v9  ;;  %8847 = vmatpush3.msra.mxu0 %v2060_v12  ;;  %v7938_v56 = vadd.f32 %v7937_v49, %v7936_v11  ;;  %v9610_v12 = vld [vmem:[%s14513_s4 + $0x238] sm:$0xff]  ;;  %v15234_v9 = vld [vmem:[#allocation133_spill] sm:$0xff]  ;;  %v9623_v26 = vld [vmem:[%s14513_s4 + $0x208] sm:$0xff] }
 0x45a   : > { %8838 = vmatmul.mubr.f32.gmra.mxu1 %v15226_v58  ;;  %3609 = vmatmul.mubr.f32.gmra.mxu0 %v12152_v63  ;;  %v7939_v52 = vpop.f32.mrf.mxu0  ;;  %v7885_v63 = vadd.f32 %v12382_v44, %v12365_v33  ;;  %v15228_v44 = vld [vmem:[#allocation53_spill] sm:$0xff]  ;;  %v2055_v45 = vmul.f32 %v9610_v12, %v1942_v37  ;;  %v1922_v11 = vpop.permute.xlu0 %1921  ;;  %v9617_v58 = vld [vmem:[%s14861_s2 + $0xb8] sm:$0xff]  ;;  %v9620_v37 = vld [vmem:[%s14861_s2 + $0xb0] sm:$0xff] }
 0x45b   : > { %8192 = vmatprep.subr.mxu1 %v2033_v30  ;;  %3613 = vmatprep.mubr.f32.mxu0 %v12160_v14  ;;  %v12635_v41 = vadd.f32 %v7938_v56, %v7882_v48  ;;  %v9603_v14 = vld [vmem:[%s14513_s4 + $0x250] sm:$0xff]  ;;  %v2053_v30 = vmul.f32 %v9614_v13, %v1932_v1  ;;  %v9618_v56 = vld [vmem:[%s14513_s4 + $0x218] sm:$0xff] }
 0x45c   : > { %8193 = vmatpush3.msra.mxu1 %v2017_v62  ;;  %3703 = vmatprep.mubr.f32.mxu1 %v12315_v17  ;;  %v2058_v40 = vmul.f32 %v9603_v14, %v12569_v61  ;;  %v7940_v10 = vpop.f32.mrf.mxu0  ;;  %v9604_v17 = vld [vmem:[%s14861_s2 + $0x10] sm:$0xff]  ;;  %v1917_v48 = vpop.permute.xlu1 %1916  ;;  %v15236_v62 = vld [vmem:[#allocation130_spill] sm:$0xff]  ;;  %v2051_v29 = vmul.f32 %v9618_v56, %v1922_v11  ;;  %v9621_v14 = vld [vmem:[%s14861_s2 + $0xe0] sm:$0xff] }
 0x45d   : > { %8194 = vmatprep.subr.mxu1 %v2032_v16  ;;  %8848 = vmatprep.subr.mxu0 %v2059_v5  ;;  %v7941_v27 = vadd.f32 %v7940_v10, %v7939_v52  ;;  %v15237_v16 = vld [vmem:[#allocation164_spill] sm:$0xff]  ;;  %v9619_v52 = vld [vmem:[%s14513_s4 + $0x210] sm:$0xff] }
 0x45e   : > { %8195 = vmatpush3.msra.mxu1 %v2016_v2  ;;  %3614 = vmatmul.mubr.f32.gmra.mxu0 %v15227_v35  ;;  %v7942_v33 = vpop.f32.mrf.mxu0  ;;  %v2050_v4 = vmul.f32 %v9619_v52, %v1917_v48  ;;  %v1912_v2 = vpop.permute.xlu0 %1911  ;;  %v9624_v35 = vld [vmem:[%s14513_s4 + $0x200] sm:$0xff]  ;;  %v9629_v47 = vld [vmem:[%s14861_s2 + $0x130] sm:$0xff] }
 0x45f   : > { %3704 = vmatmul.mubr.f32.vlgmr.msra.gmra.mxu1 %v9604_v17  ;;  %8849 = vmatpush3.msra.mxu0 %v2059_v5  ;;  %v12651_v31 = vadd.f32 %v7941_v27, %v7885_v63  ;;  %v9615_v5 = vld [vmem:[%s14513_s4 + $0x220] sm:$0xff]  ;;  %v2049_v10 = vmul.f32 %v9623_v26, %v1912_v2  ;;  %v9625_v17 = vld [vmem:[%s14861_s2 + $0xd8] sm:$0xff]  ;;  %v9630_v22 = vld [vmem:[%s14861_s2 + $0x70] sm:$0xff] }
 0x460   : > { %3618 = vmatprep.mubr.f32.mxu0 %v15228_v44  ;;  %3708 = vmatprep.mubr.f32.mxu1 %v9605_v42  ;;  %v7943_v61 = vpop.f32.mrf.mxu0  ;;  %v2052_v49 = vmul.f32 %v9615_v5, %v1927_v55  ;;  %v1907_v63 = vpop.permute.xlu1 %1906  ;;  %v9627_v44 = vld [vmem:[%s14861_s2 + $0x100] sm:$0xff]  ;;  %v9628_v42 = vld [vmem:[%s14861_s2 + $0x48] sm:$0xff]  ;;  %v9635_v1 = vld [vmem:[%s14861_s2 + $0x110] sm:$0xff] }
 0x461   : > { %8850 = vmatprep.subr.mxu0 %v2058_v40  ;;  %v7944_v60 = vadd.f32 %v7943_v61, %v7942_v33  ;;  %v2048_v27 = vmul.f32 %v9624_v35, %v1907_v63  ;;  %v9626_v33 = vld [vmem:[%s14861_s2 + $0x108] sm:$0xff]  ;;  %v9632_v61 = vld [vmem:[%s14861_s2 + $0x98] sm:$0xff] }
 0x462   : > { %3619 = vmatmul.mubr.f32.gmra.mxu0 %v15231_v57  ;;  %v7945_v38 = vpop.f32.mrf.mxu0  ;;  %v9636_v57 = vld [vmem:[%s14861_s2 + $0x138] sm:$0xff] }
 0x463   : > { %3709 = vmatmul.mubr.f32.gmra.mxu1 %v9608_v51  ;;  %8851 = vmatpush3.msra.mxu0 %v2058_v40  ;;  %v12666_v20 = vadd.f32 %v7944_v60, %v7888_v28  ;;  %v9622_v40 = vld [vmem:[%s14861_s2 + $0x20] sm:$0xff]  ;;  %v9631_v28 = vld [vmem:[%s14861_s2 + $0x128] sm:$0xff] }
 0x464   : > { %8852 = vmatprep.subr.mxu0 %v2057_v25  ;;  %3623 = vmatprep.mubr.f32.mxu0 %v15232_v19  ;;  %v7946_v3 = vpop.f32.mrf.mxu0 }
 0x465   : > { %8853 = vmatpush3.msra.mxu0 %v2057_v25  ;;  %3713 = vmatprep.mubr.f32.mxu1 %v9609_v39  ;;  %v7947_v54 = vadd.f32 %v7946_v3, %v7945_v38  ;;  %v9634_v25 = vld [vmem:[%s14861_s2 + $0xe8] sm:$0xff] }
 0x466   : > { %8854 = vmatprep.subr.mxu0 %v2056_v18  ;;  %3624 = vmatmul.mubr.f32.gmra.mxu0 %v15233_v43 }
 0x467   : > { %3714 = vmatmul.mubr.f32.gmra.mxu1 %v9612_v8  ;;  %8855 = vmatpush3.msra.mxu0 %v2056_v18  ;;  %v12682_v23 = vadd.f32 %v7947_v54, %v7891_v24 }
 0x468   : > { %8856 = vmatprep.subr.mxu0 %v2055_v45  ;;  %3628 = vmatprep.mubr.f32.mxu0 %v15234_v9 }
 0x469   : > { %8857 = vmatpush3.msra.mxu0 %v2055_v45  ;;  %3718 = vmatprep.mubr.f32.mxu1 %v9613_v6 }
 0x46a   : > { %8858 = vmatprep.subr.mxu0 %v2054_v50  ;;  %3629 = vmatmul.mubr.f32.gmra.mxu0 %v15235_v59 }
 0x46b   : > { %3719 = vmatmul.mubr.f32.gmra.mxu1 %v9616_v7  ;;  %8859 = vmatpush3.msra.mxu0 %v2054_v50 }
 0x46c   : > { %8860 = vmatprep.subr.mxu0 %v2053_v30  ;;  %3633 = vmatprep.mubr.f32.mxu0 %v15236_v62 }
 0x46d   : > { %8861 = vmatpush3.msra.mxu0 %v2053_v30  ;;  %3723 = vmatprep.mubr.f32.mxu1 %v9617_v58 }
 0x46e   : > { %8862 = vmatprep.subr.mxu0 %v2052_v49  ;;  %3634 = vmatmul.mubr.f32.gmra.mxu0 %v15237_v16 }
 0x46f   : > { %3724 = vmatmul.mubr.f32.gmra.mxu1 %v9620_v37  ;;  %8863 = vmatpush3.msra.mxu0 %v2052_v49 }
 0x470   : > { %8864 = vmatprep.subr.mxu0 %v2051_v29  ;;  %3728 = vmatprep.mubr.f32.mxu1 %v9621_v14 }
 0x471   : > { %8865 = vmatpush3.msra.mxu0 %v2051_v29  ;;  %8872 = vmatprep.mubr.f32.mxu0 %v9622_v40 }
 0x472   : > { %8866 = vmatprep.subr.mxu0 %v2050_v4 }
 0x473   : > { %3729 = vmatmul.mubr.f32.gmra.mxu1 %v9625_v17  ;;  %8867 = vmatpush3.msra.mxu0 %v2050_v4 }
 0x474   : > { %8868 = vmatprep.subr.mxu0 %v2049_v10  ;;  %3733 = vmatprep.mubr.f32.mxu1 %v9626_v33 }
 0x475   : > { %8869 = vmatpush3.msra.mxu0 %v2049_v10 }
 0x476   : > { %8870 = vmatprep.subr.mxu0 %v2048_v27 }
 0x477   : > { %3734 = vmatmul.mubr.f32.gmra.mxu1 %v9627_v44  ;;  %8871 = vmatpush3.msra.mxu0 %v2048_v27 }
 0x478   : > { %8873 = vmatmul.mubr.f32.vlgmr.msra.gmra.mxu0 %v9628_v42  ;;  %3738 = vmatprep.mubr.f32.mxu1 %v9629_v47 }
 0x479   : > { %8875 = vmatprep.mubr.f32.mxu0 %v9630_v22 }
 0x47b   : > { %3739 = vmatmul.mubr.f32.gmra.mxu1 %v9631_v28 }
 0x47c   : > { %8876 = vmatmul.mubr.f32.gmra.mxu0 %v9632_v61 }
 0x47d   : > { %8878 = vmatprep.mubr.f32.mxu0 %v9633_v36 }
 0x480   : > { %8879 = vmatmul.mubr.f32.gmra.mxu0 %v9634_v25 }
 0x481   : > { %8881 = vmatprep.mubr.f32.mxu0 %v9635_v1 }
 0x484   : > { %8882 = vmatmul.mubr.f32.gmra.mxu0 %v9636_v57 }
 0x485   : > { %5292 = vmatprep.mubr.f32.mxu0 %v15220_v0 }
 0x4a0   : > { %v8786_v34 = vpop.f32.mrf.mxu0 }
 0x4a1   : > { %v12761_v18 = vadd.f32 %v8786_v34, %v12563_v32 }
 0x4a2   : > { %v12763_v60 = vpop.f32.mrf.mxu0 }
 0x4a3   : > { %15238 = vst [vmem:[#allocation162_spill] sm:$0xff] %v12761_v18  ;;  %15239 = vst [vmem:[#allocation150_spill] sm:$0xff] %v12763_v60 }
 0x4a4   : > { %v8789_v51 = vpop.f32.mrf.mxu0 }
 0x4a5   : > { %v12766_v55 = vadd.f32 %v8789_v51, %v12607_v46 }
 0x4a6   : > { %v12768_v38 = vpop.f32.mrf.mxu0 }
 0x4a7   : > { %15240 = vst [vmem:[#allocation155_spill] sm:$0xff] %v12766_v55  ;;  %15241 = vst [vmem:[#allocation125_spill] sm:$0xff] %v12768_v38 }
 0x4a8   : > { %v8792_v19 = vpop.f32.mrf.mxu0 }
 0x4a9   : > { %v12771_v24 = vadd.f32 %v8792_v19, %v12651_v31 }
 0x4aa   : > { %v12773_v39 = vpop.f32.mrf.mxu0 }
 0x4ab   : > { %15242 = vst [vmem:[#allocation167_spill] sm:$0xff] %v12771_v24 }
 0x4ac   : > { %v8795_v3 = vpop.f32.mrf.mxu0 }
 0x4ad   : > { %v12776_v0 = vadd.f32 %v8795_v3, %v12682_v23 }
 0x4ae   : > { %v12778_v32 = vpop.f32.mrf.mxu0 }
 0x4c1   : > { %v8004_v12 = vpop.f32.mrf.mxu0 }
 0x4c3   : > { %v8005_v45 = vpop.f32.mrf.mxu0 }
 0x4c4   : > { %v8006_v49 = vadd.f32 %v8005_v45, %v8004_v12 }
 0x4c5   : > { %v8007_v43 = vpop.f32.mrf.mxu0 }
 0x4c7   : > { %v8008_v15 = vpop.f32.mrf.mxu0 }
 0x4c8   : > { %v8009_v29 = vadd.f32 %v8008_v15, %v8007_v43 }
 0x4c9   : > { %v8010_v46 = vpop.f32.mrf.mxu0 }
 0x4cb   : > { %v8011_v50 = vpop.f32.mrf.mxu0 }
 0x4cc   : > { %v8012_v37 = vadd.f32 %v8011_v50, %v8010_v46 }
 0x4cd   : > { %v8013_v54 = vpop.f32.mrf.mxu0 }
 0x4cf   : > { %v8014_v8 = vpop.f32.mrf.mxu0 }
 0x4d0   : > { %v8015_v27 = vadd.f32 %v8014_v8, %v8013_v54 }
 0x4d1   : > { %v8016_v9 = vpop.f32.mrf.mxu0 }
 0x4d3   : > { %v8017_v11 = vpop.f32.mrf.mxu0 }
 0x4d4   : > { %v8018_v47 = vadd.f32 %v8017_v11, %v8016_v9 }
 0x4d5   : > { %v8019_v31 = vpop.f32.mrf.mxu0 }
 0x4d7   : > { %v8020_v6 = vpop.f32.mrf.mxu0 }
 0x4d8   : > { %v8021_v25 = vadd.f32 %v8020_v6, %v8019_v31 }
 0x4da   : > { %v8022_v48 = vpop.f32.mrf.mxu0 }
 0x4dc   : > { %v8023_v13 = vpop.f32.mrf.mxu0 }
 0x4dd   : > { %v8024_v19 = vadd.f32 %v8023_v13, %v8022_v48 }
 0x4df   : > { %v8025_v30 = vpop.f32.mrf.mxu0 }
 0x4e1   : > { %v8026_v59 = vpop.f32.mrf.mxu0 }
 0x4e2   : > { %v8027_v46 = vadd.f32 %v8026_v59, %v8025_v30 }
 0x4e4   : > { %v8060_v23 = vpop.f32.mrf.mxu0 }
 0x4e6   : > { %v8061_v5 = vpop.f32.mrf.mxu0 }
 0x4e7   : > { %v8062_v7 = vadd.f32 %v8061_v5, %v8060_v23 }
 0x4e9   : > { %v12780_v58 = vadd.f32 %v8062_v7, %v8006_v49 }
 0x4ea   : > { %v8063_v62 = vpop.f32.mrf.mxu0 }
 0x4eb   : > { %15243 = vst [vmem:[#allocation161_spill] sm:$0xff] %v12780_v58 }
 0x4ec   : > { %v8064_v56 = vpop.f32.mrf.mxu0 }
 0x4ed   : > { %v8065_v16 = vadd.f32 %v8064_v56, %v8063_v62 }
 0x4ef   : > { %v8066_v52 = vpop.f32.mrf.mxu0  ;;  %v3356_v4 = vadd.f32 %v8065_v16, %v8009_v29 }
 0x4f1   : > { %v8067_v2 = vpop.f32.mrf.mxu0 }
 0x4f2   : > { %v8068_v63 = vadd.f32 %v8067_v2, %v8066_v52 }
 0x4f4   : > { %v8069_v14 = vpop.f32.mrf.mxu0  ;;  %v12782_v40 = vadd.f32 %v8068_v63, %v8012_v37 }
 0x4f5   : > { %v8830_v26 = vpop.f32.mrf.mxu1 }
 0x4f6   : > { %15244 = vst [vmem:[#allocation168_spill] sm:$0xff] %v12782_v40  ;;  %v8070_v10 = vpop.f32.mrf.mxu0  ;;  %v12784_v35 = vadd.f32 %v8830_v26, %v3356_v4 }
 0x4f7   : > { %v8071_v17 = vadd.f32 %v8070_v10, %v8069_v14  ;;  %v12790_v15 = vpop.f32.mrf.mxu1 }
 0x4f8   : > { %15245 = vst [vmem:[#allocation146_spill] sm:$0xff] %v12784_v35  ;;  %15247 = vst [vmem:[#allocation123_spill] sm:$0xff] %v12790_v15 }
 0x4f9   : > { %v8072_v33 = vpop.f32.mrf.mxu0  ;;  %v3366_v44 = vadd.f32 %v8071_v17, %v8015_v27 }
 0x4fb   : > { %v8073_v42 = vpop.f32.mrf.mxu0 }
 0x4fc   : > { %v8074_v22 = vadd.f32 %v8073_v42, %v8072_v33 }
 0x4fe   : > { %v8075_v28 = vpop.f32.mrf.mxu0  ;;  %v12786_v61 = vadd.f32 %v8074_v22, %v8018_v47 }
 0x500   : > { %15246 = vst [vmem:[#allocation151_spill] sm:$0xff] %v12786_v61  ;;  %v8076_v36 = vpop.f32.mrf.mxu0 }
 0x501   : > { %v8077_v1 = vadd.f32 %v8076_v36, %v8075_v28 }
 0x503   : > { %v8078_v57 = vpop.f32.mrf.mxu0  ;;  %v3376_v34 = vadd.f32 %v8077_v1, %v8021_v25  ;;  %v3532_v25 = vpop.permute.xlu0 %3531 }
 0x505   : > { %v8079_v51 = vpop.f32.mrf.mxu0 }
 0x506   : > { %v8080_v3 = vadd.f32 %v8079_v51, %v8078_v57  ;;  %v3527_v57 = vpop.permute.xlu1 %3526 }
 0x508   : > { %v8081_v12 = vpop.f32.mrf.mxu0  ;;  %v12788_v45 = vadd.f32 %v8080_v3, %v8024_v19 }
 0x50a   : > { %v8082_v43 = vpop.f32.mrf.mxu0 }
 0x50b   : > { %v8083_v50 = vadd.f32 %v8082_v43, %v8081_v12  ;;  %v3517_v12 = vpop.permute.xlu0 %3516 }
 0x50d   : > { %v3386_v54 = vadd.f32 %v8083_v50, %v8027_v46  ;;  %v3522_v50 = vpop.permute.xlu1 %3521 }
 0x50e   : > { %v8833_v8 = vpop.f32.mrf.mxu1  ;;  %v12792_v9 = vpop.f32.mrf.mxu0 }
 0x50f   : > { %v12794_v11 = vadd.f32 %v8833_v8, %v3366_v44  ;;  %v3507_v21 = vpop.permute.xlu0 %3506 }
 0x510   : > { %v12796_v31 = vpop.f32.mrf.mxu1  ;;  %v12798_v6 = vpop.f32.mrf.mxu0 }
 0x511   : > { %15248 = vst [vmem:[#allocation160_spill] sm:$0xff] %v12794_v11  ;;  %15249 = vst [vmem:[#allocation141_spill] sm:$0xff] %v12796_v31 }
 0x514   : > { %v8836_v48 = vpop.f32.mrf.mxu1  ;;  %v12800_v13 = vpop.f32.mrf.mxu0 }
 0x515   : > { %v12802_v23 = vadd.f32 %v8836_v48, %v3376_v34 }
 0x516   : > { %v12804_v5 = vpop.f32.mrf.mxu0  ;;  %v12806_v49 = vpop.f32.mrf.mxu1 }
 0x517   : > { %15250 = vst [vmem:[#allocation147_spill] sm:$0xff] %v12802_v23  ;;  %15251 = vst [vmem:[#allocation171_spill] sm:$0xff] %v12806_v49  ;;  %v3512_v23 = vpop.permute.xlu1 %3511 }
 0x51a   : > { %v8839_v30 = vpop.f32.mrf.mxu1  ;;  %v8146_v59 = vpop.f32.mrf.mxu0 }
 0x51b   : > { %v12808_v7 = vadd.f32 %v8839_v30, %v3386_v54 }
 0x51c   : > { %v8147_v62 = vpop.f32.mrf.mxu0  ;;  %v12810_v56 = vpop.f32.mrf.mxu1 }
 0x51d   : > { %v8148_v58 = vadd.f32 %v8147_v62, %v8146_v59 }
 0x51e   : > { %v8149_v29 = vpop.f32.mrf.mxu0 }
 0x51f   : > { %v8196_v16 = vpop.f32.mrf.mxu1 }
 0x520   : > { %v8150_v52 = vpop.f32.mrf.mxu0 }
 0x521   : > { %v8197_v4 = vpop.f32.mrf.mxu1  ;;  %v8151_v38 = vadd.f32 %v8150_v52, %v8149_v29 }
 0x522   : > { %v8152_v2 = vpop.f32.mrf.mxu0  ;;  %v8198_v52 = vadd.f32 %v8197_v4, %v8196_v16 }
 0x523   : > { %v12812_v37 = vpop.f32.mrf.mxu1  ;;  %v3616_v29 = vadd.f32 %v8151_v38, %v3512_v23 }
 0x524   : > { %v8153_v63 = vpop.f32.mrf.mxu0 }
 0x525   : > { %v12814_v14 = vpop.f32.mrf.mxu1  ;;  %v8154_v54 = vadd.f32 %v8153_v63, %v8152_v2 }
 0x526   : > { %v8155_v26 = vpop.f32.mrf.mxu0 }
 0x527   : > { %v8202_v10 = vpop.f32.mrf.mxu1  ;;  %v3621_v55 = vadd.f32 %v8154_v54, %v3517_v12 }
 0x528   : > { %v8156_v27 = vpop.f32.mrf.mxu0 }
 0x529   : > { %v8203_v17 = vpop.f32.mrf.mxu1  ;;  %v8157_v30 = vadd.f32 %v8156_v27, %v8155_v26  ;;  %v8142_v26 = vadd.f32 %v12798_v6, %v12792_v9  ;;  %v3611_v27 = vadd.f32 %v8148_v58, %v3507_v21  ;;  %v8201_v21 = vadd.f32 %v12814_v14, %v12812_v37 }
 0x52a   : > { %v8158_v33 = vpop.f32.mrf.mxu0  ;;  %v8204_v53 = vadd.f32 %v8203_v17, %v8202_v10 }
 0x52b   : > { %v8205_v44 = vpop.f32.mrf.mxu1  ;;  %v3626_v49 = vadd.f32 %v8157_v30, %v3522_v50 }
 0x52c   : > { %v8159_v47 = vpop.f32.mrf.mxu0  ;;  %v3716_v10 = vadd.f32 %v8204_v53, %v3611_v27 }
 0x52d   : > { %v8206_v42 = vpop.f32.mrf.mxu1  ;;  %v8160_v11 = vadd.f32 %v8159_v47, %v8158_v33 }
 0x52e   : > { %v8161_v36 = vpop.f32.mrf.mxu0 }
 0x52f   : > { %v8208_v22 = vpop.f32.mrf.mxu1  ;;  %v3631_v62 = vadd.f32 %v8160_v11, %v3527_v57 }
 0x530   : > { %v8162_v51 = vpop.f32.mrf.mxu0 }
 0x531   : > { %v8209_v28 = vpop.f32.mrf.mxu1  ;;  %v8163_v18 = vadd.f32 %v8162_v51, %v8161_v36 }
 0x532   : > { %v8210_v35 = vadd.f32 %v8209_v28, %v8208_v22  ;;  %v8207_v22 = vadd.f32 %v8206_v42, %v8205_v44 }
 0x533   : > { %v8211_v1 = vpop.f32.mrf.mxu1  ;;  %v3636_v61 = vadd.f32 %v8163_v18, %v3532_v25  ;;  %v3497_v18 = vpop.permute.xlu0 %3496 }
 0x534   : > { %v3726_v63 = vadd.f32 %v8210_v35, %v3621_v55  ;;  %v3601_v9 = vadd.f32 %v8142_v26, %v3497_v18  ;;  %v3721_v58 = vadd.f32 %v8207_v22, %v3616_v29 }
 0x535   : > { %v8212_v34 = vpop.f32.mrf.mxu1 }
 0x536   : > { %v8213_v31 = vadd.f32 %v8212_v34, %v8211_v1  ;;  %v3706_v53 = vadd.f32 %v8198_v52, %v3601_v9 }
 0x537   : > { %v8214_v19 = vpop.f32.mrf.mxu1 }
 0x538   : > { %v12816_v3 = vpop.f32.mrf.mxu0  ;;  %v3731_v28 = vadd.f32 %v8213_v31, %v3626_v49 }
 0x539   : > { %v8215_v43 = vpop.f32.mrf.mxu1 }
 0x53a   : > { %v12818_v46 = vpop.f32.mrf.mxu0  ;;  %v8216_v2 = vadd.f32 %v8215_v43, %v8214_v19 }
 0x53b   : > { %v8217_v8 = vpop.f32.mrf.mxu1 }
 0x53c   : > { %v8877_v48 = vpop.f32.mrf.mxu0  ;;  %v3736_v35 = vadd.f32 %v8216_v2, %v3631_v62 }
 0x53d   : > { %v8218_v15 = vpop.f32.mrf.mxu1  ;;  %v3826_v23 = vadd.f32 %v8877_v48, %v3721_v58 }
 0x53e   : > { %v3820_v60 = vpop.f32.mrf.mxu0  ;;  %v8219_v40 = vadd.f32 %v8218_v15, %v8217_v8  ;;  %v8145_v15 = vadd.f32 %v12804_v5, %v12800_v13 }
 0x53f   : > { %v3821_v11 = vadd.f32 %v3820_v60, %v3716_v10  ;;  %v3811_v60 = vadd.f32 %v12818_v46, %v3706_v53  ;;  %v3860_v1 = vmul.f32 0.01, %v3826_v23  ;;  %vm3852_vm8 = vcmp.ge.f32.partialorder %v3826_v23, 0.0 }
 0x540   : > { %v8880_v24 = vpop.f32.mrf.mxu0  ;;  %v3741_v33 = vadd.f32 %v8219_v40, %v3636_v61  ;;  %v3502_v40 = vpop.permute.xlu1 %3501 }
 0x541   : > { %v3836_v47 = vadd.f32 %v8880_v24, %v3731_v28  ;;  %v3606_v38 = vadd.f32 %v8145_v15, %v3502_v40  ;;  %v3859_v37 = vmul.f32 0.01, %v3821_v11  ;;  %vm3851_vm7 = vcmp.ge.f32.partialorder %v3821_v11, 0.0 }
 0x542   : > { %v3830_v59 = vpop.f32.mrf.mxu0  ;;  %v3857_v51 = vmul.f32 0.01, %v3811_v60  ;;  %vm3849_vm9 = vcmp.ge.f32.partialorder %v3811_v60, 0.0  ;;  %v3868_v46 = vsel %vm3852_vm8, %v3826_v23, %v3860_v1 }
 0x543   : > { %v3831_v36 = vadd.f32 %v3830_v59, %v3726_v63  ;;  %v3862_v24 = vmul.f32 0.01, %v3836_v47  ;;  %v3711_v16 = vadd.f32 %v8201_v21, %v3606_v38  ;;  %vm3854_vm6 = vcmp.ge.f32.partialorder %v3836_v47, 0.0 }
 0x544   : > { %v8883_v17 = vpop.f32.mrf.mxu0  ;;  %v3867_v19 = vsel %vm3851_vm7, %v3821_v11, %v3859_v37  ;;  %v3883_v54 = vsel %vm3873_vm2, %v3868_v46, -inf }
 0x545   : > { %v3846_v55 = vadd.f32 %v8883_v17, %v3741_v33  ;;  %v3861_v61 = vmul.f32 0.01, %v3831_v36  ;;  %vm3853_vm4 = vcmp.ge.f32.partialorder %v3831_v36, 0.0  ;;  %v3816_v25 = vadd.f32 %v12816_v3, %v3711_v16 }
 0x546   : > { %v3840_v31 = vpop.f32.mrf.mxu0  ;;  %v3870_v57 = vsel %vm3854_vm6, %v3836_v47, %v3862_v24  ;;  %v3880_v50 = vsel %vm3873_vm2, %v3867_v19, -inf  ;;  %v3865_v3 = vsel %vm3849_vm9, %v3811_v60, %v3857_v51 }
 0x547   : > { %v3864_v6 = vmul.f32 0.01, %v3846_v55  ;;  %v3841_v13 = vadd.f32 %v3840_v31, %v3736_v35  ;;  %vm3856_vm3 = vcmp.ge.f32.partialorder %v3846_v55, 0.0  ;;  %v3869_v44 = vsel %vm3853_vm4, %v3831_v36, %v3861_v61 }
 0x548   : > { %v3886_v34 = vsel %vm3873_vm2, %v3869_v44, -inf  ;;  %v3889_v12 = vsel %vm3873_vm2, %v3870_v57, -inf  ;;  %v3858_v43 = vmul.f32 0.01, %v3816_v25  ;;  %vm3850_vm10 = vcmp.ge.f32.partialorder %v3816_v25, 0.0 }
 0x549   : > { %v3863_v5 = vmul.f32 0.01, %v3841_v13  ;;  %v3872_v49 = vsel %vm3856_vm3, %v3846_v55, %v3864_v6  ;;  %vm3855_vm5 = vcmp.ge.f32.partialorder %v3841_v13, 0.0  ;;  %v3874_v48 = vsel %vm3873_vm2, %v3865_v3, -inf }
 0x54a   : > { %v3895_v4 = vsel %vm3873_vm2, %v3872_v49, -inf  ;;  %v3866_v8 = vsel %vm3850_vm10, %v3816_v25, %v3858_v43  ;;  %vm6679_vm3 = vcmask 72704   ;;  %vm6991_vm4 = vcmask 7168  }
 0x54b   : > { %3896 = vmax.xlane.f32.xlu1 %v3895_v4  ;;  %v3871_v14 = vsel %vm3855_vm5, %v3841_v13, %v3863_v5  ;;  %v3877_v30 = vsel %vm3873_vm2, %v3866_v8, -inf }
 0x54c   : > { %v3892_v42 = vsel %vm3873_vm2, %v3871_v14, -inf }
 0x54d   : > { %3893 = vmax.xlane.f32.xlu0 %v3892_v42  ;;  %v4042_v42 = vld [vmem:[%s14512_s3] sm:$0xff] }
 0x54e   : > { %8900 = vmatprep.mubr.msk.f32.mxu1 %vm758_vm1, %v4042_v42  ;;  %v15264_v42 = vld [vmem:[#allocation161_spill] sm:$0xff] }
 0x54f   : > { %3887 = vmax.xlane.f32.xlu1 %v3886_v34 }
 0x551   : > { %3890 = vmax.xlane.f32.xlu0 %v3889_v12 }
 0x553   : > { %3881 = vmax.xlane.f32.xlu1 %v3880_v50  ;;  %v7578_v50 = vld [vmem:[%s14519_s10] ss:$0 sm:$0xff] }
 0x555   : > { %3884 = vmax.xlane.f32.xlu0 %v3883_v54 }
 0x557   : > { %3875 = vmax.xlane.f32.xlu1 %v3874_v48  ;;  %v3486_v48 = vadd.f32 %v12810_v56, %v12788_v45  ;;  %v2761_v45 = vadd.f32 %v12773_v39, %v12635_v41  ;;  %v15252_v56 = vld [vmem:[#allocation151_spill] sm:$0xff] }
 0x559   : > { %3878 = vmax.xlane.f32.xlu0 %v3877_v30 }
 0x5d4   : > { %v3897_v2 = vpop.xlane.xlu1 %3896 }
 0x5d5   : > { %v3905_v63 = vsub.f32 %v3872_v49, %v3897_v2 }
 0x5d6   : > { %v3894_v26 = vpop.xlane.xlu0 %3893 }
 0x5d7   : > { %v3920_v27 = vmul.f32 1.442695, %v3905_v63  ;;  %v3904_v22 = vsub.f32 %v3871_v14, %v3894_v26 }
 0x5d8   : > { %v3888_v59 = vpop.xlane.xlu1 %3887 }
 0x5d9   : > { %9450 = vpow2.f32 %v3920_v27  ;;  %v3918_v62 = vmul.f32 1.442695, %v3904_v22  ;;  %v3902_v28 = vsub.f32 %v3869_v44, %v3888_v59 }
 0x5da   : > { %v3891_v36 = vpop.xlane.xlu0 %3890 }
 0x5db   : > { %9452 = vpow2.f32 %v3918_v62  ;;  %v3914_v33 = vmul.f32 1.442695, %v3902_v28  ;;  %v3903_v15 = vsub.f32 %v3870_v57, %v3891_v36 }
 0x5dc   : > { %v3882_v29 = vpop.xlane.xlu1 %3881 }
 0x5dd   : > { %9454 = vpow2.f32 %v3914_v33  ;;  %v3916_v52 = vmul.f32 1.442695, %v3903_v15  ;;  %v3900_v10 = vsub.f32 %v3867_v19, %v3882_v29  ;;  %v15254_v33 = vld [vmem:[#allocation147_spill] sm:$0xff] }
 0x5de   : > { %v3885_v17 = vpop.xlane.xlu0 %3884  ;;  %v15255_v29 = vld [vmem:[#allocation167_spill] sm:$0xff] }
 0x5df   : > { %9456 = vpow2.f32 %v3916_v52  ;;  %v3910_v18 = vmul.f32 1.442695, %v3900_v10  ;;  %v3901_v47 = vsub.f32 %v3868_v46, %v3885_v17 }
 0x5e0   : > { %v3876_v55 = vpop.xlane.xlu1 %3875 }
 0x5e1   : > { %9458 = vpow2.f32 %v3910_v18  ;;  %v3912_v35 = vmul.f32 1.442695, %v3901_v47  ;;  %v3898_v9 = vsub.f32 %v3865_v3, %v3876_v55  ;;  %v15256_v55 = vld [vmem:[#allocation127_spill] sm:$0xff] }
 0x5e2   : > { %v3879_v21 = vpop.xlane.xlu0 %3878 }
 0x5e3   : > { %9460 = vpow2.f32 %v3912_v35  ;;  %v3906_v58 = vmul.f32 1.442695, %v3898_v9  ;;  %v3899_v11 = vsub.f32 %v3866_v8, %v3879_v21  ;;  %v2771_v8 = vadd.f32 %v12778_v32, %v12666_v20  ;;  %v15257_v35 = vld [vmem:[#allocation125_spill] sm:$0xff]  ;;  %v15258_v21 = vld [vmem:[#allocation168_spill] sm:$0xff] }
 0x5e4   : > { %v2751_v9 = vadd.f32 %v15257_v35, %v15256_v55  ;;  %v4066_v55 = vld [vmem:[%s14512_s3 + $0xc0] sm:$0xff]  ;;  %v4067_v35 = vld [vmem:[%s14512_s3 + $0xc8] sm:$0xff] }
 0x5e5   : > { %9462 = vpow2.f32 %v3906_v58  ;;  %v3908_v31 = vmul.f32 1.442695, %v3899_v11  ;;  %v15259_v58 = vld [vmem:[#allocation141_spill] sm:$0xff] }
 0x5e6   : > { %v9451_v40 = vpop.eup %9450  ;;  %v3466_v11 = vadd.f32 %v15259_v58, %v15258_v21  ;;  %v4069_v21 = vld [vmem:[%s14512_s3 + $0xd8] sm:$0xff]  ;;  %v4070_v58 = vld [vmem:[%s14512_s3 + $0xe0] sm:$0xff] }
 0x5e7   : > { %9464 = vpow2.f32 %v3908_v31  ;;  %v3943_v61 = vsel %vm3873_vm2, %v9451_v40, 0.0 }
 0x5e8   : > { %v9453_v6 = vpop.eup %9452  ;;  %3944 = vadd.xlane.f32.xlu0 %v3943_v61  ;;  %v15260_v61 = vld [vmem:[#allocation160_spill] sm:$0xff] }
 0x5e9   : > { %v3940_v13 = vsel %vm3873_vm2, %v9453_v6, 0.0 }
 0x5ea   : > { %v9455_v38 = vpop.eup %9454  ;;  %3941 = vadd.xlane.f32.xlu1 %v3940_v13  ;;  %v15261_v13 = vld [vmem:[#allocation155_spill] sm:$0xff] }
 0x5eb   : > { %v3934_v24 = vsel %vm3873_vm2, %v9455_v38, 0.0 }
 0x5ec   : > { %v9457_v53 = vpop.eup %9456 }
 0x5ed   : > { %v3937_v23 = vsel %vm3873_vm2, %v9457_v53, 0.0 }
 0x5ee   : > { %v12840_v5 = vpop.eup %9458  ;;  %3938 = vadd.xlane.f32.xlu0 %v3937_v23  ;;  %3935 = vadd.xlane.f32.xlu1 %v3934_v24 }
 0x5ef   : > { %v3928_v4 = vsel %vm3873_vm2, %v12840_v5, 0.0 }
 0x5f0   : > { %v9461_v49 = vpop.eup %9460 }
 0x5f1   : > { %v3931_v16 = vsel %vm3873_vm2, %v9461_v49, 0.0 }
 0x5f2   : > { %v12845_v60 = vpop.eup %9462  ;;  %3932 = vadd.xlane.f32.xlu0 %v3931_v16  ;;  %3929 = vadd.xlane.f32.xlu1 %v3928_v4 }
 0x5f3   : > { %v3922_v44 = vsel %vm3873_vm2, %v12845_v60, 0.0 }
 0x5f4   : > { %v12847_v37 = vpop.eup %9464 }
 0x5f5   : > { %v3925_v14 = vsel %vm3873_vm2, %v12847_v37, 0.0 }
 0x5f6   : > { %3926 = vadd.xlane.f32.xlu0 %v3925_v14  ;;  %3923 = vadd.xlane.f32.xlu1 %v3922_v44  ;;  %v15263_v14 = vld [vmem:[#allocation150_spill] sm:$0xff] }
 0x671   : > { %v3945_v25 = vpop.xlane.xlu0 %3944 }
 0x672   : > { %9466 = vrcp.f32 %v3945_v25  ;;  %v15265_v25 = vld [vmem:[#allocation123_spill] sm:$0xff] }
 0x673   : > { %v3942_v1 = vpop.xlane.xlu1 %3941 }
 0x674   : > { %9468 = vrcp.f32 %v3942_v1  ;;  %v3456_v1 = vadd.f32 %v15265_v25, %v15264_v42  ;;  %v4083_v42 = vld [vmem:[%s14512_s3 + $0x148] sm:$0xff]  ;;  %v4084_v25 = vld [vmem:[%s14512_s3 + $0x150] sm:$0xff] }
 0x677   : > { %v3939_v57 = vpop.xlane.xlu0 %3938  ;;  %v3936_v34 = vpop.xlane.xlu1 %3935 }
 0x678   : > { %9470 = vrcp.f32 %v3939_v57 }
 0x679   : > { %9472 = vrcp.f32 %v3936_v34 }
 0x67b   : > { %v3933_v51 = vpop.xlane.xlu0 %3932  ;;  %v3930_v19 = vpop.xlane.xlu1 %3929 }
 0x67c   : > { %9474 = vrcp.f32 %v3933_v51  ;;  %v15266_v51 = vld [vmem:[#allocation146_spill] sm:$0xff] }
 0x67d   : > { %9476 = vrcp.f32 %v3930_v19 }
 0x67f   : > { %v9467_v12 = vpop.eup %9466  ;;  %v3927_v43 = vpop.xlane.xlu0 %3926 }
 0x680   : > { %v3924_v46 = vpop.xlane.xlu1 %3923  ;;  %9478 = vrcp.f32 %v3927_v43  ;;  %v3961_v3 = vmul.f32 %v9467_v12, %v9451_v40  ;;  %v15267_v12 = vld [vmem:[#allocation162_spill] sm:$0xff] }
 0x681   : > { %v9469_v54 = vpop.eup %9468  ;;  %9480 = vrcp.f32 %v3924_v46 }
 0x682   : > { %v4041_v30 = vmul.f32 %v7578_v50, %v3961_v3  ;;  %v3960_v2 = vmul.f32 %v9469_v54, %v9453_v6  ;;  %v12865_v63 = vmul.f32 %v3961_v3, %v12808_v7  ;;  %v12868_v26 = vmul.f32 %v3961_v3, %v12776_v0  ;;  %v15253_v7 = vld [vmem:[#allocation171_spill] sm:$0xff] }
 0x683   : > { %v3476_v28 = vadd.f32 %v15253_v7, %v15252_v56  ;;  %v4044_v54 = vld [vmem:[%s14512_s3 + $0x10] sm:$0xff]  ;;  %v4055_v56 = vld [vmem:[%s14512_s3 + $0x68] sm:$0xff] }
 0x684   : > { %8884 = vmatprep.subr.mxu1 %v4041_v30  ;;  %v4040_v27 = vmul.f32 %v7578_v50, %v3960_v2  ;;  %v12870_v22 = vmul.f32 %v3960_v2, %v3486_v48  ;;  %v12872_v59 = vmul.f32 %v3960_v2, %v2771_v8  ;;  %v4045_v8 = vld [vmem:[%s14512_s3 + $0x18] sm:$0xff]  ;;  %v4047_v48 = vld [vmem:[%s14512_s3 + $0x28] sm:$0xff]  ;;  %v4056_v7 = vld [vmem:[%s14512_s3 + $0x70] sm:$0xff] }
 0x685   : > { %v9471_v62 = vpop.eup %9470  ;;  %8885 = vmatpush3.msra.mxu1 %v4041_v30  ;;  %v4048_v30 = vld [vmem:[%s14512_s3 + $0x30] sm:$0xff]  ;;  %v4049_v2 = vld [vmem:[%s14512_s3 + $0x38] sm:$0xff] }
 0x686   : > { %v9473_v20 = vpop.eup %9472  ;;  %8886 = vmatprep.subr.mxu1 %v4040_v27  ;;  %v3959_v32 = vmul.f32 %v9471_v62, %v9457_v53  ;;  %v4051_v62 = vld [vmem:[%s14512_s3 + $0x48] sm:$0xff] }
 0x687   : > { %8887 = vmatpush3.msra.mxu1 %v4040_v27  ;;  %v3958_v0 = vmul.f32 %v9473_v20, %v9455_v38  ;;  %v4050_v27 = vld [vmem:[%s14512_s3 + $0x40] sm:$0xff]  ;;  %v4052_v20 = vld [vmem:[%s14512_s3 + $0x50] sm:$0xff] }
 0x688   : > { %v4039_v36 = vmul.f32 %v7578_v50, %v3959_v32  ;;  %v12879_v15 = vmul.f32 %v3959_v32, %v15254_v33  ;;  %v12882_v52 = vmul.f32 %v3959_v32, %v15255_v29  ;;  %v4053_v32 = vld [vmem:[%s14512_s3 + $0x58] sm:$0xff]  ;;  %v4060_v33 = vld [vmem:[%s14512_s3 + $0x90] sm:$0xff] }
 0x689   : > { %v9475_v10 = vpop.eup %9474  ;;  %v12884_v17 = vmul.f32 %v3958_v0, %v3476_v28  ;;  %v12886_v18 = vmul.f32 %v3958_v0, %v2761_v45  ;;  %v4038_v41 = vmul.f32 %v7578_v50, %v3958_v0  ;;  %v4054_v45 = vld [vmem:[%s14512_s3 + $0x60] sm:$0xff]  ;;  %v4057_v28 = vld [vmem:[%s14512_s3 + $0x78] sm:$0xff] }
 0x68a   : > { %v9477_v47 = vpop.eup %9476  ;;  %8888 = vmatprep.subr.mxu1 %v4039_v36  ;;  %v3957_v39 = vmul.f32 %v9475_v10, %v9461_v49  ;;  %v4058_v0 = vld [vmem:[%s14512_s3 + $0x80] sm:$0xff]  ;;  %v4061_v29 = vld [vmem:[%s14512_s3 + $0x98] sm:$0xff] }
 0x68b   : > { %8889 = vmatpush3.msra.mxu1 %v4039_v36  ;;  %v3956_v31 = vmul.f32 %v9477_v47, %v12840_v5  ;;  %v15262_v5 = vld [vmem:[#allocation166_spill] sm:$0xff]  ;;  %v4062_v10 = vld [vmem:[%s14512_s3 + $0xa0] sm:$0xff] }
 0x68c   : > { %8890 = vmatprep.subr.mxu1 %v4038_v41  ;;  %v4037_v40 = vmul.f32 %v7578_v50, %v3957_v39  ;;  %v12894_v6 = vmul.f32 %v3957_v39, %v15260_v61  ;;  %v12897_v38 = vmul.f32 %v3957_v39, %v15261_v13  ;;  %v2741_v44 = vadd.f32 %v15263_v14, %v15262_v5  ;;  %v4059_v36 = vld [vmem:[%s14512_s3 + $0x88] sm:$0xff]  ;;  %v4065_v39 = vld [vmem:[%s14512_s3 + $0xb8] sm:$0xff]  ;;  %v4074_v61 = vld [vmem:[%s14512_s3 + $0x100] sm:$0xff] }
 0x68d   : > { %v9479_v53 = vpop.eup %9478  ;;  %8891 = vmatpush3.msra.mxu1 %v4038_v41  ;;  %v12899_v23 = vmul.f32 %v3956_v31, %v3466_v11  ;;  %v12901_v24 = vmul.f32 %v3956_v31, %v2751_v9  ;;  %v4036_v16 = vmul.f32 %v7578_v50, %v3956_v31  ;;  %v4063_v47 = vld [vmem:[%s14512_s3 + $0xa8] sm:$0xff]  ;;  %v4064_v41 = vld [vmem:[%s14512_s3 + $0xb0] sm:$0xff]  ;;  %v4081_v14 = vld [vmem:[%s14512_s3 + $0x138] sm:$0xff] }
 0x68e   : > { %v9481_v49 = vpop.eup %9480  ;;  %8892 = vmatprep.subr.mxu1 %v4037_v40  ;;  %v3955_v4 = vmul.f32 %v9479_v53, %v12847_v37  ;;  %v4068_v9 = vld [vmem:[%s14512_s3 + $0xd0] sm:$0xff]  ;;  %v4071_v11 = vld [vmem:[%s14512_s3 + $0xe8] sm:$0xff] }
 0x68f   : > { %8893 = vmatpush3.msra.mxu1 %v4037_v40  ;;  %v3954_v57 = vmul.f32 %v9481_v49, %v12845_v60  ;;  %v4043_v60 = vld [vmem:[%s14512_s3 + $0x8] sm:$0xff]  ;;  %v4072_v31 = vld [vmem:[%s14512_s3 + $0xf0] sm:$0xff]  ;;  %v4073_v40 = vld [vmem:[%s14512_s3 + $0xf8] sm:$0xff] }
 0x690   : > { %8894 = vmatprep.subr.mxu1 %v4036_v16  ;;  %v4035_v34 = vmul.f32 %v7578_v50, %v3955_v4  ;;  %v12910_v19 = vmul.f32 %v3955_v4, %v15266_v51  ;;  %v12913_v43 = vmul.f32 %v3955_v4, %v15267_v12  ;;  %v4075_v13 = vld [vmem:[%s14512_s3 + $0x108] sm:$0xff]  ;;  %v4076_v53 = vld [vmem:[%s14512_s3 + $0x110] sm:$0xff]  ;;  %v4077_v49 = vld [vmem:[%s14512_s3 + $0x118] sm:$0xff] }
 0x691   : > { %8895 = vmatpush3.msra.mxu1 %v4036_v16  ;;  %v12915_v46 = vmul.f32 %v3954_v57, %v3456_v1  ;;  %v12917_v37 = vmul.f32 %v3954_v57, %v2741_v44  ;;  %v4034_v3 = vmul.f32 %v7578_v50, %v3954_v57  ;;  %v4046_v50 = vld [vmem:[%s14512_s3 + $0x20] sm:$0xff]  ;;  %v4079_v4 = vld [vmem:[%s14512_s3 + $0x128] sm:$0xff]  ;;  %v4080_v5 = vld [vmem:[%s14512_s3 + $0x130] sm:$0xff] }
 0x692   : > { %8896 = vmatprep.subr.mxu1 %v4035_v34  ;;  %v4078_v16 = vld [vmem:[%s14512_s3 + $0x120] sm:$0xff]  ;;  %v4085_v1 = vld [vmem:[%s14512_s3 + $0x158] sm:$0xff]  ;;  %v4088_v51 = vld [vmem:[%s14512_s3 + $0x170] sm:$0xff] }
 0x693   : > { %8897 = vmatpush3.msra.mxu1 %v4035_v34  ;;  %v4082_v44 = vld [vmem:[%s14512_s3 + $0x140] sm:$0xff]  ;;  %v4087_v34 = vld [vmem:[%s14512_s3 + $0x168] sm:$0xff]  ;;  %v4089_v12 = vld [vmem:[%s14512_s3 + $0x178] sm:$0xff] }
 0x694   : > { %8898 = vmatprep.subr.mxu1 %v4034_v3  ;;  %v4086_v57 = vld [vmem:[%s14512_s3 + $0x160] sm:$0xff] }
 0x695   : > { %8899 = vmatpush3.msra.mxu1 %v4034_v3  ;;  %v4090_v3 = vld [vmem:[%s14512_s3 + $0x180] sm:$0xff] }
 0x696   : > { %8901 = vmatmul.mubr.msk.f32.vlgmr.msra.gmra.mxu1 %vm758_vm1, %v4043_v60  ;;  %v4091_v60 = vld [vmem:[%s14512_s3 + $0x188] sm:$0xff] }
 0x697   : > { %8903 = vmatprep.mubr.msk.f32.mxu1 %vm758_vm1, %v4044_v54  ;;  %v4092_v54 = vld [vmem:[%s14512_s3 + $0x190] sm:$0xff] }
 0x69a   : > { %8904 = vmatmul.mubr.msk.f32.gmra.mxu1 %vm758_vm1, %v4045_v8  ;;  %v4093_v8 = vld [vmem:[%s14512_s3 + $0x198] sm:$0xff] }
 0x69b   : > { %8906 = vmatprep.mubr.msk.f32.mxu1 %vm758_vm1, %v4046_v50  ;;  %v4094_v50 = vld [vmem:[%s14512_s3 + $0x1a0] sm:$0xff] }
 0x69e   : > { %8907 = vmatmul.mubr.msk.f32.gmra.mxu1 %vm758_vm1, %v4047_v48  ;;  %v4095_v48 = vld [vmem:[%s14512_s3 + $0x1a8] sm:$0xff] }
 0x69f   : > { %8909 = vmatprep.mubr.msk.f32.mxu1 %vm758_vm1, %v4048_v30  ;;  %v4096_v30 = vld [vmem:[%s14512_s3 + $0x1b0] sm:$0xff] }
 0x6a2   : > { %8910 = vmatmul.mubr.msk.f32.gmra.mxu1 %vm758_vm1, %v4049_v2  ;;  %v4097_v2 = vld [vmem:[%s14512_s3 + $0x1b8] sm:$0xff] }
 0x6a3   : > { %8912 = vmatprep.mubr.msk.f32.mxu1 %vm758_vm1, %v4050_v27  ;;  %v4098_v27 = vld [vmem:[%s14512_s3 + $0x1c0] sm:$0xff] }
 0x6a6   : > { %8913 = vmatmul.mubr.msk.f32.gmra.mxu1 %vm758_vm1, %v4051_v62  ;;  %v4099_v62 = vld [vmem:[%s14512_s3 + $0x1c8] sm:$0xff] }
 0x6a7   : > { %8915 = vmatprep.mubr.msk.f32.mxu1 %vm758_vm1, %v4052_v20  ;;  %v4100_v20 = vld [vmem:[%s14512_s3 + $0x1d0] sm:$0xff] }
 0x6aa   : > { %8916 = vmatmul.mubr.msk.f32.gmra.mxu1 %vm758_vm1, %v4053_v32  ;;  %v4101_v32 = vld [vmem:[%s14512_s3 + $0x1d8] sm:$0xff] }
 0x6ab   : > { %8918 = vmatprep.mubr.msk.f32.mxu1 %vm758_vm1, %v4054_v45  ;;  %v4102_v45 = vld [vmem:[%s14512_s3 + $0x1e0] sm:$0xff] }
 0x6ae   : > { %8919 = vmatmul.mubr.msk.f32.gmra.mxu1 %vm758_vm1, %v4055_v56  ;;  %v4103_v56 = vld [vmem:[%s14512_s3 + $0x1e8] sm:$0xff] }
 0x6af   : > { %8921 = vmatprep.mubr.msk.f32.mxu1 %vm758_vm1, %v4056_v7  ;;  %v4104_v7 = vld [vmem:[%s14512_s3 + $0x1f0] sm:$0xff] }
 0x6b2   : > { %8922 = vmatmul.mubr.msk.f32.gmra.mxu1 %vm758_vm1, %v4057_v28  ;;  %v4105_v28 = vld [vmem:[%s14512_s3 + $0x1f8] sm:$0xff] }
 0x6b3   : > { %8924 = vmatprep.mubr.msk.f32.mxu1 %vm758_vm1, %v4058_v0  ;;  %v4106_v0 = vld [vmem:[%s14512_s3 + $0x200] sm:$0xff] }
 0x6b6   : > { %8925 = vmatmul.mubr.msk.f32.gmra.mxu1 %vm758_vm1, %v4059_v36  ;;  %v4107_v36 = vld [vmem:[%s14512_s3 + $0x208] sm:$0xff] }
 0x6b7   : > { %8927 = vmatprep.mubr.msk.f32.mxu1 %vm758_vm1, %v4060_v33  ;;  %v4108_v33 = vld [vmem:[%s14512_s3 + $0x210] sm:$0xff] }
 0x6ba   : > { %8928 = vmatmul.mubr.msk.f32.gmra.mxu1 %vm758_vm1, %v4061_v29  ;;  %v4109_v29 = vld [vmem:[%s14512_s3 + $0x218] sm:$0xff] }
 0x6bb   : > { %8930 = vmatprep.mubr.msk.f32.mxu1 %vm758_vm1, %v4062_v10  ;;  %v4110_v10 = vld [vmem:[%s14512_s3 + $0x220] sm:$0xff] }
 0x6be   : > { %8931 = vmatmul.mubr.msk.f32.gmra.mxu1 %vm758_vm1, %v4063_v47  ;;  %v4111_v47 = vld [vmem:[%s14512_s3 + $0x228] sm:$0xff] }
 0x6bf   : > { %8933 = vmatprep.mubr.msk.f32.mxu1 %vm758_vm1, %v4064_v41  ;;  %v4112_v41 = vld [vmem:[%s14512_s3 + $0x230] sm:$0xff] }
 0x6c2   : > { %8934 = vmatmul.mubr.msk.f32.gmra.mxu1 %vm758_vm1, %v4065_v39  ;;  %v4113_v39 = vld [vmem:[%s14512_s3 + $0x238] sm:$0xff] }
 0x6c3   : > { %8936 = vmatprep.mubr.msk.f32.mxu1 %vm758_vm1, %v4066_v55  ;;  %v4114_v55 = vld [vmem:[%s14512_s3 + $0x240] sm:$0xff] }
 0x6c6   : > { %8937 = vmatmul.mubr.msk.f32.gmra.mxu1 %vm758_vm1, %v4067_v35  ;;  %v4115_v35 = vld [vmem:[%s14512_s3 + $0x248] sm:$0xff] }
 0x6c7   : > { %8939 = vmatprep.mubr.msk.f32.mxu1 %vm758_vm1, %v4068_v9  ;;  %v4116_v9 = vld [vmem:[%s14512_s3 + $0x250] sm:$0xff] }
 0x6ca   : > { %8940 = vmatmul.mubr.msk.f32.gmra.mxu1 %vm758_vm1, %v4069_v21  ;;  %v4117_v21 = vld [vmem:[%s14512_s3 + $0x258] sm:$0xff] }
 0x6cb   : > { %8942 = vmatprep.mubr.msk.f32.mxu1 %vm758_vm1, %v4070_v58  ;;  %v4118_v58 = vld [vmem:[%s14512_s3 + $0x260] sm:$0xff] }
 0x6ce   : > { %8943 = vmatmul.mubr.msk.f32.gmra.mxu1 %vm758_vm1, %v4071_v11  ;;  %v4119_v11 = vld [vmem:[%s14512_s3 + $0x268] sm:$0xff] }
 0x6cf   : > { %8945 = vmatprep.mubr.msk.f32.mxu1 %vm758_vm1, %v4072_v31  ;;  %v4120_v31 = vld [vmem:[%s14512_s3 + $0x270] sm:$0xff] }
 0x6d2   : > { %8946 = vmatmul.mubr.msk.f32.gmra.mxu1 %vm758_vm1, %v4073_v40  ;;  %v4121_v40 = vld [vmem:[%s14512_s3 + $0x278] sm:$0xff] }
 0x6d3   : > { %8948 = vmatprep.mubr.msk.f32.mxu1 %vm758_vm1, %v4074_v61 }
 0x6d6   : > { %8949 = vmatmul.mubr.msk.f32.gmra.mxu1 %vm758_vm1, %v4075_v13  ;;  %v9637_v13 = vld [vmem:[%s14513_s4 + $0x8] sm:$0xff] }
 0x6d7   : > { %8951 = vmatprep.mubr.msk.f32.mxu1 %vm758_vm1, %v4076_v53 }
 0x6da   : > { %8952 = vmatmul.mubr.msk.f32.gmra.mxu1 %vm758_vm1, %v4077_v49 }
 0x6db   : > { %8954 = vmatprep.mubr.msk.f32.mxu1 %vm758_vm1, %v4078_v16  ;;  %v9638_v16 = vld [vmem:[%s14513_s4] sm:$0xff] }
 0x6de   : > { %8955 = vmatmul.mubr.msk.f32.gmra.mxu1 %vm758_vm1, %v4079_v4 }
 0x6df   : > { %8957 = vmatprep.mubr.msk.f32.mxu1 %vm758_vm1, %v4080_v5 }
 0x6e2   : > { %8958 = vmatmul.mubr.msk.f32.gmra.mxu1 %vm758_vm1, %v4081_v14 }
 0x6e3   : > { %8960 = vmatprep.mubr.msk.f32.mxu1 %vm758_vm1, %v4082_v44 }
 0x6e6   : > { %8961 = vmatmul.mubr.msk.f32.gmra.mxu1 %vm758_vm1, %v4083_v42  ;;  %v9639_v42 = vld [vmem:[%s14513_s4 + $0x18] sm:$0xff] }
 0x6e7   : > { %8963 = vmatprep.mubr.msk.f32.mxu1 %vm758_vm1, %v4084_v25 }
 0x6ea   : > { %8964 = vmatmul.mubr.msk.f32.gmra.mxu1 %vm758_vm1, %v4085_v1 }
 0x6eb   : > { %8966 = vmatprep.mubr.msk.f32.mxu1 %vm758_vm1, %v4086_v57 }
 0x6ee   : > { %8967 = vmatmul.mubr.msk.f32.gmra.mxu1 %vm758_vm1, %v4087_v34 }
 0x6ef   : > { %8969 = vmatprep.mubr.msk.f32.mxu1 %vm758_vm1, %v4088_v51  ;;  %v9640_v51 = vld [vmem:[%s14513_s4 + $0x10] sm:$0xff] }
 0x6f2   : > { %8970 = vmatmul.mubr.msk.f32.gmra.mxu1 %vm758_vm1, %v4089_v12 }
 0x6f3   : > { %8972 = vmatprep.mubr.msk.f32.mxu1 %vm758_vm1, %v4090_v3 }
 0x6f6   : > { %8973 = vmatmul.mubr.msk.f32.gmra.mxu1 %vm758_vm1, %v4091_v60 }
 0x6f7   : > { %8975 = vmatprep.mubr.msk.f32.mxu1 %vm758_vm1, %v4092_v54 }
 0x6fa   : > { %8976 = vmatmul.mubr.msk.f32.gmra.mxu1 %vm758_vm1, %v4093_v8  ;;  %v9641_v8 = vld [vmem:[%s14513_s4 + $0x28] sm:$0xff] }
 0x6fb   : > { %8978 = vmatprep.mubr.msk.f32.mxu1 %vm758_vm1, %v4094_v50 }
 0x6fe   : > { %8979 = vmatmul.mubr.msk.f32.gmra.mxu1 %vm758_vm1, %v4095_v48 }
 0x6ff   : > { %8981 = vmatprep.mubr.msk.f32.mxu1 %vm758_vm1, %v4096_v30 }
 0x702   : > { %8982 = vmatmul.mubr.msk.f32.gmra.mxu1 %vm758_vm1, %v4097_v2 }
 0x703   : > { %8984 = vmatprep.mubr.msk.f32.mxu1 %vm758_vm1, %v4098_v27  ;;  %v9642_v27 = vld [vmem:[%s14513_s4 + $0x20] sm:$0xff] }
 0x706   : > { %8985 = vmatmul.mubr.msk.f32.gmra.mxu1 %vm758_vm1, %v4099_v62 }
 0x707   : > { %8987 = vmatprep.mubr.msk.f32.mxu1 %vm758_vm1, %v4100_v20 }
 0x70a   : > { %8988 = vmatmul.mubr.msk.f32.gmra.mxu1 %vm758_vm1, %v4101_v32 }
 0x70b   : > { %8990 = vmatprep.mubr.msk.f32.mxu1 %vm758_vm1, %v4102_v45 }
 0x70e   : > { %8991 = vmatmul.mubr.msk.f32.gmra.mxu1 %vm758_vm1, %v4103_v56  ;;  %v9643_v56 = vld [vmem:[%s14513_s4 + $0x38] sm:$0xff] }
 0x70f   : > { %8993 = vmatprep.mubr.msk.f32.mxu1 %vm758_vm1, %v4104_v7 }
 0x712   : > { %8994 = vmatmul.mubr.msk.f32.gmra.mxu1 %vm758_vm1, %v4105_v28 }
 0x713   : > { %8996 = vmatprep.mubr.msk.f32.mxu1 %vm758_vm1, %v4106_v0 }
 0x716   : > { %8997 = vmatmul.mubr.msk.f32.gmra.mxu1 %vm758_vm1, %v4107_v36 }
 0x717   : > { %8999 = vmatprep.mubr.msk.f32.mxu1 %vm758_vm1, %v4108_v33  ;;  %v9644_v33 = vld [vmem:[%s14513_s4 + $0x30] sm:$0xff] }
 0x71a   : > { %9000 = vmatmul.mubr.msk.f32.gmra.mxu1 %vm758_vm1, %v4109_v29 }
 0x71b   : > { %9002 = vmatprep.mubr.msk.f32.mxu1 %vm758_vm1, %v4110_v10 }
 0x71e   : > { %9003 = vmatmul.mubr.msk.f32.gmra.mxu1 %vm758_vm1, %v4111_v47 }
 0x71f   : > { %9005 = vmatprep.mubr.msk.f32.mxu1 %vm758_vm1, %v4112_v41 }
 0x722   : > { %9006 = vmatmul.mubr.msk.f32.gmra.mxu1 %vm758_vm1, %v4113_v39  ;;  %v9645_v39 = vld [vmem:[%s14513_s4 + $0x48] sm:$0xff] }
 0x723   : > { %9008 = vmatprep.mubr.msk.f32.mxu1 %vm758_vm1, %v4114_v55 }
 0x726   : > { %9009 = vmatmul.mubr.msk.f32.gmra.mxu1 %vm758_vm1, %v4115_v35 }
 0x727   : > { %9011 = vmatprep.mubr.msk.f32.mxu1 %vm758_vm1, %v4116_v9 }
 0x72a   : > { %9012 = vmatmul.mubr.msk.f32.gmra.mxu1 %vm758_vm1, %v4117_v21  ;;  %v9646_v21 = vld [vmem:[%s14513_s4 + $0x88] sm:$0xff] }
 0x72b   : > { %9014 = vmatprep.mubr.msk.f32.mxu1 %vm758_vm1, %v4118_v58 }
 0x72e   : > { %9015 = vmatmul.mubr.msk.f32.gmra.mxu1 %vm758_vm1, %v4119_v11 }
 0x72f   : > { %9017 = vmatprep.mubr.msk.f32.mxu1 %vm758_vm1, %v4120_v31  ;;  %v9647_v31 = vld [vmem:[%s14513_s4 + $0x40] sm:$0xff] }
 0x732   : > { %9018 = vmatmul.mubr.msk.f32.gmra.mxu1 %vm758_vm1, %v4121_v40 }
 0x756   : > { %v8902_v61 = vpop.f32.mrf.mxu1 }
 0x757   : > { %v4828_v53 = vmul.f32 %v9637_v13, %v8902_v61  ;;  %v9648_v61 = vld [vmem:[%s14513_s4 + $0x80] sm:$0xff] }
 0x758   : > { %v4428_v49 = vpop.f32.mrf.mxu1 }
 0x759   : > { %v4827_v4 = vmul.f32 %v9638_v16, %v4428_v49  ;;  %v4910_v5 = vsel %vm3873_vm2, %v4828_v53, 0.0 }
 0x75a   : > { %4911 = vadd.xlane.f32.xlu1 %v4910_v5  ;;  %v8905_v14 = vpop.f32.mrf.mxu1  ;;  %v9649_v5 = vld [vmem:[%s14513_s4 + $0x58] sm:$0xff] }
 0x75b   : > { %v4830_v25 = vmul.f32 %v9639_v42, %v8905_v14  ;;  %v4907_v1 = vsel %vm3873_vm2, %v4827_v4, 0.0 }
 0x75c   : > { %v4438_v44 = vpop.f32.mrf.mxu1 }
 0x75d   : > { %v4829_v12 = vmul.f32 %v9640_v51, %v4438_v44  ;;  %v4916_v3 = vsel %vm3873_vm2, %v4830_v25, 0.0  ;;  %v9650_v44 = vld [vmem:[%s14513_s4 + $0x98] sm:$0xff]  ;;  %v9651_v51 = vld [vmem:[%s14513_s4 + $0x50] sm:$0xff] }
 0x75e   : > { %4908 = vadd.xlane.f32.xlu1 %v4907_v1  ;;  %v8908_v57 = vpop.f32.mrf.mxu1 }
 0x75f   : > { %v4832_v50 = vmul.f32 %v9641_v8, %v8908_v57  ;;  %v4913_v48 = vsel %vm3873_vm2, %v4829_v12, 0.0 }
 0x760   : > { %v4448_v34 = vpop.f32.mrf.mxu1 }
 0x761   : > { %v4831_v62 = vmul.f32 %v9642_v27, %v4448_v34  ;;  %v4922_v20 = vsel %vm3873_vm2, %v4832_v50, 0.0  ;;  %v9654_v27 = vld [vmem:[%s14513_s4 + $0xa8] sm:$0xff] }
 0x762   : > { %4917 = vadd.xlane.f32.xlu1 %v4916_v3  ;;  %v8911_v60 = vpop.f32.mrf.mxu1  ;;  %v9652_v3 = vld [vmem:[%s14513_s4 + $0x90] sm:$0xff] }
 0x763   : > { %v4834_v7 = vmul.f32 %v9643_v56, %v8911_v60  ;;  %v4919_v28 = vsel %vm3873_vm2, %v4831_v62, 0.0 }
 0x764   : > { %v4458_v54 = vpop.f32.mrf.mxu1 }
 0x765   : > { %v4833_v29 = vmul.f32 %v9644_v33, %v4458_v54  ;;  %v4928_v10 = vsel %vm3873_vm2, %v4834_v7, 0.0  ;;  %v9655_v7 = vld [vmem:[%s14513_s4 + $0x60] sm:$0xff] }
 0x766   : > { %4914 = vadd.xlane.f32.xlu1 %v4913_v48  ;;  %v8914_v30 = vpop.f32.mrf.mxu1 }
 0x767   : > { %v4836_v55 = vmul.f32 %v9645_v39, %v8914_v30  ;;  %v4925_v35 = vsel %vm3873_vm2, %v4833_v29, 0.0  ;;  %v9653_v30 = vld [vmem:[%s14513_s4 + $0x68] sm:$0xff] }
 0x768   : > { %v4468_v2 = vpop.f32.mrf.mxu1 }
 0x769   : > { %v4835_v40 = vmul.f32 %v9647_v31, %v4468_v2  ;;  %v4934_v53 = vsel %vm3873_vm2, %v4836_v55, 0.0 }
 0x76a   : > { %4923 = vadd.xlane.f32.xlu1 %v4922_v20  ;;  %v8917_v32 = vpop.f32.mrf.mxu1 }
 0x76b   : > { %v4838_v14 = vmul.f32 %v9649_v5, %v8917_v32  ;;  %v4931_v25 = vsel %vm3873_vm2, %v4835_v40, 0.0 }
 0x76c   : > { %v4478_v45 = vpop.f32.mrf.mxu1 }
 0x76d   : > { %v4837_v12 = vmul.f32 %v9651_v51, %v4478_v45  ;;  %v4940_v54 = vsel %vm3873_vm2, %v4838_v14, 0.0  ;;  %v9661_v14 = vld [vmem:[%s14513_s4 + $0xc8] sm:$0xff] }
 0x76e   : > { %4920 = vadd.xlane.f32.xlu1 %v4919_v28  ;;  %v8920_v0 = vpop.f32.mrf.mxu1 }
 0x76f   : > { %v4840_v2 = vmul.f32 %v9653_v30, %v8920_v0  ;;  %v4937_v20 = vsel %vm3873_vm2, %v4837_v12, 0.0  ;;  %v9656_v0 = vld [vmem:[%s14513_s4 + $0xa0] sm:$0xff] }
 0x770   : > { %v4488_v36 = vpop.f32.mrf.mxu1 }
 0x771   : > { %v4839_v28 = vmul.f32 %v9655_v7, %v4488_v36  ;;  %v4946_v29 = vsel %vm3873_vm2, %v4840_v2, 0.0  ;;  %v9658_v36 = vld [vmem:[%s14513_s4 + $0xb8] sm:$0xff] }
 0x772   : > { %4929 = vadd.xlane.f32.xlu1 %v4928_v10  ;;  %v8923_v47 = vpop.f32.mrf.mxu1 }
 0x774   : > { %v13266_v41 = vpop.f32.mrf.mxu1 }
 0x776   : > { %4926 = vadd.xlane.f32.xlu1 %v4925_v35  ;;  %v8926_v9 = vpop.f32.mrf.mxu1  ;;  %v9657_v35 = vld [vmem:[%s14513_s4 + $0x78] sm:$0xff] }
 0x777   : > { %v4844_v58 = vmul.f32 %v9646_v21, %v8926_v9  ;;  %v4842_v9 = vmul.f32 %v9657_v35, %v8923_v47  ;;  %v9660_v47 = vld [vmem:[%s14513_s4 + $0xb0] sm:$0xff] }
 0x778   : > { %v4508_v11 = vpop.f32.mrf.mxu1 }
 0x779   : > { %v4843_v13 = vmul.f32 %v9648_v61, %v4508_v11  ;;  %v4958_v49 = vsel %vm3873_vm2, %v4844_v58, 0.0  ;;  %v4943_v58 = vsel %vm3873_vm2, %v4839_v28, 0.0  ;;  %v9659_v61 = vld [vmem:[%s14513_s4 + $0x70] sm:$0xff] }
 0x77a   : > { %4935 = vadd.xlane.f32.xlu1 %v4934_v53  ;;  %4959 = vadd.xlane.f32.xlu0 %v4958_v49  ;;  %v8929_v16 = vpop.f32.mrf.mxu1  ;;  %v4952_v49 = vsel %vm3873_vm2, %v4842_v9, 0.0 }
 0x77b   : > { %v4846_v42 = vmul.f32 %v9650_v44, %v8929_v16  ;;  %v4955_v1 = vsel %vm3873_vm2, %v4843_v13, 0.0  ;;  %v4841_v13 = vmul.f32 %v9659_v61, %v13266_v41 }
 0x77c   : > { %v4518_v4 = vpop.f32.mrf.mxu1 }
 0x77d   : > { %v4845_v60 = vmul.f32 %v9652_v3, %v4518_v4  ;;  %v4964_v8 = vsel %vm3873_vm2, %v4846_v42, 0.0  ;;  %v4949_v41 = vsel %vm3873_vm2, %v4841_v13, 0.0  ;;  %v9663_v3 = vld [vmem:[%s14513_s4 + $0x118] sm:$0xff] }
 0x77e   : > { %4932 = vadd.xlane.f32.xlu1 %v4931_v25  ;;  %4956 = vadd.xlane.f32.xlu0 %v4955_v1  ;;  %v8932_v57 = vpop.f32.mrf.mxu1 }
 0x77f   : > { %v4848_v62 = vmul.f32 %v9654_v27, %v8932_v57  ;;  %v4961_v32 = vsel %vm3873_vm2, %v4845_v60, 0.0  ;;  %v9662_v57 = vld [vmem:[%s14513_s4 + $0xc0] sm:$0xff]  ;;  %v9665_v27 = vld [vmem:[%s14513_s4 + $0x128] sm:$0xff] }
 0x780   : > { %v4528_v34 = vpop.f32.mrf.mxu1 }
 0x781   : > { %v4847_v33 = vmul.f32 %v9656_v0, %v4528_v34  ;;  %v4970_v10 = vsel %vm3873_vm2, %v4848_v62, 0.0 }
 0x782   : > { %4941 = vadd.xlane.f32.xlu1 %v4940_v54  ;;  %4965 = vadd.xlane.f32.xlu0 %v4964_v8  ;;  %v8935_v50 = vpop.f32.mrf.mxu1  ;;  %v9664_v8 = vld [vmem:[%s14513_s4 + $0xd8] sm:$0xff] }
 0x783   : > { %v4850_v21 = vmul.f32 %v9658_v36, %v8935_v50  ;;  %v4967_v11 = vsel %vm3873_vm2, %v4847_v33, 0.0 }
 0x784   : > { %v4538_v48 = vpop.f32.mrf.mxu1 }
 0x785   : > { %v4849_v53 = vmul.f32 %v9660_v47, %v4538_v48  ;;  %v4976_v16 = vsel %vm3873_vm2, %v4850_v21, 0.0 }
 0x786   : > { %4938 = vadd.xlane.f32.xlu1 %v4937_v20  ;;  %4962 = vadd.xlane.f32.xlu0 %v4961_v32  ;;  %v8938_v45 = vpop.f32.mrf.mxu1  ;;  %v9666_v32 = vld [vmem:[%s14513_s4 + $0xd0] sm:$0xff] }
 0x787   : > { %v4852_v44 = vmul.f32 %v9661_v14, %v8938_v45  ;;  %v4973_v42 = vsel %vm3873_vm2, %v4849_v53, 0.0  ;;  %v9672_v14 = vld [vmem:[%s14513_s4 + $0xf8] sm:$0xff] }
 0x788   : > { %v4548_v56 = vpop.f32.mrf.mxu1 }
 0x789   : > { %v4851_v34 = vmul.f32 %v9662_v57, %v4548_v56  ;;  %v4982_v51 = vsel %vm3873_vm2, %v4852_v44, 0.0  ;;  %v9667_v56 = vld [vmem:[%s14513_s4 + $0x120] sm:$0xff] }
 0x78a   : > { %4947 = vadd.xlane.f32.xlu1 %v4946_v29  ;;  %4971 = vadd.xlane.f32.xlu0 %v4970_v10  ;;  %v8941_v39 = vpop.f32.mrf.mxu1  ;;  %v9668_v10 = vld [vmem:[%s14513_s4 + $0xe8] sm:$0xff] }
 0x78b   : > { %v4854_v50 = vmul.f32 %v9664_v8, %v8941_v39  ;;  %v4979_v48 = vsel %vm3873_vm2, %v4851_v34, 0.0 }
 0x78c   : > { %v4558_v55 = vpop.f32.mrf.mxu1 }
 0x78d   : > { %v4853_v45 = vmul.f32 %v9666_v32, %v4558_v55  ;;  %v4988_v28 = vsel %vm3873_vm2, %v4854_v50, 0.0  ;;  %v9669_v55 = vld [vmem:[%s14513_s4 + $0x138] sm:$0xff] }
 0x78e   : > { %4944 = vadd.xlane.f32.xlu1 %v4943_v58  ;;  %4968 = vadd.xlane.f32.xlu0 %v4967_v11  ;;  %v8944_v31 = vpop.f32.mrf.mxu1  ;;  %v9670_v11 = vld [vmem:[%s14513_s4 + $0xe0] sm:$0xff] }
 0x78f   : > { %v4856_v39 = vmul.f32 %v9668_v10, %v8944_v31  ;;  %v4985_v9 = vsel %vm3873_vm2, %v4853_v45, 0.0  ;;  %v9671_v31 = vld [vmem:[%s14513_s4 + $0x130] sm:$0xff]  ;;  %v9679_v10 = vld [vmem:[%s14513_s4 + $0x168] sm:$0xff] }
 0x790   : > { %v4568_v40 = vpop.f32.mrf.mxu1  ;;  %v9677_v45 = vld [vmem:[%s14513_s4 + $0x150] sm:$0xff] }
 0x791   : > { %v4855_v61 = vmul.f32 %v9670_v11, %v4568_v40  ;;  %v4994_v47 = vsel %vm3873_vm2, %v4856_v39, 0.0  ;;  %v9673_v40 = vld [vmem:[%s14513_s4 + $0x148] sm:$0xff]  ;;  %v9681_v11 = vld [vmem:[%s14513_s4 + $0x160] sm:$0xff] }
 0x792   : > { %4953 = vadd.xlane.f32.xlu1 %v4952_v49  ;;  %4977 = vadd.xlane.f32.xlu0 %v4976_v16  ;;  %v8947_v4 = vpop.f32.mrf.mxu1 }
 0x793   : > { %v4858_v44 = vmul.f32 %v9672_v14, %v8947_v4  ;;  %v9675_v4 = vld [vmem:[%s14513_s4 + $0x140] sm:$0xff] }
 0x794   : > { %v13332_v5 = vpop.f32.mrf.mxu1 }
 0x795   : > { %v5000_v8 = vsel %vm3873_vm2, %v4858_v44, 0.0 }
 0x796   : > { %4950 = vadd.xlane.f32.xlu1 %v4949_v41  ;;  %4974 = vadd.xlane.f32.xlu0 %v4973_v42  ;;  %v13339_v25 = vpop.f32.mrf.mxu1  ;;  %v4991_v42 = vsel %vm3873_vm2, %v4855_v61, 0.0 }
 0x798   : > { %v13341_v1 = vpop.f32.mrf.mxu1 }
 0x79a   : > { %4983 = vadd.xlane.f32.xlu0 %v4982_v51  ;;  %v8953_v12 = vpop.f32.mrf.mxu1 }
 0x79b   : > { %v4862_v60 = vmul.f32 %v9663_v3, %v8953_v12  ;;  %v9674_v12 = vld [vmem:[%s14513_s4 + $0xf0] sm:$0xff] }
 0x79c   : > { %v13350_v54 = vpop.f32.mrf.mxu1  ;;  %v4857_v3 = vmul.f32 %v9674_v12, %v13332_v5 }
 0x79d   : > { %v5012_v30 = vsel %vm3873_vm2, %v4862_v60, 0.0 }
 0x79e   : > { %4980 = vadd.xlane.f32.xlu0 %v4979_v48  ;;  %5013 = vadd.xlane.f32.xlu1 %v5012_v30  ;;  %v8956_v2 = vpop.f32.mrf.mxu1  ;;  %v4997_v5 = vsel %vm3873_vm2, %v4857_v3, 0.0  ;;  %v9685_v3 = vld [vmem:[%s14513_s4 + $0x170] sm:$0xff] }
 0x79f   : > { %v4864_v62 = vmul.f32 %v9665_v27, %v8956_v2  ;;  %v9676_v2 = vld [vmem:[%s14513_s4 + $0x158] sm:$0xff] }
 0x7a0   : > { %v4608_v20 = vpop.f32.mrf.mxu1 }
 0x7a1   : > { %v4863_v7 = vmul.f32 %v9667_v56, %v4608_v20  ;;  %v5018_v0 = vsel %vm3873_vm2, %v4864_v62, 0.0 }
 0x7a2   : > { %4989 = vadd.xlane.f32.xlu0 %v4988_v28  ;;  %5019 = vadd.xlane.f32.xlu1 %v5018_v0  ;;  %v8959_v33 = vpop.f32.mrf.mxu1  ;;  %v9678_v0 = vld [vmem:[%s14513_s4 + $0x198] sm:$0xff] }
 0x7a3   : > { %v4866_v35 = vmul.f32 %v9669_v55, %v8959_v33  ;;  %v5015_v36 = vsel %vm3873_vm2, %v4863_v7, 0.0 }
 0x7a4   : > { %v4618_v29 = vpop.f32.mrf.mxu1 }
 0x7a5   : > { %v4865_v13 = vmul.f32 %v9671_v31, %v4618_v29  ;;  %v5024_v53 = vsel %vm3873_vm2, %v4866_v35, 0.0  ;;  %v9682_v31 = vld [vmem:[%s14513_s4 + $0x1a0] sm:$0xff] }
 0x7a6   : > { %4986 = vadd.xlane.f32.xlu0 %v4985_v9  ;;  %5016 = vadd.xlane.f32.xlu1 %v5015_v36  ;;  %v8962_v21 = vpop.f32.mrf.mxu1  ;;  %v9680_v36 = vld [vmem:[%s14513_s4 + $0x1a8] sm:$0xff] }
 0x7a7   : > { %v4868_v41 = vmul.f32 %v9673_v40, %v8962_v21  ;;  %v5021_v57 = vsel %vm3873_vm2, %v4865_v13, 0.0  ;;  %v9684_v40 = vld [vmem:[%s14513_s4 + $0x178] sm:$0xff] }
 0x7a8   : > { %v4628_v58 = vpop.f32.mrf.mxu1 }
 0x7a9   : > { %v4867_v60 = vmul.f32 %v9675_v4, %v4628_v58  ;;  %v5030_v50 = vsel %vm3873_vm2, %v4868_v41, 0.0 }
 0x7aa   : > { %4995 = vadd.xlane.f32.xlu0 %v4994_v47  ;;  %5025 = vadd.xlane.f32.xlu1 %v5024_v53  ;;  %v8965_v49 = vpop.f32.mrf.mxu1 }
 0x7ab   : > { %v4870_v27 = vmul.f32 %v9676_v2, %v8965_v49  ;;  %v5027_v62 = vsel %vm3873_vm2, %v4867_v60, 0.0  ;;  %v9686_v60 = vld [vmem:[%s14513_s4 + $0x1b0] sm:$0xff]  ;;  %v9687_v2 = vld [vmem:[%s14513_s4 + $0x1c8] sm:$0xff] }
 0x7ac   : > { %v4638_v16 = vpop.f32.mrf.mxu1 }
 0x7ad   : > { %v4869_v56 = vmul.f32 %v9677_v45, %v4638_v16  ;;  %v5036_v7 = vsel %vm3873_vm2, %v4870_v27, 0.0  ;;  %v9683_v16 = vld [vmem:[%s14513_s4 + $0x1b8] sm:$0xff] }
 0x7ae   : > { %4992 = vadd.xlane.f32.xlu0 %v4991_v42  ;;  %5022 = vadd.xlane.f32.xlu1 %v5021_v57  ;;  %v8968_v34 = vpop.f32.mrf.mxu1 }
 0x7af   : > { %v4872_v39 = vmul.f32 %v9679_v10, %v8968_v34  ;;  %v5033_v55 = vsel %vm3873_vm2, %v4869_v56, 0.0 }
 0x7b0   : > { %v4648_v51 = vpop.f32.mrf.mxu1 }
 0x7b1   : > { %v4871_v61 = vmul.f32 %v9681_v11, %v4648_v51  ;;  %v5042_v47 = vsel %vm3873_vm2, %v4872_v39, 0.0 }
 0x7b2   : > { %5001 = vadd.xlane.f32.xlu0 %v5000_v8  ;;  %5031 = vadd.xlane.f32.xlu1 %v5030_v50  ;;  %v8971_v48 = vpop.f32.mrf.mxu1 }
 0x7b3   : > { %v4874_v41 = vmul.f32 %v9684_v40, %v8971_v48  ;;  %v5039_v42 = vsel %vm3873_vm2, %v4871_v61, 0.0 }
 0x7b4   : > { %v4658_v30 = vpop.f32.mrf.mxu1 }
 0x7b5   : > { %v4873_v4 = vmul.f32 %v9685_v3, %v4658_v30  ;;  %v5048_v50 = vsel %vm3873_vm2, %v4874_v41, 0.0  ;;  %v9688_v30 = vld [vmem:[%s14513_s4 + $0x110] sm:$0xff] }
 0x7b6   : > { %4998 = vadd.xlane.f32.xlu0 %v4997_v5  ;;  %5028 = vadd.xlane.f32.xlu1 %v5027_v62  ;;  %v13406_v20 = vpop.f32.mrf.mxu1  ;;  %v4861_v62 = vmul.f32 %v9688_v30, %v13350_v54  ;;  %v9690_v54 = vld [vmem:[%s14513_s4 + $0x1c0] sm:$0xff] }
 0x7b7   : > { %v5045_v45 = vsel %vm3873_vm2, %v4873_v4, 0.0  ;;  %v9696_v4 = vld [vmem:[%s14513_s4 + $0x1f8] sm:$0xff] }
 0x7b8   : > { %v13408_v32 = vpop.f32.mrf.mxu1 }
 0x7ba   : > { %5037 = vadd.xlane.f32.xlu1 %v5036_v7  ;;  %v8977_v28 = vpop.f32.mrf.mxu1 }
 0x7bb   : > { %v4878_v33 = vmul.f32 %v9678_v0, %v8977_v28 }
 0x7bc   : > { %v13417_v29 = vpop.f32.mrf.mxu1 }
 0x7bd   : > { %v5060_v35 = vsel %vm3873_vm2, %v4878_v33, 0.0  ;;  %v9689_v33 = vld [vmem:[%s14513_s4 + $0x108] sm:$0xff] }
 0x7be   : > { %5034 = vadd.xlane.f32.xlu1 %v5033_v55  ;;  %5061 = vadd.xlane.f32.xlu0 %v5060_v35  ;;  %v8980_v9 = vpop.f32.mrf.mxu1  ;;  %v4860_v10 = vmul.f32 %v9689_v33, %v13339_v25  ;;  %v5009_v55 = vsel %vm3873_vm2, %v4861_v62, 0.0  ;;  %v9692_v25 = vld [vmem:[%s14513_s4 + $0x100] sm:$0xff] }
 0x7bf   : > { %v4880_v21 = vmul.f32 %v9680_v36, %v8980_v9  ;;  %v9691_v9 = vld [vmem:[%s14513_s4 + $0x1d8] sm:$0xff] }
 0x7c0   : > { %v4688_v58 = vpop.f32.mrf.mxu1  ;;  %v5006_v11 = vsel %vm3873_vm2, %v4860_v10, 0.0 }
 0x7c1   : > { %v4879_v13 = vmul.f32 %v9682_v31, %v4688_v58  ;;  %v5066_v53 = vsel %vm3873_vm2, %v4880_v21, 0.0  ;;  %v4859_v58 = vmul.f32 %v9692_v25, %v13341_v1 }
 0x7c2   : > { %5043 = vadd.xlane.f32.xlu1 %v5042_v47  ;;  %5067 = vadd.xlane.f32.xlu0 %v5066_v53  ;;  %v8983_v49 = vpop.f32.mrf.mxu1  ;;  %v9693_v53 = vld [vmem:[%s14513_s4 + $0x1d0] sm:$0xff] }
 0x7c3   : > { %v4882_v14 = vmul.f32 %v9683_v16, %v8983_v49  ;;  %v5063_v57 = vsel %vm3873_vm2, %v4879_v13, 0.0  ;;  %v5003_v16 = vsel %vm3873_vm2, %v4859_v58, 0.0 }
 0x7c4   : > { %v4698_v44 = vpop.f32.mrf.mxu1 }
 0x7c5   : > { %v5072_v51 = vsel %vm3873_vm2, %v4882_v14, 0.0  ;;  %v4881_v8 = vmul.f32 %v9686_v60, %v4698_v44  ;;  %v9694_v14 = vld [vmem:[%s14513_s4 + $0x1e8] sm:$0xff] }
 0x7c6   : > { %5040 = vadd.xlane.f32.xlu1 %v5039_v42  ;;  %5064 = vadd.xlane.f32.xlu0 %v5063_v57  ;;  %v8986_v34 = vpop.f32.mrf.mxu1 }
 0x7c7   : > { %v4884_v27 = vmul.f32 %v9687_v2, %v8986_v34  ;;  %v5069_v56 = vsel %vm3873_vm2, %v4881_v8, 0.0 }
 0x7c8   : > { %v4708_v12 = vpop.f32.mrf.mxu1 }
 0x7c9   : > { %v5078_v28 = vsel %vm3873_vm2, %v4884_v27, 0.0  ;;  %v4883_v39 = vmul.f32 %v9690_v54, %v4708_v12 }
 0x7ca   : > { %5049 = vadd.xlane.f32.xlu1 %v5048_v50  ;;  %5073 = vadd.xlane.f32.xlu0 %v5072_v51  ;;  %v8989_v48 = vpop.f32.mrf.mxu1  ;;  %v9695_v51 = vld [vmem:[%s14513_s4 + $0x1e0] sm:$0xff] }
 0x7cb   : > { %v4886_v36 = vmul.f32 %v9691_v9, %v8989_v48  ;;  %v5075_v61 = vsel %vm3873_vm2, %v4883_v39, 0.0  ;;  %v9697_v48 = vld [vmem:[%s14513_s4 + $0x230] sm:$0xff] }
 0x7cc   : > { %v4718_v5 = vpop.f32.mrf.mxu1 }
 0x7cd   : > { %v5084_v13 = vsel %vm3873_vm2, %v4886_v36, 0.0  ;;  %v4885_v49 = vmul.f32 %v9693_v53, %v4718_v5  ;;  %v9701_v36 = vld [vmem:[%s14513_s4 + $0x250] sm:$0xff]  ;;  %v9702_v53 = vld [vmem:[%s14513_s4 + $0x188] sm:$0xff] }
 0x7ce   : > { %5046 = vadd.xlane.f32.xlu1 %v5045_v45  ;;  %5070 = vadd.xlane.f32.xlu0 %v5069_v56  ;;  %v8992_v7 = vpop.f32.mrf.mxu1 }
 0x7cf   : > { %v4888_v44 = vmul.f32 %v9694_v14, %v8992_v7  ;;  %v5081_v41 = vsel %vm3873_vm2, %v4885_v49, 0.0  ;;  %v9698_v7 = vld [vmem:[%s14513_s4 + $0x1f0] sm:$0xff]  ;;  %v9703_v49 = vld [vmem:[%s14513_s4 + $0x260] sm:$0xff] }
 0x7d0   : > { %v4728_v0 = vpop.f32.mrf.mxu1 }
 0x7d1   : > { %v5090_v57 = vsel %vm3873_vm2, %v4888_v44, 0.0  ;;  %v4887_v12 = vmul.f32 %v9695_v51, %v4728_v0  ;;  %v9699_v0 = vld [vmem:[%s14513_s4 + $0x240] sm:$0xff] }
 0x7d2   : > { %5010 = vadd.xlane.f32.xlu1 %v5009_v55  ;;  %5079 = vadd.xlane.f32.xlu0 %v5078_v28  ;;  %v8995_v35 = vpop.f32.mrf.mxu1 }
 0x7d3   : > { %v4890_v60 = vmul.f32 %v9696_v4, %v8995_v35  ;;  %v5087_v27 = vsel %vm3873_vm2, %v4887_v12, 0.0  ;;  %v9700_v35 = vld [vmem:[%s14513_s4 + $0x190] sm:$0xff]  ;;  %v9705_v4 = vld [vmem:[%s14513_s4 + $0x180] sm:$0xff] }
 0x7d4   : > { %v4738_v21 = vpop.f32.mrf.mxu1  ;;  %v4877_v9 = vmul.f32 %v9700_v35, %v13417_v29  ;;  %v4876_v29 = vmul.f32 %v9702_v53, %v13406_v20 }
 0x7d5   : > { %v5096_v45 = vsel %vm3873_vm2, %v4890_v60, 0.0  ;;  %v4889_v28 = vmul.f32 %v9698_v7, %v4738_v21  ;;  %v4875_v60 = vmul.f32 %v9705_v4, %v13408_v32  ;;  %v9708_v7 = vld [vmem:[%s14513_s4 + $0x210] sm:$0xff] }
 0x7d6   : > { %5007 = vadd.xlane.f32.xlu1 %v5006_v11  ;;  %5076 = vadd.xlane.f32.xlu0 %v5075_v61  ;;  %v13478_v31 = vpop.f32.mrf.mxu1  ;;  %v5057_v14 = vsel %vm3873_vm2, %v4877_v9, 0.0 }
 0x7d7   : > { %v5093_v25 = vsel %vm3873_vm2, %v4889_v28, 0.0  ;;  %v5051_v32 = vsel %vm3873_vm2, %v4875_v60, 0.0 }
 0x7d8   : > { %v13481_v47 = vpop.f32.mrf.mxu1 }
 0x7da   : > { %5004 = vadd.xlane.f32.xlu1 %v5003_v16  ;;  %5085 = vadd.xlane.f32.xlu0 %v5084_v13  ;;  %v13487_v1 = vpop.f32.mrf.mxu1 }
 0x7dc   : > { %v13492_v40 = vpop.f32.mrf.mxu1 }
 0x7dd   : > { %v4893_v28 = vmul.f32 %v9708_v7, %v13492_v40 }
 0x7de   : > { %5082 = vadd.xlane.f32.xlu0 %v5081_v41  ;;  %v13495_v42 = vpop.f32.mrf.mxu1  ;;  %v9704_v41 = vld [vmem:[%s14513_s4 + $0x220] sm:$0xff] }
 0x7df   : > { %v5105_v40 = vsel %vm3873_vm2, %v4893_v28, 0.0 }
 0x7e0   : > { %v4768_v34 = vpop.f32.mrf.mxu1 }
 0x7e2   : > { %5091 = vadd.xlane.f32.xlu0 %v5090_v57  ;;  %v9007_v3 = vpop.f32.mrf.mxu1  ;;  %v4895_v57 = vmul.f32 %v9704_v41, %v4768_v34 }
 0x7e3   : > { %v13504_v8 = vpop.xlane.xlu1 %4911 }
 0x7e4   : > { %v4778_v50 = vpop.f32.mrf.mxu1 }
 0x7e5   : > { %v4897_v2 = vmul.f32 %v9697_v48, %v4778_v50  ;;  %v5054_v50 = vsel %vm3873_vm2, %v4876_v29, 0.0  ;;  %v9706_v48 = vld [vmem:[%s14513_s4 + $0x270] sm:$0xff] }
 0x7e6   : > { %5088 = vadd.xlane.f32.xlu0 %v5087_v27  ;;  %v9010_v5 = vpop.f32.mrf.mxu1  ;;  %v5111_v27 = vsel %vm3873_vm2, %v4895_v57, 0.0 }
 0x7e7   : > { %v13510_v30 = vpop.xlane.xlu1 %4908  ;;  %v5117_v62 = vsel %vm3873_vm2, %v4897_v2, 0.0 }
 0x7e8   : > { %5118 = vadd.xlane.f32.xlu1 %v5117_v62  ;;  %v4788_v56 = vpop.f32.mrf.mxu1  ;;  %v9707_v62 = vld [vmem:[%s14513_s4 + $0x238] sm:$0xff] }
 0x7e9   : > { %v4899_v33 = vmul.f32 %v9699_v0, %v4788_v56 }
 0x7ea   : > { %5097 = vadd.xlane.f32.xlu0 %v5096_v45  ;;  %v9013_v10 = vpop.f32.mrf.mxu1  ;;  %v4898_v45 = vmul.f32 %v9707_v62, %v9007_v3 }
 0x7eb   : > { %v13520_v54 = vpop.xlane.xlu1 %4917  ;;  %v5123_v39 = vsel %vm3873_vm2, %v4899_v33, 0.0  ;;  %v9709_v33 = vld [vmem:[%s14513_s4 + $0x248] sm:$0xff] }
 0x7ec   : > { %5124 = vadd.xlane.f32.xlu1 %v5123_v39  ;;  %v4798_v55 = vpop.f32.mrf.mxu1  ;;  %v4900_v39 = vmul.f32 %v9709_v33, %v9010_v5  ;;  %v5120_v3 = vsel %vm3873_vm2, %v4898_v45, 0.0 }
 0x7ed   : > { %v4901_v21 = vmul.f32 %v9701_v36, %v4798_v55  ;;  %v9710_v55 = vld [vmem:[%s14513_s4 + $0x200] sm:$0xff]  ;;  %v9711_v36 = vld [vmem:[%s14513_s4 + $0x258] sm:$0xff] }
 0x7ee   : > { %5094 = vadd.xlane.f32.xlu0 %v5093_v25  ;;  %v9016_v58 = vpop.f32.mrf.mxu1  ;;  %v4891_v35 = vmul.f32 %v9710_v55, %v13481_v47  ;;  %v5126_v5 = vsel %vm3873_vm2, %v4900_v39, 0.0  ;;  %v9712_v47 = vld [vmem:[%s14513_s4 + $0x268] sm:$0xff] }
 0x7ef   : > { %v13531_v11 = vpop.xlane.xlu1 %4914  ;;  %v5129_v61 = vsel %vm3873_vm2, %v4901_v21, 0.0  ;;  %v4902_v21 = vmul.f32 %v9711_v36, %v9013_v10  ;;  %v4904_v53 = vmul.f32 %v9712_v47, %v9016_v58  ;;  %v9713_v10 = vld [vmem:[%s14513_s4 + $0x278] sm:$0xff] }
 0x7f0   : > { %5130 = vadd.xlane.f32.xlu1 %v5129_v61  ;;  %v4808_v13 = vpop.f32.mrf.mxu1 }
 0x7f1   : > { %v4903_v16 = vmul.f32 %v9703_v49, %v4808_v13  ;;  %v5099_v13 = vsel %vm3873_vm2, %v4891_v35, 0.0  ;;  %v5132_v29 = vsel %vm3873_vm2, %v4902_v21, 0.0  ;;  %v5138_v41 = vsel %vm3873_vm2, %v4904_v53, 0.0 }
 0x7f2   : > { %5058 = vadd.xlane.f32.xlu0 %v5057_v14  ;;  %v9019_v44 = vpop.f32.mrf.mxu1  ;;  %v9852_v53 = vmov 0.0  }
 0x7f3   : > { %v13545_v51 = vpop.xlane.xlu1 %4923  ;;  %v5135_v12 = vsel %vm3873_vm2, %v4903_v16, 0.0  ;;  %v4906_v49 = vmul.f32 %v9713_v10, %v9019_v44  ;;  %9149 = vmatprep.subr.mxu1 %v9852_v53  ;;  %v15269_v10 = vld [vmem:[#allocation32_spill] sm:$0xff]  ;;  %9165 = vmatprep.mubr.msk.f32.mxu1 %vm9853_vm11, %v9852_v53 }
 0x7f4   : > { %5136 = vadd.xlane.f32.xlu1 %v5135_v12  ;;  %v4818_v20 = vpop.f32.mrf.mxu1 }
 0x7f5   : > { %v4905_v2 = vmul.f32 %v9706_v48, %v4818_v20  ;;  %v5144_v58 = vsel %vm3873_vm2, %v4906_v49, 0.0  ;;  %v9714_v20 = vld [vmem:[%s14513_s4 + $0x228] sm:$0xff] }
 0x7f6   : > { %5055 = vadd.xlane.f32.xlu0 %v5054_v50  ;;  %v4896_v4 = vmul.f32 %v9714_v20, %v13495_v42  ;;  %v9715_v50 = vld [vmem:[%s14513_s4 + $0x218] sm:$0xff]  ;;  %v9716_v42 = vld [vmem:[%s14513_s4 + $0x208] sm:$0xff]  ;;  %v15271_v20 = vld [vmem:[#allocation33_spill] sm:$0xff] }
 0x7f7   : > { %v13556_v34 = vpop.xlane.xlu1 %4920  ;;  %v5141_v56 = vsel %vm3873_vm2, %v4905_v2, 0.0  ;;  %v4894_v48 = vmul.f32 %v9715_v50, %v13487_v1  ;;  %v4892_v45 = vmul.f32 %v9716_v42, %v13478_v31  ;;  %v15272_v50 = vld [vmem:[#allocation46_spill] sm:$0xff] }
 0x7f8   : > { %5112 = vadd.xlane.f32.xlu1 %v5111_v27  ;;  %v5114_v2 = vsel %vm3873_vm2, %v4896_v4, 0.0 }
 0x7f9   : > { %v5102_v7 = vsel %vm3873_vm2, %v4892_v45, 0.0  ;;  %v15274_v45 = vld [vmem:[#allocation47_spill] sm:$0xff] }
 0x7fa   : > { %5052 = vadd.xlane.f32.xlu0 %v5051_v32  ;;  %v5108_v32 = vsel %vm3873_vm2, %v4894_v48, 0.0  ;;  %vm6704_vm2 = vcmask 1040384  }
 0x7fb   : > { %v13568_v0 = vpop.xlane.xlu1 %4929 }
 0x7fc   : > { %5142 = vadd.xlane.f32.xlu1 %v5141_v56 }
 0x7fe   : > { %5121 = vadd.xlane.f32.xlu0 %v5120_v3 }
 0x7ff   : > { %v13578_v9 = vpop.xlane.xlu1 %4926 }
 0x800   : > { %5106 = vadd.xlane.f32.xlu1 %v5105_v40 }
 0x802   : > { %5127 = vadd.xlane.f32.xlu0 %v5126_v5 }
 0x803   : > { %v13585_v25 = vpop.xlane.xlu1 %4935  ;;  %v13587_v61 = vpop.xlane.xlu0 %4959 }
 0x804   : > { %5100 = vadd.xlane.f32.xlu1 %v5099_v13 }
 0x806   : > { %5133 = vadd.xlane.f32.xlu0 %v5132_v29  ;;  %v15268_v29 = vld [vmem:[#allocation48_spill] sm:$0xff] }
 0x807   : > { %v13597_v16 = vpop.xlane.xlu1 %4932  ;;  %v13599_v14 = vpop.xlane.xlu0 %4956 }
 0x80a   : > { %5139 = vadd.xlane.f32.xlu0 %v5138_v41 }
 0x80b   : > { %v13602_v57 = vpop.xlane.xlu1 %4941  ;;  %v13604_v12 = vpop.xlane.xlu0 %4965 }
 0x80e   : > { %5145 = vadd.xlane.f32.xlu0 %v5144_v58  ;;  %v15270_v58 = vld [vmem:[#allocation49_spill] sm:$0xff] }
 0x80f   : > { %v13611_v44 = vpop.xlane.xlu1 %4938  ;;  %v13613_v60 = vpop.xlane.xlu0 %4962 }
 0x812   : > { %5115 = vadd.xlane.f32.xlu0 %v5114_v2  ;;  %v15273_v2 = vld [vmem:[#allocation30_spill] sm:$0xff] }
 0x813   : > { %v4948_v27 = vpop.xlane.xlu1 %4947  ;;  %v13620_v62 = vpop.xlane.xlu0 %4971 }
 0x814   : > { %v5160_v42 = vmul.f32 %v15273_v2, %v4948_v27 }
 0x815   : > { %3998 = vrot.lane.b32.xlu1 %v12870_v22, %s9851_s26 }
 0x816   : > { %5109 = vadd.xlane.f32.xlu0 %v5108_v32 }
 0x817   : > { %v4945_v1 = vpop.xlane.xlu1 %4944  ;;  %v13629_v56 = vpop.xlane.xlu0 %4968 }
 0x819   : > { %3996 = vrot.lane.b32.xlu1 %v12879_v15, %s9851_s26 }
 0x81a   : > { %5103 = vadd.xlane.f32.xlu0 %v5102_v7 }
 0x81b   : > { %v13634_v28 = vpop.xlane.xlu0 %4977  ;;  %v4954_v33 = vpop.xlane.xlu1 %4953 }
 0x81c   : > { %v5162_v49 = vmul.f32 %v15269_v10, %v4954_v33  ;;  %v15278_v10 = vld [vmem:[#allocation45_spill] sm:$0xff] }
 0x81d   : > { %3992 = vrot.lane.b32.xlu1 %v12894_v6, %s9851_s26 }
 0x81f   : > { %v13638_v31 = vpop.xlane.xlu0 %4974  ;;  %v4951_v22 = vpop.xlane.xlu1 %4950 }
 0x820   : > { %v5161_v4 = vmul.f32 %v4951_v22, %v15271_v20 }
 0x821   : > { %3988 = vrot.lane.b32.xlu1 %v12910_v19, %s9851_s26 }
 0x823   : > { %v4984_v39 = vpop.xlane.xlu0 %4983 }
 0x827   : > { %v4981_v3 = vpop.xlane.xlu0 %4980  ;;  %v13642_v55 = vpop.xlane.xlu1 %5013 }
 0x82b   : > { %v4990_v15 = vpop.xlane.xlu0 %4989  ;;  %v13644_v35 = vpop.xlane.xlu1 %5019 }
 0x82f   : > { %v4987_v40 = vpop.xlane.xlu0 %4986  ;;  %v13646_v36 = vpop.xlane.xlu1 %5016 }
 0x830   : > { %4000 = vrot.lane.b32.xlu0 %v12865_v63, %s9851_s26  ;;  %v5173_v27 = vmul.f32 %v4987_v40, %v15278_v10  ;;  %v15282_v40 = vld [vmem:[#allocation43_spill] sm:$0xff] }
 0x831   : > { %v5171_v20 = vmul.f32 %v4981_v3, %v15282_v40  ;;  %v15287_v3 = vld [vmem:[#allocation25_spill] sm:$0xff]  ;;  %v15298_v40 = vld [vmem:[#allocation35_spill] sm:$0xff] }
 0x833   : > { %v4996_v6 = vpop.xlane.xlu0 %4995  ;;  %v13650_v21 = vpop.xlane.xlu1 %5025 }
 0x834   : > { %3994 = vrot.lane.b32.xlu0 %v12884_v17, %s9851_s26  ;;  %v5176_v48 = vmul.f32 %v15272_v50, %v4996_v6 }
 0x837   : > { %v4993_v19 = vpop.xlane.xlu0 %4992  ;;  %v13654_v5 = vpop.xlane.xlu1 %5022 }
 0x838   : > { %3990 = vrot.lane.b32.xlu0 %v12899_v23, %s9851_s26  ;;  %v5175_v32 = vmul.f32 %v4993_v19, %v15274_v45 }
 0x83b   : > { %v5002_v13 = vpop.xlane.xlu0 %5001  ;;  %v13658_v47 = vpop.xlane.xlu1 %5031 }
 0x83c   : > { %v5178_v63 = vmul.f32 %v15268_v29, %v5002_v13  ;;  %3986 = vrot.lane.b32.xlu0 %v12915_v46, %s9851_s26  ;;  %v15275_v46 = vld [vmem:[#allocation31_spill] sm:$0xff]  ;;  %v15276_v13 = vld [vmem:[#allocation44_spill] sm:$0xff] }
 0x83d   : > { %v5159_v7 = vmul.f32 %v4945_v1, %v15275_v46  ;;  %v5174_v29 = vmul.f32 %v15276_v13, %v4990_v15  ;;  %v15280_v1 = vld [vmem:[#allocation42_spill] sm:$0xff] }
 0x83e   : > { %8332 = vmatprep.subr.mxu0 %v5178_v63  ;;  %v15277_v63 = vld [vmem:[#allocation28_spill] sm:$0xff]  ;;  %v15281_v15 = vld [vmem:[#allocation26_spill] sm:$0xff] }
 0x83f   : > { %8333 = vmatpush3.msra.mxu0 %v5162_v49  ;;  %v4999_v17 = vpop.xlane.xlu0 %4998  ;;  %v13665_v41 = vpop.xlane.xlu1 %5028  ;;  %v5158_v22 = vmul.f32 %v15277_v63, %v13602_v57  ;;  %v15279_v49 = vld [vmem:[#allocation29_spill] sm:$0xff]  ;;  %v5156_v57 = vmul.f32 %v15281_v15, %v13585_v25  ;;  %v15291_v63 = vld [vmem:[#allocation23_spill] sm:$0xff]  ;;  %v15297_v15 = vld [vmem:[#allocation18_spill] sm:$0xff] }
 0x840   : > { %v5177_v23 = vmul.f32 %v4999_v17, %v15270_v58  ;;  %v5157_v19 = vmul.f32 %v13611_v44, %v15279_v49  ;;  %v5172_v17 = vmul.f32 %v15280_v1, %v4984_v39  ;;  %v15283_v44 = vld [vmem:[#allocation27_spill] sm:$0xff]  ;;  %v15284_v39 = vld [vmem:[#allocation40_spill] sm:$0xff]  ;;  %v15295_v1 = vld [vmem:[#allocation21_spill] sm:$0xff] }
 0x841   : > { %v5170_v50 = vmul.f32 %v15284_v39, %v13634_v28 }
 0x842   : > { %8334 = vmatprep.subr.mxu0 %v5177_v23 }
 0x843   : > { %8335 = vmatpush3.msra.mxu0 %v5161_v4  ;;  %v13673_v33 = vpop.xlane.xlu1 %5037  ;;  %v5155_v4 = vmul.f32 %v13597_v16, %v15283_v44  ;;  %v15288_v16 = vld [vmem:[#allocation38_spill] sm:$0xff] }
 0x844   : > { %8336 = vmatprep.subr.mxu0 %v5176_v48  ;;  %v15285_v48 = vld [vmem:[#allocation24_spill] sm:$0xff]  ;;  %v5168_v28 = vmul.f32 %v15288_v16, %v13620_v62  ;;  %v9724_v16 = vld [vmem:[%s14861_s2 + $0xa8] sm:$0xff] }
 0x845   : > { %8337 = vmatpush3.msra.mxu0 %v5160_v42  ;;  %v5154_v2 = vmul.f32 %v15285_v48, %v13568_v0  ;;  %v15286_v42 = vld [vmem:[#allocation41_spill] sm:$0xff]  ;;  %v15293_v62 = vld [vmem:[#allocation20_spill] sm:$0xff] }
 0x846   : > { %8338 = vmatprep.subr.mxu0 %v5175_v32  ;;  %v5169_v45 = vmul.f32 %v13638_v31, %v15286_v42  ;;  %v5153_v32 = vmul.f32 %v13578_v9, %v15287_v3  ;;  %v5151_v9 = vmul.f32 %v13556_v34, %v15291_v63  ;;  %v5149_v34 = vmul.f32 %v13531_v11, %v15295_v1  ;;  %v15300_v63 = vld [vmem:[#allocation119_spill] sm:$0xff]  ;;  %v15302_v1 = vld [vmem:[#allocation122_spill] sm:$0xff] }
 0x847   : > { %8339 = vmatpush3.msra.mxu0 %v5159_v7  ;;  %v13678_v6 = vpop.xlane.xlu0 %5061  ;;  %v13688_v58 = vpop.xlane.xlu1 %5034  ;;  %v15289_v7 = vld [vmem:[#allocation22_spill] sm:$0xff] }
 0x848   : > { %8340 = vmatprep.subr.mxu0 %v5174_v29  ;;  %v5152_v0 = vmul.f32 %v15289_v7, %v13545_v51  ;;  %v15290_v29 = vld [vmem:[#allocation39_spill] sm:$0xff] }
 0x849   : > { %8341 = vmatpush3.msra.mxu0 %v5158_v22  ;;  %v5167_v31 = vmul.f32 %v13629_v56, %v15290_v29  ;;  %v15292_v22 = vld [vmem:[#allocation36_spill] sm:$0xff]  ;;  %v9726_v29 = vld [vmem:[%s14861_s2 + $0xd0] sm:$0xff] }
 0x84a   : > { %8342 = vmatprep.subr.mxu0 %v5173_v27  ;;  %v5166_v10 = vmul.f32 %v15292_v22, %v13604_v12  ;;  %v5150_v27 = vmul.f32 %v15293_v62, %v13520_v54  ;;  %v5148_v54 = vmul.f32 %v15297_v15, %v13504_v8  ;;  %v9717_v8 = vld [vmem:[%s14861_s2] sm:$0xff]  ;;  %v9727_v22 = vld [vmem:[%s14861_s2 + $0xc8] sm:$0xff] }
 0x84b   : > { %8343 = vmatpush3.msra.mxu0 %v5157_v19  ;;  %v13690_v23 = vpop.xlane.xlu0 %5067  ;;  %v13705_v46 = vpop.xlane.xlu1 %5043  ;;  %v15294_v19 = vld [vmem:[#allocation37_spill] sm:$0xff] }
 0x84c   : > { %8344 = vmatprep.subr.mxu0 %v5172_v17  ;;  %v5165_v56 = vmul.f32 %v13613_v60, %v15294_v19  ;;  %v15296_v17 = vld [vmem:[#allocation34_spill] sm:$0xff]  ;;  %v15299_v60 = vld [vmem:[#allocation19_spill] sm:$0xff]  ;;  %v9728_v19 = vld [vmem:[%s14861_s2 + $0xf8] sm:$0xff] }
 0x84d   : > { %8345 = vmatpush3.msra.mxu0 %v5156_v57  ;;  %v5164_v12 = vmul.f32 %v15296_v17, %v13587_v61  ;;  %v5147_v44 = vmul.f32 %v13510_v30, %v15299_v60  ;;  %v9718_v61 = vld [vmem:[%s14861_s2 + $0x30] sm:$0xff]  ;;  %v9719_v30 = vld [vmem:[%s14861_s2 + $0x28] sm:$0xff] }
 0x84e   : > { %8346 = vmatprep.subr.mxu0 %v5171_v20  ;;  %v5163_v20 = vmul.f32 %v13599_v14, %v15298_v40  ;;  %v9729_v17 = vld [vmem:[%s14861_s2 + $0xf0] sm:$0xff]  ;;  %v9730_v40 = vld [vmem:[%s14861_s2 + $0x120] sm:$0xff] }
 0x84f   : > { %8347 = vmatpush3.msra.mxu0 %v5155_v4  ;;  %v13699_v25 = vpop.xlane.xlu0 %5064  ;;  %v13721_v49 = vpop.xlane.xlu1 %5040 }
 0x850   : > { %8348 = vmatprep.subr.mxu0 %v5170_v50  ;;  %v9720_v50 = vld [vmem:[%s14861_s2 + $0x58] sm:$0xff] }
 0x851   : > { %8349 = vmatpush3.msra.mxu0 %v5154_v2  ;;  %v9721_v2 = vld [vmem:[%s14861_s2 + $0x50] sm:$0xff] }
 0x852   : > { %8350 = vmatprep.subr.mxu0 %v5169_v45  ;;  %v9722_v45 = vld [vmem:[%s14861_s2 + $0x80] sm:$0xff] }
 0x853   : > { %8351 = vmatpush3.msra.mxu0 %v5153_v32  ;;  %v13711_v13 = vpop.xlane.xlu0 %5073  ;;  %v5050_v4 = vpop.xlane.xlu1 %5049  ;;  %v9723_v32 = vld [vmem:[%s14861_s2 + $0x78] sm:$0xff] }
 0x854   : > { %8352 = vmatprep.subr.mxu0 %v5168_v28 }
 0x855   : > { %8353 = vmatpush3.msra.mxu0 %v5152_v0  ;;  %v9725_v0 = vld [vmem:[%s14861_s2 + $0xa0] sm:$0xff] }
 0x856   : > { %8354 = vmatprep.subr.mxu0 %v5167_v31 }
 0x857   : > { %8355 = vmatpush3.msra.mxu0 %v5151_v9  ;;  %v13723_v51 = vpop.xlane.xlu0 %5070  ;;  %v5047_v14 = vpop.xlane.xlu1 %5046 }
 0x858   : > { %8356 = vmatprep.subr.mxu0 %v5166_v10  ;;  %v15301_v10 = vld [vmem:[#allocation77_spill] sm:$0xff] }
 0x859   : > { %8357 = vmatpush3.msra.mxu0 %v5150_v27  ;;  %v5194_v62 = vmul.f32 %v15301_v10, %v5050_v4 }
 0x85a   : > { %8358 = vmatprep.subr.mxu0 %v5165_v56 }
 0x85b   : > { %8359 = vmatpush3.msra.mxu0 %v5149_v34  ;;  %v13733_v57 = vpop.xlane.xlu0 %5079  ;;  %v13756_v42 = vpop.xlane.xlu1 %5010 }
 0x85c   : > { %8360 = vmatprep.subr.mxu0 %v5164_v12  ;;  %v15303_v12 = vld [vmem:[#allocation80_spill] sm:$0xff] }
 0x85d   : > { %8361 = vmatpush3.msra.mxu0 %v5148_v54  ;;  %v5193_v15 = vmul.f32 %v5047_v14, %v15303_v12  ;;  %v9731_v14 = vld [vmem:[%s14861_s2 + $0x118] sm:$0xff]  ;;  %v15318_v12 = vld [vmem:[#allocation102_spill] sm:$0xff] }
 0x85e   : > { %8362 = vmatprep.subr.mxu0 %v5163_v20  ;;  %v15304_v20 = vld [vmem:[#allocation114_spill] sm:$0xff] }
 0x85f   : > { %8363 = vmatpush3.msra.mxu0 %v5147_v44  ;;  %v13739_v11 = vpop.xlane.xlu0 %5076  ;;  %v13767_v28 = vpop.xlane.xlu1 %5007  ;;  %v15305_v44 = vld [vmem:[#allocation74_spill] sm:$0xff] }
 0x860   : > { %5293 = vmatmul.mubr.f32.vlgmr.msra.gmra.mxu0 %v9717_v8  ;;  %v5192_v4 = vmul.f32 %v15305_v44, %v13705_v46  ;;  %v15308_v46 = vld [vmem:[#allocation109_spill] sm:$0xff] }
 0x861   : > { %5297 = vmatprep.mubr.f32.mxu0 %v9718_v61  ;;  %v15306_v61 = vld [vmem:[#allocation117_spill] sm:$0xff] }
 0x863   : > { %v5086_v39 = vpop.xlane.xlu0 %5085  ;;  %v13780_v27 = vpop.xlane.xlu1 %5004 }
 0x864   : > { %5298 = vmatmul.mubr.f32.gmra.mxu0 %v9719_v30 }
 0x865   : > { %5302 = vmatprep.mubr.f32.mxu0 %v9720_v50  ;;  %v15307_v50 = vld [vmem:[#allocation76_spill] sm:$0xff] }
 0x867   : > { %v5083_v48 = vpop.xlane.xlu0 %5082 }
 0x868   : > { %5303 = vmatmul.mubr.f32.gmra.mxu0 %v9721_v2  ;;  %v5191_v2 = vmul.f32 %v13721_v49, %v15307_v50  ;;  %v15311_v49 = vld [vmem:[#allocation72_spill] sm:$0xff] }
 0x869   : > { %5307 = vmatprep.mubr.f32.mxu0 %v9722_v45  ;;  %v9732_v45 = vld [vmem:[%s14861_s2 + $0x18] sm:$0xff] }
 0x86b   : > { %v5092_v3 = vpop.xlane.xlu0 %5091 }
 0x86c   : > { %5308 = vmatmul.mubr.f32.gmra.mxu0 %v9723_v32  ;;  %v5208_v60 = vmul.f32 %v15304_v20, %v5092_v3  ;;  %v5206_v3 = vmul.f32 %v15308_v46, %v5086_v39  ;;  %v15309_v32 = vld [vmem:[#allocation70_spill] sm:$0xff]  ;;  %v15327_v46 = vld [vmem:[#allocation56_spill] sm:$0xff] }
 0x86d   : > { %5312 = vmatprep.mubr.f32.mxu0 %v9724_v16  ;;  %v5190_v16 = vmul.f32 %v15309_v32, %v13673_v33  ;;  %v15313_v39 = vld [vmem:[#allocation66_spill] sm:$0xff] }
 0x86e   : > { %v5188_v10 = vmul.f32 %v15313_v39, %v13658_v47  ;;  %v15333_v39 = vld [vmem:[#allocation156_spill] sm:$0xff] }
 0x86f   : > { %v5089_v7 = vpop.xlane.xlu0 %5088 }
 0x870   : > { %5313 = vmatmul.mubr.f32.gmra.mxu0 %v9725_v0  ;;  %v5207_v30 = vmul.f32 %v5089_v7, %v15306_v61 }
 0x871   : > { %5317 = vmatprep.mubr.f32.mxu0 %v9726_v29  ;;  %v13790_v54 = vpop.xlane.xlu1 %5118  ;;  %v15310_v29 = vld [vmem:[#allocation112_spill] sm:$0xff] }
 0x873   : > { %v5098_v31 = vpop.xlane.xlu0 %5097 }
 0x874   : > { %v5210_v9 = vmul.f32 %v15300_v63, %v5098_v31  ;;  %5318 = vmatmul.mubr.f32.gmra.mxu0 %v9727_v22  ;;  %v5205_v31 = vmul.f32 %v5083_v48, %v15310_v29  ;;  %v5189_v63 = vmul.f32 %v13688_v58, %v15311_v49  ;;  %v15316_v58 = vld [vmem:[#allocation98_spill] sm:$0xff]  ;;  %v15331_v49 = vld [vmem:[#allocation52_spill] sm:$0xff] }
 0x875   : > { %5322 = vmatprep.mubr.f32.mxu0 %v9728_v19  ;;  %v13810_v7 = vpop.xlane.xlu1 %5124 }
 0x876   : > { %8388 = vmatprep.subr.mxu0 %v5210_v9  ;;  %v15312_v9 = vld [vmem:[#allocation104_spill] sm:$0xff] }
 0x877   : > { %8389 = vmatpush3.msra.mxu0 %v5194_v62  ;;  %v5095_v56 = vpop.xlane.xlu0 %5094  ;;  %v5204_v22 = vmul.f32 %v15312_v9, %v13733_v57  ;;  %v15314_v62 = vld [vmem:[#allocation107_spill] sm:$0xff]  ;;  %v15317_v57 = vld [vmem:[#allocation62_spill] sm:$0xff]  ;;  %v15332_v9 = vld [vmem:[#allocation153_spill] sm:$0xff] }
 0x878   : > { %v5209_v34 = vmul.f32 %v5095_v56, %v15302_v1  ;;  %5323 = vmatmul.mubr.f32.gmra.mxu0 %v9729_v17  ;;  %v5203_v19 = vmul.f32 %v13739_v11, %v15314_v62  ;;  %v15315_v56 = vld [vmem:[#allocation68_spill] sm:$0xff]  ;;  %v5186_v17 = vmul.f32 %v15317_v57, %v13650_v21  ;;  %v5201_v11 = vmul.f32 %v13723_v51, %v15318_v12  ;;  %v15336_v57 = vld [vmem:[#allocation145_spill] sm:$0xff] }
 0x879   : > { %5327 = vmatprep.mubr.f32.mxu0 %v9730_v40  ;;  %v5187_v48 = vmul.f32 %v13665_v41, %v15315_v56  ;;  %v13823_v1 = vpop.xlane.xlu1 %5130  ;;  %v15320_v40 = vld [vmem:[#allocation93_spill] sm:$0xff]  ;;  %v15323_v51 = vld [vmem:[#allocation60_spill] sm:$0xff]  ;;  %v9736_v56 = vld [vmem:[%s14861_s2 + $0x68] sm:$0xff] }
 0x87a   : > { %8390 = vmatprep.subr.mxu0 %v5209_v34  ;;  %v5202_v34 = vmul.f32 %v15316_v58, %v13711_v13  ;;  %v5200_v20 = vmul.f32 %v15320_v40, %v13690_v23  ;;  %v15321_v13 = vld [vmem:[#allocation58_spill] sm:$0xff]  ;;  %v9737_v12 = vld [vmem:[%s14861_s2 + $0x60] sm:$0xff] }
 0x87b   : > { %8391 = vmatpush3.msra.mxu0 %v5193_v15  ;;  %v5059_v8 = vpop.xlane.xlu0 %5058  ;;  %v15319_v15 = vld [vmem:[#allocation64_spill] sm:$0xff]  ;;  %v15325_v23 = vld [vmem:[#allocation54_spill] sm:$0xff] }
 0x87c   : > { %8392 = vmatprep.subr.mxu0 %v5208_v60  ;;  %5328 = vmatmul.mubr.f32.gmra.mxu0 %v9731_v14  ;;  %v5185_v41 = vmul.f32 %v13654_v5, %v15319_v15  ;;  %v5184_v60 = vmul.f32 %v15321_v13, %v13644_v35  ;;  %v15324_v5 = vld [vmem:[#allocation87_spill] sm:$0xff]  ;;  %v5182_v50 = vmul.f32 %v15325_v23, %v13642_v55  ;;  %v15330_v55 = vld [vmem:[#allocation86_spill] sm:$0xff]  ;;  %v15337_v15 = vld [vmem:[#allocation148_spill] sm:$0xff] }
 0x87d   : > { %8393 = vmatpush3.msra.mxu0 %v5192_v4  ;;  %5397 = vmatprep.mubr.f32.mxu0 %v9732_v45  ;;  %v5137_v44 = vpop.xlane.xlu1 %5136  ;;  %v15322_v4 = vld [vmem:[#allocation96_spill] sm:$0xff]  ;;  %v5198_v14 = vmul.f32 %v15324_v5, %v13678_v6  ;;  %v15329_v6 = vld [vmem:[#allocation50_spill] sm:$0xff]  ;;  %v9741_v5 = vld [vmem:[%s14861_s2 + $0xb0] sm:$0xff] }
 0x87e   : > { %8394 = vmatprep.subr.mxu0 %v5207_v30  ;;  %v5199_v61 = vmul.f32 %v13699_v25, %v15322_v4  ;;  %v5183_v30 = vmul.f32 %v13646_v36, %v15323_v51  ;;  %v5181_v25 = vmul.f32 %v13756_v42, %v15327_v46  ;;  %v15328_v36 = vld [vmem:[#allocation82_spill] sm:$0xff]  ;;  %v15339_v4 = vld [vmem:[#allocation144_spill] sm:$0xff]  ;;  %v15343_v46 = vld [vmem:[#allocation137_spill] sm:$0xff] }
 0x87f   : > { %8395 = vmatpush3.msra.mxu0 %v5191_v2  ;;  %v5056_v0 = vpop.xlane.xlu0 %5055  ;;  %v15326_v2 = vld [vmem:[#allocation91_spill] sm:$0xff] }
 0x880   : > { %8396 = vmatprep.subr.mxu0 %v5206_v3  ;;  %v5197_v45 = vmul.f32 %v5059_v8, %v15326_v2  ;;  %v5196_v32 = vmul.f32 %v15328_v36, %v5056_v0  ;;  %v5179_v8 = vmul.f32 %v13780_v27, %v15331_v49  ;;  %v9733_v0 = vld [vmem:[%s14861_s2 + $0x10] sm:$0xff]  ;;  %v15334_v27 = vld [vmem:[#allocation149_spill] sm:$0xff]  ;;  %v9743_v2 = vld [vmem:[%s14861_s2 + $0xd8] sm:$0xff] }
 0x881   : > { %8397 = vmatpush3.msra.mxu0 %v5190_v16  ;;  %v13850_v3 = vpop.xlane.xlu1 %5112  ;;  %v5180_v16 = vmul.f32 %v15329_v6, %v13767_v28  ;;  %v9734_v28 = vld [vmem:[%s14861_s2 + $0x40] sm:$0xff] }
 0x882   : > { %8398 = vmatprep.subr.mxu0 %v5205_v31  ;;  %v15344_v36 = vld [vmem:[#allocation129_spill] sm:$0xff] }
 0x883   : > { %8399 = vmatpush3.msra.mxu0 %v5189_v63  ;;  %v5053_v33 = vpop.xlane.xlu0 %5052  ;;  %v9745_v6 = vld [vmem:[%s14861_s2 + $0x100] sm:$0xff] }
 0x884   : > { %8400 = vmatprep.subr.mxu0 %v5204_v22  ;;  %v5195_v31 = vmul.f32 %v5053_v33, %v15330_v55 }
 0x885   : > { %8401 = vmatpush3.msra.mxu0 %v5188_v10  ;;  %v5143_v42 = vpop.xlane.xlu1 %5142 }
 0x886   : > { %8402 = vmatprep.subr.mxu0 %v5203_v19  ;;  %v5225_v10 = vmul.f32 %v5143_v42, %v15333_v39  ;;  %v9735_v19 = vld [vmem:[%s14861_s2 + $0x38] sm:$0xff]  ;;  %v9747_v42 = vld [vmem:[%s14861_s2 + $0x128] sm:$0xff]  ;;  %v4018_v39 = vstv %s544_s20  ;;  %s529_s20 = scalar_lea.vmem [#allocation5], %s7485_s9 }
 0x887   : > { %8403 = vmatpush3.msra.mxu0 %v5187_v48  ;;  %v13829_v47 = vpop.xlane.xlu0 %5121  ;;  %v15335_v48 = vld [vmem:[#allocation152_spill] sm:$0xff] }
 0x888   : > { %8404 = vmatprep.subr.mxu0 %v5202_v34  ;;  %v5223_v58 = vmul.f32 %v5137_v44, %v15335_v48  ;;  %v9740_v44 = vld [vmem:[%s14861_s2 + $0xb8] sm:$0xff] }
 0x889   : > { %8405 = vmatpush3.msra.mxu0 %v5186_v17  ;;  %v5107_v34 = vpop.xlane.xlu1 %5106 }
 0x88a   : > { %8406 = vmatprep.subr.mxu0 %v5201_v11  ;;  %v9738_v11 = vld [vmem:[%s14861_s2 + $0x90] sm:$0xff] }
 0x88b   : > { %8407 = vmatpush3.msra.mxu0 %v5185_v41  ;;  %v5128_v21 = vpop.xlane.xlu0 %5127  ;;  %v5221_v41 = vmul.f32 %v13823_v1, %v15337_v15  ;;  %v5219_v1 = vmul.f32 %v13810_v7, %v15339_v4  ;;  %v15341_v7 = vld [vmem:[#allocation140_spill] sm:$0xff] }
 0x88c   : > { %8408 = vmatprep.subr.mxu0 %v5200_v20  ;;  %v15338_v20 = vld [vmem:[#allocation143_spill] sm:$0xff]  ;;  %v5217_v23 = vmul.f32 %v13790_v54, %v15341_v7  ;;  %v5215_v54 = vmul.f32 %v13850_v3, %v15343_v46 }
 0x88d   : > { %8409 = vmatpush3.msra.mxu0 %v5184_v60  ;;  %v5220_v13 = vmul.f32 %v15338_v20, %v5128_v21  ;;  %v9739_v60 = vld [vmem:[%s14861_s2 + $0x88] sm:$0xff]  ;;  %v15340_v21 = vld [vmem:[#allocation139_spill] sm:$0xff]  ;;  %v9755_v20 = vld [vmem:[%s14861_s2 + $0x138] sm:$0xff] }
 0x88e   : > { %8410 = vmatprep.subr.mxu0 %v5199_v61  ;;  %v5101_v61 = vpop.xlane.xlu1 %5100  ;;  %v5218_v51 = vmul.f32 %v15340_v21, %v13829_v47  ;;  %v15342_v47 = vld [vmem:[#allocation134_spill] sm:$0xff] }
 0x88f   : > { %8411 = vmatpush3.msra.mxu0 %v5183_v30  ;;  %v5134_v35 = vpop.xlane.xlu0 %5133 }
 0x890   : > { %8412 = vmatprep.subr.mxu0 %v5198_v14  ;;  %v5222_v17 = vmul.f32 %v15336_v57, %v5134_v35  ;;  %v9742_v14 = vld [vmem:[%s14861_s2 + $0xe0] sm:$0xff] }
 0x891   : > { %8413 = vmatpush3.msra.mxu0 %v5182_v50 }
 0x892   : > { %8414 = vmatprep.subr.mxu0 %v5197_v45  ;;  %v3999_v50 = vpop.permute.xlu1 %3998  ;;  %v9744_v45 = vld [vmem:[%s14861_s2 + $0x108] sm:$0xff] }
 0x893   : > { %8415 = vmatpush3.msra.mxu0 %v5181_v25  ;;  %v5140_v29 = vpop.xlane.xlu0 %5139 }
 0x894   : > { %8416 = vmatprep.subr.mxu0 %v5196_v32  ;;  %v5224_v33 = vmul.f32 %v15334_v27, %v5140_v29  ;;  %v15345_v29 = vld [vmem:[#allocation132_spill] sm:$0xff] }
 0x895   : > { %8417 = vmatpush3.msra.mxu0 %v5180_v16  ;;  %v9746_v16 = vld [vmem:[%s14861_s2 + $0x130] sm:$0xff]  ;;  %v5213_v3 = vmul.f32 %v5107_v34, %v15345_v29 }
 0x896   : > { %8418 = vmatprep.subr.mxu0 %v5195_v31  ;;  %v3997_v55 = vpop.permute.xlu1 %3996  ;;  %v15346_v31 = vld [vmem:[#allocation124_spill] sm:$0xff] }
 0x897   : > { %8419 = vmatpush3.msra.mxu0 %v5179_v8  ;;  %v5146_v63 = vpop.xlane.xlu0 %5145  ;;  %v4015_v27 = vadd.f32 %v3997_v55, %v12882_v52  ;;  %v9750_v52 = vld [vmem:[%s14861_s2 + $0x70] sm:$0xff] }
 0x898   : > { %v5226_v22 = vmul.f32 %v15332_v9, %v5146_v63  ;;  %5398 = vmatmul.mubr.f32.vlgmr.msra.gmra.mxu0 %v9733_v0  ;;  %v9748_v9 = vld [vmem:[%s14861_s2 + $0x20] sm:$0xff] }
 0x899   : > { %5402 = vmatprep.mubr.f32.mxu0 %v9734_v28  ;;  %v4016_v28 = vadd.f32 %v3999_v50, %v12872_v59 }
 0x89a   : > { %9020 = vmatprep.subr.mxu0 %v5226_v22 }
 0x89b   : > { %9021 = vmatpush3.msra.mxu0 %v5226_v22  ;;  %v5116_v62 = vpop.xlane.xlu0 %5115  ;;  %v15347_v22 = vld [vmem:[#allocation126_spill] sm:$0xff] }
 0x89c   : > { %9022 = vmatprep.subr.mxu0 %v5225_v10  ;;  %5403 = vmatmul.mubr.f32.gmra.mxu0 %v9735_v19  ;;  %v5216_v35 = vmul.f32 %v15342_v47, %v5116_v62  ;;  %v5211_v0 = vmul.f32 %v5101_v61, %v15347_v22  ;;  %v9749_v62 = vld [vmem:[%s14861_s2 + $0x48] sm:$0xff]  ;;  %v13936_v19 = vadd.f32 %v4018_v39, %v4016_v28 }
 0x89d   : > { %9023 = vmatpush3.msra.mxu0 %v5225_v10  ;;  %5407 = vmatprep.mubr.f32.mxu0 %v9736_v56  ;;  %v3993_v10 = vpop.permute.xlu1 %3992  ;;  %v13944_v56 = vadd.f32 %v4018_v39, %v4015_v27 }
 0x89e   : > { %9024 = vmatprep.subr.mxu0 %v5224_v33  ;;  %v4013_v48 = vadd.f32 %v3993_v10, %v12897_v38  ;;  %v9752_v38 = vld [vmem:[%s14861_s2 + $0xc0] sm:$0xff] }
 0x89f   : > { %9025 = vmatpush3.msra.mxu0 %v5224_v33  ;;  %v5110_v40 = vpop.xlane.xlu0 %5109  ;;  %v5635_v4 = vmul.f32 %v13944_v56, %v13944_v56 }
 0x8a0   : > { %9026 = vmatprep.subr.mxu0 %v5223_v58  ;;  %5408 = vmatmul.mubr.f32.gmra.mxu0 %v9737_v12  ;;  %v5214_v32 = vmul.f32 %v15344_v36, %v5110_v40  ;;  %v13960_v12 = vadd.f32 %v4018_v39, %v4013_v48  ;;  %v9754_v40 = vld [vmem:[%s14861_s2 + $0x110] sm:$0xff] }
 0x8a1   : > { %9027 = vmatpush3.msra.mxu0 %v5223_v58  ;;  %5412 = vmatprep.mubr.f32.mxu0 %v9738_v11  ;;  %v3989_v58 = vpop.permute.xlu1 %3988 }
 0x8a2   : > { %9028 = vmatprep.subr.mxu0 %v5222_v17  ;;  %v4011_v11 = vadd.f32 %v3989_v58, %v12913_v43  ;;  %v5633_v61 = vmul.f32 %v13960_v12, %v13960_v12 }
 0x8a3   : > { %9029 = vmatpush3.msra.mxu0 %v5222_v17  ;;  %v5104_v30 = vpop.xlane.xlu0 %5103 }
 0x8a4   : > { %9030 = vmatprep.subr.mxu0 %v5221_v41  ;;  %5413 = vmatmul.mubr.f32.gmra.mxu0 %v9739_v60  ;;  %v5212_v49 = vmul.f32 %v15346_v31, %v5104_v30  ;;  %v13976_v43 = vadd.f32 %v4018_v39, %v4011_v11 }
 0x8a5   : > { %9031 = vmatpush3.msra.mxu0 %v5221_v41  ;;  %5417 = vmatprep.mubr.f32.mxu0 %v9740_v44  ;;  %v5636_v44 = vmul.f32 %v13936_v19, %v13936_v19 }
 0x8a6   : > { %9032 = vmatprep.subr.mxu0 %v5220_v13 }
 0x8a7   : > { %9033 = vmatpush3.msra.mxu0 %v5220_v13  ;;  %v4001_v25 = vpop.permute.xlu0 %4000  ;;  %v13991_v13 = vld [vmem:[%s14516_s7] sm:$0xf] }
 0x8a8   : > { %9034 = vmatprep.subr.mxu0 %v5219_v1  ;;  %5418 = vmatmul.mubr.f32.gmra.mxu0 %v9741_v5  ;;  %v4017_v63 = vadd.f32 %v4001_v25, %v12868_v26 }
 0x8a9   : > { %9035 = vmatpush3.msra.mxu0 %v5219_v1  ;;  %5422 = vmatprep.mubr.f32.mxu0 %v9742_v14 }
 0x8aa   : > { %9036 = vmatprep.subr.mxu0 %v5218_v51  ;;  %v13930_v33 = vadd.f32 %v4018_v39, %v4017_v63 }
 0x8ab   : > { %9037 = vmatpush3.msra.mxu0 %v5218_v51  ;;  %v3995_v8 = vpop.permute.xlu0 %3994  ;;  %v5631_v51 = vmul.f32 %v13976_v43, %v13976_v43 }
 0x8ac   : > { %9038 = vmatprep.subr.mxu0 %v5217_v23  ;;  %5423 = vmatmul.mubr.f32.gmra.mxu0 %v9743_v2  ;;  %v4014_v59 = vadd.f32 %v3995_v8, %v12886_v18  ;;  %v9751_v18 = vld [vmem:[%s14861_s2 + $0x98] sm:$0xff]  ;;  %v5637_v60 = vmul.f32 %v13930_v33, %v13930_v33 }
 0x8ad   : > { %9039 = vmatpush3.msra.mxu0 %v5217_v23  ;;  %5427 = vmatprep.mubr.f32.mxu0 %v9744_v45 }
 0x8ae   : > { %9040 = vmatprep.subr.mxu0 %v5216_v35  ;;  %v13952_v34 = vadd.f32 %v4018_v39, %v4014_v59 }
 0x8af   : > { %9041 = vmatpush3.msra.mxu0 %v5216_v35  ;;  %v3991_v26 = vpop.permute.xlu0 %3990 }
 0x8b0   : > { %9042 = vmatprep.subr.mxu0 %v5215_v54  ;;  %5428 = vmatmul.mubr.f32.gmra.mxu0 %v9745_v6  ;;  %v4012_v57 = vadd.f32 %v3991_v26, %v12901_v24  ;;  %v9753_v24 = vld [vmem:[%s14861_s2 + $0xe8] sm:$0xff]  ;;  %v5634_v1 = vmul.f32 %v13952_v34, %v13952_v34 }
 0x8b1   : > { %9043 = vmatpush3.msra.mxu0 %v5215_v54  ;;  %5432 = vmatprep.mubr.f32.mxu0 %v9746_v16 }
 0x8b2   : > { %9044 = vmatprep.subr.mxu0 %v5214_v32  ;;  %v13968_v15 = vadd.f32 %v4018_v39, %v4012_v57 }
 0x8b3   : > { %9045 = vmatpush3.msra.mxu0 %v5214_v32  ;;  %v3987_v17 = vpop.permute.xlu0 %3986 }
 0x8b4   : > { %9046 = vmatprep.subr.mxu0 %v5213_v3  ;;  %5433 = vmatmul.mubr.f32.gmra.mxu0 %v9747_v42  ;;  %v4010_v41 = vadd.f32 %v3987_v17, %v12917_v37  ;;  %v5632_v21 = vmul.f32 %v13968_v15, %v13968_v15 }
 0x8b5   : > { %9047 = vmatpush3.msra.mxu0 %v5213_v3  ;;  %9052 = vmatprep.mubr.f32.mxu0 %v9748_v9 }
 0x8b6   : > { %9048 = vmatprep.subr.mxu0 %v5212_v49  ;;  %v13983_v37 = vadd.f32 %v4018_v39, %v4010_v41 }
 0x8b7   : > { %9049 = vmatpush3.msra.mxu0 %v5212_v49 }
 0x8b8   : > { %9050 = vmatprep.subr.mxu0 %v5211_v0  ;;  %v5630_v30 = vmul.f32 %v13983_v37, %v13983_v37 }
 0x8b9   : > { %9051 = vmatpush3.msra.mxu0 %v5211_v0 }
 0x8ba   : > { %9053 = vmatmul.mubr.f32.vlgmr.msra.gmra.mxu0 %v9749_v62  ;;  %9064 = vmatprep.subr.mxu0 %v9852_v53 }
 0x8bb   : > { %9065 = vmatpush3.msra.mxu0 %v13930_v33  ;;  %9055 = vmatprep.mubr.f32.mxu0 %v9750_v52 }
 0x8bc   : > { %9066 = vmatprep.subr.mxu0 %v9852_v53 }
 0x8bd   : > { %9067 = vmatpush3.msra.mxu0 %v13936_v19 }
 0x8be   : > { %9056 = vmatmul.mubr.f32.gmra.mxu0 %v9751_v18  ;;  %9068 = vmatprep.subr.mxu0 %v9852_v53 }
 0x8bf   : > { %9069 = vmatpush3.msra.mxu0 %v13944_v56  ;;  %9058 = vmatprep.mubr.f32.mxu0 %v9752_v38 }
 0x8c0   : > { %9070 = vmatprep.subr.mxu0 %v9852_v53 }
 0x8c1   : > { %9071 = vmatpush3.msra.mxu0 %v13952_v34 }
 0x8c2   : > { %9059 = vmatmul.mubr.f32.gmra.mxu0 %v9753_v24  ;;  %9072 = vmatprep.subr.mxu0 %v9852_v53 }
 0x8c3   : > { %9073 = vmatpush3.msra.mxu0 %v13960_v12  ;;  %9061 = vmatprep.mubr.f32.mxu0 %v9754_v40  ;;  %v5227_v40 = vstv %s7488_s29  ;;  %s7489_s29 = sld [smem:[#allocation2 + $0x2]] }
 0x8c4   : > { %9074 = vmatprep.subr.mxu0 %v9852_v53 }
 0x8c5   : > { %9075 = vmatpush3.msra.mxu0 %v13968_v15 }
 0x8c6   : > { %9062 = vmatmul.mubr.f32.gmra.mxu0 %v9755_v20  ;;  %9076 = vmatprep.subr.mxu0 %v9852_v53 }
 0x8c7   : > { %9077 = vmatpush3.msra.mxu0 %v13976_v43  ;;  %9080 = vmatprep.mubr.msk.f32.mxu0 %vm9853_vm11, %v9852_v53 }
 0x8c8   : > { %9078 = vmatprep.subr.mxu0 %v9852_v53 }
 0x8c9   : > { %9079 = vmatpush3.msra.mxu0 %v13983_v37 }
 0x8ca   : > { %9083 = vmatprep.subr.mxu0 %v9852_v53  ;;  %9081 = vmatmul.mubr.msk.f32.vlgmr.msra.gmra.mxu0 %vm758_vm1, %v13991_v13 }
 0x8cb   : > { %9084 = vmatpush3.msra.mxu0 %v5637_v60  ;;  %9099 = vmatprep.mubr.msk.f32.mxu0 %vm9853_vm11, %v9852_v53 }
 0x8cc   : > { %9085 = vmatprep.subr.mxu0 %v9852_v53 }
 0x8cd   : > { %9086 = vmatpush3.msra.mxu0 %v5636_v44 }
 0x8ce   : > { %9087 = vmatprep.subr.mxu0 %v9852_v53 }
 0x8cf   : > { %9088 = vmatpush3.msra.mxu0 %v5635_v4 }
 0x8d0   : > { %9089 = vmatprep.subr.mxu0 %v9852_v53 }
 0x8d1   : > { %9090 = vmatpush3.msra.mxu0 %v5634_v1 }
 0x8d2   : > { %9091 = vmatprep.subr.mxu0 %v9852_v53 }
 0x8d3   : > { %9092 = vmatpush3.msra.mxu0 %v5633_v61 }
 0x8d4   : > { %9093 = vmatprep.subr.mxu0 %v9852_v53 }
 0x8d5   : > { %9094 = vmatpush3.msra.mxu0 %v5632_v21 }
 0x8d6   : > { %9095 = vmatprep.subr.mxu0 %v9852_v53 }
 0x8d7   : > { %9096 = vmatpush3.msra.mxu0 %v5631_v51 }
 0x8d8   : > { %9097 = vmatprep.subr.mxu0 %v9852_v53 }
 0x8d9   : > { %9098 = vmatpush3.msra.mxu0 %v5630_v30 }
 0x8da   : > { %9100 = vmatmul.mubr.msk.f32.vlgmr.msra.gmra.mxu0 %vm758_vm1, %v13991_v13 }
 0x920   : > { %v8364_v5 = vpop.f32.mrf.mxu0 }
 0x922   : > { %v8365_v14 = vpop.f32.mrf.mxu0 }
 0x923   : > { %v14025_v7 = vadd.f32 %v8365_v14, %v8364_v5 }
 0x924   : > { %v8367_v23 = vpop.f32.mrf.mxu0 }
 0x926   : > { %v8368_v50 = vpop.f32.mrf.mxu0 }
 0x927   : > { %v14027_v47 = vadd.f32 %v8368_v50, %v8367_v23 }
 0x928   : > { %v8370_v35 = vpop.f32.mrf.mxu0 }
 0x92a   : > { %v8371_v2 = vpop.f32.mrf.mxu0 }
 0x92b   : > { %v8372_v45 = vadd.f32 %v8371_v2, %v8370_v35 }
 0x92c   : > { %v8373_v46 = vpop.f32.mrf.mxu0 }
 0x92e   : > { %v8374_v54 = vpop.f32.mrf.mxu0 }
 0x92f   : > { %v8375_v25 = vadd.f32 %v8374_v54, %v8373_v46 }
 0x930   : > { %v8376_v36 = vpop.f32.mrf.mxu0 }
 0x931   : > { %v5310_v54 = vadd.f32 %v8375_v25, %v5227_v40 }
 0x932   : > { %v8377_v32 = vpop.f32.mrf.mxu0 }
 0x933   : > { %v8378_v20 = vadd.f32 %v8377_v32, %v8376_v36 }
 0x934   : > { %v8379_v6 = vpop.f32.mrf.mxu0 }
 0x935   : > { %v5315_v14 = vadd.f32 %v8378_v20, %v5227_v40 }
 0x936   : > { %v8380_v16 = vpop.f32.mrf.mxu0 }
 0x937   : > { %v8381_v11 = vadd.f32 %v8380_v16, %v8379_v6 }
 0x938   : > { %v8382_v29 = vpop.f32.mrf.mxu0 }
 0x939   : > { %v5320_v21 = vadd.f32 %v8381_v11, %v5227_v40  ;;  %v14077_v11 = vld [vmem:[%s14517_s8] sm:$0xff] }
 0x93a   : > { %v8383_v3 = vpop.f32.mrf.mxu0  ;;  %9104 = vmatprep.mubr.msk.f32.mxu0 %vm5717_vm13, %v14077_v11 }
 0x93b   : > { %v8384_v24 = vadd.f32 %v8383_v3, %v8382_v29 }
 0x93c   : > { %v8385_v55 = vpop.f32.mrf.mxu0 }
 0x93d   : > { %v5325_v51 = vadd.f32 %v8384_v24, %v5227_v40 }
 0x93e   : > { %v8386_v31 = vpop.f32.mrf.mxu0 }
 0x93f   : > { %v8387_v38 = vadd.f32 %v8386_v31, %v8385_v55  ;;  %v5305_v55 = vadd.f32 %v8372_v45, %v5227_v40 }
 0x941   : > { %v5330_v44 = vadd.f32 %v8387_v38, %v5227_v40 }
 0x958   : > { %v8420_v49 = vpop.f32.mrf.mxu0 }
 0x95a   : > { %v8421_v8 = vpop.f32.mrf.mxu0 }
 0x95c   : > { %v8423_v42 = vpop.f32.mrf.mxu0 }
 0x95e   : > { %v8424_v63 = vpop.f32.mrf.mxu0 }
 0x95f   : > { %v8425_v31 = vadd.f32 %v8424_v63, %v8423_v42  ;;  %v5295_v63 = vadd.f32 %v14025_v7, %v5227_v40 }
 0x960   : > { %v8426_v9 = vpop.f32.mrf.mxu0 }
 0x962   : > { %v8427_v22 = vpop.f32.mrf.mxu0 }
 0x963   : > { %v8428_v6 = vadd.f32 %v8427_v22, %v8426_v9  ;;  %v5300_v22 = vadd.f32 %v14027_v47, %v5227_v40 }
 0x964   : > { %v8429_v0 = vpop.f32.mrf.mxu0 }
 0x965   : > { %v5410_v45 = vadd.f32 %v8428_v6, %v5305_v55 }
 0x966   : > { %v8430_v28 = vpop.f32.mrf.mxu0 }
 0x967   : > { %v8431_v50 = vadd.f32 %v8430_v28, %v8429_v0 }
 0x968   : > { %v8432_v39 = vpop.f32.mrf.mxu0 }
 0x969   : > { %v5415_v0 = vadd.f32 %v8431_v50, %v5310_v54  ;;  %v14124_v50 = vld [vmem:[%s14517_s8 + $0x30] sm:$0xff] }
 0x96a   : > { %v8433_v10 = vpop.f32.mrf.mxu0 }
 0x96b   : > { %v8434_v30 = vadd.f32 %v8433_v10, %v8432_v39 }
 0x96c   : > { %v8435_v27 = vpop.f32.mrf.mxu0 }
 0x96d   : > { %v5420_v32 = vadd.f32 %v8434_v30, %v5315_v14  ;;  %v14109_v14 = vld [vmem:[%s14517_s8 + $0x20] sm:$0xff] }
 0x96e   : > { %v8436_v26 = vpop.f32.mrf.mxu0 }
 0x96f   : > { %v8437_v4 = vadd.f32 %v8436_v26, %v8435_v27  ;;  %v8422_v27 = vadd.f32 %v8421_v8, %v8420_v49 }
 0x970   : > { %v8438_v62 = vpop.f32.mrf.mxu0 }
 0x971   : > { %v5425_v35 = vadd.f32 %v8437_v4, %v5320_v21  ;;  %v5400_v8 = vadd.f32 %v8422_v27, %v5295_v63  ;;  %v14086_v21 = vld [vmem:[%s14517_s8 + $0x8] sm:$0xff] }
 0x972   : > { %v8439_v59 = vpop.f32.mrf.mxu0 }
 0x973   : > { %v8440_v1 = vadd.f32 %v8439_v59, %v8438_v62  ;;  %v5405_v62 = vadd.f32 %v8425_v31, %v5300_v22 }
 0x974   : > { %v8441_v52 = vpop.f32.mrf.mxu0 }
 0x975   : > { %v5430_v46 = vadd.f32 %v8440_v1, %v5325_v51  ;;  %v14092_v51 = vld [vmem:[%s14517_s8 + $0x10] sm:$0xff] }
 0x976   : > { %v8442_v48 = vpop.f32.mrf.mxu0 }
 0x977   : > { %v8443_v41 = vadd.f32 %v8442_v48, %v8441_v52 }
 0x979   : > { %v5435_v5 = vadd.f32 %v8443_v41, %v5330_v44 }
 0x97a   : > { %v9054_v58 = vpop.f32.mrf.mxu0 }
 0x97b   : > { %v14055_v49 = vadd.f32 %v9054_v58, %v5405_v62 }
 0x97c   : > { %v5504_v18 = vpop.f32.mrf.mxu0 }
 0x97d   : > { %v14060_v48 = vadd.f32 %v5504_v18, %v5400_v8 }
 0x97e   : > { %v9057_v57 = vpop.f32.mrf.mxu0 }
 0x97f   : > { %v14044_v26 = vadd.f32 %v9057_v57, %v5415_v0  ;;  %v6142_v57 = vmul.f32 %v14055_v49, %v14055_v49  ;;  %v6141_v58 = vmul.f32 %v14060_v48, %v14060_v48 }
 0x980   : > { %v5514_v17 = vpop.f32.mrf.mxu0 }
 0x981   : > { %v14050_v59 = vadd.f32 %v5514_v17, %v5410_v45  ;;  %v6144_v52 = vmul.f32 %v14044_v26, %v14044_v26 }
 0x982   : > { %v9060_v60 = vpop.f32.mrf.mxu0 }
 0x983   : > { %v14031_v36 = vadd.f32 %v9060_v60, %v5425_v35  ;;  %v6143_v7 = vmul.f32 %v14050_v59, %v14050_v59  ;;  %v14133_v35 = vld [vmem:[%s14517_s8 + $0x38] sm:$0xff] }
 0x984   : > { %v5524_v61 = vpop.f32.mrf.mxu0 }
 0x985   : > { %v14037_v28 = vadd.f32 %v5524_v61, %v5420_v32  ;;  %v6146_v42 = vmul.f32 %v14031_v36, %v14031_v36 }
 0x986   : > { %v9063_v23 = vpop.f32.mrf.mxu0 }
 0x987   : > { %v14029_v2 = vadd.f32 %v9063_v23, %v5435_v5  ;;  %v6145_v47 = vmul.f32 %v14037_v28, %v14037_v28  ;;  %v14103_v5 = vld [vmem:[%s14517_s8 + $0x18] sm:$0xff]  ;;  %v14119_v23 = vld [vmem:[%s14517_s8 + $0x28] sm:$0xff] }
 0x988   : > { %v5534_v16 = vpop.f32.mrf.mxu0 }
 0x989   : > { %v6148_v29 = vmul.f32 %v14029_v2, %v14029_v2  ;;  %v14035_v3 = vadd.f32 %v5534_v16, %v5430_v46  ;;  %v15348_v16 = vld [vmem:[#allocation17_spill] sm:$0xff] }
 0x98a   : > { %v5621_v39 = vpop.f32.mrf.mxu0 }
 0x98b   : > { %v6147_v25 = vmul.f32 %v14035_v3, %v14035_v3  ;;  %9150 = vmatpush3.msra.mxu1 %v6148_v29  ;;  %v5626_v9 = vsel %vm5625_vm12, %v5621_v39, 0.0 }
 0x98c   : > { %9151 = vmatprep.subr.mxu1 %v9852_v53  ;;  %v9082_v10 = vpop.f32.mrf.mxu0  ;;  %5627 = vadd.xlane.f32.xlu1 %v5626_v9 }
 0x98d   : > { %9152 = vmatpush3.msra.mxu1 %v6147_v25 }
 0x98e   : > { %9153 = vmatprep.subr.mxu1 %v9852_v53 }
 0x98f   : > { %9154 = vmatpush3.msra.mxu1 %v6146_v42 }
 0x990   : > { %9155 = vmatprep.subr.mxu1 %v9852_v53 }
 0x991   : > { %9156 = vmatpush3.msra.mxu1 %v6145_v47 }
 0x992   : > { %9157 = vmatprep.subr.mxu1 %v9852_v53 }
 0x993   : > { %9158 = vmatpush3.msra.mxu1 %v6144_v52 }
 0x994   : > { %9159 = vmatprep.subr.mxu1 %v9852_v53 }
 0x995   : > { %9160 = vmatpush3.msra.mxu1 %v6143_v7  ;;  %v15349_v7 = vld [vmem:[#allocation16_spill] sm:$0xff] }
 0x996   : > { %9161 = vmatprep.subr.mxu1 %v9852_v53 }
 0x997   : > { %9162 = vmatpush3.msra.mxu1 %v6142_v57  ;;  %v9855_v57 = vmov 0  }
 0x998   : > { %9163 = vmatprep.subr.mxu1 %v9852_v53  ;;  %9448 = vset.pattern.permute.xlu1 %v9855_v57 }
 0x999   : > { %9164 = vmatpush3.msra.mxu1 %v6141_v58  ;;  %9449 = vset.pattern.permute.xlu0 %v9855_v57 }
 0x99a   : > { %9166 = vmatmul.mubr.msk.f32.vlgmr.msra.gmra.mxu1 %vm758_vm1, %v13991_v13  ;;  %v5704_v18 = vpop.f32.mrf.mxu0 }
 0x99b   : > { %v5708_v38 = vsel %vm5625_vm12, %v5704_v18, 0.0  ;;  %9184 = vmatprep.mubr.msk.f32.mxu1 %vm5717_vm13, %v14077_v11 }
 0x99c   : > { %5709 = vadd.xlane.f32.xlu0 %v5708_v38  ;;  %v9101_v17 = vpop.f32.mrf.mxu0 }
 0xa15   : > { %v5628_v24 = vpop.xlane.xlu1 %5627 }
 0xa16   : > { %v5629_v41 = vmul.f32 0.11111111, %v5628_v24 }
 0xa18   : > { %v5712_v20 = vmul.f32 %v5629_v41, %v5629_v41 }
 0xa25   : > { %v5710_v40 = vpop.xlane.xlu0 %5709 }
 0xa26   : > { %v5711_v60 = vmul.f32 0.11111111, %v5710_v40 }
 0xa28   : > { %v5713_v44 = vsub.f32 %v5711_v60, %v5712_v20  ;;  %v6549_v60 = vld [vmem:[%s14521_s12] sm:$0xff] }
 0xa2a   : > { %v5714_v4 = vmax.f32 %v5713_v44, 0.0 }
 0xa2c   : > { %v5715_v1 = vadd.f32 1e-05, %v5714_v4 }
 0xa2e   : > { %9482 = vrsqrt.f32 %v5715_v1 }
 0xa3b   : > { %v9483_v61 = vpop.eup %9482 }
 0xa3c   : > { %9102 = vmatprep.subr.msk.mxu0 %vm5742_vm14, %v9483_v61  ;;  %v5851_v30 = vmul.f32 %v9483_v61, %v5629_v41 }
 0xa3d   : > { %9103 = vmatpush3.msk.msra.mxu0 %vm5742_vm14, %v9483_v61 }
 0xa3e   : > { %9105 = vmatmul.mubr.msk.f32.vlgmr.msra.gmra.mxu0 %vm5717_vm13, %v14086_v21  ;;  %9116 = vmatprep.subr.msk.mxu0 %vm5742_vm14, %v5851_v30 }
 0xa3f   : > { %9107 = vmatprep.mubr.msk.f32.mxu0 %vm5717_vm13, %v14092_v51  ;;  %9117 = vmatpush3.msk.msra.mxu0 %vm5742_vm14, %v5851_v30 }
 0xa40   : > { %9130 = vmatprep.subr.mxu0 %v9852_v53 }
 0xa42   : > { %9108 = vmatmul.mubr.msk.f32.gmra.mxu0 %vm5717_vm13, %v14103_v5 }
 0xa43   : > { %9110 = vmatprep.mubr.msk.f32.mxu0 %vm5717_vm13, %v14109_v14 }
 0xa46   : > { %9111 = vmatmul.mubr.msk.f32.gmra.mxu0 %vm5717_vm13, %v14119_v23 }
 0xa47   : > { %9113 = vmatprep.mubr.msk.f32.mxu0 %vm5717_vm13, %v14124_v50 }
 0xa4a   : > { %9114 = vmatmul.mubr.msk.f32.gmra.mxu0 %vm5717_vm13, %v14133_v35 }
 0xa4b   : > { %9118 = vmatprep.mubr.msk.f32.mxu0 %vm5717_vm13, %v14077_v11 }
 0xa4e   : > { %9119 = vmatmul.mubr.msk.f32.vlgmr.msra.gmra.mxu0 %vm5717_vm13, %v14086_v21 }
 0xa4f   : > { %9131 = vmatpush3.msra.mxu0 %v14029_v2  ;;  %9121 = vmatprep.mubr.msk.f32.mxu0 %vm5717_vm13, %v14092_v51 }
 0xa50   : > { %9132 = vmatprep.subr.mxu0 %v9852_v53 }
 0xa51   : > { %9133 = vmatpush3.msra.mxu0 %v14035_v3 }
 0xa52   : > { %9134 = vmatprep.subr.mxu0 %v9852_v53  ;;  %9122 = vmatmul.mubr.msk.f32.gmra.mxu0 %vm5717_vm13, %v14103_v5 }
 0xa53   : > { %9135 = vmatpush3.msra.mxu0 %v14031_v36  ;;  %9124 = vmatprep.mubr.msk.f32.mxu0 %vm5717_vm13, %v14109_v14 }
 0xa54   : > { %9136 = vmatprep.subr.mxu0 %v9852_v53 }
 0xa55   : > { %9137 = vmatpush3.msra.mxu0 %v14037_v28 }
 0xa56   : > { %9138 = vmatprep.subr.mxu0 %v9852_v53  ;;  %9125 = vmatmul.mubr.msk.f32.gmra.mxu0 %vm5717_vm13, %v14119_v23 }
 0xa57   : > { %9139 = vmatpush3.msra.mxu0 %v14044_v26  ;;  %9127 = vmatprep.mubr.msk.f32.mxu0 %vm5717_vm13, %v14124_v50 }
 0xa58   : > { %9140 = vmatprep.subr.mxu0 %v9852_v53 }
 0xa59   : > { %9141 = vmatpush3.msra.mxu0 %v14050_v59 }
 0xa5a   : > { %9142 = vmatprep.subr.mxu0 %v9852_v53  ;;  %9128 = vmatmul.mubr.msk.f32.gmra.mxu0 %vm5717_vm13, %v14133_v35  ;;  %v6215_v46 = vpop.f32.mrf.mxu1 }
 0xa5b   : > { %9143 = vmatpush3.msra.mxu0 %v14055_v49  ;;  %v6219_v54 = vsel %vm6136_vm15, %v6215_v46, 0.0  ;;  %9146 = vmatprep.mubr.msk.f32.mxu0 %vm9853_vm11, %v9852_v53 }
 0xa5c   : > { %9144 = vmatprep.subr.mxu0 %v9852_v53  ;;  %6220 = vadd.xlane.f32.xlu1 %v6219_v54  ;;  %v9167_v6 = vpop.f32.mrf.mxu1 }
 0xa5d   : > { %9145 = vmatpush3.msra.mxu0 %v14060_v48 }
 0xa5e   : > { %9147 = vmatmul.mubr.msk.f32.vlgmr.msra.gmra.mxu0 %vm758_vm1, %v13991_v13 }
 0xa5f   : > { %9170 = vmatprep.mubr.msk.f32.mxu0 %vm5717_vm13, %v14077_v11 }
 0xa6d   : > { %6850 = vrot.lane.b32.xlu1 %v15348_v16, %s9854_s28  ;;  %v15350_v16 = vld [vmem:[#allocation15_spill] sm:$0xff] }
 0xae5   : > { %v6221_v58 = vpop.xlane.xlu1 %6220 }
 0xae6   : > { %v6222_v38 = vmul.f32 0.125, %v6221_v58  ;;  %v15353_v58 = vld [vmem:[#allocation14_spill] sm:$0xff] }
 0xafe   : > { %v14177_v32 = vpop.f32.mrf.mxu0 }
 0xb00   : > { %v14179_v29 = vpop.f32.mrf.mxu0 }
 0xb02   : > { %v14181_v55 = vpop.f32.mrf.mxu0 }
 0xb04   : > { %v14183_v31 = vpop.f32.mrf.mxu0 }
 0xb06   : > { %v14185_v39 = vpop.f32.mrf.mxu0 }
 0xb08   : > { %v14187_v0 = vpop.f32.mrf.mxu0 }
 0xb0a   : > { %v14189_v13 = vpop.f32.mrf.mxu0 }
 0xb0c   : > { %v14191_v25 = vpop.f32.mrf.mxu0 }
 0xb0e   : > { %v14193_v9 = vpop.f32.mrf.mxu0 }
 0xb10   : > { %v14195_v22 = vpop.f32.mrf.mxu0 }
 0xb12   : > { %v14197_v10 = vpop.f32.mrf.mxu0 }
 0xb14   : > { %v14199_v27 = vpop.f32.mrf.mxu0 }
 0xb16   : > { %v14201_v45 = vpop.f32.mrf.mxu0 }
 0xb18   : > { %v14203_v42 = vpop.f32.mrf.mxu0 }
 0xb1a   : > { %v14205_v63 = vpop.f32.mrf.mxu0 }
 0xb1c   : > { %v14207_v62 = vpop.f32.mrf.mxu0 }
 0xb1e   : > { %v6132_v47 = vpop.f32.mrf.mxu0 }
 0xb1f   : > { %v6137_v8 = vsel %vm6136_vm15, %v6132_v47, 0.0 }
 0xb20   : > { %6138 = vadd.xlane.f32.xlu0 %v6137_v8  ;;  %v9148_v52 = vpop.f32.mrf.mxu0  ;;  %v15351_v8 = vld [vmem:[#allocation13_spill] sm:$0xff] }
 0xb21   : > { %v15352_v52 = vld [vmem:[#allocation11_spill] sm:$0xff] }
 0xb36   : > { %6852 = vrot.lane.b32.xlu0 %v15349_v7, %s9854_s28 }
 0xba9   : > { %v6139_v18 = vpop.xlane.xlu0 %6138 }
 0xbaa   : > { %v6140_v17 = vmul.f32 0.125, %v6139_v18  ;;  %v6065_v18 = vld [vmem:[%s14520_s11 + $0x8] sm:$0x1] }
 0xbac   : > { %v6223_v11 = vmul.f32 %v6140_v17, %v6140_v17 }
 0xbad   : > { %v14219_v4 = vpop.permute.xlu0 %6852 }
 0xbae   : > { %v6224_v24 = vsub.f32 %v6222_v38, %v6223_v11 }
 0xbb0   : > { %v6225_v41 = vmax.f32 %v6224_v24, 0.0 }
 0xbb2   : > { %v6226_v40 = vadd.f32 1e-05, %v6225_v41 }
 0xbb4   : > { %9484 = vrsqrt.f32 %v6226_v40 }
 0xbc1   : > { %v9485_v20 = vpop.eup %9484 }
 0xbc2   : > { %v6336_v44 = vmul.f32 %v9485_v20, %v6140_v17  ;;  %9168 = vmatprep.subr.msk.mxu0 %vm5742_vm14, %v9485_v20 }
 0xbc3   : > { %9169 = vmatpush3.msk.msra.mxu0 %vm5742_vm14, %v9485_v20 }
 0xbc4   : > { %9171 = vmatmul.mubr.msk.f32.vlgmr.msra.gmra.mxu0 %vm5717_vm13, %v14086_v21  ;;  %9196 = vmatprep.subr.mxu0 %v6549_v60 }
 0xbc5   : > { %9197 = vmatpush3.msra.mxu0 %v6549_v60  ;;  %9182 = vmatprep.subr.msk.mxu1 %vm5742_vm14, %v6336_v44 }
 0xbc6   : > { %9226 = vmatprep.subr.mxu0 %v14219_v4  ;;  %9173 = vmatprep.mubr.msk.f32.mxu0 %vm5717_vm13, %v14092_v51 }
 0xbc7   : > { %9183 = vmatpush3.msk.msra.mxu1 %vm5742_vm14, %v6336_v44 }
 0xbc8   : > { %9174 = vmatmul.mubr.msk.f32.gmra.mxu0 %vm5717_vm13, %v14103_v5  ;;  %9185 = vmatmul.mubr.msk.f32.vlgmr.msra.gmra.mxu1 %vm5717_vm13, %v14086_v21 }
 0xbc9   : > { %9176 = vmatprep.mubr.msk.f32.mxu0 %vm5717_vm13, %v14109_v14  ;;  %9187 = vmatprep.mubr.msk.f32.mxu1 %vm5717_vm13, %v14092_v51 }
 0xbca   : > { %9210 = vmatprep.subr.msk.mxu1 %vm6704_vm2, %v6065_v18 }
 0xbcb   : > { %9211 = vmatpush3.msk.msra.mxu1 %vm6704_vm2, %v6065_v18 }
 0xbcc   : > { %9177 = vmatmul.mubr.msk.f32.gmra.mxu0 %vm5717_vm13, %v14119_v23  ;;  %9188 = vmatmul.mubr.msk.f32.gmra.mxu1 %vm5717_vm13, %v14103_v5 }
 0xbcd   : > { %9190 = vmatprep.mubr.msk.f32.mxu1 %vm5717_vm13, %v14109_v14  ;;  %9179 = vmatprep.mubr.msk.f32.mxu0 %vm5717_vm13, %v14124_v50 }
 0xbd0   : > { %9191 = vmatmul.mubr.msk.f32.gmra.mxu1 %vm5717_vm13, %v14119_v23  ;;  %9180 = vmatmul.mubr.msk.f32.gmra.mxu0 %vm5717_vm13, %v14133_v35 }
 0xbd1   : > { %9193 = vmatprep.mubr.msk.f32.mxu1 %vm5717_vm13, %v14124_v50 }
 0xbd4   : > { %9194 = vmatmul.mubr.msk.f32.gmra.mxu1 %vm5717_vm13, %v14133_v35 }
 0xc84   : > { %v9172_v1 = vpop.f32.mrf.mxu0 }
 0xc85   : > { %6452 = vperm.xlu1 %9448, %v9172_v1  }
 0xc86   : > { %v6297_v61 = vpop.f32.mrf.mxu0 }
 0xc87   : > { %6447 = vperm.xlu0 %9449, %v6297_v61  }
 0xc88   : > { %v9175_v21 = vpop.f32.mrf.mxu0  ;;  %v9186_v51 = vpop.f32.mrf.mxu1 }
 0xc89   : > { %6500 = vperm.xlu1 %9448, %v9186_v51  }
 0xc8a   : > { %v6307_v30 = vpop.f32.mrf.mxu0  ;;  %v6406_v5 = vpop.f32.mrf.mxu1 }
 0xc8c   : > { %v9178_v14 = vpop.f32.mrf.mxu0  ;;  %v9189_v23 = vpop.f32.mrf.mxu1 }
 0xc8d   : > { %6495 = vperm.xlu1 %9448, %v6406_v5   ;;  %6472 = vperm.xlu0 %9449, %v9178_v14  }
 0xc8e   : > { %v6416_v46 = vpop.f32.mrf.mxu1  ;;  %v6317_v47 = vpop.f32.mrf.mxu0 }
 0xc90   : > { %v9192_v54 = vpop.f32.mrf.mxu1  ;;  %v9181_v7 = vpop.f32.mrf.mxu0 }
 0xc91   : > { %6462 = vperm.xlu1 %9448, %v9175_v21   ;;  %6520 = vperm.xlu0 %9449, %v9192_v54  }
 0xc92   : > { %v6426_v50 = vpop.f32.mrf.mxu1  ;;  %v6327_v57 = vpop.f32.mrf.mxu0 }
 0xc94   : > { %v9195_v6 = vpop.f32.mrf.mxu1 }
 0xc95   : > { %6457 = vperm.xlu1 %9448, %v6307_v30   ;;  %6530 = vperm.xlu0 %9449, %v9195_v6  }
 0xc96   : > { %v6436_v35 = vpop.f32.mrf.mxu1 }
 0xc99   : > { %6510 = vperm.xlu1 %9448, %v9189_v23   ;;  %6525 = vperm.xlu0 %9449, %v6436_v35  }
 0xc9d   : > { %6505 = vperm.xlu1 %9448, %v6416_v46   ;;  %6846 = vrot.lane.b32.xlu0 %v15350_v16, %s9854_s28 }
 0xca1   : > { %6842 = vrot.lane.b32.xlu0 %v15351_v8, %s9854_s28  ;;  %6467 = vperm.xlu1 %9448, %v6317_v47  }
 0xca5   : > { %6838 = vrot.lane.b32.xlu0 %v15352_v52, %s9854_s28  ;;  %6515 = vperm.xlu1 %9448, %v6426_v50  }
 0xca9   : > { %5962 = vperm.xlu0 %9449, %v14179_v29   ;;  %6482 = vperm.xlu1 %9448, %v9181_v7   ;;  %v6064_v29 = vld [vmem:[%s14520_s11] sm:$0xff] }
 0xcaa   : > { %9212 = vmatprep.subr.mxu1 %v6064_v29 }
 0xcab   : > { %9213 = vmatpush3.msra.mxu1 %v6064_v29 }
 0xcad   : > { %5967 = vperm.xlu0 %9449, %v14177_v32   ;;  %6477 = vperm.xlu1 %9448, %v6327_v57   ;;  %v15354_v32 = vld [vmem:[#allocation12_spill] sm:$0xff] }
 0xcb1   : > { %6010 = vperm.xlu0 %9449, %v14195_v22   ;;  %6848 = vrot.lane.b32.xlu1 %v15353_v58, %s9854_s28  ;;  %v15355_v22 = vld [vmem:[#allocation10_spill] sm:$0xff] }
 0xcb5   : > { %6015 = vperm.xlu0 %9449, %v14193_v9   ;;  %6844 = vrot.lane.b32.xlu1 %v15354_v32, %s9854_s28 }
 0xcb9   : > { %5972 = vperm.xlu0 %9449, %v14183_v31   ;;  %6840 = vrot.lane.b32.xlu1 %v15355_v22, %s9854_s28  ;;  %v6851_v31 = vpop.permute.xlu1 %6850  ;;  %s7408_s28 = sshll.u32 %s529_s20, 4  ;;  %s7409_s28 = int_to_ptr.vmem [resolvable:$true] %s7408_s28 }
 0xcba   : > { %s9780_s2 = scalar_lea.vmem %s7409_s28, 64 }
 0xcbb   : > { %p9781_p9 = scmp.ne.s32.totalorder %s7409_s28, %s9780_s2 }
 0xcbd   : > { %5977 = vperm.xlu0 %9449, %v14181_v55   ;;  %p9782_p10 = pnand %p9781_p9, %p9980_p5 }
 0xcbf   : > { %p9783_p12 = pneg %p9782_p10 }
 0xcc1   : > { %6020 = vperm.xlu0 %9449, %v14199_v27  }
 0xcc5   : > { %6025 = vperm.xlu0 %9449, %v14197_v10  }
 0xcc9   : > { %5982 = vperm.xlu0 %9449, %v14187_v0  }
 0xccd   : > { %6030 = vperm.xlu0 %9449, %v14203_v42  }
 0xcd1   : > { %6035 = vperm.xlu0 %9449, %v14201_v45  }
 0xcd5   : > { %5992 = vperm.xlu0 %9449, %v14191_v25  }
 0xcd9   : > { %5997 = vperm.xlu0 %9449, %v14189_v13  }
 0xcdd   : > { %6045 = vperm.xlu0 %9449, %v14205_v63  }
 0xd00   : > { %v6453_v9 = vpop.permute.xlu1 %6452 }
 0xd01   : > { %v6486_v27 = vmul.f32 %v6453_v9, %v14055_v49 }
 0xd02   : > { %v6448_v38 = vpop.permute.xlu0 %6447 }
 0xd03   : > { %v6485_v10 = vmul.f32 %v6448_v38, %v14060_v48 }
 0xd04   : > { %v6501_v55 = vpop.permute.xlu1 %6500 }
 0xd05   : > { %v6534_v17 = vsub.f32 %v6486_v27, %v6501_v55  ;;  %v6830_v27 = vld [vmem:[%s14514_s5 + $0x8] sm:$0xff] }
 0xd07   : > { %v6542_v45 = vmax.f32 %v6534_v17, 0.0  ;;  %v6831_v17 = vld [vmem:[%s14514_s5 + $0x10] sm:$0xff] }
 0xd08   : > { %v6496_v0 = vpop.permute.xlu1 %6495  ;;  %v6473_v11 = vpop.permute.xlu0 %6472 }
 0xd09   : > { %v6533_v42 = vsub.f32 %v6485_v10, %v6496_v0 }
 0xd0b   : > { %v6541_v24 = vmax.f32 %v6533_v42, 0.0 }
 0xd0c   : > { %v6463_v41 = vpop.permute.xlu1 %6462  ;;  %v6521_v25 = vpop.permute.xlu0 %6520 }
 0xd0d   : > { %9198 = vmatprep.mubr.msk.f32.mxu0 %vm548_vm0, %v6541_v24  ;;  %v6488_v40 = vmul.f32 %v6463_v41, %v14044_v26  ;;  %v6833_v24 = vld [vmem:[%s14514_s5 + $0x20] sm:$0xff] }
 0xd0e   : > { %9199 = vmatmul.mubr.msk.f32.vlgmr.msra.gmra.mxu0 %vm548_vm0, %v6542_v45 }
 0xd0f   : > { %9227 = vmatpush3.msra.mxu0 %v14219_v4  ;;  %v6490_v4 = vmul.f32 %v6473_v11, %v14031_v36  ;;  %v6832_v11 = vld [vmem:[%s14514_s5 + $0x18] sm:$0xff] }
 0xd10   : > { %9228 = vmatprep.subr.mxu0 %v6851_v31  ;;  %v6458_v13 = vpop.permute.xlu1 %6457  ;;  %v6531_v63 = vpop.permute.xlu0 %6530 }
 0xd11   : > { %9229 = vmatpush3.msra.mxu0 %v6851_v31  ;;  %v6487_v20 = vmul.f32 %v6458_v13, %v14050_v59  ;;  %v6538_v23 = vsub.f32 %v6490_v4, %v6521_v25 }
 0xd13   : > { %v6546_v50 = vmax.f32 %v6538_v23, 0.0 }
 0xd14   : > { %v6511_v49 = vpop.permute.xlu1 %6510  ;;  %v6526_v48 = vpop.permute.xlu0 %6525 }
 0xd15   : > { %v6536_v60 = vsub.f32 %v6488_v40, %v6511_v49 }
 0xd17   : > { %v6544_v51 = vmax.f32 %v6536_v60, 0.0 }
 0xd18   : > { %v6506_v44 = vpop.permute.xlu1 %6505  ;;  %v6847_v1 = vpop.permute.xlu0 %6846 }
 0xd19   : > { %v6535_v61 = vsub.f32 %v6487_v20, %v6506_v44 }
 0xd1b   : > { %v6543_v21 = vmax.f32 %v6535_v61, 0.0 }
 0xd1c   : > { %v6843_v30 = vpop.permute.xlu0 %6842  ;;  %v6468_v5 = vpop.permute.xlu1 %6467 }
 0xd1d   : > { %9201 = vmatprep.mubr.msk.f32.mxu0 %vm548_vm0, %v6543_v21  ;;  %v6489_v14 = vmul.f32 %v6468_v5, %v14037_v28 }
 0xd1e   : > { %9202 = vmatmul.mubr.msk.f32.gmra.mxu0 %vm548_vm0, %v6544_v51 }
 0xd20   : > { %v6839_v26 = vpop.permute.xlu0 %6838  ;;  %v6516_v46 = vpop.permute.xlu1 %6515 }
 0xd21   : > { %v6537_v59 = vsub.f32 %v6489_v14, %v6516_v46 }
 0xd23   : > { %v6545_v54 = vmax.f32 %v6537_v59, 0.0 }
 0xd24   : > { %v5963_v6 = vpop.permute.xlu0 %5962  ;;  %v6483_v35 = vpop.permute.xlu1 %6482 }
 0xd25   : > { %9204 = vmatprep.mubr.msk.f32.mxu0 %vm548_vm0, %v6545_v54  ;;  %v6492_v16 = vmul.f32 %v6483_v35, %v14029_v2  ;;  %v6000_v28 = vmul.f32 %v5963_v6, %v13983_v37 }
 0xd26   : > { %9205 = vmatmul.mubr.msk.f32.gmra.mxu0 %vm548_vm0, %v6546_v50 }
 0xd27   : > { %v6540_v52 = vsub.f32 %v6492_v16, %v6531_v63  ;;  %v6835_v63 = vld [vmem:[%s14514_s5 + $0x30] sm:$0xff] }
 0xd28   : > { %v5968_v47 = vpop.permute.xlu0 %5967  ;;  %v6478_v36 = vpop.permute.xlu1 %6477 }
 0xd29   : > { %v6491_v8 = vmul.f32 %v6478_v36, %v14035_v3  ;;  %v6548_v32 = vmax.f32 %v6540_v52, 0.0  ;;  %v6001_v2 = vmul.f32 %v5968_v47, %v13976_v43  ;;  %v6829_v3 = vld [vmem:[%s14514_s5] sm:$0xff]  ;;  %v6837_v47 = vstv %s7489_s29  ;;  %s7395_s29 = scalar_lea.sflag [#allocation3], %s527_s15 }
 0xd2b   : > { %v6539_v7 = vsub.f32 %v6491_v8, %v6526_v48 }
 0xd2c   : > { %v6011_v57 = vpop.permute.xlu0 %6010  ;;  %v6849_v58 = vpop.permute.xlu1 %6848 }
 0xd2d   : > { %v6547_v18 = vmax.f32 %v6539_v7, 0.0  ;;  %v6048_v29 = vsub.f32 %v6000_v28, %v6011_v57  ;;  %9230 = vmatprep.subr.mxu0 %v6849_v58 }
 0xd2e   : > { %9231 = vmatpush3.msra.mxu0 %v6849_v58 }
 0xd2f   : > { %v6056_v22 = vmax.f32 %v6048_v29, 0.0  ;;  %9207 = vmatprep.mubr.msk.f32.mxu0 %vm548_vm0, %v6547_v18  ;;  %9232 = vmatprep.subr.mxu0 %v6847_v1 }
 0xd30   : > { %v6016_v37 = vpop.permute.xlu0 %6015  ;;  %9208 = vmatmul.mubr.msk.f32.gmra.mxu0 %vm548_vm0, %v6548_v32  ;;  %v6845_v31 = vpop.permute.xlu1 %6844 }
 0xd31   : > { %v6049_v9 = vsub.f32 %v6001_v2, %v6016_v37  ;;  %9233 = vmatpush3.msra.mxu0 %v6847_v1  ;;  %9214 = vmatprep.mubr.msk.f32.mxu1 %vm6679_vm3, %v6056_v22 }
 0xd32   : > { %9234 = vmatprep.subr.mxu0 %v6845_v31  ;;  %9242 = vmatprep.mubr.msk.f32.mxu0 %vm758_vm1, %v6829_v3 }
 0xd33   : > { %v6057_v43 = vmax.f32 %v6049_v9, 0.0  ;;  %9235 = vmatpush3.msra.mxu0 %v6845_v31 }
 0xd34   : > { %9236 = vmatprep.subr.mxu0 %v6843_v30  ;;  %v5973_v38 = vpop.permute.xlu0 %5972  ;;  %v6841_v55 = vpop.permute.xlu1 %6840 }
 0xd35   : > { %9237 = vmatpush3.msra.mxu0 %v6843_v30  ;;  %9215 = vmatmul.mubr.msk.f32.vlgmr.msra.gmra.mxu1 %vm6679_vm3, %v6057_v43  ;;  %v6002_v0 = vmul.f32 %v5973_v38, %v13968_v15  ;;  %v6834_v15 = vld [vmem:[%s14514_s5 + $0x28] sm:$0xff] }
 0xd36   : > { %9238 = vmatprep.subr.mxu0 %v6841_v55 }
 0xd37   : > { %9239 = vmatpush3.msra.mxu0 %v6841_v55 }
 0xd38   : > { %9240 = vmatprep.subr.mxu0 %v6839_v26  ;;  %v5978_v10 = vpop.permute.xlu0 %5977 }
 0xd39   : > { %9241 = vmatpush3.msra.mxu0 %v6839_v26  ;;  %v6003_v41 = vmul.f32 %v5978_v10, %v13960_v12  ;;  %v6836_v12 = vld [vmem:[%s14514_s5 + $0x38] sm:$0xff] }
 0xd3a   : > { %9243 = vmatmul.mubr.msk.f32.vlgmr.msra.gmra.mxu0 %vm758_vm1, %v6830_v27  ;;  %9282 = vmatprep.subr.mxu0 %v9852_v53 }
 0xd3b   : > { %9245 = vmatprep.mubr.msk.f32.mxu0 %vm758_vm1, %v6831_v17 }
 0xd3c   : > { %v6021_v42 = vpop.permute.xlu0 %6020 }
 0xd3d   : > { %v6050_v45 = vsub.f32 %v6002_v0, %v6021_v42 }
 0xd3e   : > { %9246 = vmatmul.mubr.msk.f32.gmra.mxu0 %vm758_vm1, %v6832_v11 }
 0xd3f   : > { %v6058_v25 = vmax.f32 %v6050_v45, 0.0  ;;  %9248 = vmatprep.mubr.msk.f32.mxu0 %vm758_vm1, %v6833_v24 }
 0xd40   : > { %v6026_v13 = vpop.permute.xlu0 %6025 }
 0xd41   : > { %v6051_v49 = vsub.f32 %v6003_v41, %v6026_v13  ;;  %9217 = vmatprep.mubr.msk.f32.mxu1 %vm6679_vm3, %v6058_v25 }
 0xd42   : > { %9249 = vmatmul.mubr.msk.f32.gmra.mxu0 %vm758_vm1, %v6834_v15 }
 0xd43   : > { %v6059_v48 = vmax.f32 %v6051_v49, 0.0  ;;  %9251 = vmatprep.mubr.msk.f32.mxu0 %vm758_vm1, %v6835_v63 }
 0xd44   : > { %v5983_v40 = vpop.permute.xlu0 %5982 }
 0xd45   : > { %9218 = vmatmul.mubr.msk.f32.gmra.mxu1 %vm6679_vm3, %v6059_v48  ;;  %v6004_v20 = vmul.f32 %v5983_v40, %v13952_v34 }
 0xd46   : > { %9252 = vmatmul.mubr.msk.f32.gmra.mxu0 %vm758_vm1, %v6836_v12 }
 0xd47   : > { %9298 = vmatprep.mubr.msk.f32.mxu0 %vm9853_vm11, %v9852_v53 }
 0xd48   : > { %v6031_v60 = vpop.permute.xlu0 %6030 }
 0xd49   : > { %v6052_v44 = vsub.f32 %v6004_v20, %v6031_v60 }
 0xd4b   : > { %v6060_v1 = vmax.f32 %v6052_v44, 0.0 }
 0xd4c   : > { %v6036_v25 = vpop.permute.xlu0 %6035 }
 0xd4d   : > { %9220 = vmatprep.mubr.msk.f32.mxu1 %vm6679_vm3, %v6060_v1 }
 0xd50   : > { %v5993_v15 = vpop.permute.xlu0 %5992 }
 0xd51   : > { %v6006_v44 = vmul.f32 %v5993_v15, %v13936_v19  ;;  %v7041_v19 = vld [vmem:[%s14515_s6] sm:$0xff] }
 0xd54   : > { %v5998_v13 = vpop.permute.xlu0 %5997 }
 0xd55   : > { %v6007_v1 = vmul.f32 %v5998_v13, %v13930_v33 }
 0xd58   : > { %v6046_v60 = vpop.permute.xlu0 %6045 }
 0xdce   : > { %v9200_v61 = vpop.f32.mrf.mxu0 }
 0xdd0   : > { %v6640_v21 = vpop.f32.mrf.mxu0 }
 0xdde   : > { %v9203_v51 = vpop.f32.mrf.mxu0 }
 0xde0   : > { %v14344_v30 = vpop.f32.mrf.mxu0 }
 0xde6   : > { %v14346_v5 = vpop.f32.mrf.mxu0 }
 0xde8   : > { %v14348_v4 = vpop.f32.mrf.mxu0 }
 0xdf0   : > { %v14350_v14 = vpop.f32.mrf.mxu0 }
 0xdf2   : > { %v14354_v46 = vpop.f32.mrf.mxu0 }
 0xdf5   : > { %v9216_v34 = vpop.f32.mrf.mxu1 }
 0xdf6   : > { %v14352_v23 = vadd.f32 %v9216_v34, %v9200_v61 }
 0xdf7   : > { %v6774_v26 = vpop.f32.mrf.mxu1 }
 0xdf8   : > { %v14356_v59 = vadd.f32 %v6774_v26, %v6640_v21 }
 0xdfa   : > { %v9244_v54 = vpop.f32.mrf.mxu0 }
 0xdfb   : > { %v14364_v57 = vadd.f32 %v9244_v54, %v6837_v47 }
 0xdfc   : > { %v6952_v50 = vpop.f32.mrf.mxu0 }
 0xdfd   : > { %v14358_v8 = vadd.f32 %v6952_v50, %v6837_v47  ;;  %v6993_v55 = vsel %vm6991_vm4, %v14364_v57, -inf }
 0xdfe   : > { %v9247_v6 = vpop.f32.mrf.mxu0 }
 0xdff   : > { %v14368_v29 = vadd.f32 %v9247_v6, %v6837_v47  ;;  %v6992_v37 = vsel %vm6991_vm4, %v14358_v8, -inf }
 0xe00   : > { %v6962_v35 = vpop.f32.mrf.mxu0 }
 0xe01   : > { %v14370_v32 = vadd.f32 %v6962_v35, %v6837_v47  ;;  %v6995_v27 = vsel %vm6991_vm4, %v14368_v29, -inf }
 0xe02   : > { %v9250_v16 = vpop.f32.mrf.mxu0 }
 0xe03   : > { %v14360_v52 = vadd.f32 %v9250_v16, %v6837_v47  ;;  %v6994_v10 = vsel %vm6991_vm4, %v14370_v32, -inf }
 0xe04   : > { %v6972_v36 = vpop.f32.mrf.mxu0 }
 0xe05   : > { %v14362_v28 = vadd.f32 %v6972_v36, %v6837_v47  ;;  %v9219_v7 = vpop.f32.mrf.mxu1  ;;  %v6998_v31 = vsel %vm6991_vm4, %v14360_v52, -inf }
 0xe06   : > { %v14366_v58 = vadd.f32 %v9219_v7, %v9203_v51  ;;  %v9253_v18 = vpop.f32.mrf.mxu0  ;;  %v6999_v0 = vmax.f32 %v6993_v55, %v6998_v31  ;;  %v6055_v51 = vsub.f32 %v6007_v1, %v6046_v60 }
 0xe07   : > { %v6996_v2 = vsel %vm6991_vm4, %v14362_v28, -inf  ;;  %v6988_v22 = vadd.f32 %v9253_v18, %v6837_v47 }
 0xe08   : > { %v6982_v3 = vpop.f32.mrf.mxu0  ;;  %v6997_v38 = vmax.f32 %v6992_v37, %v6996_v2  ;;  %v6063_v6 = vmax.f32 %v6055_v51, 0.0 }
 0xe09   : > { %v7002_v9 = vsel %vm6991_vm4, %v6988_v22, -inf  ;;  %v6983_v43 = vadd.f32 %v6982_v3, %v6837_v47 }
 0xe0a   : > { %v7003_v11 = vmax.f32 %v6995_v27, %v7002_v9  ;;  %v7004_v24 = vmax.f32 %v6997_v38, %v6999_v0  ;;  %v7043_v0 = vld [vmem:[%s14515_s6 + $0x10] sm:$0xff] }
 0xe0b   : > { %v7000_v17 = vsel %vm6991_vm4, %v6983_v43, -inf }
 0xe0c   : > { %v7001_v42 = vmax.f32 %v6994_v10, %v7000_v17  ;;  %v7042_v17 = vld [vmem:[%s14515_s6 + $0x8] sm:$0xff] }
 0xe0e   : > { %v7005_v45 = vmax.f32 %v7001_v42, %v7003_v11  ;;  %v7044_v11 = vld [vmem:[%s14515_s6 + $0x18] sm:$0xff]  ;;  %v7045_v42 = vld [vmem:[%s14515_s6 + $0x20] sm:$0xff] }
 0xe10   : > { %v7006_v41 = vmax.f32 %v7004_v24, %v7005_v45  ;;  %v7046_v24 = vld [vmem:[%s14515_s6 + $0x28] sm:$0xff]  ;;  %v7047_v45 = vld [vmem:[%s14515_s6 + $0x30] sm:$0xff] }
 0xe12   : > { %7007 = vmax.xlane.f32.xlu1 %v7006_v41  ;;  %v7048_v41 = vld [vmem:[%s14515_s6 + $0x38] sm:$0xff] }
 0xe23   : > { %5987 = vperm.xlu1 %9448, %v14185_v39  }
 0xe27   : > { %6040 = vperm.xlu1 %9448, %v14207_v62  }
 0xe9b   : > { %v7008_v63 = vpop.xlane.xlu1 %7007 }
 0xe9c   : > { %v7009_v49 = vrot.slane %v7008_v63, 4 }
 0xe9e   : > { %v7010_v48 = vmax.f32 %v7008_v63, %v7009_v49 }
 0xe9f   : > { %v5988_v12 = vpop.permute.xlu1 %5987 }
 0xea0   : > { %v7011_v40 = vrot.slane %v7010_v48, 2  ;;  %v6005_v20 = vmul.f32 %v5988_v12, %v13944_v56 }
 0xea2   : > { %v6053_v61 = vsub.f32 %v6005_v20, %v6036_v25  ;;  %v7012_v21 = vmax.f32 %v7010_v48, %v7011_v40  ;;  %v6784_v25 = vpop.f32.mrf.mxu1 }
 0xea3   : > { %v6041_v39 = vpop.permute.xlu1 %6040 }
 0xea4   : > { %v6061_v62 = vmax.f32 %v6053_v61, 0.0  ;;  %v6054_v34 = vsub.f32 %v6006_v44, %v6041_v39  ;;  %v7013_v26 = vrot.slane %v7012_v21, 1 }
 0xea6   : > { %v6062_v54 = vmax.f32 %v6054_v34, 0.0  ;;  %9221 = vmatmul.mubr.msk.f32.gmra.mxu1 %vm6679_vm3, %v6061_v62  ;;  %v7014_v50 = vmax.f32 %v7012_v21, %v7013_v26 }
 0xea8   : > { %9223 = vmatprep.mubr.msk.f32.mxu1 %vm6679_vm3, %v6062_v54  ;;  %9306 = vpush %v7014_v50 }
 0xeaa   : > { %9224 = vmatmul.mubr.msk.f32.gmra.mxu1 %vm6679_vm3, %v6063_v6 }
 0xeab   : > { %9270 = vmatprep.mubr.msk.f32.mxu1 %vm758_vm1, %v7041_v19 }
 0xed9   : > { %s9307_s19 = spop %9306 }
 0xeda   : > { %v7016_v33 = vstv %s9307_s19  ;;  %s9856_s19 = smov [#allocation5]  }
 0xedb   : > { %v7024_v56 = vsub.f32 %v6988_v22, %v7016_v33  ;;  %v7023_v35 = vsub.f32 %v6983_v43, %v7016_v33  ;;  %v7022_v16 = vsub.f32 %v14360_v52, %v7016_v33  ;;  %v7021_v36 = vsub.f32 %v14362_v28, %v7016_v33  ;;  %s9784_s25 = sshll.u32 %s9856_s19, 4  ;;  %s9785_s25 = int_to_ptr.vmem [resolvable:$false] %s9784_s25 }
 0xedc   : > { %v7020_v18 = vsub.f32 %v14368_v29, %v7016_v33  ;;  %v7019_v3 = vsub.f32 %v14370_v32, %v7016_v33  ;;  %v7018_v31 = vsub.f32 %v14364_v57, %v7016_v33  ;;  %v7017_v22 = vsub.f32 %v14358_v8, %v7016_v33  ;;  %s9786_s9 = scalar_lea.vmem %s9785_s25, 128  ;;  %p9787_p13 = scmp.lt.s32.totalorder %s7409_s28, %s9785_s25 }
 0xedd   : > { %v7039_v47 = vmul.f32 1.442695, %v7024_v56  ;;  %v7037_v7 = vmul.f32 1.442695, %v7023_v35  ;;  %v7035_v2 = vmul.f32 1.442695, %v7022_v16  ;;  %p9788_p0 = scmp.lt.s32.totalorder %s9786_s9, %s9780_s2 }
 0xede   : > { %v7033_v37 = vmul.f32 1.442695, %v7021_v36  ;;  %v7031_v9 = vmul.f32 1.442695, %v7020_v18  ;;  %v7029_v43 = vmul.f32 1.442695, %v7019_v3 }
 0xedf   : > { %9486 = vpow2.f32 %v7039_v47  ;;  %v7027_v52 = vmul.f32 1.442695, %v7018_v31  ;;  %v7025_v28 = vmul.f32 1.442695, %v7017_v22  ;;  %v9756_v3 = vld [vmem:[%s10015_s30 + $0x38] sm:$0xff]  ;;  %p9789_p1 = por %p9788_p0, %p9787_p13 }
 0xee0   : > { %9488 = vpow2.f32 %v7037_v7 }
 0xee1   : > { %9490 = vpow2.f32 %v7035_v2  ;;  %p9790_p2 = pnand %p9789_p1, %p9783_p12 }
 0xee2   : > { %9492 = vpow2.f32 %v7033_v37 }
 0xee3   : > { %9494 = vpow2.f32 %v7031_v9  ;;  %v9757_v9 = vld [vmem:[%s10015_s30 + $0x30] sm:$0xff] }
 0xee4   : > { %9496 = vpow2.f32 %v7029_v43  ;;  %v9758_v43 = vld [vmem:[%s10015_s30 + $0x28] sm:$0xff] }
 0xee5   : > { %9498 = vpow2.f32 %v7027_v52 }
 0xee6   : > { %9500 = vpow2.f32 %v7025_v28 }
 0xeec   : > { %v9487_v29 = vpop.eup %9486 }
 0xeed   : > { %9254 = vmatprep.subr.mxu1 %v9487_v29  ;;  %v9489_v38 = vpop.eup %9488 }
 0xeee   : > { %9255 = vmatpush3.msra.mxu1 %v9487_v29  ;;  %v9491_v32 = vpop.eup %9490 }
 0xeef   : > { %9256 = vmatprep.subr.mxu1 %v9489_v38  ;;  %v9493_v57 = vpop.eup %9492 }
 0xef0   : > { %9257 = vmatpush3.msra.mxu1 %v9489_v38  ;;  %v9495_v8 = vpop.eup %9494 }
 0xef1   : > { %9258 = vmatprep.subr.mxu1 %v9491_v32  ;;  %v9497_v55 = vpop.eup %9496 }
 0xef2   : > { %9259 = vmatpush3.msra.mxu1 %v9491_v32  ;;  %v9499_v27 = vpop.eup %9498 }
 0xef3   : > { %9260 = vmatprep.subr.mxu1 %v9493_v57  ;;  %v9501_v10 = vpop.eup %9500 }
 0xef4   : > { %9261 = vmatpush3.msra.mxu1 %v9493_v57 }
 0xef5   : > { %9262 = vmatprep.subr.mxu1 %v9495_v8 }
 0xef6   : > { %9263 = vmatpush3.msra.mxu1 %v9495_v8 }
 0xef7   : > { %9264 = vmatprep.subr.mxu1 %v9497_v55 }
 0xef8   : > { %9265 = vmatpush3.msra.mxu1 %v9497_v55 }
 0xef9   : > { %9266 = vmatprep.subr.mxu1 %v9499_v27 }
 0xefa   : > { %9267 = vmatpush3.msra.mxu1 %v9499_v27 }
 0xefb   : > { %9268 = vmatprep.subr.mxu1 %v9501_v10 }
 0xefc   : > { %9269 = vmatpush3.msra.mxu1 %v9501_v10 }
 0xefd   : > { %9271 = vmatmul.mubr.msk.f32.vlgmr.msra.gmra.mxu1 %vm758_vm1, %v7042_v17  ;;  %v9761_v17 = vld [vmem:[%s10015_s30 + $0x10] sm:$0xff] }
 0xefe   : > { %9273 = vmatprep.mubr.msk.f32.mxu1 %vm758_vm1, %v7043_v0 }
 0xf01   : > { %9274 = vmatmul.mubr.msk.f32.gmra.mxu1 %vm758_vm1, %v7044_v11 }
 0xf02   : > { %9276 = vmatprep.mubr.msk.f32.mxu1 %vm758_vm1, %v7045_v42 }
 0xf05   : > { %9277 = vmatmul.mubr.msk.f32.gmra.mxu1 %vm758_vm1, %v7046_v24  ;;  %v9762_v24 = vld [vmem:[%s10015_s30 + $0x8] sm:$0xff] }
 0xf06   : > { %9279 = vmatprep.mubr.msk.f32.mxu1 %vm758_vm1, %v7047_v45  ;;  %v6814_v45 = vadd.f32 %v9762_v24, %v14352_v23 }
 0xf09   : > { %9280 = vmatmul.mubr.msk.f32.gmra.mxu1 %vm758_vm1, %v7048_v41 }
 0xf66   : > { %v9222_v15 = vpop.f32.mrf.mxu1 }
 0xf67   : > { %v6800_v2 = vadd.f32 %v9222_v15, %v14346_v5  ;;  %v9763_v15 = vld [vmem:[%s10015_s30] sm:$0xff] }
 0xf68   : > { %v6794_v13 = vpop.f32.mrf.mxu1 }
 0xf69   : > { %v6795_v31 = vadd.f32 %v6794_v13, %v14348_v4  ;;  %v6818_v52 = vadd.f32 %v9758_v43, %v6800_v2  ;;  %v6813_v13 = vadd.f32 %v9763_v15, %v14356_v59 }
 0xf6a   : > { %v9225_v63 = vpop.f32.mrf.mxu1 }
 0xf6b   : > { %v6810_v7 = vadd.f32 %v9225_v63, %v14350_v14  ;;  %v6826_v4 = vmax.f32 %v6818_v52, 0.0 }
 0xf6c   : > { %v6804_v49 = vpop.f32.mrf.mxu1 }
 0xf6d   : > { %v6805_v18 = vadd.f32 %v6804_v49, %v14354_v46  ;;  %v6820_v37 = vadd.f32 %v9756_v3, %v6810_v7 }
 0xf6f   : > { %v6819_v22 = vadd.f32 %v9757_v9, %v6805_v18  ;;  %v6828_v28 = vmax.f32 %v6820_v37, 0.0 }
 0xf71   : > { %v6827_v46 = vmax.f32 %v6819_v22, 0.0 }
 0xfbd   : > { %v9272_v48 = vpop.f32.mrf.mxu1 }
 0xfbf   : > { %v7139_v12 = vpop.f32.mrf.mxu1 }
 0xfc1   : > { %v9275_v40 = vpop.f32.mrf.mxu1 }
 0xfc3   : > { %v7149_v20 = vpop.f32.mrf.mxu1 }
 0xfc5   : > { %v9278_v60 = vpop.f32.mrf.mxu1 }
 0xfc7   : > { %v7159_v44 = vpop.f32.mrf.mxu1 }
 0xfc9   : > { %v9281_v1 = vpop.f32.mrf.mxu1 }
 0xfca   : > { %9502 = vrcp.f32 %v9281_v1  ;;  %v7312_v1 = vld [vmem:[%s14522_s13] sm:$0xff] }
 0xfcb   : > { %9504 = vrcp.f32 %v9278_v60  ;;  %v7169_v61 = vpop.f32.mrf.mxu1  ;;  %v6821_v60 = vmax.f32 %v6813_v13, 0.0 }
 0xfcc   : > { %9506 = vrcp.f32 %v7169_v61  ;;  %v9764_v61 = vld [vmem:[%s14516_s7] sm:$0xf] }
 0xfcd   : > { %9508 = vrcp.f32 %v7159_v44 }
 0xfce   : > { %9510 = vrcp.f32 %v9275_v40  ;;  %v6822_v40 = vmax.f32 %v6814_v45, 0.0 }
 0xfcf   : > { %9512 = vrcp.f32 %v7149_v20 }
 0xfd0   : > { %9514 = vrcp.f32 %v9272_v48 }
 0xfd1   : > { %9516 = vrcp.f32 %v7139_v12 }
 0xfd7   : > { %v9503_v21 = vpop.eup %9502 }
 0xfd8   : > { %v9505_v39 = vpop.eup %9504  ;;  %v7193_v51 = vmul.f32 %v9503_v21, %v9487_v29 }
 0xfd9   : > { %v9507_v62 = vpop.eup %9506  ;;  %v7191_v54 = vmul.f32 %v9505_v39, %v9491_v32  ;;  %v9759_v32 = vld [vmem:[%s10015_s30 + $0x20] sm:$0xff] }
 0xfda   : > { %7231 = vperm.xlu1 %9448, %v7193_v51   ;;  %v7192_v34 = vmul.f32 %v9507_v62, %v9489_v38  ;;  %v9509_v26 = vpop.eup %9508  ;;  %v6785_v38 = vadd.f32 %v6784_v25, %v14344_v30  ;;  %v6817_v14 = vadd.f32 %v9759_v32, %v6795_v31  ;;  %v7733_v51 = vld [vmem:[%s14523_s14] ss:$0 sm:$0xff] }
 0xfdb   : > { %v9511_v50 = vpop.eup %9510  ;;  %v7190_v6 = vmul.f32 %v9509_v26, %v9493_v57 }
 0xfdc   : > { %7226 = vperm.xlu0 %9449, %v7192_v34   ;;  %v9513_v19 = vpop.eup %9512  ;;  %v7189_v33 = vmul.f32 %v9511_v50, %v9495_v8  ;;  %v9760_v8 = vld [vmem:[%s10015_s30 + $0x18] sm:$0xff]  ;;  %v6815_v0 = vadd.f32 %v9761_v17, %v6785_v38  ;;  %v6825_v30 = vmax.f32 %v6817_v14, 0.0 }
 0xfdd   : > { %v9515_v56 = vpop.eup %9514  ;;  %v7188_v35 = vmul.f32 %v9513_v19, %v9497_v55  ;;  %v6816_v55 = vadd.f32 %v9760_v8, %v14366_v58 }
 0xfde   : > { %7221 = vperm.xlu1 %9448, %v7191_v54   ;;  %v9517_v16 = vpop.eup %9516  ;;  %v7187_v47 = vmul.f32 %v9515_v56, %v9499_v27  ;;  %v6823_v49 = vmax.f32 %v6815_v0, 0.0 }
 0xfdf   : > { %v7186_v36 = vmul.f32 %v9517_v16, %v9501_v10  ;;  %v6824_v58 = vmax.f32 %v6816_v55, 0.0 }
 0xfe0   : > { %7216 = vperm.xlu0 %9449, %v7190_v6  }
 0xfe2   : > { %7211 = vperm.xlu1 %9448, %v7189_v33  }
 0xfe4   : > { %7206 = vperm.xlu0 %9449, %v7188_v35  }
 0xfe6   : > { %7201 = vperm.xlu1 %9448, %v7187_v47  }
 0xfe8   : > { %7196 = vperm.xlu0 %9449, %v7186_v36  }
0x1055   : > { %v7232_v29 = vpop.permute.xlu1 %7231 }
0x1056   : > { %v7241_v57 = vmul.f32 %v7232_v29, %v6828_v28 }
0x1057   : > { %v7227_v5 = vpop.permute.xlu0 %7226 }
0x1058   : > { %v7240_v27 = vmul.f32 %v7227_v5, %v6827_v46  ;;  %9283 = vmatpush3.msra.mxu0 %v7241_v57 }
0x1059   : > { %9284 = vmatprep.subr.mxu0 %v9852_v53  ;;  %v7222_v10 = vpop.permute.xlu1 %7221 }
0x105a   : > { %v7239_v11 = vmul.f32 %v7222_v10, %v6826_v4  ;;  %9285 = vmatpush3.msra.mxu0 %v7240_v27 }
0x105b   : > { %v7217_v42 = vpop.permute.xlu0 %7216  ;;  %9286 = vmatprep.subr.mxu0 %v9852_v53 }
0x105c   : > { %v7238_v41 = vmul.f32 %v7217_v42, %v6825_v30  ;;  %9287 = vmatpush3.msra.mxu0 %v7239_v11 }
0x105d   : > { %v7212_v25 = vpop.permute.xlu1 %7211  ;;  %9288 = vmatprep.subr.mxu0 %v9852_v53 }
0x105e   : > { %v7237_v63 = vmul.f32 %v7212_v25, %v6824_v58  ;;  %9289 = vmatpush3.msra.mxu0 %v7238_v41 }
0x105f   : > { %v7207_v48 = vpop.permute.xlu0 %7206  ;;  %9290 = vmatprep.subr.mxu0 %v9852_v53 }
0x1060   : > { %v7236_v12 = vmul.f32 %v7207_v48, %v6823_v49  ;;  %9291 = vmatpush3.msra.mxu0 %v7237_v63 }
0x1061   : > { %v7202_v20 = vpop.permute.xlu1 %7201  ;;  %9292 = vmatprep.subr.mxu0 %v9852_v53 }
0x1062   : > { %v7235_v23 = vmul.f32 %v7202_v20, %v6822_v40  ;;  %9293 = vmatpush3.msra.mxu0 %v7236_v12 }
0x1063   : > { %v7197_v44 = vpop.permute.xlu0 %7196  ;;  %9294 = vmatprep.subr.mxu0 %v9852_v53 }
0x1064   : > { %v7234_v59 = vmul.f32 %v7197_v44, %v6821_v60  ;;  %9295 = vmatpush3.msra.mxu0 %v7235_v23 }
0x1065   : > { %9296 = vmatprep.subr.mxu0 %v9852_v53 }
0x1066   : > { %9297 = vmatpush3.msra.mxu0 %v7234_v59 }
0x1067   : > { %9299 = vmatmul.mubr.msk.f32.vlgmr.msra.gmra.mxu0 %vm758_vm1, %v9764_v61  ;;  %9301 = vmatprep.subr.mxu0 %v9852_v53 }
0x1068   : > { %9302 = vmatpush3.msra.mxu0 %v7312_v1  ;;  %9303 = vmatprep.mubr.msk.f32.mxu0 %vm9853_vm11, %v9852_v53 }
0x1127   : > { %v7308_v21 = vpop.f32.mrf.mxu0 }
0x1128   : > { %9304 = vmatmul.mubr.msk.f32.vlgmr.msra.gmra.mxu0 %vm548_vm0, %v7308_v21 }
0x1129   : > { %v9300_v39 = vpop.f32.mrf.mxu0 }
0x11e8   : > { %v7389_v62 = vpop.f32.mrf.mxu0 }
0x11e9   : > { %v7390_v34 = vadd.f32 %v7733_v51, %v7389_v62 }
0x11ea   : > { %v9305_v53 = vpop.f32.mrf.mxu0 }
0x11eb   : > { %7393 = vst [vmem:[%s529_s20] sm:$0xf] %v7390_v34 }
0x11ec   : > { %9793 = shalt.err (!%p9790_p2)
}
0x11ed   : > { %s9794_s1 = scalar_lea.hbm %s14474_s18, 64  ;;  %s9798_s20 = scalar_lea.hbm %s14525_s16, 128 }
0x11ee   : > { %p9795_p3 = scmp.ne.s32.totalorder %s14474_s18, %s9794_s1  ;;  %p9799_p8 = scmp.lt.s32.totalorder %s14474_s18, %s14525_s16 }
0x11ef   : > { %p9800_p11 = scmp.lt.s32.totalorder %s9798_s20, %s9794_s1 }
0x11f0   : > { %p9796_p4 = pnand %p9795_p3, %p9980_p5 }
0x11f1   : > { %p9801_p9 = por %p9800_p11, %p9799_p8 }
0x11f2   : > { %p9797_p7 = pneg %p9796_p4 }
0x11f4   : > { %p9802_p10 = pnand %p9801_p9, %p9797_p7 }
0x11f6   : > { %9805 = shalt.err (!%p9802_p10)
}
0x11f7   : > { %9312 = dma.vmem_to_hbm [thread:$0]  (%p9980_p5), %s7409_s28, 64, %s14474_s18, %s7395_s29  }
0x11f8 PF: > { %p9324_p12 = scmp.ge.s32.totalorder %s9844_s24, 2  ;;  %s7420_s2 = sand.u32 1, %s9832_s21  }
0x11f9   : > { %s7421_s19 = scalar_lea.sflag [#allocation3], %s7420_s2 }
0x11fa   : > { %p9319_p13 = pnand %p9324_p12, %p9984_p6 }
0x11fc   : > { %p9320_p0 = pneg %p9319_p13 }
0x11fe   : > { %9827 = dma.done.wait (%p9320_p0), %s7421_s19, 64  }
0x11ff   : > { %9829 = vsyncadd (%p9320_p0), %s7421_s19, 4294967232  ;;  %s15356_s25 = sld [smem:[#allocation8_spill]]  ;;  %p27_p1 = scmp.ge.s32.totalorder %s9967_s27, 4  }
0x1200   : > { %s15357_s23 = sld [smem:[#allocation9_spill]]  ;;  %s15358_s21 = smov %s9836_s22 }
0x1201   : > { %s15360_s24 = smov %s9967_s27  ;;  %29 = sbr.rel (!%p27_p1) target bundleno = 10 (0xa), region = 124 }
0x1205   : > { %s15359_s22 = smov %s15356_s25 }
0x1206   :  { %7426 = vsyncpa [#allocation3], 1 }
0x1207   :  { %7428 = vsyncpa [#allocation3 + $0x1], 1 }
0x1208   :  { %7429 = vsyncpa [#allocation4], 1 }
0x1209   :  { %7431 = vsyncpa [#allocation4 + $0x1], 1 }

</bundles_post_ra>
